<compile_context>
chip_gen: v7x
topology: tpu7x:2x2x1
jax: 0.10.0
libtpu: 0.0.40
codegen_flags: <defaults>
</compile_context>

<pallas_src>
import functools

import jax
import jax.numpy as jnp
from jax.experimental import pallas as pl
from jax.experimental.pallas import tpu as pltpu

VMEM_SPEC = pl.BlockSpec(memory_space=pltpu.MemorySpace.VMEM)

_VMEM_LIMIT = 48 * 1024 * 1024  # explicit, fits v7x's 64 MiB physical VMEM


# ----------------------------- Pallas kernels ------------------------------

def _mm_affine_kernel(a_ref, b_ref, scale_ref, bias_ref, o_ref, acc_ref, *, relu):
    """One (tm, tn) output tile; K streamed over grid axis 2 into f32 scratch."""
    k = pl.program_id(2)

    @pl.when(k == 0)
    def _():
        acc_ref[...] = jnp.zeros_like(acc_ref)

    acc_ref[...] += jnp.dot(a_ref[...], b_ref[...],
                            preferred_element_type=jnp.float32)

    @pl.when(k == pl.num_programs(2) - 1)
    def _():
        acc = acc_ref[...] * scale_ref[...] + bias_ref[...]
        if relu:
            acc = jnp.maximum(acc, 0.0)
        o_ref[...] = acc.astype(o_ref.dtype)


def _mm_affine_res_kernel(a_ref, b_ref, scale_ref, bias_ref, res_ref, o_ref,
                          acc_ref, *, relu):
    k = pl.program_id(2)

    @pl.when(k == 0)
    def _():
        acc_ref[...] = jnp.zeros_like(acc_ref)

    acc_ref[...] += jnp.dot(a_ref[...], b_ref[...],
                            preferred_element_type=jnp.float32)

    @pl.when(k == pl.num_programs(2) - 1)
    def _():
        acc = acc_ref[...] * scale_ref[...] + bias_ref[...] + res_ref[...]
        if relu:
            acc = jnp.maximum(acc, 0.0)
        o_ref[...] = acc.astype(o_ref.dtype)


def _global_maxpool_fc_kernel(x_ref, w_ref, b_ref, o_ref):
    """Fused adaptive_max_pool2d(.,1) + Linear (tiny, single VMEM block)."""
    feat = jnp.max(x_ref[...], axis=0)                 # (B, C) f32, elementwise max
    y = jnp.dot(feat.astype(w_ref.dtype), w_ref[...],
                preferred_element_type=jnp.float32)
    o_ref[...] = y + b_ref[...]


# ----------------------------- tile selection -------------------------------

def _round_up(x, m):
    return (x + m - 1) // m * m


def _pick_m_tile(M, max_tm=256):
    p = _round_up(M, 8)
    if p <= max_tm:
        return p, p
    return max_tm, _round_up(p, max_tm)


def _pick_k_tile(K, max_tk=512):
    p = _round_up(K, 128)
    if p <= max_tk:
        return p, p
    for t in range(max_tk, 0, -128):
        if p % t == 0:
            return t, p
    return 128, p  # unreachable: 128 always divides p


# ------------------------- tiled fused matmul wrapper ------------------------

def matmul_affine(a, b, scale, bias, residual=None, relu=False):
    """out = [relu]((a @ b) * scale + bias [+ residual]).

    a: (M, K), b: (K, N) -> cast to bf16 for the MXU; epilogue in f32.
    Tiled over an (M, N, K) grid with a VMEM accumulator and double-buffered
    HBM->VMEM streaming.  M is padded to a multiple of 8/tm, K and N to
    multiples of 128 (lane-dense stores), padded slices are cut off at the end.
    """
    M, K = a.shape
    K2, N = b.shape
    assert K == K2

    tm, Mp = _pick_m_tile(M)
    tk, Kp = _pick_k_tile(K)
    tn = 128
    Np = _round_up(N, tn)

    a = jnp.pad(a, ((0, Mp - M), (0, Kp - K))).astype(jnp.bfloat16)
    b = jnp.pad(b, ((0, Kp - K), (0, Np - N))).astype(jnp.bfloat16)
    scale = jnp.pad(scale.astype(jnp.float32), ((0, 0), (0, Np - N)))
    bias = jnp.pad(bias.astype(jnp.float32), ((0, 0), (0, Np - N)))

    in_specs = [
        pl.BlockSpec((tm, tk), lambda i, j, k: (i, k)),
        pl.BlockSpec((tk, tn), lambda i, j, k: (k, j)),
        pl.BlockSpec((1, tn), lambda i, j, k: (0, j)),
        pl.BlockSpec((1, tn), lambda i, j, k: (0, j)),
    ]
    args = [a, b, scale, bias]
    if residual is not None:
        res = jnp.pad(residual.astype(jnp.float32), ((0, Mp - M), (0, Np - N)))
        in_specs.append(pl.BlockSpec((tm, tn), lambda i, j, k: (i, j)))
        args.append(res)
        kern = functools.partial(_mm_affine_res_kernel, relu=relu)
    else:
        kern = functools.partial(_mm_affine_kernel, relu=relu)

    grid = (Mp // tm, Np // tn, Kp // tk)

    out = pl.pallas_call(
        kern,
        out_shape=jax.ShapeDtypeStruct((Mp, Np), jnp.float32),
        grid_spec=pltpu.PrefetchScalarGridSpec(
            num_scalar_prefetch=0,
            grid=grid,
            in_specs=in_specs,
            out_specs=pl.BlockSpec((tm, tn), lambda i, j, k: (i, j)),
            scratch_shapes=[pltpu.VMEM((tm, tn), jnp.float32)],
        ),
        compiler_params=pltpu.CompilerParams(
            dimension_semantics=("parallel", "parallel", "arbitrary"),
            vmem_limit_bytes=_VMEM_LIMIT,
        ),
    )(*args)

    if Mp != M or Np != N:
        out = out[:M, :N]
    return out


def global_maxpool_fc(x_nhwc, w, b):
    """adaptive_max_pool2d(x, 1) + Linear, fused into one Pallas kernel.

    x_nhwc: (B, H, W, C) f32; w: (Fout, C) torch layout; b: (Fout,)."""
    B, H, W, C = x_nhwc.shape
    xs = jnp.transpose(x_nhwc, (1, 2, 0, 3)).reshape(H * W, B, C)
    wt = jnp.transpose(w).astype(jnp.bfloat16)                   # (C, Fout)
    bb = b.reshape(1, -1).astype(jnp.float32)
    return pl.pallas_call(
        _global_maxpool_fc_kernel,
        out_shape=jax.ShapeDtypeStruct((B, w.shape[0]), jnp.float32),
        in_specs=[VMEM_SPEC, VMEM_SPEC, VMEM_SPEC],
        out_specs=VMEM_SPEC,
    )(xs, wt, bb)


# ------------------------------- glue (XLA) ---------------------------------

def _im2col(x, kh, kw, stride, pad):
    """x: (N,H,W,C) NHWC -> patches (N*OH*OW, kh*kw*C), plus OH, OW."""
    N, H, W, C = x.shape
    OH = (H + 2 * pad - kh) // stride + 1
    OW = (W + 2 * pad - kw) // stride + 1
    xp = jnp.pad(x, ((0, 0), (pad, pad), (pad, pad), (0, 0)))
    cols = []
    for i in range(kh):
        for j in range(kw):
            cols.append(xp[:, i:i + stride * OH:stride, j:j + stride * OW:stride, :])
    patches = jnp.stack(cols, axis=3)            # (N, OH, OW, kh*kw, C)
    return patches.reshape(N * OH * OW, kh * kw * C), OH, OW


def conv_bn(x, w, scale, bias, stride, pad, relu=True, residual=None):
    """Conv2d (no bias, torch weight layout (Cout,Cin,KH,KW)) + folded-BN affine
    [+ residual add] [+ ReLU]; matmul + epilogue run in the tiled Pallas kernel."""
    Cout, Cin, KH, KW = w.shape
    N = x.shape[0]
    # im2col patches in bf16 (halves the duplicated-activation HBM traffic).
    a, OH, OW = _im2col(x.astype(jnp.bfloat16), KH, KW, stride, pad)
    bmat = jnp.transpose(w.astype(jnp.bfloat16), (2, 3, 1, 0)).reshape(KH * KW * Cin, Cout)
    res = residual.reshape(N * OH * OW, Cout) if residual is not None else None
    y = matmul_affine(a, bmat, scale.reshape(1, Cout), bias.reshape(1, Cout),
                      residual=res, relu=relu)
    return y.reshape(N, OH, OW, Cout)


def maxpool_3x3_s2_p1(x):
    """PyTorch MaxPool2d(kernel_size=3, stride=2, padding=1), NHWC.

    Pairwise jnp.maximum fold (no 9x stacked tensor) -- cheap VPU/HBM work that
    XLA fuses with the strided window slices, per the performance review."""
    N, H, W, C = x.shape
    k, s, p = 3, 2, 1
    OH = (H + 2 * p - k) // s + 1
    OW = (W + 2 * p - k) // s + 1
    xp = jnp.pad(x, ((0, 0), (p, p), (p, p), (0, 0)), constant_values=-jnp.inf)
    out = None
    for i in range(k):
        for j in range(k):
            win = xp[:, i:i + s * OH:s, j:j + s * OW:s, :]
            out = win if out is None else jnp.maximum(out, win)
    return out


# ------------------------------ model defn ----------------------------------

def _basic_block(x, p, stride):
    identity = x
    out = conv_bn(x, p['conv1_w'], p['bn1_scale'], p['bn1_bias'],
                  stride=stride, pad=1, relu=True)
    if 'down_w' in p:
        identity = conv_bn(x, p['down_w'], p['down_scale'], p['down_bias'],
                           stride=stride, pad=0, relu=False)
    out = conv_bn(out, p['conv2_w'], p['bn2_scale'], p['bn2_bias'],
                  stride=1, pad=1, relu=True, residual=identity)
    return out


def resnet18_forward(x_nchw, params):
    """Equivalent of Resnet18_.forward (pool_type='maxpool', with_fc=True)."""
    x = jnp.transpose(x_nchw, (0, 2, 3, 1)).astype(jnp.float32)   # NCHW -> NHWC
    # conv1 (7x7/2, pad 3, no bias) + bn1 + relu
    x = conv_bn(x, params['conv1_w'], params['bn1_scale'], params['bn1_bias'],
                stride=2, pad=3, relu=True)
    # maxpool 3x3/2 pad 1
    x = maxpool_3x3_s2_p1(x)
    # layer1..layer4
    for li, layer in enumerate(params['layers']):
        for bi, bp in enumerate(layer):
            stride = 2 if (li > 0 and bi == 0) else 1
            x = _basic_block(x, bp, stride)
    # adaptive max pool to 1x1 + fc (512 -> 128), fused Pallas kernel
    y = global_maxpool_fc(x, params['fc_w'], params['fc_b'])
    # x.view(B, -1, 1, 1)
    return y.reshape(y.shape[0], -1, 1, 1)


# ------------------------- deterministic parameters -------------------------

def _make_params(key, input_channel=3, fc_in=512, fc_out=128):
    keys = iter(jax.random.split(key, 256))
    eps = 1e-5

    def conv_w(cout, cin, k):
        w = 0.02 * jax.random.normal(next(keys), (cout, cin, k, k), jnp.float32)
        return w.astype(jnp.bfloat16)          # MXU inputs are bf16

    def bn_affine(c):
        gamma = 1.0 + 0.02 * jax.random.normal(next(keys), (c,), jnp.float32)
        beta = jnp.zeros((c,), jnp.float32)
        running_mean = jnp.zeros((c,), jnp.float32)
        running_var = jnp.ones((c,), jnp.float32)
        scale = gamma / jnp.sqrt(running_var + eps)
        bias = beta - running_mean * scale
        return scale, bias

    params = {}
    params['conv1_w'] = conv_w(64, input_channel, 7)
    params['bn1_scale'], params['bn1_bias'] = bn_affine(64)

    plan = [(64, 64), (64, 128), (128, 256), (256, 512)]   # (in, out) per layer
    layers = []
    for li, (cin, cout) in enumerate(plan):
        blocks = []
        for bi in range(2):
            bin_ = cin if bi == 0 else cout
            p = {}
            p['conv1_w'] = conv_w(cout, bin_, 3)
            p['bn1_scale'], p['bn1_bias'] = bn_affine(cout)
            p['conv2_w'] = conv_w(cout, cout, 3)
            p['bn2_scale'], p['bn2_bias'] = bn_affine(cout)
            if bi == 0 and li > 0:                          # downsample: 1x1/2 conv + bn
                p['down_w'] = conv_w(cout, bin_, 1)
                p['down_scale'], p['down_bias'] = bn_affine(cout)
            blocks.append(p)
        layers.append(blocks)
    params['layers'] = layers

    params['fc_w'] = (0.02 * jax.random.normal(next(keys), (fc_out, fc_in),
                                               jnp.float32)).astype(jnp.bfloat16)
    params['fc_b'] = 0.02 * jax.random.normal(next(keys), (fc_out,), jnp.float32)
    return params


# ----------------------------------- main ------------------------------------

if __name__ == "__main__":
    key = jax.random.PRNGKey(0)
    kx, kp = jax.random.split(key)

    # Small input consistent with the module: NCHW, 3 input channels.
    x = jax.random.normal(kx, (2, 3, 64, 64), jnp.float32)
    params = _make_params(kp, input_channel=3, fc_in=512, fc_out=128)

    fwd = jax.jit(resnet18_forward)
    out = fwd(x, params)
    out = jax.block_until_ready(out)

    assert out.shape == (2, 128, 1, 1), out.shape
    assert out.dtype == jnp.float32
    assert bool(jnp.all(jnp.isfinite(out)))
    print("KERNEL_OK")
</pallas_src>

<mosaic_0001>
module attributes {stable_mosaic.version = 11 : i64} {
  func.func @_mm_affine_kernel(%arg0: i32, %arg1: i32, %arg2: i32, %arg3: memref<256x256xbf16, #tpu.memory_space<vmem>>, %arg4: memref<256x128xbf16, #tpu.memory_space<vmem>>, %arg5: memref<1x128xf32, #tpu.memory_space<vmem>>, %arg6: memref<1x128xf32, #tpu.memory_space<vmem>>, %arg7: memref<256x128xf32, #tpu.memory_space<vmem>>, %arg8: memref<256x128xf32, #tpu.memory_space<vmem>>) attributes {dimension_semantics = [#tpu.dimension_semantics<parallel>, #tpu.dimension_semantics<parallel>, #tpu.dimension_semantics<arbitrary>], iteration_bounds = array<i64: 8, 1, 1>, scalar_prefetch = 0 : i64, scratch_operands = 1 : i64, tpu.core_type = #tpu.core_type<tc>, window_params = [{transform_indices = @transform_0, window_bounds = array<i64: 256, 256>}, {transform_indices = @transform_1, window_bounds = array<i64: 256, 128>}, {transform_indices = @transform_2, window_bounds = array<i64: 1, 128>}, {transform_indices = @transform_3, window_bounds = array<i64: 1, 128>}, {transform_indices = @transform_4, window_bounds = array<i64: 256, 128>}]} {
    %c0_i32 = arith.constant 0 : i32
    %0 = arith.cmpi eq, %arg2, %c0_i32 : i32
    %1 = arith.extui %0 : i1 to i32
    %c0_i32_0 = arith.constant 0 : i32
    %2 = arith.cmpi ne, %1, %c0_i32_0 : i32
    scf.if %2 {
      %cst_10 = arith.constant 0.000000e+00 : f32
      %12 = vector.broadcast %cst_10 : f32 to vector<256x128xf32>
      %c0_11 = arith.constant 0 : index
      %c0_12 = arith.constant 0 : index
      %13 = vector.load %arg8[%c0_11, %c0_12] : memref<256x128xf32, #tpu.memory_space<vmem>>, vector<256x128xf32>
      tpu.vector_store %arg8[%c0_11, %c0_12], %12 {strides = array<i32>} : memref<256x128xf32, #tpu.memory_space<vmem>>, vector<256x128xf32>,
    } else {
    }
    %c0 = arith.constant 0 : index
    %c0_1 = arith.constant 0 : index
    %3 = vector.load %arg8[%c0, %c0_1] : memref<256x128xf32, #tpu.memory_space<vmem>>, vector<256x128xf32>
    %c0_2 = arith.constant 0 : index
    %c0_3 = arith.constant 0 : index
    %4 = vector.load %arg3[%c0_2, %c0_3] : memref<256x256xbf16, #tpu.memory_space<vmem>>, vector<256x256xbf16>
    %c0_4 = arith.constant 0 : index
    %c0_5 = arith.constant 0 : index
    %5 = vector.load %arg4[%c0_4, %c0_5] : memref<256x128xbf16, #tpu.memory_space<vmem>>, vector<256x128xbf16>
    %cst = arith.constant dense<0.000000e+00> : vector<256x128xf32>
    %6 = tpu.matmul %4, %5, %cst {dimension_numbers = #tpu.dot_dimension_numbers<[1], [0], [0], [1], [0, 0, 1, 1], [], []>} : vector<256x256xbf16>, vector<256x128xbf16>, vector<256x128xf32> -> vector<256x128xf32>
    %7 = arith.addf %3, %6 : vector<256x128xf32>
    %c0_6 = arith.constant 0 : index
    %c0_7 = arith.constant 0 : index
    %8 = vector.load %arg8[%c0_6, %c0_7] : memref<256x128xf32, #tpu.memory_space<vmem>>, vector<256x128xf32>
    tpu.vector_store %arg8[%c0_6, %c0_7], %7 {strides = array<i32>} : memref<256x128xf32, #tpu.memory_space<vmem>>, vector<256x128xf32>,
    %c0_i32_8 = arith.constant 0 : i32
    %9 = arith.cmpi eq, %arg2, %c0_i32_8 : i32
    %10 = arith.extui %9 : i1 to i32
    %c0_i32_9 = arith.constant 0 : i32
    %11 = arith.cmpi ne, %10, %c0_i32_9 : i32
    scf.if %11 {
      %c0_10 = arith.constant 0 : index
      %c0_11 = arith.constant 0 : index
      %12 = vector.load %arg8[%c0_10, %c0_11] : memref<256x128xf32, #tpu.memory_space<vmem>>, vector<256x128xf32>
      %c0_12 = arith.constant 0 : index
      %c0_13 = arith.constant 0 : index
      %13 = vector.load %arg5[%c0_12, %c0_13] : memref<1x128xf32, #tpu.memory_space<vmem>>, vector<1x128xf32>
      %14 = vector.broadcast %13 : vector<1x128xf32> to vector<256x128xf32>
      %15 = arith.mulf %12, %14 : vector<256x128xf32>
      %c0_14 = arith.constant 0 : index
      %c0_15 = arith.constant 0 : index
      %16 = vector.load %arg6[%c0_14, %c0_15] : memref<1x128xf32, #tpu.memory_space<vmem>>, vector<1x128xf32>
      %17 = vector.broadcast %16 : vector<1x128xf32> to vector<256x128xf32>
      %18 = arith.addf %15, %17 : vector<256x128xf32>
      %cst_16 = arith.constant 0.000000e+00 : f32
      %19 = vector.broadcast %cst_16 : f32 to vector<256x128xf32>
      %20 = arith.maximumf %18, %19 : vector<256x128xf32>
      %c0_17 = arith.constant 0 : index
      %c0_18 = arith.constant 0 : index
      %21 = vector.load %arg7[%c0_17, %c0_18] : memref<256x128xf32, #tpu.memory_space<vmem>>, vector<256x128xf32>
      tpu.vector_store %arg7[%c0_17, %c0_18], %20 {strides = array<i32>} : memref<256x128xf32, #tpu.memory_space<vmem>>, vector<256x128xf32>,
    } else {
    }
    return
  }
  func.func @transform_0(%arg0: i32, %arg1: i32, %arg2: i32) -> (i32, i32) {
    %c0_i32 = arith.constant 0 : i32
    return %arg0, %arg2 : i32, i32
  }
  func.func @transform_1(%arg0: i32, %arg1: i32, %arg2: i32) -> (i32, i32) {
    %c0_i32 = arith.constant 0 : i32
    return %arg2, %arg1 : i32, i32
  }
  func.func @transform_2(%arg0: i32, %arg1: i32, %arg2: i32) -> (i32, i32) {
    %c0_i32 = arith.constant 0 : i32
    %c0_i32_0 = arith.constant 0 : i32
    return %c0_i32, %arg1 : i32, i32
  }
  func.func @transform_3(%arg0: i32, %arg1: i32, %arg2: i32) -> (i32, i32) {
    %c0_i32 = arith.constant 0 : i32
    %c0_i32_0 = arith.constant 0 : i32
    return %c0_i32, %arg1 : i32, i32
  }
  func.func @transform_4(%arg0: i32, %arg1: i32, %arg2: i32) -> (i32, i32) {
    %c0_i32 = arith.constant 0 : i32
    return %arg0, %arg1 : i32, i32
  }
}

module attributes {stable_mosaic.version = 11 : i64} {
  func.func @_mm_affine_kernel(%arg0: i32, %arg1: i32, %arg2: i32, %arg3: memref<256x128xbf16, #tpu.memory_space<vmem>>, %arg4: memref<128x128xbf16, #tpu.memory_space<vmem>>, %arg5: memref<1x128xf32, #tpu.memory_space<vmem>>, %arg6: memref<1x128xf32, #tpu.memory_space<vmem>>, %arg7: memref<256x128xf32, #tpu.memory_space<vmem>>, %arg8: memref<256x128xf32, #tpu.memory_space<vmem>>) attributes {dimension_semantics = [#tpu.dimension_semantics<parallel>, #tpu.dimension_semantics<parallel>, #tpu.dimension_semantics<arbitrary>], iteration_bounds = array<i64: 2, 1, 5>, scalar_prefetch = 0 : i64, scratch_operands = 1 : i64, tpu.core_type = #tpu.core_type<tc>, window_params = [{transform_indices = @transform_0, window_bounds = array<i64: 256, 128>}, {transform_indices = @transform_1, window_bounds = array<i64: 128, 128>}, {transform_indices = @transform_2, window_bounds = array<i64: 1, 128>}, {transform_indices = @transform_3, window_bounds = array<i64: 1, 128>}, {transform_indices = @transform_4, window_bounds = array<i64: 256, 128>}]} {
    %c0_i32 = arith.constant 0 : i32
    %0 = arith.cmpi eq, %arg2, %c0_i32 : i32
    %1 = arith.extui %0 : i1 to i32
    %c0_i32_0 = arith.constant 0 : i32
    %2 = arith.cmpi ne, %1, %c0_i32_0 : i32
    scf.if %2 {
      %cst_9 = arith.constant 0.000000e+00 : f32
      %12 = vector.broadcast %cst_9 : f32 to vector<256x128xf32>
      %c0_10 = arith.constant 0 : index
      %c0_11 = arith.constant 0 : index
      %13 = vector.load %arg8[%c0_10, %c0_11] : memref<256x128xf32, #tpu.memory_space<vmem>>, vector<256x128xf32>
      tpu.vector_store %arg8[%c0_10, %c0_11], %12 {strides = array<i32>} : memref<256x128xf32, #tpu.memory_space<vmem>>, vector<256x128xf32>,
    } else {
    }
    %c0 = arith.constant 0 : index
    %c0_1 = arith.constant 0 : index
    %3 = vector.load %arg8[%c0, %c0_1] : memref<256x128xf32, #tpu.memory_space<vmem>>, vector<256x128xf32>
    %c0_2 = arith.constant 0 : index
    %c0_3 = arith.constant 0 : index
    %4 = vector.load %arg3[%c0_2, %c0_3] : memref<256x128xbf16, #tpu.memory_space<vmem>>, vector<256x128xbf16>
    %c0_4 = arith.constant 0 : index
    %c0_5 = arith.constant 0 : index
    %5 = vector.load %arg4[%c0_4, %c0_5] : memref<128x128xbf16, #tpu.memory_space<vmem>>, vector<128x128xbf16>
    %cst = arith.constant dense<0.000000e+00> : vector<256x128xf32>
    %6 = tpu.matmul %4, %5, %cst {dimension_numbers = #tpu.dot_dimension_numbers<[1], [0], [0], [1], [0, 0, 1, 1], [], []>} : vector<256x128xbf16>, vector<128x128xbf16>, vector<256x128xf32> -> vector<256x128xf32>
    %7 = arith.addf %3, %6 : vector<256x128xf32>
    %c0_6 = arith.constant 0 : index
    %c0_7 = arith.constant 0 : index
    %8 = vector.load %arg8[%c0_6, %c0_7] : memref<256x128xf32, #tpu.memory_space<vmem>>, vector<256x128xf32>
    tpu.vector_store %arg8[%c0_6, %c0_7], %7 {strides = array<i32>} : memref<256x128xf32, #tpu.memory_space<vmem>>, vector<256x128xf32>,
    %c4_i32 = arith.constant 4 : i32
    %9 = arith.cmpi eq, %arg2, %c4_i32 : i32
    %10 = arith.extui %9 : i1 to i32
    %c0_i32_8 = arith.constant 0 : i32
    %11 = arith.cmpi ne, %10, %c0_i32_8 : i32
    scf.if %11 {
      %c0_9 = arith.constant 0 : index
      %c0_10 = arith.constant 0 : index
      %12 = vector.load %arg8[%c0_9, %c0_10] : memref<256x128xf32, #tpu.memory_space<vmem>>, vector<256x128xf32>
      %c0_11 = arith.constant 0 : index
      %c0_12 = arith.constant 0 : index
      %13 = vector.load %arg5[%c0_11, %c0_12] : memref<1x128xf32, #tpu.memory_space<vmem>>, vector<1x128xf32>
      %14 = vector.broadcast %13 : vector<1x128xf32> to vector<256x128xf32>
      %15 = arith.mulf %12, %14 : vector<256x128xf32>
      %c0_13 = arith.constant 0 : index
      %c0_14 = arith.constant 0 : index
      %16 = vector.load %arg6[%c0_13, %c0_14] : memref<1x128xf32, #tpu.memory_space<vmem>>, vector<1x128xf32>
      %17 = vector.broadcast %16 : vector<1x128xf32> to vector<256x128xf32>
      %18 = arith.addf %15, %17 : vector<256x128xf32>
      %cst_15 = arith.constant 0.000000e+00 : f32
      %19 = vector.broadcast %cst_15 : f32 to vector<256x128xf32>
      %20 = arith.maximumf %18, %19 : vector<256x128xf32>
      %c0_16 = arith.constant 0 : index
      %c0_17 = arith.constant 0 : index
      %21 = vector.load %arg7[%c0_16, %c0_17] : memref<256x128xf32, #tpu.memory_space<vmem>>, vector<256x128xf32>
      tpu.vector_store %arg7[%c0_16, %c0_17], %20 {strides = array<i32>} : memref<256x128xf32, #tpu.memory_space<vmem>>, vector<256x128xf32>,
    } else {
    }
    return
  }
  func.func @transform_0(%arg0: i32, %arg1: i32, %arg2: i32) -> (i32, i32) {
    %c0_i32 = arith.constant 0 : i32
    return %arg0, %arg2 : i32, i32
  }
  func.func @transform_1(%arg0: i32, %arg1: i32, %arg2: i32) -> (i32, i32) {
    %c0_i32 = arith.constant 0 : i32
    return %arg2, %arg1 : i32, i32
  }
  func.func @transform_2(%arg0: i32, %arg1: i32, %arg2: i32) -> (i32, i32) {
    %c0_i32 = arith.constant 0 : i32
    %c0_i32_0 = arith.constant 0 : i32
    return %c0_i32, %arg1 : i32, i32
  }
  func.func @transform_3(%arg0: i32, %arg1: i32, %arg2: i32) -> (i32, i32) {
    %c0_i32 = arith.constant 0 : i32
    %c0_i32_0 = arith.constant 0 : i32
    return %c0_i32, %arg1 : i32, i32
  }
  func.func @transform_4(%arg0: i32, %arg1: i32, %arg2: i32) -> (i32, i32) {
    %c0_i32 = arith.constant 0 : i32
    return %arg0, %arg1 : i32, i32
  }
}

module attributes {stable_mosaic.version = 11 : i64} {
  func.func @_mm_affine_res_kernel(%arg0: i32, %arg1: i32, %arg2: i32, %arg3: memref<256x128xbf16, #tpu.memory_space<vmem>>, %arg4: memref<128x128xbf16, #tpu.memory_space<vmem>>, %arg5: memref<1x128xf32, #tpu.memory_space<vmem>>, %arg6: memref<1x128xf32, #tpu.memory_space<vmem>>, %arg7: memref<256x128xf32, #tpu.memory_space<vmem>>, %arg8: memref<256x128xf32, #tpu.memory_space<vmem>>, %arg9: memref<256x128xf32, #tpu.memory_space<vmem>>) attributes {dimension_semantics = [#tpu.dimension_semantics<parallel>, #tpu.dimension_semantics<parallel>, #tpu.dimension_semantics<arbitrary>], iteration_bounds = array<i64: 2, 1, 5>, scalar_prefetch = 0 : i64, scratch_operands = 1 : i64, tpu.core_type = #tpu.core_type<tc>, window_params = [{transform_indices = @transform_0, window_bounds = array<i64: 256, 128>}, {transform_indices = @transform_1, window_bounds = array<i64: 128, 128>}, {transform_indices = @transform_2, window_bounds = array<i64: 1, 128>}, {transform_indices = @transform_3, window_bounds = array<i64: 1, 128>}, {transform_indices = @transform_4, window_bounds = array<i64: 256, 128>}, {transform_indices = @transform_5, window_bounds = array<i64: 256, 128>}]} {
    %c0_i32 = arith.constant 0 : i32
    %0 = arith.cmpi eq, %arg2, %c0_i32 : i32
    %1 = arith.extui %0 : i1 to i32
    %c0_i32_0 = arith.constant 0 : i32
    %2 = arith.cmpi ne, %1, %c0_i32_0 : i32
    scf.if %2 {
      %cst_9 = arith.constant 0.000000e+00 : f32
      %12 = vector.broadcast %cst_9 : f32 to vector<256x128xf32>
      %c0_10 = arith.constant 0 : index
      %c0_11 = arith.constant 0 : index
      %13 = vector.load %arg9[%c0_10, %c0_11] : memref<256x128xf32, #tpu.memory_space<vmem>>, vector<256x128xf32>
      tpu.vector_store %arg9[%c0_10, %c0_11], %12 {strides = array<i32>} : memref<256x128xf32, #tpu.memory_space<vmem>>, vector<256x128xf32>,
    } else {
    }
    %c0 = arith.constant 0 : index
    %c0_1 = arith.constant 0 : index
    %3 = vector.load %arg9[%c0, %c0_1] : memref<256x128xf32, #tpu.memory_space<vmem>>, vector<256x128xf32>
    %c0_2 = arith.constant 0 : index
    %c0_3 = arith.constant 0 : index
    %4 = vector.load %arg3[%c0_2, %c0_3] : memref<256x128xbf16, #tpu.memory_space<vmem>>, vector<256x128xbf16>
    %c0_4 = arith.constant 0 : index
    %c0_5 = arith.constant 0 : index
    %5 = vector.load %arg4[%c0_4, %c0_5] : memref<128x128xbf16, #tpu.memory_space<vmem>>, vector<128x128xbf16>
    %cst = arith.constant dense<0.000000e+00> : vector<256x128xf32>
    %6 = tpu.matmul %4, %5, %cst {dimension_numbers = #tpu.dot_dimension_numbers<[1], [0], [0], [1], [0, 0, 1, 1], [], []>} : vector<256x128xbf16>, vector<128x128xbf16>, vector<256x128xf32> -> vector<256x128xf32>
    %7 = arith.addf %3, %6 : vector<256x128xf32>
    %c0_6 = arith.constant 0 : index
    %c0_7 = arith.constant 0 : index
    %8 = vector.load %arg9[%c0_6, %c0_7] : memref<256x128xf32, #tpu.memory_space<vmem>>, vector<256x128xf32>
    tpu.vector_store %arg9[%c0_6, %c0_7], %7 {strides = array<i32>} : memref<256x128xf32, #tpu.memory_space<vmem>>, vector<256x128xf32>,
    %c4_i32 = arith.constant 4 : i32
    %9 = arith.cmpi eq, %arg2, %c4_i32 : i32
    %10 = arith.extui %9 : i1 to i32
    %c0_i32_8 = arith.constant 0 : i32
    %11 = arith.cmpi ne, %10, %c0_i32_8 : i32
    scf.if %11 {
      %c0_9 = arith.constant 0 : index
      %c0_10 = arith.constant 0 : index
      %12 = vector.load %arg9[%c0_9, %c0_10] : memref<256x128xf32, #tpu.memory_space<vmem>>, vector<256x128xf32>
      %c0_11 = arith.constant 0 : index
      %c0_12 = arith.constant 0 : index
      %13 = vector.load %arg5[%c0_11, %c0_12] : memref<1x128xf32, #tpu.memory_space<vmem>>, vector<1x128xf32>
      %14 = vector.broadcast %13 : vector<1x128xf32> to vector<256x128xf32>
      %15 = arith.mulf %12, %14 : vector<256x128xf32>
      %c0_13 = arith.constant 0 : index
      %c0_14 = arith.constant 0 : index
      %16 = vector.load %arg6[%c0_13, %c0_14] : memref<1x128xf32, #tpu.memory_space<vmem>>, vector<1x128xf32>
      %17 = vector.broadcast %16 : vector<1x128xf32> to vector<256x128xf32>
      %18 = arith.addf %15, %17 : vector<256x128xf32>
      %c0_15 = arith.constant 0 : index
      %c0_16 = arith.constant 0 : index
      %19 = vector.load %arg7[%c0_15, %c0_16] : memref<256x128xf32, #tpu.memory_space<vmem>>, vector<256x128xf32>
      %20 = arith.addf %18, %19 : vector<256x128xf32>
      %cst_17 = arith.constant 0.000000e+00 : f32
      %21 = vector.broadcast %cst_17 : f32 to vector<256x128xf32>
      %22 = arith.maximumf %20, %21 : vector<256x128xf32>
      %c0_18 = arith.constant 0 : index
      %c0_19 = arith.constant 0 : index
      %23 = vector.load %arg8[%c0_18, %c0_19] : memref<256x128xf32, #tpu.memory_space<vmem>>, vector<256x128xf32>
      tpu.vector_store %arg8[%c0_18, %c0_19], %22 {strides = array<i32>} : memref<256x128xf32, #tpu.memory_space<vmem>>, vector<256x128xf32>,
    } else {
    }
    return
  }
  func.func @transform_0(%arg0: i32, %arg1: i32, %arg2: i32) -> (i32, i32) {
    %c0_i32 = arith.constant 0 : i32
    return %arg0, %arg2 : i32, i32
  }
  func.func @transform_1(%arg0: i32, %arg1: i32, %arg2: i32) -> (i32, i32) {
    %c0_i32 = arith.constant 0 : i32
    return %arg2, %arg1 : i32, i32
  }
  func.func @transform_2(%arg0: i32, %arg1: i32, %arg2: i32) -> (i32, i32) {
    %c0_i32 = arith.constant 0 : i32
    %c0_i32_0 = arith.constant 0 : i32
    return %c0_i32, %arg1 : i32, i32
  }
  func.func @transform_3(%arg0: i32, %arg1: i32, %arg2: i32) -> (i32, i32) {
    %c0_i32 = arith.constant 0 : i32
    %c0_i32_0 = arith.constant 0 : i32
    return %c0_i32, %arg1 : i32, i32
  }
  func.func @transform_4(%arg0: i32, %arg1: i32, %arg2: i32) -> (i32, i32) {
    %c0_i32 = arith.constant 0 : i32
    return %arg0, %arg1 : i32, i32
  }
  func.func @transform_5(%arg0: i32, %arg1: i32, %arg2: i32) -> (i32, i32) {
    %c0_i32 = arith.constant 0 : i32
    return %arg0, %arg1 : i32, i32
  }
}

module attributes {stable_mosaic.version = 11 : i64} {
  func.func @_mm_affine_kernel(%arg0: i32, %arg1: i32, %arg2: i32, %arg3: memref<128x128xbf16, #tpu.memory_space<vmem>>, %arg4: memref<128x128xbf16, #tpu.memory_space<vmem>>, %arg5: memref<1x128xf32, #tpu.memory_space<vmem>>, %arg6: memref<1x128xf32, #tpu.memory_space<vmem>>, %arg7: memref<128x128xf32, #tpu.memory_space<vmem>>, %arg8: memref<128x128xf32, #tpu.memory_space<vmem>>) attributes {dimension_semantics = [#tpu.dimension_semantics<parallel>, #tpu.dimension_semantics<parallel>, #tpu.dimension_semantics<arbitrary>], iteration_bounds = array<i64: 1, 1, 5>, scalar_prefetch = 0 : i64, scratch_operands = 1 : i64, tpu.core_type = #tpu.core_type<tc>, window_params = [{transform_indices = @transform_0, window_bounds = array<i64: 128, 128>}, {transform_indices = @transform_1, window_bounds = array<i64: 128, 128>}, {transform_indices = @transform_2, window_bounds = array<i64: 1, 128>}, {transform_indices = @transform_3, window_bounds = array<i64: 1, 128>}, {transform_indices = @transform_4, window_bounds = array<i64: 128, 128>}]} {
    %c0_i32 = arith.constant 0 : i32
    %0 = arith.cmpi eq, %arg2, %c0_i32 : i32
    %1 = arith.extui %0 : i1 to i32
    %c0_i32_0 = arith.constant 0 : i32
    %2 = arith.cmpi ne, %1, %c0_i32_0 : i32
    scf.if %2 {
      %cst_9 = arith.constant 0.000000e+00 : f32
      %12 = vector.broadcast %cst_9 : f32 to vector<128x128xf32>
      %c0_10 = arith.constant 0 : index
      %c0_11 = arith.constant 0 : index
      %13 = vector.load %arg8[%c0_10, %c0_11] : memref<128x128xf32, #tpu.memory_space<vmem>>, vector<128x128xf32>
      tpu.vector_store %arg8[%c0_10, %c0_11], %12 {strides = array<i32>} : memref<128x128xf32, #tpu.memory_space<vmem>>, vector<128x128xf32>,
    } else {
    }
    %c0 = arith.constant 0 : index
    %c0_1 = arith.constant 0 : index
    %3 = vector.load %arg8[%c0, %c0_1] : memref<128x128xf32, #tpu.memory_space<vmem>>, vector<128x128xf32>
    %c0_2 = arith.constant 0 : index
    %c0_3 = arith.constant 0 : index
    %4 = vector.load %arg3[%c0_2, %c0_3] : memref<128x128xbf16, #tpu.memory_space<vmem>>, vector<128x128xbf16>
    %c0_4 = arith.constant 0 : index
    %c0_5 = arith.constant 0 : index
    %5 = vector.load %arg4[%c0_4, %c0_5] : memref<128x128xbf16, #tpu.memory_space<vmem>>, vector<128x128xbf16>
    %cst = arith.constant dense<0.000000e+00> : vector<128x128xf32>
    %6 = tpu.matmul %4, %5, %cst {dimension_numbers = #tpu.dot_dimension_numbers<[1], [0], [0], [1], [0, 0, 1, 1], [], []>} : vector<128x128xbf16>, vector<128x128xbf16>, vector<128x128xf32> -> vector<128x128xf32>
    %7 = arith.addf %3, %6 : vector<128x128xf32>
    %c0_6 = arith.constant 0 : index
    %c0_7 = arith.constant 0 : index
    %8 = vector.load %arg8[%c0_6, %c0_7] : memref<128x128xf32, #tpu.memory_space<vmem>>, vector<128x128xf32>
    tpu.vector_store %arg8[%c0_6, %c0_7], %7 {strides = array<i32>} : memref<128x128xf32, #tpu.memory_space<vmem>>, vector<128x128xf32>,
    %c4_i32 = arith.constant 4 : i32
    %9 = arith.cmpi eq, %arg2, %c4_i32 : i32
    %10 = arith.extui %9 : i1 to i32
    %c0_i32_8 = arith.constant 0 : i32
    %11 = arith.cmpi ne, %10, %c0_i32_8 : i32
    scf.if %11 {
      %c0_9 = arith.constant 0 : index
      %c0_10 = arith.constant 0 : index
      %12 = vector.load %arg8[%c0_9, %c0_10] : memref<128x128xf32, #tpu.memory_space<vmem>>, vector<128x128xf32>
      %c0_11 = arith.constant 0 : index
      %c0_12 = arith.constant 0 : index
      %13 = vector.load %arg5[%c0_11, %c0_12] : memref<1x128xf32, #tpu.memory_space<vmem>>, vector<1x128xf32>
      %14 = vector.broadcast %13 : vector<1x128xf32> to vector<128x128xf32>
      %15 = arith.mulf %12, %14 : vector<128x128xf32>
      %c0_13 = arith.constant 0 : index
      %c0_14 = arith.constant 0 : index
      %16 = vector.load %arg6[%c0_13, %c0_14] : memref<1x128xf32, #tpu.memory_space<vmem>>, vector<1x128xf32>
      %17 = vector.broadcast %16 : vector<1x128xf32> to vector<128x128xf32>
      %18 = arith.addf %15, %17 : vector<128x128xf32>
      %cst_15 = arith.constant 0.000000e+00 : f32
      %19 = vector.broadcast %cst_15 : f32 to vector<128x128xf32>
      %20 = arith.maximumf %18, %19 : vector<128x128xf32>
      %c0_16 = arith.constant 0 : index
      %c0_17 = arith.constant 0 : index
      %21 = vector.load %arg7[%c0_16, %c0_17] : memref<128x128xf32, #tpu.memory_space<vmem>>, vector<128x128xf32>
      tpu.vector_store %arg7[%c0_16, %c0_17], %20 {strides = array<i32>} : memref<128x128xf32, #tpu.memory_space<vmem>>, vector<128x128xf32>,
    } else {
    }
    return
  }
  func.func @transform_0(%arg0: i32, %arg1: i32, %arg2: i32) -> (i32, i32) {
    %c0_i32 = arith.constant 0 : i32
    return %arg0, %arg2 : i32, i32
  }
  func.func @transform_1(%arg0: i32, %arg1: i32, %arg2: i32) -> (i32, i32) {
    %c0_i32 = arith.constant 0 : i32
    return %arg2, %arg1 : i32, i32
  }
  func.func @transform_2(%arg0: i32, %arg1: i32, %arg2: i32) -> (i32, i32) {
    %c0_i32 = arith.constant 0 : i32
    %c0_i32_0 = arith.constant 0 : i32
    return %c0_i32, %arg1 : i32, i32
  }
  func.func @transform_3(%arg0: i32, %arg1: i32, %arg2: i32) -> (i32, i32) {
    %c0_i32 = arith.constant 0 : i32
    %c0_i32_0 = arith.constant 0 : i32
    return %c0_i32, %arg1 : i32, i32
  }
  func.func @transform_4(%arg0: i32, %arg1: i32, %arg2: i32) -> (i32, i32) {
    %c0_i32 = arith.constant 0 : i32
    return %arg0, %arg1 : i32, i32
  }
}

module attributes {stable_mosaic.version = 11 : i64} {
  func.func @_mm_affine_kernel(%arg0: i32, %arg1: i32, %arg2: i32, %arg3: memref<128x128xbf16, #tpu.memory_space<vmem>>, %arg4: memref<128x128xbf16, #tpu.memory_space<vmem>>, %arg5: memref<1x128xf32, #tpu.memory_space<vmem>>, %arg6: memref<1x128xf32, #tpu.memory_space<vmem>>, %arg7: memref<128x128xf32, #tpu.memory_space<vmem>>, %arg8: memref<128x128xf32, #tpu.memory_space<vmem>>) attributes {dimension_semantics = [#tpu.dimension_semantics<parallel>, #tpu.dimension_semantics<parallel>, #tpu.dimension_semantics<arbitrary>], iteration_bounds = array<i64: 1, 1, 1>, scalar_prefetch = 0 : i64, scratch_operands = 1 : i64, tpu.core_type = #tpu.core_type<tc>, window_params = [{transform_indices = @transform_0, window_bounds = array<i64: 128, 128>}, {transform_indices = @transform_1, window_bounds = array<i64: 128, 128>}, {transform_indices = @transform_2, window_bounds = array<i64: 1, 128>}, {transform_indices = @transform_3, window_bounds = array<i64: 1, 128>}, {transform_indices = @transform_4, window_bounds = array<i64: 128, 128>}]} {
    %c0_i32 = arith.constant 0 : i32
    %0 = arith.cmpi eq, %arg2, %c0_i32 : i32
    %1 = arith.extui %0 : i1 to i32
    %c0_i32_0 = arith.constant 0 : i32
    %2 = arith.cmpi ne, %1, %c0_i32_0 : i32
    scf.if %2 {
      %cst_10 = arith.constant 0.000000e+00 : f32
      %12 = vector.broadcast %cst_10 : f32 to vector<128x128xf32>
      %c0_11 = arith.constant 0 : index
      %c0_12 = arith.constant 0 : index
      %13 = vector.load %arg8[%c0_11, %c0_12] : memref<128x128xf32, #tpu.memory_space<vmem>>, vector<128x128xf32>
      tpu.vector_store %arg8[%c0_11, %c0_12], %12 {strides = array<i32>} : memref<128x128xf32, #tpu.memory_space<vmem>>, vector<128x128xf32>,
    } else {
    }
    %c0 = arith.constant 0 : index
    %c0_1 = arith.constant 0 : index
    %3 = vector.load %arg8[%c0, %c0_1] : memref<128x128xf32, #tpu.memory_space<vmem>>, vector<128x128xf32>
    %c0_2 = arith.constant 0 : index
    %c0_3 = arith.constant 0 : index
    %4 = vector.load %arg3[%c0_2, %c0_3] : memref<128x128xbf16, #tpu.memory_space<vmem>>, vector<128x128xbf16>
    %c0_4 = arith.constant 0 : index
    %c0_5 = arith.constant 0 : index
    %5 = vector.load %arg4[%c0_4, %c0_5] : memref<128x128xbf16, #tpu.memory_space<vmem>>, vector<128x128xbf16>
    %cst = arith.constant dense<0.000000e+00> : vector<128x128xf32>
    %6 = tpu.matmul %4, %5, %cst {dimension_numbers = #tpu.dot_dimension_numbers<[1], [0], [0], [1], [0, 0, 1, 1], [], []>} : vector<128x128xbf16>, vector<128x128xbf16>, vector<128x128xf32> -> vector<128x128xf32>
    %7 = arith.addf %3, %6 : vector<128x128xf32>
    %c0_6 = arith.constant 0 : index
    %c0_7 = arith.constant 0 : index
    %8 = vector.load %arg8[%c0_6, %c0_7] : memref<128x128xf32, #tpu.memory_space<vmem>>, vector<128x128xf32>
    tpu.vector_store %arg8[%c0_6, %c0_7], %7 {strides = array<i32>} : memref<128x128xf32, #tpu.memory_space<vmem>>, vector<128x128xf32>,
    %c0_i32_8 = arith.constant 0 : i32
    %9 = arith.cmpi eq, %arg2, %c0_i32_8 : i32
    %10 = arith.extui %9 : i1 to i32
    %c0_i32_9 = arith.constant 0 : i32
    %11 = arith.cmpi ne, %10, %c0_i32_9 : i32
    scf.if %11 {
      %c0_10 = arith.constant 0 : index
      %c0_11 = arith.constant 0 : index
      %12 = vector.load %arg8[%c0_10, %c0_11] : memref<128x128xf32, #tpu.memory_space<vmem>>, vector<128x128xf32>
      %c0_12 = arith.constant 0 : index
      %c0_13 = arith.constant 0 : index
      %13 = vector.load %arg5[%c0_12, %c0_13] : memref<1x128xf32, #tpu.memory_space<vmem>>, vector<1x128xf32>
      %14 = vector.broadcast %13 : vector<1x128xf32> to vector<128x128xf32>
      %15 = arith.mulf %12, %14 : vector<128x128xf32>
      %c0_14 = arith.constant 0 : index
      %c0_15 = arith.constant 0 : index
      %16 = vector.load %arg6[%c0_14, %c0_15] : memref<1x128xf32, #tpu.memory_space<vmem>>, vector<1x128xf32>
      %17 = vector.broadcast %16 : vector<1x128xf32> to vector<128x128xf32>
      %18 = arith.addf %15, %17 : vector<128x128xf32>
      %c0_16 = arith.constant 0 : index
      %c0_17 = arith.constant 0 : index
      %19 = vector.load %arg7[%c0_16, %c0_17] : memref<128x128xf32, #tpu.memory_space<vmem>>, vector<128x128xf32>
      tpu.vector_store %arg7[%c0_16, %c0_17], %18 {strides = array<i32>} : memref<128x128xf32, #tpu.memory_space<vmem>>, vector<128x128xf32>,
    } else {
    }
    return
  }
  func.func @transform_0(%arg0: i32, %arg1: i32, %arg2: i32) -> (i32, i32) {
    %c0_i32 = arith.constant 0 : i32
    return %arg0, %arg2 : i32, i32
  }
  func.func @transform_1(%arg0: i32, %arg1: i32, %arg2: i32) -> (i32, i32) {
    %c0_i32 = arith.constant 0 : i32
    return %arg2, %arg1 : i32, i32
  }
  func.func @transform_2(%arg0: i32, %arg1: i32, %arg2: i32) -> (i32, i32) {
    %c0_i32 = arith.constant 0 : i32
    %c0_i32_0 = arith.constant 0 : i32
    return %c0_i32, %arg1 : i32, i32
  }
  func.func @transform_3(%arg0: i32, %arg1: i32, %arg2: i32) -> (i32, i32) {
    %c0_i32 = arith.constant 0 : i32
    %c0_i32_0 = arith.constant 0 : i32
    return %c0_i32, %arg1 : i32, i32
  }
  func.func @transform_4(%arg0: i32, %arg1: i32, %arg2: i32) -> (i32, i32) {
    %c0_i32 = arith.constant 0 : i32
    return %arg0, %arg1 : i32, i32
  }
}

module attributes {stable_mosaic.version = 11 : i64} {
  func.func @_mm_affine_res_kernel(%arg0: i32, %arg1: i32, %arg2: i32, %arg3: memref<128x384xbf16, #tpu.memory_space<vmem>>, %arg4: memref<384x128xbf16, #tpu.memory_space<vmem>>, %arg5: memref<1x128xf32, #tpu.memory_space<vmem>>, %arg6: memref<1x128xf32, #tpu.memory_space<vmem>>, %arg7: memref<128x128xf32, #tpu.memory_space<vmem>>, %arg8: memref<128x128xf32, #tpu.memory_space<vmem>>, %arg9: memref<128x128xf32, #tpu.memory_space<vmem>>) attributes {dimension_semantics = [#tpu.dimension_semantics<parallel>, #tpu.dimension_semantics<parallel>, #tpu.dimension_semantics<arbitrary>], iteration_bounds = array<i64: 1, 1, 3>, scalar_prefetch = 0 : i64, scratch_operands = 1 : i64, tpu.core_type = #tpu.core_type<tc>, window_params = [{transform_indices = @transform_0, window_bounds = array<i64: 128, 384>}, {transform_indices = @transform_1, window_bounds = array<i64: 384, 128>}, {transform_indices = @transform_2, window_bounds = array<i64: 1, 128>}, {transform_indices = @transform_3, window_bounds = array<i64: 1, 128>}, {transform_indices = @transform_4, window_bounds = array<i64: 128, 128>}, {transform_indices = @transform_5, window_bounds = array<i64: 128, 128>}]} {
    %c0_i32 = arith.constant 0 : i32
    %0 = arith.cmpi eq, %arg2, %c0_i32 : i32
    %1 = arith.extui %0 : i1 to i32
    %c0_i32_0 = arith.constant 0 : i32
    %2 = arith.cmpi ne, %1, %c0_i32_0 : i32
    scf.if %2 {
      %cst_9 = arith.constant 0.000000e+00 : f32
      %12 = vector.broadcast %cst_9 : f32 to vector<128x128xf32>
      %c0_10 = arith.constant 0 : index
      %c0_11 = arith.constant 0 : index
      %13 = vector.load %arg9[%c0_10, %c0_11] : memref<128x128xf32, #tpu.memory_space<vmem>>, vector<128x128xf32>
      tpu.vector_store %arg9[%c0_10, %c0_11], %12 {strides = array<i32>} : memref<128x128xf32, #tpu.memory_space<vmem>>, vector<128x128xf32>,
    } else {
    }
    %c0 = arith.constant 0 : index
    %c0_1 = arith.constant 0 : index
    %3 = vector.load %arg9[%c0, %c0_1] : memref<128x128xf32, #tpu.memory_space<vmem>>, vector<128x128xf32>
    %c0_2 = arith.constant 0 : index
    %c0_3 = arith.constant 0 : index
    %4 = vector.load %arg3[%c0_2, %c0_3] : memref<128x384xbf16, #tpu.memory_space<vmem>>, vector<128x384xbf16>
    %c0_4 = arith.constant 0 : index
    %c0_5 = arith.constant 0 : index
    %5 = vector.load %arg4[%c0_4, %c0_5] : memref<384x128xbf16, #tpu.memory_space<vmem>>, vector<384x128xbf16>
    %cst = arith.constant dense<0.000000e+00> : vector<128x128xf32>
    %6 = tpu.matmul %4, %5, %cst {dimension_numbers = #tpu.dot_dimension_numbers<[1], [0], [0], [1], [0, 0, 1, 1], [], []>} : vector<128x384xbf16>, vector<384x128xbf16>, vector<128x128xf32> -> vector<128x128xf32>
    %7 = arith.addf %3, %6 : vector<128x128xf32>
    %c0_6 = arith.constant 0 : index
    %c0_7 = arith.constant 0 : index
    %8 = vector.load %arg9[%c0_6, %c0_7] : memref<128x128xf32, #tpu.memory_space<vmem>>, vector<128x128xf32>
    tpu.vector_store %arg9[%c0_6, %c0_7], %7 {strides = array<i32>} : memref<128x128xf32, #tpu.memory_space<vmem>>, vector<128x128xf32>,
    %c2_i32 = arith.constant 2 : i32
    %9 = arith.cmpi eq, %arg2, %c2_i32 : i32
    %10 = arith.extui %9 : i1 to i32
    %c0_i32_8 = arith.constant 0 : i32
    %11 = arith.cmpi ne, %10, %c0_i32_8 : i32
    scf.if %11 {
      %c0_9 = arith.constant 0 : index
      %c0_10 = arith.constant 0 : index
      %12 = vector.load %arg9[%c0_9, %c0_10] : memref<128x128xf32, #tpu.memory_space<vmem>>, vector<128x128xf32>
      %c0_11 = arith.constant 0 : index
      %c0_12 = arith.constant 0 : index
      %13 = vector.load %arg5[%c0_11, %c0_12] : memref<1x128xf32, #tpu.memory_space<vmem>>, vector<1x128xf32>
      %14 = vector.broadcast %13 : vector<1x128xf32> to vector<128x128xf32>
      %15 = arith.mulf %12, %14 : vector<128x128xf32>
      %c0_13 = arith.constant 0 : index
      %c0_14 = arith.constant 0 : index
      %16 = vector.load %arg6[%c0_13, %c0_14] : memref<1x128xf32, #tpu.memory_space<vmem>>, vector<1x128xf32>
      %17 = vector.broadcast %16 : vector<1x128xf32> to vector<128x128xf32>
      %18 = arith.addf %15, %17 : vector<128x128xf32>
      %c0_15 = arith.constant 0 : index
      %c0_16 = arith.constant 0 : index
      %19 = vector.load %arg7[%c0_15, %c0_16] : memref<128x128xf32, #tpu.memory_space<vmem>>, vector<128x128xf32>
      %20 = arith.addf %18, %19 : vector<128x128xf32>
      %cst_17 = arith.constant 0.000000e+00 : f32
      %21 = vector.broadcast %cst_17 : f32 to vector<128x128xf32>
      %22 = arith.maximumf %20, %21 : vector<128x128xf32>
      %c0_18 = arith.constant 0 : index
      %c0_19 = arith.constant 0 : index
      %23 = vector.load %arg8[%c0_18, %c0_19] : memref<128x128xf32, #tpu.memory_space<vmem>>, vector<128x128xf32>
      tpu.vector_store %arg8[%c0_18, %c0_19], %22 {strides = array<i32>} : memref<128x128xf32, #tpu.memory_space<vmem>>, vector<128x128xf32>,
    } else {
    }
    return
  }
  func.func @transform_0(%arg0: i32, %arg1: i32, %arg2: i32) -> (i32, i32) {
    %c0_i32 = arith.constant 0 : i32
    return %arg0, %arg2 : i32, i32
  }
  func.func @transform_1(%arg0: i32, %arg1: i32, %arg2: i32) -> (i32, i32) {
    %c0_i32 = arith.constant 0 : i32
    return %arg2, %arg1 : i32, i32
  }
  func.func @transform_2(%arg0: i32, %arg1: i32, %arg2: i32) -> (i32, i32) {
    %c0_i32 = arith.constant 0 : i32
    %c0_i32_0 = arith.constant 0 : i32
    return %c0_i32, %arg1 : i32, i32
  }
  func.func @transform_3(%arg0: i32, %arg1: i32, %arg2: i32) -> (i32, i32) {
    %c0_i32 = arith.constant 0 : i32
    %c0_i32_0 = arith.constant 0 : i32
    return %c0_i32, %arg1 : i32, i32
  }
  func.func @transform_4(%arg0: i32, %arg1: i32, %arg2: i32) -> (i32, i32) {
    %c0_i32 = arith.constant 0 : i32
    return %arg0, %arg1 : i32, i32
  }
  func.func @transform_5(%arg0: i32, %arg1: i32, %arg2: i32) -> (i32, i32) {
    %c0_i32 = arith.constant 0 : i32
    return %arg0, %arg1 : i32, i32
  }
}

module attributes {stable_mosaic.version = 11 : i64} {
  func.func @_mm_affine_kernel(%arg0: i32, %arg1: i32, %arg2: i32, %arg3: memref<128x384xbf16, #tpu.memory_space<vmem>>, %arg4: memref<384x128xbf16, #tpu.memory_space<vmem>>, %arg5: memref<1x128xf32, #tpu.memory_space<vmem>>, %arg6: memref<1x128xf32, #tpu.memory_space<vmem>>, %arg7: memref<128x128xf32, #tpu.memory_space<vmem>>, %arg8: memref<128x128xf32, #tpu.memory_space<vmem>>) attributes {dimension_semantics = [#tpu.dimension_semantics<parallel>, #tpu.dimension_semantics<parallel>, #tpu.dimension_semantics<arbitrary>], iteration_bounds = array<i64: 1, 1, 3>, scalar_prefetch = 0 : i64, scratch_operands = 1 : i64, tpu.core_type = #tpu.core_type<tc>, window_params = [{transform_indices = @transform_0, window_bounds = array<i64: 128, 384>}, {transform_indices = @transform_1, window_bounds = array<i64: 384, 128>}, {transform_indices = @transform_2, window_bounds = array<i64: 1, 128>}, {transform_indices = @transform_3, window_bounds = array<i64: 1, 128>}, {transform_indices = @transform_4, window_bounds = array<i64: 128, 128>}]} {
    %c0_i32 = arith.constant 0 : i32
    %0 = arith.cmpi eq, %arg2, %c0_i32 : i32
    %1 = arith.extui %0 : i1 to i32
    %c0_i32_0 = arith.constant 0 : i32
    %2 = arith.cmpi ne, %1, %c0_i32_0 : i32
    scf.if %2 {
      %cst_9 = arith.constant 0.000000e+00 : f32
      %12 = vector.broadcast %cst_9 : f32 to vector<128x128xf32>
      %c0_10 = arith.constant 0 : index
      %c0_11 = arith.constant 0 : index
      %13 = vector.load %arg8[%c0_10, %c0_11] : memref<128x128xf32, #tpu.memory_space<vmem>>, vector<128x128xf32>
      tpu.vector_store %arg8[%c0_10, %c0_11], %12 {strides = array<i32>} : memref<128x128xf32, #tpu.memory_space<vmem>>, vector<128x128xf32>,
    } else {
    }
    %c0 = arith.constant 0 : index
    %c0_1 = arith.constant 0 : index
    %3 = vector.load %arg8[%c0, %c0_1] : memref<128x128xf32, #tpu.memory_space<vmem>>, vector<128x128xf32>
    %c0_2 = arith.constant 0 : index
    %c0_3 = arith.constant 0 : index
    %4 = vector.load %arg3[%c0_2, %c0_3] : memref<128x384xbf16, #tpu.memory_space<vmem>>, vector<128x384xbf16>
    %c0_4 = arith.constant 0 : index
    %c0_5 = arith.constant 0 : index
    %5 = vector.load %arg4[%c0_4, %c0_5] : memref<384x128xbf16, #tpu.memory_space<vmem>>, vector<384x128xbf16>
    %cst = arith.constant dense<0.000000e+00> : vector<128x128xf32>
    %6 = tpu.matmul %4, %5, %cst {dimension_numbers = #tpu.dot_dimension_numbers<[1], [0], [0], [1], [0, 0, 1, 1], [], []>} : vector<128x384xbf16>, vector<384x128xbf16>, vector<128x128xf32> -> vector<128x128xf32>
    %7 = arith.addf %3, %6 : vector<128x128xf32>
    %c0_6 = arith.constant 0 : index
    %c0_7 = arith.constant 0 : index
    %8 = vector.load %arg8[%c0_6, %c0_7] : memref<128x128xf32, #tpu.memory_space<vmem>>, vector<128x128xf32>
    tpu.vector_store %arg8[%c0_6, %c0_7], %7 {strides = array<i32>} : memref<128x128xf32, #tpu.memory_space<vmem>>, vector<128x128xf32>,
    %c2_i32 = arith.constant 2 : i32
    %9 = arith.cmpi eq, %arg2, %c2_i32 : i32
    %10 = arith.extui %9 : i1 to i32
    %c0_i32_8 = arith.constant 0 : i32
    %11 = arith.cmpi ne, %10, %c0_i32_8 : i32
    scf.if %11 {
      %c0_9 = arith.constant 0 : index
      %c0_10 = arith.constant 0 : index
      %12 = vector.load %arg8[%c0_9, %c0_10] : memref<128x128xf32, #tpu.memory_space<vmem>>, vector<128x128xf32>
      %c0_11 = arith.constant 0 : index
      %c0_12 = arith.constant 0 : index
      %13 = vector.load %arg5[%c0_11, %c0_12] : memref<1x128xf32, #tpu.memory_space<vmem>>, vector<1x128xf32>
      %14 = vector.broadcast %13 : vector<1x128xf32> to vector<128x128xf32>
      %15 = arith.mulf %12, %14 : vector<128x128xf32>
      %c0_13 = arith.constant 0 : index
      %c0_14 = arith.constant 0 : index
      %16 = vector.load %arg6[%c0_13, %c0_14] : memref<1x128xf32, #tpu.memory_space<vmem>>, vector<1x128xf32>
      %17 = vector.broadcast %16 : vector<1x128xf32> to vector<128x128xf32>
      %18 = arith.addf %15, %17 : vector<128x128xf32>
      %cst_15 = arith.constant 0.000000e+00 : f32
      %19 = vector.broadcast %cst_15 : f32 to vector<128x128xf32>
      %20 = arith.maximumf %18, %19 : vector<128x128xf32>
      %c0_16 = arith.constant 0 : index
      %c0_17 = arith.constant 0 : index
      %21 = vector.load %arg7[%c0_16, %c0_17] : memref<128x128xf32, #tpu.memory_space<vmem>>, vector<128x128xf32>
      tpu.vector_store %arg7[%c0_16, %c0_17], %20 {strides = array<i32>} : memref<128x128xf32, #tpu.memory_space<vmem>>, vector<128x128xf32>,
    } else {
    }
    return
  }
  func.func @transform_0(%arg0: i32, %arg1: i32, %arg2: i32) -> (i32, i32) {
    %c0_i32 = arith.constant 0 : i32
    return %arg0, %arg2 : i32, i32
  }
  func.func @transform_1(%arg0: i32, %arg1: i32, %arg2: i32) -> (i32, i32) {
    %c0_i32 = arith.constant 0 : i32
    return %arg2, %arg1 : i32, i32
  }
  func.func @transform_2(%arg0: i32, %arg1: i32, %arg2: i32) -> (i32, i32) {
    %c0_i32 = arith.constant 0 : i32
    %c0_i32_0 = arith.constant 0 : i32
    return %c0_i32, %arg1 : i32, i32
  }
  func.func @transform_3(%arg0: i32, %arg1: i32, %arg2: i32) -> (i32, i32) {
    %c0_i32 = arith.constant 0 : i32
    %c0_i32_0 = arith.constant 0 : i32
    return %c0_i32, %arg1 : i32, i32
  }
  func.func @transform_4(%arg0: i32, %arg1: i32, %arg2: i32) -> (i32, i32) {
    %c0_i32 = arith.constant 0 : i32
    return %arg0, %arg1 : i32, i32
  }
}

module attributes {stable_mosaic.version = 11 : i64} {
  func.func @_mm_affine_kernel(%arg0: i32, %arg1: i32, %arg2: i32, %arg3: memref<32x384xbf16, #tpu.memory_space<vmem>>, %arg4: memref<384x128xbf16, #tpu.memory_space<vmem>>, %arg5: memref<1x128xf32, #tpu.memory_space<vmem>>, %arg6: memref<1x128xf32, #tpu.memory_space<vmem>>, %arg7: memref<32x128xf32, #tpu.memory_space<vmem>>, %arg8: memref<32x128xf32, #tpu.memory_space<vmem>>) attributes {dimension_semantics = [#tpu.dimension_semantics<parallel>, #tpu.dimension_semantics<parallel>, #tpu.dimension_semantics<arbitrary>], iteration_bounds = array<i64: 1, 2, 3>, scalar_prefetch = 0 : i64, scratch_operands = 1 : i64, tpu.core_type = #tpu.core_type<tc>, window_params = [{transform_indices = @transform_0, window_bounds = array<i64: 32, 384>}, {transform_indices = @transform_1, window_bounds = array<i64: 384, 128>}, {transform_indices = @transform_2, window_bounds = array<i64: 1, 128>}, {transform_indices = @transform_3, window_bounds = array<i64: 1, 128>}, {transform_indices = @transform_4, window_bounds = array<i64: 32, 128>}]} {
    %c0_i32 = arith.constant 0 : i32
    %0 = arith.cmpi eq, %arg2, %c0_i32 : i32
    %1 = arith.extui %0 : i1 to i32
    %c0_i32_0 = arith.constant 0 : i32
    %2 = arith.cmpi ne, %1, %c0_i32_0 : i32
    scf.if %2 {
      %cst_9 = arith.constant 0.000000e+00 : f32
      %12 = vector.broadcast %cst_9 : f32 to vector<32x128xf32>
      %c0_10 = arith.constant 0 : index
      %c0_11 = arith.constant 0 : index
      %13 = vector.load %arg8[%c0_10, %c0_11] : memref<32x128xf32, #tpu.memory_space<vmem>>, vector<32x128xf32>
      tpu.vector_store %arg8[%c0_10, %c0_11], %12 {strides = array<i32>} : memref<32x128xf32, #tpu.memory_space<vmem>>, vector<32x128xf32>,
    } else {
    }
    %c0 = arith.constant 0 : index
    %c0_1 = arith.constant 0 : index
    %3 = vector.load %arg8[%c0, %c0_1] : memref<32x128xf32, #tpu.memory_space<vmem>>, vector<32x128xf32>
    %c0_2 = arith.constant 0 : index
    %c0_3 = arith.constant 0 : index
    %4 = vector.load %arg3[%c0_2, %c0_3] : memref<32x384xbf16, #tpu.memory_space<vmem>>, vector<32x384xbf16>
    %c0_4 = arith.constant 0 : index
    %c0_5 = arith.constant 0 : index
    %5 = vector.load %arg4[%c0_4, %c0_5] : memref<384x128xbf16, #tpu.memory_space<vmem>>, vector<384x128xbf16>
    %cst = arith.constant dense<0.000000e+00> : vector<32x128xf32>
    %6 = tpu.matmul %4, %5, %cst {dimension_numbers = #tpu.dot_dimension_numbers<[1], [0], [0], [1], [0, 0, 1, 1], [], []>} : vector<32x384xbf16>, vector<384x128xbf16>, vector<32x128xf32> -> vector<32x128xf32>
    %7 = arith.addf %3, %6 : vector<32x128xf32>
    %c0_6 = arith.constant 0 : index
    %c0_7 = arith.constant 0 : index
    %8 = vector.load %arg8[%c0_6, %c0_7] : memref<32x128xf32, #tpu.memory_space<vmem>>, vector<32x128xf32>
    tpu.vector_store %arg8[%c0_6, %c0_7], %7 {strides = array<i32>} : memref<32x128xf32, #tpu.memory_space<vmem>>, vector<32x128xf32>,
    %c2_i32 = arith.constant 2 : i32
    %9 = arith.cmpi eq, %arg2, %c2_i32 : i32
    %10 = arith.extui %9 : i1 to i32
    %c0_i32_8 = arith.constant 0 : i32
    %11 = arith.cmpi ne, %10, %c0_i32_8 : i32
    scf.if %11 {
      %c0_9 = arith.constant 0 : index
      %c0_10 = arith.constant 0 : index
      %12 = vector.load %arg8[%c0_9, %c0_10] : memref<32x128xf32, #tpu.memory_space<vmem>>, vector<32x128xf32>
      %c0_11 = arith.constant 0 : index
      %c0_12 = arith.constant 0 : index
      %13 = vector.load %arg5[%c0_11, %c0_12] : memref<1x128xf32, #tpu.memory_space<vmem>>, vector<1x128xf32>
      %14 = vector.broadcast %13 : vector<1x128xf32> to vector<32x128xf32>
      %15 = arith.mulf %12, %14 : vector<32x128xf32>
      %c0_13 = arith.constant 0 : index
      %c0_14 = arith.constant 0 : index
      %16 = vector.load %arg6[%c0_13, %c0_14] : memref<1x128xf32, #tpu.memory_space<vmem>>, vector<1x128xf32>
      %17 = vector.broadcast %16 : vector<1x128xf32> to vector<32x128xf32>
      %18 = arith.addf %15, %17 : vector<32x128xf32>
      %cst_15 = arith.constant 0.000000e+00 : f32
      %19 = vector.broadcast %cst_15 : f32 to vector<32x128xf32>
      %20 = arith.maximumf %18, %19 : vector<32x128xf32>
      %c0_16 = arith.constant 0 : index
      %c0_17 = arith.constant 0 : index
      %21 = vector.load %arg7[%c0_16, %c0_17] : memref<32x128xf32, #tpu.memory_space<vmem>>, vector<32x128xf32>
      tpu.vector_store %arg7[%c0_16, %c0_17], %20 {strides = array<i32>} : memref<32x128xf32, #tpu.memory_space<vmem>>, vector<32x128xf32>,
    } else {
    }
    return
  }
  func.func @transform_0(%arg0: i32, %arg1: i32, %arg2: i32) -> (i32, i32) {
    %c0_i32 = arith.constant 0 : i32
    return %arg0, %arg2 : i32, i32
  }
  func.func @transform_1(%arg0: i32, %arg1: i32, %arg2: i32) -> (i32, i32) {
    %c0_i32 = arith.constant 0 : i32
    return %arg2, %arg1 : i32, i32
  }
  func.func @transform_2(%arg0: i32, %arg1: i32, %arg2: i32) -> (i32, i32) {
    %c0_i32 = arith.constant 0 : i32
    %c0_i32_0 = arith.constant 0 : i32
    return %c0_i32, %arg1 : i32, i32
  }
  func.func @transform_3(%arg0: i32, %arg1: i32, %arg2: i32) -> (i32, i32) {
    %c0_i32 = arith.constant 0 : i32
    %c0_i32_0 = arith.constant 0 : i32
    return %c0_i32, %arg1 : i32, i32
  }
  func.func @transform_4(%arg0: i32, %arg1: i32, %arg2: i32) -> (i32, i32) {
    %c0_i32 = arith.constant 0 : i32
    return %arg0, %arg1 : i32, i32
  }
}

module attributes {stable_mosaic.version = 11 : i64} {
  func.func @_mm_affine_kernel(%arg0: i32, %arg1: i32, %arg2: i32, %arg3: memref<32x128xbf16, #tpu.memory_space<vmem>>, %arg4: memref<128x128xbf16, #tpu.memory_space<vmem>>, %arg5: memref<1x128xf32, #tpu.memory_space<vmem>>, %arg6: memref<1x128xf32, #tpu.memory_space<vmem>>, %arg7: memref<32x128xf32, #tpu.memory_space<vmem>>, %arg8: memref<32x128xf32, #tpu.memory_space<vmem>>) attributes {dimension_semantics = [#tpu.dimension_semantics<parallel>, #tpu.dimension_semantics<parallel>, #tpu.dimension_semantics<arbitrary>], iteration_bounds = array<i64: 1, 2, 1>, scalar_prefetch = 0 : i64, scratch_operands = 1 : i64, tpu.core_type = #tpu.core_type<tc>, window_params = [{transform_indices = @transform_0, window_bounds = array<i64: 32, 128>}, {transform_indices = @transform_1, window_bounds = array<i64: 128, 128>}, {transform_indices = @transform_2, window_bounds = array<i64: 1, 128>}, {transform_indices = @transform_3, window_bounds = array<i64: 1, 128>}, {transform_indices = @transform_4, window_bounds = array<i64: 32, 128>}]} {
    %c0_i32 = arith.constant 0 : i32
    %0 = arith.cmpi eq, %arg2, %c0_i32 : i32
    %1 = arith.extui %0 : i1 to i32
    %c0_i32_0 = arith.constant 0 : i32
    %2 = arith.cmpi ne, %1, %c0_i32_0 : i32
    scf.if %2 {
      %cst_10 = arith.constant 0.000000e+00 : f32
      %12 = vector.broadcast %cst_10 : f32 to vector<32x128xf32>
      %c0_11 = arith.constant 0 : index
      %c0_12 = arith.constant 0 : index
      %13 = vector.load %arg8[%c0_11, %c0_12] : memref<32x128xf32, #tpu.memory_space<vmem>>, vector<32x128xf32>
      tpu.vector_store %arg8[%c0_11, %c0_12], %12 {strides = array<i32>} : memref<32x128xf32, #tpu.memory_space<vmem>>, vector<32x128xf32>,
    } else {
    }
    %c0 = arith.constant 0 : index
    %c0_1 = arith.constant 0 : index
    %3 = vector.load %arg8[%c0, %c0_1] : memref<32x128xf32, #tpu.memory_space<vmem>>, vector<32x128xf32>
    %c0_2 = arith.constant 0 : index
    %c0_3 = arith.constant 0 : index
    %4 = vector.load %arg3[%c0_2, %c0_3] : memref<32x128xbf16, #tpu.memory_space<vmem>>, vector<32x128xbf16>
    %c0_4 = arith.constant 0 : index
    %c0_5 = arith.constant 0 : index
    %5 = vector.load %arg4[%c0_4, %c0_5] : memref<128x128xbf16, #tpu.memory_space<vmem>>, vector<128x128xbf16>
    %cst = arith.constant dense<0.000000e+00> : vector<32x128xf32>
    %6 = tpu.matmul %4, %5, %cst {dimension_numbers = #tpu.dot_dimension_numbers<[1], [0], [0], [1], [0, 0, 1, 1], [], []>} : vector<32x128xbf16>, vector<128x128xbf16>, vector<32x128xf32> -> vector<32x128xf32>
    %7 = arith.addf %3, %6 : vector<32x128xf32>
    %c0_6 = arith.constant 0 : index
    %c0_7 = arith.constant 0 : index
    %8 = vector.load %arg8[%c0_6, %c0_7] : memref<32x128xf32, #tpu.memory_space<vmem>>, vector<32x128xf32>
    tpu.vector_store %arg8[%c0_6, %c0_7], %7 {strides = array<i32>} : memref<32x128xf32, #tpu.memory_space<vmem>>, vector<32x128xf32>,
    %c0_i32_8 = arith.constant 0 : i32
    %9 = arith.cmpi eq, %arg2, %c0_i32_8 : i32
    %10 = arith.extui %9 : i1 to i32
    %c0_i32_9 = arith.constant 0 : i32
    %11 = arith.cmpi ne, %10, %c0_i32_9 : i32
    scf.if %11 {
      %c0_10 = arith.constant 0 : index
      %c0_11 = arith.constant 0 : index
      %12 = vector.load %arg8[%c0_10, %c0_11] : memref<32x128xf32, #tpu.memory_space<vmem>>, vector<32x128xf32>
      %c0_12 = arith.constant 0 : index
      %c0_13 = arith.constant 0 : index
      %13 = vector.load %arg5[%c0_12, %c0_13] : memref<1x128xf32, #tpu.memory_space<vmem>>, vector<1x128xf32>
      %14 = vector.broadcast %13 : vector<1x128xf32> to vector<32x128xf32>
      %15 = arith.mulf %12, %14 : vector<32x128xf32>
      %c0_14 = arith.constant 0 : index
      %c0_15 = arith.constant 0 : index
      %16 = vector.load %arg6[%c0_14, %c0_15] : memref<1x128xf32, #tpu.memory_space<vmem>>, vector<1x128xf32>
      %17 = vector.broadcast %16 : vector<1x128xf32> to vector<32x128xf32>
      %18 = arith.addf %15, %17 : vector<32x128xf32>
      %c0_16 = arith.constant 0 : index
      %c0_17 = arith.constant 0 : index
      %19 = vector.load %arg7[%c0_16, %c0_17] : memref<32x128xf32, #tpu.memory_space<vmem>>, vector<32x128xf32>
      tpu.vector_store %arg7[%c0_16, %c0_17], %18 {strides = array<i32>} : memref<32x128xf32, #tpu.memory_space<vmem>>, vector<32x128xf32>,
    } else {
    }
    return
  }
  func.func @transform_0(%arg0: i32, %arg1: i32, %arg2: i32) -> (i32, i32) {
    %c0_i32 = arith.constant 0 : i32
    return %arg0, %arg2 : i32, i32
  }
  func.func @transform_1(%arg0: i32, %arg1: i32, %arg2: i32) -> (i32, i32) {
    %c0_i32 = arith.constant 0 : i32
    return %arg2, %arg1 : i32, i32
  }
  func.func @transform_2(%arg0: i32, %arg1: i32, %arg2: i32) -> (i32, i32) {
    %c0_i32 = arith.constant 0 : i32
    %c0_i32_0 = arith.constant 0 : i32
    return %c0_i32, %arg1 : i32, i32
  }
  func.func @transform_3(%arg0: i32, %arg1: i32, %arg2: i32) -> (i32, i32) {
    %c0_i32 = arith.constant 0 : i32
    %c0_i32_0 = arith.constant 0 : i32
    return %c0_i32, %arg1 : i32, i32
  }
  func.func @transform_4(%arg0: i32, %arg1: i32, %arg2: i32) -> (i32, i32) {
    %c0_i32 = arith.constant 0 : i32
    return %arg0, %arg1 : i32, i32
  }
}

module attributes {stable_mosaic.version = 11 : i64} {
  func.func @_mm_affine_res_kernel(%arg0: i32, %arg1: i32, %arg2: i32, %arg3: memref<32x384xbf16, #tpu.memory_space<vmem>>, %arg4: memref<384x128xbf16, #tpu.memory_space<vmem>>, %arg5: memref<1x128xf32, #tpu.memory_space<vmem>>, %arg6: memref<1x128xf32, #tpu.memory_space<vmem>>, %arg7: memref<32x128xf32, #tpu.memory_space<vmem>>, %arg8: memref<32x128xf32, #tpu.memory_space<vmem>>, %arg9: memref<32x128xf32, #tpu.memory_space<vmem>>) attributes {dimension_semantics = [#tpu.dimension_semantics<parallel>, #tpu.dimension_semantics<parallel>, #tpu.dimension_semantics<arbitrary>], iteration_bounds = array<i64: 1, 2, 6>, scalar_prefetch = 0 : i64, scratch_operands = 1 : i64, tpu.core_type = #tpu.core_type<tc>, window_params = [{transform_indices = @transform_0, window_bounds = array<i64: 32, 384>}, {transform_indices = @transform_1, window_bounds = array<i64: 384, 128>}, {transform_indices = @transform_2, window_bounds = array<i64: 1, 128>}, {transform_indices = @transform_3, window_bounds = array<i64: 1, 128>}, {transform_indices = @transform_4, window_bounds = array<i64: 32, 128>}, {transform_indices = @transform_5, window_bounds = array<i64: 32, 128>}]} {
    %c0_i32 = arith.constant 0 : i32
    %0 = arith.cmpi eq, %arg2, %c0_i32 : i32
    %1 = arith.extui %0 : i1 to i32
    %c0_i32_0 = arith.constant 0 : i32
    %2 = arith.cmpi ne, %1, %c0_i32_0 : i32
    scf.if %2 {
      %cst_9 = arith.constant 0.000000e+00 : f32
      %12 = vector.broadcast %cst_9 : f32 to vector<32x128xf32>
      %c0_10 = arith.constant 0 : index
      %c0_11 = arith.constant 0 : index
      %13 = vector.load %arg9[%c0_10, %c0_11] : memref<32x128xf32, #tpu.memory_space<vmem>>, vector<32x128xf32>
      tpu.vector_store %arg9[%c0_10, %c0_11], %12 {strides = array<i32>} : memref<32x128xf32, #tpu.memory_space<vmem>>, vector<32x128xf32>,
    } else {
    }
    %c0 = arith.constant 0 : index
    %c0_1 = arith.constant 0 : index
    %3 = vector.load %arg9[%c0, %c0_1] : memref<32x128xf32, #tpu.memory_space<vmem>>, vector<32x128xf32>
    %c0_2 = arith.constant 0 : index
    %c0_3 = arith.constant 0 : index
    %4 = vector.load %arg3[%c0_2, %c0_3] : memref<32x384xbf16, #tpu.memory_space<vmem>>, vector<32x384xbf16>
    %c0_4 = arith.constant 0 : index
    %c0_5 = arith.constant 0 : index
    %5 = vector.load %arg4[%c0_4, %c0_5] : memref<384x128xbf16, #tpu.memory_space<vmem>>, vector<384x128xbf16>
    %cst = arith.constant dense<0.000000e+00> : vector<32x128xf32>
    %6 = tpu.matmul %4, %5, %cst {dimension_numbers = #tpu.dot_dimension_numbers<[1], [0], [0], [1], [0, 0, 1, 1], [], []>} : vector<32x384xbf16>, vector<384x128xbf16>, vector<32x128xf32> -> vector<32x128xf32>
    %7 = arith.addf %3, %6 : vector<32x128xf32>
    %c0_6 = arith.constant 0 : index
    %c0_7 = arith.constant 0 : index
    %8 = vector.load %arg9[%c0_6, %c0_7] : memref<32x128xf32, #tpu.memory_space<vmem>>, vector<32x128xf32>
    tpu.vector_store %arg9[%c0_6, %c0_7], %7 {strides = array<i32>} : memref<32x128xf32, #tpu.memory_space<vmem>>, vector<32x128xf32>,
    %c5_i32 = arith.constant 5 : i32
    %9 = arith.cmpi eq, %arg2, %c5_i32 : i32
    %10 = arith.extui %9 : i1 to i32
    %c0_i32_8 = arith.constant 0 : i32
    %11 = arith.cmpi ne, %10, %c0_i32_8 : i32
    scf.if %11 {
      %c0_9 = arith.constant 0 : index
      %c0_10 = arith.constant 0 : index
      %12 = vector.load %arg9[%c0_9, %c0_10] : memref<32x128xf32, #tpu.memory_space<vmem>>, vector<32x128xf32>
      %c0_11 = arith.constant 0 : index
      %c0_12 = arith.constant 0 : index
      %13 = vector.load %arg5[%c0_11, %c0_12] : memref<1x128xf32, #tpu.memory_space<vmem>>, vector<1x128xf32>
      %14 = vector.broadcast %13 : vector<1x128xf32> to vector<32x128xf32>
      %15 = arith.mulf %12, %14 : vector<32x128xf32>
      %c0_13 = arith.constant 0 : index
      %c0_14 = arith.constant 0 : index
      %16 = vector.load %arg6[%c0_13, %c0_14] : memref<1x128xf32, #tpu.memory_space<vmem>>, vector<1x128xf32>
      %17 = vector.broadcast %16 : vector<1x128xf32> to vector<32x128xf32>
      %18 = arith.addf %15, %17 : vector<32x128xf32>
      %c0_15 = arith.constant 0 : index
      %c0_16 = arith.constant 0 : index
      %19 = vector.load %arg7[%c0_15, %c0_16] : memref<32x128xf32, #tpu.memory_space<vmem>>, vector<32x128xf32>
      %20 = arith.addf %18, %19 : vector<32x128xf32>
      %cst_17 = arith.constant 0.000000e+00 : f32
      %21 = vector.broadcast %cst_17 : f32 to vector<32x128xf32>
      %22 = arith.maximumf %20, %21 : vector<32x128xf32>
      %c0_18 = arith.constant 0 : index
      %c0_19 = arith.constant 0 : index
      %23 = vector.load %arg8[%c0_18, %c0_19] : memref<32x128xf32, #tpu.memory_space<vmem>>, vector<32x128xf32>
      tpu.vector_store %arg8[%c0_18, %c0_19], %22 {strides = array<i32>} : memref<32x128xf32, #tpu.memory_space<vmem>>, vector<32x128xf32>,
    } else {
    }
    return
  }
  func.func @transform_0(%arg0: i32, %arg1: i32, %arg2: i32) -> (i32, i32) {
    %c0_i32 = arith.constant 0 : i32
    return %arg0, %arg2 : i32, i32
  }
  func.func @transform_1(%arg0: i32, %arg1: i32, %arg2: i32) -> (i32, i32) {
    %c0_i32 = arith.constant 0 : i32
    return %arg2, %arg1 : i32, i32
  }
  func.func @transform_2(%arg0: i32, %arg1: i32, %arg2: i32) -> (i32, i32) {
    %c0_i32 = arith.constant 0 : i32
    %c0_i32_0 = arith.constant 0 : i32
    return %c0_i32, %arg1 : i32, i32
  }
  func.func @transform_3(%arg0: i32, %arg1: i32, %arg2: i32) -> (i32, i32) {
    %c0_i32 = arith.constant 0 : i32
    %c0_i32_0 = arith.constant 0 : i32
    return %c0_i32, %arg1 : i32, i32
  }
  func.func @transform_4(%arg0: i32, %arg1: i32, %arg2: i32) -> (i32, i32) {
    %c0_i32 = arith.constant 0 : i32
    return %arg0, %arg1 : i32, i32
  }
  func.func @transform_5(%arg0: i32, %arg1: i32, %arg2: i32) -> (i32, i32) {
    %c0_i32 = arith.constant 0 : i32
    return %arg0, %arg1 : i32, i32
  }
}

module attributes {stable_mosaic.version = 11 : i64} {
  func.func @_mm_affine_kernel(%arg0: i32, %arg1: i32, %arg2: i32, %arg3: memref<32x384xbf16, #tpu.memory_space<vmem>>, %arg4: memref<384x128xbf16, #tpu.memory_space<vmem>>, %arg5: memref<1x128xf32, #tpu.memory_space<vmem>>, %arg6: memref<1x128xf32, #tpu.memory_space<vmem>>, %arg7: memref<32x128xf32, #tpu.memory_space<vmem>>, %arg8: memref<32x128xf32, #tpu.memory_space<vmem>>) attributes {dimension_semantics = [#tpu.dimension_semantics<parallel>, #tpu.dimension_semantics<parallel>, #tpu.dimension_semantics<arbitrary>], iteration_bounds = array<i64: 1, 2, 6>, scalar_prefetch = 0 : i64, scratch_operands = 1 : i64, tpu.core_type = #tpu.core_type<tc>, window_params = [{transform_indices = @transform_0, window_bounds = array<i64: 32, 384>}, {transform_indices = @transform_1, window_bounds = array<i64: 384, 128>}, {transform_indices = @transform_2, window_bounds = array<i64: 1, 128>}, {transform_indices = @transform_3, window_bounds = array<i64: 1, 128>}, {transform_indices = @transform_4, window_bounds = array<i64: 32, 128>}]} {
    %c0_i32 = arith.constant 0 : i32
    %0 = arith.cmpi eq, %arg2, %c0_i32 : i32
    %1 = arith.extui %0 : i1 to i32
    %c0_i32_0 = arith.constant 0 : i32
    %2 = arith.cmpi ne, %1, %c0_i32_0 : i32
    scf.if %2 {
      %cst_9 = arith.constant 0.000000e+00 : f32
      %12 = vector.broadcast %cst_9 : f32 to vector<32x128xf32>
      %c0_10 = arith.constant 0 : index
      %c0_11 = arith.constant 0 : index
      %13 = vector.load %arg8[%c0_10, %c0_11] : memref<32x128xf32, #tpu.memory_space<vmem>>, vector<32x128xf32>
      tpu.vector_store %arg8[%c0_10, %c0_11], %12 {strides = array<i32>} : memref<32x128xf32, #tpu.memory_space<vmem>>, vector<32x128xf32>,
    } else {
    }
    %c0 = arith.constant 0 : index
    %c0_1 = arith.constant 0 : index
    %3 = vector.load %arg8[%c0, %c0_1] : memref<32x128xf32, #tpu.memory_space<vmem>>, vector<32x128xf32>
    %c0_2 = arith.constant 0 : index
    %c0_3 = arith.constant 0 : index
    %4 = vector.load %arg3[%c0_2, %c0_3] : memref<32x384xbf16, #tpu.memory_space<vmem>>, vector<32x384xbf16>
    %c0_4 = arith.constant 0 : index
    %c0_5 = arith.constant 0 : index
    %5 = vector.load %arg4[%c0_4, %c0_5] : memref<384x128xbf16, #tpu.memory_space<vmem>>, vector<384x128xbf16>
    %cst = arith.constant dense<0.000000e+00> : vector<32x128xf32>
    %6 = tpu.matmul %4, %5, %cst {dimension_numbers = #tpu.dot_dimension_numbers<[1], [0], [0], [1], [0, 0, 1, 1], [], []>} : vector<32x384xbf16>, vector<384x128xbf16>, vector<32x128xf32> -> vector<32x128xf32>
    %7 = arith.addf %3, %6 : vector<32x128xf32>
    %c0_6 = arith.constant 0 : index
    %c0_7 = arith.constant 0 : index
    %8 = vector.load %arg8[%c0_6, %c0_7] : memref<32x128xf32, #tpu.memory_space<vmem>>, vector<32x128xf32>
    tpu.vector_store %arg8[%c0_6, %c0_7], %7 {strides = array<i32>} : memref<32x128xf32, #tpu.memory_space<vmem>>, vector<32x128xf32>,
    %c5_i32 = arith.constant 5 : i32
    %9 = arith.cmpi eq, %arg2, %c5_i32 : i32
    %10 = arith.extui %9 : i1 to i32
    %c0_i32_8 = arith.constant 0 : i32
    %11 = arith.cmpi ne, %10, %c0_i32_8 : i32
    scf.if %11 {
      %c0_9 = arith.constant 0 : index
      %c0_10 = arith.constant 0 : index
      %12 = vector.load %arg8[%c0_9, %c0_10] : memref<32x128xf32, #tpu.memory_space<vmem>>, vector<32x128xf32>
      %c0_11 = arith.constant 0 : index
      %c0_12 = arith.constant 0 : index
      %13 = vector.load %arg5[%c0_11, %c0_12] : memref<1x128xf32, #tpu.memory_space<vmem>>, vector<1x128xf32>
      %14 = vector.broadcast %13 : vector<1x128xf32> to vector<32x128xf32>
      %15 = arith.mulf %12, %14 : vector<32x128xf32>
      %c0_13 = arith.constant 0 : index
      %c0_14 = arith.constant 0 : index
      %16 = vector.load %arg6[%c0_13, %c0_14] : memref<1x128xf32, #tpu.memory_space<vmem>>, vector<1x128xf32>
      %17 = vector.broadcast %16 : vector<1x128xf32> to vector<32x128xf32>
      %18 = arith.addf %15, %17 : vector<32x128xf32>
      %cst_15 = arith.constant 0.000000e+00 : f32
      %19 = vector.broadcast %cst_15 : f32 to vector<32x128xf32>
      %20 = arith.maximumf %18, %19 : vector<32x128xf32>
      %c0_16 = arith.constant 0 : index
      %c0_17 = arith.constant 0 : index
      %21 = vector.load %arg7[%c0_16, %c0_17] : memref<32x128xf32, #tpu.memory_space<vmem>>, vector<32x128xf32>
      tpu.vector_store %arg7[%c0_16, %c0_17], %20 {strides = array<i32>} : memref<32x128xf32, #tpu.memory_space<vmem>>, vector<32x128xf32>,
    } else {
    }
    return
  }
  func.func @transform_0(%arg0: i32, %arg1: i32, %arg2: i32) -> (i32, i32) {
    %c0_i32 = arith.constant 0 : i32
    return %arg0, %arg2 : i32, i32
  }
  func.func @transform_1(%arg0: i32, %arg1: i32, %arg2: i32) -> (i32, i32) {
    %c0_i32 = arith.constant 0 : i32
    return %arg2, %arg1 : i32, i32
  }
  func.func @transform_2(%arg0: i32, %arg1: i32, %arg2: i32) -> (i32, i32) {
    %c0_i32 = arith.constant 0 : i32
    %c0_i32_0 = arith.constant 0 : i32
    return %c0_i32, %arg1 : i32, i32
  }
  func.func @transform_3(%arg0: i32, %arg1: i32, %arg2: i32) -> (i32, i32) {
    %c0_i32 = arith.constant 0 : i32
    %c0_i32_0 = arith.constant 0 : i32
    return %c0_i32, %arg1 : i32, i32
  }
  func.func @transform_4(%arg0: i32, %arg1: i32, %arg2: i32) -> (i32, i32) {
    %c0_i32 = arith.constant 0 : i32
    return %arg0, %arg1 : i32, i32
  }
}

module attributes {stable_mosaic.version = 11 : i64} {
  func.func @_mm_affine_kernel(%arg0: i32, %arg1: i32, %arg2: i32, %arg3: memref<8x384xbf16, #tpu.memory_space<vmem>>, %arg4: memref<384x128xbf16, #tpu.memory_space<vmem>>, %arg5: memref<1x128xf32, #tpu.memory_space<vmem>>, %arg6: memref<1x128xf32, #tpu.memory_space<vmem>>, %arg7: memref<8x128xf32, #tpu.memory_space<vmem>>, %arg8: memref<8x128xf32, #tpu.memory_space<vmem>>) attributes {dimension_semantics = [#tpu.dimension_semantics<parallel>, #tpu.dimension_semantics<parallel>, #tpu.dimension_semantics<arbitrary>], iteration_bounds = array<i64: 1, 4, 6>, scalar_prefetch = 0 : i64, scratch_operands = 1 : i64, tpu.core_type = #tpu.core_type<tc>, window_params = [{transform_indices = @transform_0, window_bounds = array<i64: 8, 384>}, {transform_indices = @transform_1, window_bounds = array<i64: 384, 128>}, {transform_indices = @transform_2, window_bounds = array<i64: 1, 128>}, {transform_indices = @transform_3, window_bounds = array<i64: 1, 128>}, {transform_indices = @transform_4, window_bounds = array<i64: 8, 128>}]} {
    %c0_i32 = arith.constant 0 : i32
    %0 = arith.cmpi eq, %arg2, %c0_i32 : i32
    %1 = arith.extui %0 : i1 to i32
    %c0_i32_0 = arith.constant 0 : i32
    %2 = arith.cmpi ne, %1, %c0_i32_0 : i32
    scf.if %2 {
      %cst_9 = arith.constant 0.000000e+00 : f32
      %12 = vector.broadcast %cst_9 : f32 to vector<8x128xf32>
      %c0_10 = arith.constant 0 : index
      %c0_11 = arith.constant 0 : index
      %13 = vector.load %arg8[%c0_10, %c0_11] : memref<8x128xf32, #tpu.memory_space<vmem>>, vector<8x128xf32>
      tpu.vector_store %arg8[%c0_10, %c0_11], %12 {strides = array<i32>} : memref<8x128xf32, #tpu.memory_space<vmem>>, vector<8x128xf32>,
    } else {
    }
    %c0 = arith.constant 0 : index
    %c0_1 = arith.constant 0 : index
    %3 = vector.load %arg8[%c0, %c0_1] : memref<8x128xf32, #tpu.memory_space<vmem>>, vector<8x128xf32>
    %c0_2 = arith.constant 0 : index
    %c0_3 = arith.constant 0 : index
    %4 = vector.load %arg3[%c0_2, %c0_3] : memref<8x384xbf16, #tpu.memory_space<vmem>>, vector<8x384xbf16>
    %c0_4 = arith.constant 0 : index
    %c0_5 = arith.constant 0 : index
    %5 = vector.load %arg4[%c0_4, %c0_5] : memref<384x128xbf16, #tpu.memory_space<vmem>>, vector<384x128xbf16>
    %cst = arith.constant dense<0.000000e+00> : vector<8x128xf32>
    %6 = tpu.matmul %4, %5, %cst {dimension_numbers = #tpu.dot_dimension_numbers<[1], [0], [0], [1], [0, 0, 1, 1], [], []>} : vector<8x384xbf16>, vector<384x128xbf16>, vector<8x128xf32> -> vector<8x128xf32>
    %7 = arith.addf %3, %6 : vector<8x128xf32>
    %c0_6 = arith.constant 0 : index
    %c0_7 = arith.constant 0 : index
    %8 = vector.load %arg8[%c0_6, %c0_7] : memref<8x128xf32, #tpu.memory_space<vmem>>, vector<8x128xf32>
    tpu.vector_store %arg8[%c0_6, %c0_7], %7 {strides = array<i32>} : memref<8x128xf32, #tpu.memory_space<vmem>>, vector<8x128xf32>,
    %c5_i32 = arith.constant 5 : i32
    %9 = arith.cmpi eq, %arg2, %c5_i32 : i32
    %10 = arith.extui %9 : i1 to i32
    %c0_i32_8 = arith.constant 0 : i32
    %11 = arith.cmpi ne, %10, %c0_i32_8 : i32
    scf.if %11 {
      %c0_9 = arith.constant 0 : index
      %c0_10 = arith.constant 0 : index
      %12 = vector.load %arg8[%c0_9, %c0_10] : memref<8x128xf32, #tpu.memory_space<vmem>>, vector<8x128xf32>
      %c0_11 = arith.constant 0 : index
      %c0_12 = arith.constant 0 : index
      %13 = vector.load %arg5[%c0_11, %c0_12] : memref<1x128xf32, #tpu.memory_space<vmem>>, vector<1x128xf32>
      %14 = vector.broadcast %13 : vector<1x128xf32> to vector<8x128xf32>
      %15 = arith.mulf %12, %14 : vector<8x128xf32>
      %c0_13 = arith.constant 0 : index
      %c0_14 = arith.constant 0 : index
      %16 = vector.load %arg6[%c0_13, %c0_14] : memref<1x128xf32, #tpu.memory_space<vmem>>, vector<1x128xf32>
      %17 = vector.broadcast %16 : vector<1x128xf32> to vector<8x128xf32>
      %18 = arith.addf %15, %17 : vector<8x128xf32>
      %cst_15 = arith.constant 0.000000e+00 : f32
      %19 = vector.broadcast %cst_15 : f32 to vector<8x128xf32>
      %20 = arith.maximumf %18, %19 : vector<8x128xf32>
      %c0_16 = arith.constant 0 : index
      %c0_17 = arith.constant 0 : index
      %21 = vector.load %arg7[%c0_16, %c0_17] : memref<8x128xf32, #tpu.memory_space<vmem>>, vector<8x128xf32>
      tpu.vector_store %arg7[%c0_16, %c0_17], %20 {strides = array<i32>} : memref<8x128xf32, #tpu.memory_space<vmem>>, vector<8x128xf32>,
    } else {
    }
    return
  }
  func.func @transform_0(%arg0: i32, %arg1: i32, %arg2: i32) -> (i32, i32) {
    %c0_i32 = arith.constant 0 : i32
    return %arg0, %arg2 : i32, i32
  }
  func.func @transform_1(%arg0: i32, %arg1: i32, %arg2: i32) -> (i32, i32) {
    %c0_i32 = arith.constant 0 : i32
    return %arg2, %arg1 : i32, i32
  }
  func.func @transform_2(%arg0: i32, %arg1: i32, %arg2: i32) -> (i32, i32) {
    %c0_i32 = arith.constant 0 : i32
    %c0_i32_0 = arith.constant 0 : i32
    return %c0_i32, %arg1 : i32, i32
  }
  func.func @transform_3(%arg0: i32, %arg1: i32, %arg2: i32) -> (i32, i32) {
    %c0_i32 = arith.constant 0 : i32
    %c0_i32_0 = arith.constant 0 : i32
    return %c0_i32, %arg1 : i32, i32
  }
  func.func @transform_4(%arg0: i32, %arg1: i32, %arg2: i32) -> (i32, i32) {
    %c0_i32 = arith.constant 0 : i32
    return %arg0, %arg1 : i32, i32
  }
}

module attributes {stable_mosaic.version = 11 : i64} {
  func.func @_mm_affine_kernel(%arg0: i32, %arg1: i32, %arg2: i32, %arg3: memref<8x256xbf16, #tpu.memory_space<vmem>>, %arg4: memref<256x128xbf16, #tpu.memory_space<vmem>>, %arg5: memref<1x128xf32, #tpu.memory_space<vmem>>, %arg6: memref<1x128xf32, #tpu.memory_space<vmem>>, %arg7: memref<8x128xf32, #tpu.memory_space<vmem>>, %arg8: memref<8x128xf32, #tpu.memory_space<vmem>>) attributes {dimension_semantics = [#tpu.dimension_semantics<parallel>, #tpu.dimension_semantics<parallel>, #tpu.dimension_semantics<arbitrary>], iteration_bounds = array<i64: 1, 4, 1>, scalar_prefetch = 0 : i64, scratch_operands = 1 : i64, tpu.core_type = #tpu.core_type<tc>, window_params = [{transform_indices = @transform_0, window_bounds = array<i64: 8, 256>}, {transform_indices = @transform_1, window_bounds = array<i64: 256, 128>}, {transform_indices = @transform_2, window_bounds = array<i64: 1, 128>}, {transform_indices = @transform_3, window_bounds = array<i64: 1, 128>}, {transform_indices = @transform_4, window_bounds = array<i64: 8, 128>}]} {
    %c0_i32 = arith.constant 0 : i32
    %0 = arith.cmpi eq, %arg2, %c0_i32 : i32
    %1 = arith.extui %0 : i1 to i32
    %c0_i32_0 = arith.constant 0 : i32
    %2 = arith.cmpi ne, %1, %c0_i32_0 : i32
    scf.if %2 {
      %cst_10 = arith.constant 0.000000e+00 : f32
      %12 = vector.broadcast %cst_10 : f32 to vector<8x128xf32>
      %c0_11 = arith.constant 0 : index
      %c0_12 = arith.constant 0 : index
      %13 = vector.load %arg8[%c0_11, %c0_12] : memref<8x128xf32, #tpu.memory_space<vmem>>, vector<8x128xf32>
      tpu.vector_store %arg8[%c0_11, %c0_12], %12 {strides = array<i32>} : memref<8x128xf32, #tpu.memory_space<vmem>>, vector<8x128xf32>,
    } else {
    }
    %c0 = arith.constant 0 : index
    %c0_1 = arith.constant 0 : index
    %3 = vector.load %arg8[%c0, %c0_1] : memref<8x128xf32, #tpu.memory_space<vmem>>, vector<8x128xf32>
    %c0_2 = arith.constant 0 : index
    %c0_3 = arith.constant 0 : index
    %4 = vector.load %arg3[%c0_2, %c0_3] : memref<8x256xbf16, #tpu.memory_space<vmem>>, vector<8x256xbf16>
    %c0_4 = arith.constant 0 : index
    %c0_5 = arith.constant 0 : index
    %5 = vector.load %arg4[%c0_4, %c0_5] : memref<256x128xbf16, #tpu.memory_space<vmem>>, vector<256x128xbf16>
    %cst = arith.constant dense<0.000000e+00> : vector<8x128xf32>
    %6 = tpu.matmul %4, %5, %cst {dimension_numbers = #tpu.dot_dimension_numbers<[1], [0], [0], [1], [0, 0, 1, 1], [], []>} : vector<8x256xbf16>, vector<256x128xbf16>, vector<8x128xf32> -> vector<8x128xf32>
    %7 = arith.addf %3, %6 : vector<8x128xf32>
    %c0_6 = arith.constant 0 : index
    %c0_7 = arith.constant 0 : index
    %8 = vector.load %arg8[%c0_6, %c0_7] : memref<8x128xf32, #tpu.memory_space<vmem>>, vector<8x128xf32>
    tpu.vector_store %arg8[%c0_6, %c0_7], %7 {strides = array<i32>} : memref<8x128xf32, #tpu.memory_space<vmem>>, vector<8x128xf32>,
    %c0_i32_8 = arith.constant 0 : i32
    %9 = arith.cmpi eq, %arg2, %c0_i32_8 : i32
    %10 = arith.extui %9 : i1 to i32
    %c0_i32_9 = arith.constant 0 : i32
    %11 = arith.cmpi ne, %10, %c0_i32_9 : i32
    scf.if %11 {
      %c0_10 = arith.constant 0 : index
      %c0_11 = arith.constant 0 : index
      %12 = vector.load %arg8[%c0_10, %c0_11] : memref<8x128xf32, #tpu.memory_space<vmem>>, vector<8x128xf32>
      %c0_12 = arith.constant 0 : index
      %c0_13 = arith.constant 0 : index
      %13 = vector.load %arg5[%c0_12, %c0_13] : memref<1x128xf32, #tpu.memory_space<vmem>>, vector<1x128xf32>
      %14 = vector.broadcast %13 : vector<1x128xf32> to vector<8x128xf32>
      %15 = arith.mulf %12, %14 : vector<8x128xf32>
      %c0_14 = arith.constant 0 : index
      %c0_15 = arith.constant 0 : index
      %16 = vector.load %arg6[%c0_14, %c0_15] : memref<1x128xf32, #tpu.memory_space<vmem>>, vector<1x128xf32>
      %17 = vector.broadcast %16 : vector<1x128xf32> to vector<8x128xf32>
      %18 = arith.addf %15, %17 : vector<8x128xf32>
      %c0_16 = arith.constant 0 : index
      %c0_17 = arith.constant 0 : index
      %19 = vector.load %arg7[%c0_16, %c0_17] : memref<8x128xf32, #tpu.memory_space<vmem>>, vector<8x128xf32>
      tpu.vector_store %arg7[%c0_16, %c0_17], %18 {strides = array<i32>} : memref<8x128xf32, #tpu.memory_space<vmem>>, vector<8x128xf32>,
    } else {
    }
    return
  }
  func.func @transform_0(%arg0: i32, %arg1: i32, %arg2: i32) -> (i32, i32) {
    %c0_i32 = arith.constant 0 : i32
    return %arg0, %arg2 : i32, i32
  }
  func.func @transform_1(%arg0: i32, %arg1: i32, %arg2: i32) -> (i32, i32) {
    %c0_i32 = arith.constant 0 : i32
    return %arg2, %arg1 : i32, i32
  }
  func.func @transform_2(%arg0: i32, %arg1: i32, %arg2: i32) -> (i32, i32) {
    %c0_i32 = arith.constant 0 : i32
    %c0_i32_0 = arith.constant 0 : i32
    return %c0_i32, %arg1 : i32, i32
  }
  func.func @transform_3(%arg0: i32, %arg1: i32, %arg2: i32) -> (i32, i32) {
    %c0_i32 = arith.constant 0 : i32
    %c0_i32_0 = arith.constant 0 : i32
    return %c0_i32, %arg1 : i32, i32
  }
  func.func @transform_4(%arg0: i32, %arg1: i32, %arg2: i32) -> (i32, i32) {
    %c0_i32 = arith.constant 0 : i32
    return %arg0, %arg1 : i32, i32
  }
}

module attributes {stable_mosaic.version = 11 : i64} {
  func.func @_mm_affine_res_kernel(%arg0: i32, %arg1: i32, %arg2: i32, %arg3: memref<8x512xbf16, #tpu.memory_space<vmem>>, %arg4: memref<512x128xbf16, #tpu.memory_space<vmem>>, %arg5: memref<1x128xf32, #tpu.memory_space<vmem>>, %arg6: memref<1x128xf32, #tpu.memory_space<vmem>>, %arg7: memref<8x128xf32, #tpu.memory_space<vmem>>, %arg8: memref<8x128xf32, #tpu.memory_space<vmem>>, %arg9: memref<8x128xf32, #tpu.memory_space<vmem>>) attributes {dimension_semantics = [#tpu.dimension_semantics<parallel>, #tpu.dimension_semantics<parallel>, #tpu.dimension_semantics<arbitrary>], iteration_bounds = array<i64: 1, 4, 9>, scalar_prefetch = 0 : i64, scratch_operands = 1 : i64, tpu.core_type = #tpu.core_type<tc>, window_params = [{transform_indices = @transform_0, window_bounds = array<i64: 8, 512>}, {transform_indices = @transform_1, window_bounds = array<i64: 512, 128>}, {transform_indices = @transform_2, window_bounds = array<i64: 1, 128>}, {transform_indices = @transform_3, window_bounds = array<i64: 1, 128>}, {transform_indices = @transform_4, window_bounds = array<i64: 8, 128>}, {transform_indices = @transform_5, window_bounds = array<i64: 8, 128>}]} {
    %c0_i32 = arith.constant 0 : i32
    %0 = arith.cmpi eq, %arg2, %c0_i32 : i32
    %1 = arith.extui %0 : i1 to i32
    %c0_i32_0 = arith.constant 0 : i32
    %2 = arith.cmpi ne, %1, %c0_i32_0 : i32
    scf.if %2 {
      %cst_9 = arith.constant 0.000000e+00 : f32
      %12 = vector.broadcast %cst_9 : f32 to vector<8x128xf32>
      %c0_10 = arith.constant 0 : index
      %c0_11 = arith.constant 0 : index
      %13 = vector.load %arg9[%c0_10, %c0_11] : memref<8x128xf32, #tpu.memory_space<vmem>>, vector<8x128xf32>
      tpu.vector_store %arg9[%c0_10, %c0_11], %12 {strides = array<i32>} : memref<8x128xf32, #tpu.memory_space<vmem>>, vector<8x128xf32>,
    } else {
    }
    %c0 = arith.constant 0 : index
    %c0_1 = arith.constant 0 : index
    %3 = vector.load %arg9[%c0, %c0_1] : memref<8x128xf32, #tpu.memory_space<vmem>>, vector<8x128xf32>
    %c0_2 = arith.constant 0 : index
    %c0_3 = arith.constant 0 : index
    %4 = vector.load %arg3[%c0_2, %c0_3] : memref<8x512xbf16, #tpu.memory_space<vmem>>, vector<8x512xbf16>
    %c0_4 = arith.constant 0 : index
    %c0_5 = arith.constant 0 : index
    %5 = vector.load %arg4[%c0_4, %c0_5] : memref<512x128xbf16, #tpu.memory_space<vmem>>, vector<512x128xbf16>
    %cst = arith.constant dense<0.000000e+00> : vector<8x128xf32>
    %6 = tpu.matmul %4, %5, %cst {dimension_numbers = #tpu.dot_dimension_numbers<[1], [0], [0], [1], [0, 0, 1, 1], [], []>} : vector<8x512xbf16>, vector<512x128xbf16>, vector<8x128xf32> -> vector<8x128xf32>
    %7 = arith.addf %3, %6 : vector<8x128xf32>
    %c0_6 = arith.constant 0 : index
    %c0_7 = arith.constant 0 : index
    %8 = vector.load %arg9[%c0_6, %c0_7] : memref<8x128xf32, #tpu.memory_space<vmem>>, vector<8x128xf32>
    tpu.vector_store %arg9[%c0_6, %c0_7], %7 {strides = array<i32>} : memref<8x128xf32, #tpu.memory_space<vmem>>, vector<8x128xf32>,
    %c8_i32 = arith.constant 8 : i32
    %9 = arith.cmpi eq, %arg2, %c8_i32 : i32
    %10 = arith.extui %9 : i1 to i32
    %c0_i32_8 = arith.constant 0 : i32
    %11 = arith.cmpi ne, %10, %c0_i32_8 : i32
    scf.if %11 {
      %c0_9 = arith.constant 0 : index
      %c0_10 = arith.constant 0 : index
      %12 = vector.load %arg9[%c0_9, %c0_10] : memref<8x128xf32, #tpu.memory_space<vmem>>, vector<8x128xf32>
      %c0_11 = arith.constant 0 : index
      %c0_12 = arith.constant 0 : index
      %13 = vector.load %arg5[%c0_11, %c0_12] : memref<1x128xf32, #tpu.memory_space<vmem>>, vector<1x128xf32>
      %14 = vector.broadcast %13 : vector<1x128xf32> to vector<8x128xf32>
      %15 = arith.mulf %12, %14 : vector<8x128xf32>
      %c0_13 = arith.constant 0 : index
      %c0_14 = arith.constant 0 : index
      %16 = vector.load %arg6[%c0_13, %c0_14] : memref<1x128xf32, #tpu.memory_space<vmem>>, vector<1x128xf32>
      %17 = vector.broadcast %16 : vector<1x128xf32> to vector<8x128xf32>
      %18 = arith.addf %15, %17 : vector<8x128xf32>
      %c0_15 = arith.constant 0 : index
      %c0_16 = arith.constant 0 : index
      %19 = vector.load %arg7[%c0_15, %c0_16] : memref<8x128xf32, #tpu.memory_space<vmem>>, vector<8x128xf32>
      %20 = arith.addf %18, %19 : vector<8x128xf32>
      %cst_17 = arith.constant 0.000000e+00 : f32
      %21 = vector.broadcast %cst_17 : f32 to vector<8x128xf32>
      %22 = arith.maximumf %20, %21 : vector<8x128xf32>
      %c0_18 = arith.constant 0 : index
      %c0_19 = arith.constant 0 : index
      %23 = vector.load %arg8[%c0_18, %c0_19] : memref<8x128xf32, #tpu.memory_space<vmem>>, vector<8x128xf32>
      tpu.vector_store %arg8[%c0_18, %c0_19], %22 {strides = array<i32>} : memref<8x128xf32, #tpu.memory_space<vmem>>, vector<8x128xf32>,
    } else {
    }
    return
  }
  func.func @transform_0(%arg0: i32, %arg1: i32, %arg2: i32) -> (i32, i32) {
    %c0_i32 = arith.constant 0 : i32
    return %arg0, %arg2 : i32, i32
  }
  func.func @transform_1(%arg0: i32, %arg1: i32, %arg2: i32) -> (i32, i32) {
    %c0_i32 = arith.constant 0 : i32
    return %arg2, %arg1 : i32, i32
  }
  func.func @transform_2(%arg0: i32, %arg1: i32, %arg2: i32) -> (i32, i32) {
    %c0_i32 = arith.constant 0 : i32
    %c0_i32_0 = arith.constant 0 : i32
    return %c0_i32, %arg1 : i32, i32
  }
  func.func @transform_3(%arg0: i32, %arg1: i32, %arg2: i32) -> (i32, i32) {
    %c0_i32 = arith.constant 0 : i32
    %c0_i32_0 = arith.constant 0 : i32
    return %c0_i32, %arg1 : i32, i32
  }
  func.func @transform_4(%arg0: i32, %arg1: i32, %arg2: i32) -> (i32, i32) {
    %c0_i32 = arith.constant 0 : i32
    return %arg0, %arg1 : i32, i32
  }
  func.func @transform_5(%arg0: i32, %arg1: i32, %arg2: i32) -> (i32, i32) {
    %c0_i32 = arith.constant 0 : i32
    return %arg0, %arg1 : i32, i32
  }
}

module attributes {stable_mosaic.version = 11 : i64} {
  func.func @_mm_affine_kernel(%arg0: i32, %arg1: i32, %arg2: i32, %arg3: memref<8x512xbf16, #tpu.memory_space<vmem>>, %arg4: memref<512x128xbf16, #tpu.memory_space<vmem>>, %arg5: memref<1x128xf32, #tpu.memory_space<vmem>>, %arg6: memref<1x128xf32, #tpu.memory_space<vmem>>, %arg7: memref<8x128xf32, #tpu.memory_space<vmem>>, %arg8: memref<8x128xf32, #tpu.memory_space<vmem>>) attributes {dimension_semantics = [#tpu.dimension_semantics<parallel>, #tpu.dimension_semantics<parallel>, #tpu.dimension_semantics<arbitrary>], iteration_bounds = array<i64: 1, 4, 9>, scalar_prefetch = 0 : i64, scratch_operands = 1 : i64, tpu.core_type = #tpu.core_type<tc>, window_params = [{transform_indices = @transform_0, window_bounds = array<i64: 8, 512>}, {transform_indices = @transform_1, window_bounds = array<i64: 512, 128>}, {transform_indices = @transform_2, window_bounds = array<i64: 1, 128>}, {transform_indices = @transform_3, window_bounds = array<i64: 1, 128>}, {transform_indices = @transform_4, window_bounds = array<i64: 8, 128>}]} {
    %c0_i32 = arith.constant 0 : i32
    %0 = arith.cmpi eq, %arg2, %c0_i32 : i32
    %1 = arith.extui %0 : i1 to i32
    %c0_i32_0 = arith.constant 0 : i32
    %2 = arith.cmpi ne, %1, %c0_i32_0 : i32
    scf.if %2 {
      %cst_9 = arith.constant 0.000000e+00 : f32
      %12 = vector.broadcast %cst_9 : f32 to vector<8x128xf32>
      %c0_10 = arith.constant 0 : index
      %c0_11 = arith.constant 0 : index
      %13 = vector.load %arg8[%c0_10, %c0_11] : memref<8x128xf32, #tpu.memory_space<vmem>>, vector<8x128xf32>
      tpu.vector_store %arg8[%c0_10, %c0_11], %12 {strides = array<i32>} : memref<8x128xf32, #tpu.memory_space<vmem>>, vector<8x128xf32>,
    } else {
    }
    %c0 = arith.constant 0 : index
    %c0_1 = arith.constant 0 : index
    %3 = vector.load %arg8[%c0, %c0_1] : memref<8x128xf32, #tpu.memory_space<vmem>>, vector<8x128xf32>
    %c0_2 = arith.constant 0 : index
    %c0_3 = arith.constant 0 : index
    %4 = vector.load %arg3[%c0_2, %c0_3] : memref<8x512xbf16, #tpu.memory_space<vmem>>, vector<8x512xbf16>
    %c0_4 = arith.constant 0 : index
    %c0_5 = arith.constant 0 : index
    %5 = vector.load %arg4[%c0_4, %c0_5] : memref<512x128xbf16, #tpu.memory_space<vmem>>, vector<512x128xbf16>
    %cst = arith.constant dense<0.000000e+00> : vector<8x128xf32>
    %6 = tpu.matmul %4, %5, %cst {dimension_numbers = #tpu.dot_dimension_numbers<[1], [0], [0], [1], [0, 0, 1, 1], [], []>} : vector<8x512xbf16>, vector<512x128xbf16>, vector<8x128xf32> -> vector<8x128xf32>
    %7 = arith.addf %3, %6 : vector<8x128xf32>
    %c0_6 = arith.constant 0 : index
    %c0_7 = arith.constant 0 : index
    %8 = vector.load %arg8[%c0_6, %c0_7] : memref<8x128xf32, #tpu.memory_space<vmem>>, vector<8x128xf32>
    tpu.vector_store %arg8[%c0_6, %c0_7], %7 {strides = array<i32>} : memref<8x128xf32, #tpu.memory_space<vmem>>, vector<8x128xf32>,
    %c8_i32 = arith.constant 8 : i32
    %9 = arith.cmpi eq, %arg2, %c8_i32 : i32
    %10 = arith.extui %9 : i1 to i32
    %c0_i32_8 = arith.constant 0 : i32
    %11 = arith.cmpi ne, %10, %c0_i32_8 : i32
    scf.if %11 {
      %c0_9 = arith.constant 0 : index
      %c0_10 = arith.constant 0 : index
      %12 = vector.load %arg8[%c0_9, %c0_10] : memref<8x128xf32, #tpu.memory_space<vmem>>, vector<8x128xf32>
      %c0_11 = arith.constant 0 : index
      %c0_12 = arith.constant 0 : index
      %13 = vector.load %arg5[%c0_11, %c0_12] : memref<1x128xf32, #tpu.memory_space<vmem>>, vector<1x128xf32>
      %14 = vector.broadcast %13 : vector<1x128xf32> to vector<8x128xf32>
      %15 = arith.mulf %12, %14 : vector<8x128xf32>
      %c0_13 = arith.constant 0 : index
      %c0_14 = arith.constant 0 : index
      %16 = vector.load %arg6[%c0_13, %c0_14] : memref<1x128xf32, #tpu.memory_space<vmem>>, vector<1x128xf32>
      %17 = vector.broadcast %16 : vector<1x128xf32> to vector<8x128xf32>
      %18 = arith.addf %15, %17 : vector<8x128xf32>
      %cst_15 = arith.constant 0.000000e+00 : f32
      %19 = vector.broadcast %cst_15 : f32 to vector<8x128xf32>
      %20 = arith.maximumf %18, %19 : vector<8x128xf32>
      %c0_16 = arith.constant 0 : index
      %c0_17 = arith.constant 0 : index
      %21 = vector.load %arg7[%c0_16, %c0_17] : memref<8x128xf32, #tpu.memory_space<vmem>>, vector<8x128xf32>
      tpu.vector_store %arg7[%c0_16, %c0_17], %20 {strides = array<i32>} : memref<8x128xf32, #tpu.memory_space<vmem>>, vector<8x128xf32>,
    } else {
    }
    return
  }
  func.func @transform_0(%arg0: i32, %arg1: i32, %arg2: i32) -> (i32, i32) {
    %c0_i32 = arith.constant 0 : i32
    return %arg0, %arg2 : i32, i32
  }
  func.func @transform_1(%arg0: i32, %arg1: i32, %arg2: i32) -> (i32, i32) {
    %c0_i32 = arith.constant 0 : i32
    return %arg2, %arg1 : i32, i32
  }
  func.func @transform_2(%arg0: i32, %arg1: i32, %arg2: i32) -> (i32, i32) {
    %c0_i32 = arith.constant 0 : i32
    %c0_i32_0 = arith.constant 0 : i32
    return %c0_i32, %arg1 : i32, i32
  }
  func.func @transform_3(%arg0: i32, %arg1: i32, %arg2: i32) -> (i32, i32) {
    %c0_i32 = arith.constant 0 : i32
    %c0_i32_0 = arith.constant 0 : i32
    return %c0_i32, %arg1 : i32, i32
  }
  func.func @transform_4(%arg0: i32, %arg1: i32, %arg2: i32) -> (i32, i32) {
    %c0_i32 = arith.constant 0 : i32
    return %arg0, %arg1 : i32, i32
  }
}

module attributes {stable_mosaic.version = 11 : i64} {
  func.func @_global_maxpool_fc_kernel(%arg0: memref<4x2x512xf32, #tpu.memory_space<vmem>>, %arg1: memref<512x128xbf16, #tpu.memory_space<vmem>>, %arg2: memref<1x128xf32, #tpu.memory_space<vmem>>, %arg3: memref<2x128xf32, #tpu.memory_space<vmem>>) attributes {dimension_semantics = [], scalar_prefetch = 0 : i64, scratch_operands = 0 : i64, tpu.core_type = #tpu.core_type<tc>} {
    %c0 = arith.constant 0 : index
    %c0_0 = arith.constant 0 : index
    %c0_1 = arith.constant 0 : index
    %0 = vector.load %arg0[%c0, %c0_0, %c0_1] : memref<4x2x512xf32, #tpu.memory_space<vmem>>, vector<4x2x512xf32>
    %cst = arith.constant dense<0xFF800000> : vector<2x512xf32>
    %1 = vector.multi_reduction <maximumf>, %0, %cst [0] : vector<4x2x512xf32> to vector<2x512xf32>
    %2 = arith.truncf %1 : vector<2x512xf32> to vector<2x512xbf16>
    %c0_2 = arith.constant 0 : index
    %c0_3 = arith.constant 0 : index
    %3 = vector.load %arg1[%c0_2, %c0_3] : memref<512x128xbf16, #tpu.memory_space<vmem>>, vector<512x128xbf16>
    %cst_4 = arith.constant dense<0.000000e+00> : vector<2x128xf32>
    %4 = tpu.matmul %2, %3, %cst_4 {dimension_numbers = #tpu.dot_dimension_numbers<[1], [0], [0], [1], [0, 0, 1, 1], [], []>} : vector<2x512xbf16>, vector<512x128xbf16>, vector<2x128xf32> -> vector<2x128xf32>
    %c0_5 = arith.constant 0 : index
    %c0_6 = arith.constant 0 : index
    %5 = vector.load %arg2[%c0_5, %c0_6] : memref<1x128xf32, #tpu.memory_space<vmem>>, vector<1x128xf32>
    %6 = vector.broadcast %5 : vector<1x128xf32> to vector<2x128xf32>
    %7 = arith.addf %4, %6 : vector<2x128xf32>
    %c0_7 = arith.constant 0 : index
    %c0_8 = arith.constant 0 : index
    %8 = vector.load %arg3[%c0_7, %c0_8] : memref<2x128xf32, #tpu.memory_space<vmem>>, vector<2x128xf32>
    tpu.vector_store %arg3[%c0_7, %c0_8], %7 {strides = array<i32>} : memref<2x128xf32, #tpu.memory_space<vmem>>, vector<2x128xf32>,
    return
  }
}

</mosaic_0001>

<bundles_post_ra>
// kernel: resnet18_forward.21
= control target key start
LH: loop header
LB: loop body
LE: loop exit
PB: predicated region body
PF: predicated region fallthrough
CT: control target
= control target key end

     0   :  { %s1556_s15 = smov 0   ;;  %s1558_s16 = smov 0   ;;  %s1786_s0 = inlined_call_operand.vmem [shape: bf16[2048,256], index: 0, kind: input, shape index: {}]   ;;  %s1787_s1 = inlined_call_operand.vmem [shape: bf16[256,128], index: 1, kind: input, shape index: {}]   ;;  %s1788_s2 = inlined_call_operand.vmem [shape: f32[1,128], index: 2, kind: input, shape index: {}]   ;;  %s1789_s3 = inlined_call_operand.vmem [shape: f32[1,128], index: 3, kind: input, shape index: {}]   ;;  %s1790_s4 = inlined_call_operand.vmem [shape: f32[2048,128], index: 4, kind: output, shape index: {}]  }
   0x1   :  { %s1560_s17 = smov 0  }
   0x2 LB: > { %s33_s18 = sadd.s32 1, %s1525_s16  ;;  %p1232_p0 = scmp.ge.s32.totalorder %s1529_s17, 1  ;;  %s1529_s17 = sphi %s1560_s17, %s14_s17   ;;  %s1525_s16 = sphi %s1558_s16, %s1792_s16   ;;  %s1521_s15 = sphi %s1556_s15, %s1791_s15  }
   0x3   : > { %p35_p1 = scmp.ge.s32.totalorder %s33_s18, 8  ;;  %p224_p2 = scmp.lt.s32.totalorder %s1529_s17, 9 }
   0x5   : > { %s1794_s18 = smov (%p35_p1, %s33_s18), 0  ;;  %p225_p3 = pnand %p1232_p0, %p224_p2 }
   0x6   : > { %v1443_v0 = vld [vmem:[%s1787_s1 + $0x40] sm:$0xff] (!%p225_p3)   ;;  %s1233_s21 = sshll.u32 (!%p225_p3), %s1521_s15, 5  ;;  %v1445_v2 = vld [vmem:[%s1787_s1 + $0x48] sm:$0xff] (!%p225_p3)   ;;  %v1447_v4 = vld [vmem:[%s1787_s1 + $0x50] sm:$0xff] (!%p225_p3)  }
   0x7   : > { %228 = sbr.rel (%p225_p3) target bundleno = 320 (0x140), region = 36  ;;  %v1444_v1 = vld [vmem:[%s1787_s1] sm:$0xff] (!%p225_p3)   ;;  %1291 = vmatprep.subr.bf16.mxu0 (!%p225_p3), %v1443_v0  ;;  %1403 = vmatprep.subr.bf16.mxu1 (!%p225_p3), %v1443_v0  ;;  %v1446_v3 = vld [vmem:[%s1787_s1 + $0x8] sm:$0xff] (!%p225_p3)   ;;  %p274_p4 = scmp.lt.s32.totalorder (!%p225_p3), %s1233_s21, 255  ;;  %v1448_v5 = vld [vmem:[%s1787_s1 + $0x10] sm:$0xff] (!%p225_p3)  }
   0x8   : > { %1292 = vmatpush3.bf16.msra.mxu0 (!%p225_p3), %v1444_v1  ;;  %1411 = vmatpush3.bf16.msra.mxu1 (!%p225_p3), %v1444_v1  ;;  %v1449_v6 = vld [vmem:[%s1787_s1 + $0x58] sm:$0xff] (!%p225_p3)   ;;  %v1451_v8 = vld [vmem:[%s1787_s1 + $0x60] sm:$0xff] (!%p225_p3)   ;;  %v1453_v10 = vld [vmem:[%s1787_s1 + $0x68] sm:$0xff] (!%p225_p3)  }
   0x9   : > { %1293 = vmatprep.subr.bf16.mxu0 (!%p225_p3), %v1445_v2  ;;  %1404 = vmatprep.subr.bf16.mxu1 (!%p225_p3), %v1445_v2  ;;  %v1450_v7 = vld [vmem:[%s1787_s1 + $0x18] sm:$0xff] (!%p225_p3)   ;;  %v1452_v9 = vld [vmem:[%s1787_s1 + $0x20] sm:$0xff] (!%p225_p3)   ;;  %v1454_v13 = vld [vmem:[%s1787_s1 + $0x28] sm:$0xff] (!%p225_p3)  }
   0xa   : > { %v1455_v14 = vld [vmem:[%s1787_s1 + $0x70] sm:$0xff] (!%p225_p3)   ;;  %v1457_v16 = vld [vmem:[%s1787_s1 + $0x78] sm:$0xff] (!%p225_p3)   ;;  %v1667_v51 = vld [vmem:[%s1788_s2] ss:$0 sm:$0xff] (!%p225_p3) }
   0xb   : > { %v1456_v15 = vld [vmem:[%s1787_s1 + $0x30] sm:$0xff] (!%p225_p3)   ;;  %v1458_v17 = vld [vmem:[%s1787_s1 + $0x38] sm:$0xff] (!%p225_p3)   ;;  %v1672_v57 = vld [vmem:[%s1789_s3] ss:$0 sm:$0xff] (!%p225_p3) }
   0xc   : > { %1294 = vmatpush3.bf16.msra.mxu0 (!%p225_p3), %v1446_v3  ;;  %1412 = vmatpush3.bf16.msra.mxu1 (!%p225_p3), %v1446_v3 }
   0xd   : > { %1295 = vmatprep.subr.bf16.mxu0 (!%p225_p3), %v1447_v4  ;;  %1405 = vmatprep.subr.bf16.mxu1 (!%p225_p3), %v1447_v4 }
   0xe   : > { %s1796_s21 = smov (!%p274_p4, %s1233_s21), 255 }
   0xf   : > { %s1290_s10 = sshll.u32 %s1796_s21, 3 }
  0x10   : > { %1296 = vmatpush3.bf16.msra.mxu0 %v1448_v5  ;;  %1413 = vmatpush3.bf16.msra.mxu1 %v1448_v5  ;;  %s1609_s15 = scalar_lea.vmem %s1786_s0, %s1290_s10 }
  0x11   : > { %1297 = vmatprep.subr.bf16.mxu0 %v1449_v6  ;;  %1406 = vmatprep.subr.bf16.mxu1 %v1449_v6  ;;  %v1461_v11 = vld [vmem:[%s1609_s15 + $0x4] ss:$8 sps:$4 sm:$0xff]   ;;  %v1459_v18 = vld [vmem:[%s1609_s15] ss:$8 sps:$4 sm:$0xff]   ;;  %v1465_v20 = vld [vmem:[%s1609_s15 + $0x14] ss:$8 sps:$4 sm:$0xff]  }
  0x12   : > { %v1464_v12 = vld [vmem:[%s1609_s15 + $0x84] ss:$8 sps:$4 sm:$0xff]   ;;  %729 = vmatprep.mubr.bf16.mxu0 %v1461_v11  ;;  %v1462_v19 = vld [vmem:[%s1609_s15 + $0x80] ss:$8 sps:$4 sm:$0xff]   ;;  %v1467_v21 = vld [vmem:[%s1609_s15 + $0x94] ss:$8 sps:$4 sm:$0xff]  }
  0x13   : > { %793 = vmatprep.mubr.bf16.mxu1 %v1464_v12  ;;  %v1469_v22 = vld [vmem:[%s1609_s15 + $0x10] ss:$8 sps:$4 sm:$0xff]   ;;  %v1471_v24 = vld [vmem:[%s1609_s15 + $0x24] ss:$8 sps:$4 sm:$0xff]   ;;  %v1475_v26 = vld [vmem:[%s1609_s15 + $0x20] ss:$8 sps:$4 sm:$0xff]  }
  0x14   : > { %1298 = vmatpush3.bf16.msra.mxu0 %v1450_v7  ;;  %1414 = vmatpush3.bf16.msra.mxu1 %v1450_v7  ;;  %v1470_v23 = vld [vmem:[%s1609_s15 + $0x90] ss:$8 sps:$4 sm:$0xff]   ;;  %v1473_v25 = vld [vmem:[%s1609_s15 + $0xa4] ss:$8 sps:$4 sm:$0xff]   ;;  %v1476_v27 = vld [vmem:[%s1609_s15 + $0xa0] ss:$8 sps:$4 sm:$0xff]  }
  0x15   : > { %1299 = vmatprep.subr.bf16.mxu0 %v1451_v8  ;;  %1407 = vmatprep.subr.bf16.mxu1 %v1451_v8  ;;  %v1477_v28 = vld [vmem:[%s1609_s15 + $0x34] ss:$8 sps:$4 sm:$0xff]   ;;  %v1481_v30 = vld [vmem:[%s1609_s15 + $0x30] ss:$8 sps:$4 sm:$0xff]   ;;  %v1483_v32 = vld [vmem:[%s1609_s15 + $0x44] ss:$8 sps:$4 sm:$0xff]  }
  0x16   : > { %v1479_v29 = vld [vmem:[%s1609_s15 + $0xb4] ss:$8 sps:$4 sm:$0xff]   ;;  %v1482_v31 = vld [vmem:[%s1609_s15 + $0xb0] ss:$8 sps:$4 sm:$0xff]   ;;  %v1485_v33 = vld [vmem:[%s1609_s15 + $0xc4] ss:$8 sps:$4 sm:$0xff]  }
  0x17   : > { %v1487_v34 = vld [vmem:[%s1609_s15 + $0x40] ss:$8 sps:$4 sm:$0xff]   ;;  %v1489_v36 = vld [vmem:[%s1609_s15 + $0x54] ss:$8 sps:$4 sm:$0xff]   ;;  %v1493_v38 = vld [vmem:[%s1609_s15 + $0x50] ss:$8 sps:$4 sm:$0xff]  }
  0x18   : > { %1300 = vmatpush3.bf16.msra.mxu0 %v1452_v9  ;;  %1415 = vmatpush3.bf16.msra.mxu1 %v1452_v9  ;;  %v1488_v35 = vld [vmem:[%s1609_s15 + $0xc0] ss:$8 sps:$4 sm:$0xff]   ;;  %v1491_v37 = vld [vmem:[%s1609_s15 + $0xd4] ss:$8 sps:$4 sm:$0xff]   ;;  %v1494_v39 = vld [vmem:[%s1609_s15 + $0xd0] ss:$8 sps:$4 sm:$0xff]  }
  0x19   : > { %1301 = vmatprep.subr.bf16.mxu0 %v1453_v10  ;;  %1408 = vmatprep.subr.bf16.mxu1 %v1453_v10  ;;  %v1495_v40 = vld [vmem:[%s1609_s15 + $0x64] ss:$8 sps:$4 sm:$0xff]   ;;  %v1499_v42 = vld [vmem:[%s1609_s15 + $0x60] ss:$8 sps:$4 sm:$0xff]   ;;  %v1501_v44 = vld [vmem:[%s1609_s15 + $0x74] ss:$8 sps:$4 sm:$0xff]  }
  0x1a   : > { %v1497_v41 = vld [vmem:[%s1609_s15 + $0xe4] ss:$8 sps:$4 sm:$0xff]   ;;  %v1500_v43 = vld [vmem:[%s1609_s15 + $0xe0] ss:$8 sps:$4 sm:$0xff]   ;;  %v1503_v45 = vld [vmem:[%s1609_s15 + $0xf4] ss:$8 sps:$4 sm:$0xff]  }
  0x1b   : > { %v1505_v46 = vld [vmem:[%s1609_s15 + $0x70] ss:$8 sps:$4 sm:$0xff]  }
  0x1c   : > { %1302 = vmatpush3.bf16.msra.mxu0 %v1454_v13  ;;  %1416 = vmatpush3.bf16.msra.mxu1 %v1454_v13  ;;  %v1506_v47 = vld [vmem:[%s1609_s15 + $0xf0] ss:$8 sps:$4 sm:$0xff]   ;;  %s1685_s15 = scalar_lea.vmem %s1790_s4, %s1290_s10 }
  0x1d   : > { %1303 = vmatprep.subr.bf16.mxu0 %v1455_v14  ;;  %1409 = vmatprep.subr.bf16.mxu1 %v1455_v14 }
  0x20   : > { %1304 = vmatpush3.bf16.msra.mxu0 %v1456_v15  ;;  %1417 = vmatpush3.bf16.msra.mxu1 %v1456_v15 }
  0x21   : > { %1305 = vmatprep.subr.bf16.mxu0 %v1457_v16  ;;  %1410 = vmatprep.subr.bf16.mxu1 %v1457_v16 }
  0x24   : > { %1306 = vmatpush3.bf16.msra.mxu0 %v1458_v17  ;;  %1418 = vmatpush3.bf16.msra.mxu1 %v1458_v17 }
  0x27   : > { %730 = vmatmul.mubr.bf16.vlgmr.msra.gmra.mrb[0].mxu0 %v1459_v18  ;;  %794 = vmatmul.mubr.bf16.vlgmr.msra.gmra.mrb[0].mxu1 %v1462_v19 }
  0x28   : > { %737 = vmatprep.mubr.bf16.mxu0 %v1465_v20  ;;  %801 = vmatprep.mubr.bf16.mxu1 %v1467_v21 }
  0x2f   : > { %738 = vmatmul.mubr.bf16.gmra.mrb[4].mxu0 %v1469_v22  ;;  %802 = vmatmul.mubr.bf16.gmra.mrb[4].mxu1 %v1470_v23 }
  0x30   : > { %745 = vmatprep.mubr.bf16.mxu0 %v1471_v24  ;;  %809 = vmatprep.mubr.bf16.mxu1 %v1473_v25 }
  0x37   : > { %746 = vmatmul.mubr.bf16.gmra.mrb[8].mxu0 %v1475_v26  ;;  %810 = vmatmul.mubr.bf16.gmra.mrb[8].mxu1 %v1476_v27 }
  0x38   : > { %753 = vmatprep.mubr.bf16.mxu0 %v1477_v28  ;;  %817 = vmatprep.mubr.bf16.mxu1 %v1479_v29 }
  0x3f   : > { %754 = vmatmul.mubr.bf16.gmra.mrb[12].mxu0 %v1481_v30  ;;  %818 = vmatmul.mubr.bf16.gmra.mrb[12].mxu1 %v1482_v31 }
  0x40   : > { %761 = vmatprep.mubr.bf16.mxu0 %v1483_v32  ;;  %825 = vmatprep.mubr.bf16.mxu1 %v1485_v33 }
  0x47   : > { %762 = vmatmul.mubr.bf16.gmra.mrb[16].mxu0 %v1487_v34  ;;  %826 = vmatmul.mubr.bf16.gmra.mrb[16].mxu1 %v1488_v35 }
  0x48   : > { %769 = vmatprep.mubr.bf16.mxu0 %v1489_v36  ;;  %833 = vmatprep.mubr.bf16.mxu1 %v1491_v37 }
  0x4f   : > { %770 = vmatmul.mubr.bf16.gmra.mrb[20].mxu0 %v1493_v38  ;;  %834 = vmatmul.mubr.bf16.gmra.mrb[20].mxu1 %v1494_v39 }
  0x50   : > { %777 = vmatprep.mubr.bf16.mxu0 %v1495_v40  ;;  %841 = vmatprep.mubr.bf16.mxu1 %v1497_v41 }
  0x57   : > { %778 = vmatmul.mubr.bf16.gmra.mrb[24].mxu0 %v1499_v42  ;;  %842 = vmatmul.mubr.bf16.gmra.mrb[24].mxu1 %v1500_v43 }
  0x58   : > { %785 = vmatprep.mubr.bf16.mxu0 %v1501_v44  ;;  %849 = vmatprep.mubr.bf16.mxu1 %v1503_v45 }
  0x5f   : > { %786 = vmatmul.mubr.bf16.gmra.mrb[28].mxu0 %v1505_v46  ;;  %850 = vmatmul.mubr.bf16.gmra.mrb[28].mxu1 %v1506_v47 }
  0xfa   : > { %v1307_v48 = vpop.f32.mrb[0].mxu0  ;;  %v1355_v49 = vpop.f32.mrb[0].mxu1 }
  0xfb   : > { %v1308_v50 = vpop.f32.mrb[1].mxu0  ;;  %v1356_v52 = vpop.f32.mrb[1].mxu1 }
  0xfc   : > { %v1309_v53 = vadd.f32 %v1308_v50, %v1307_v48  ;;  %v1357_v54 = vadd.f32 %v1356_v52, %v1355_v49  ;;  %v1310_v55 = vpop.f32.mrb[2].mxu0  ;;  %v1358_v56 = vpop.f32.mrb[2].mxu1 }
  0xfd   : > { %v1311_v58 = vpop.f32.mrb[3].mxu0  ;;  %v1359_v59 = vpop.f32.mrb[3].mxu1 }
  0xfe   : > { %v964_v60 = vmul.f32 %v1309_v53, %v1667_v51  ;;  %v980_v61 = vmul.f32 %v1357_v54, %v1667_v51  ;;  %v1312_v62 = vadd.f32 %v1311_v58, %v1310_v55  ;;  %v1360_v63 = vadd.f32 %v1359_v59, %v1358_v56 }
 0x100   : > { %v1003_v0 = vadd.f32 %v1672_v57, %v964_v60  ;;  %v1019_v1 = vadd.f32 %v1672_v57, %v980_v61  ;;  %v965_v2 = vmul.f32 %v1312_v62, %v1667_v51  ;;  %v981_v3 = vmul.f32 %v1360_v63, %v1667_v51 }
 0x102   : > { %v1035_v4 = vmax.f32 %v1003_v0, 0.0  ;;  %v1051_v5 = vmax.f32 %v1019_v1, 0.0  ;;  %v1004_v6 = vadd.f32 %v1672_v57, %v965_v2  ;;  %v1020_v7 = vadd.f32 %v1672_v57, %v981_v3  ;;  %v1313_v8 = vpop.f32.mrb[4].mxu0  ;;  %v1361_v9 = vpop.f32.mrb[4].mxu1 }
 0x103   : > { %v1314_v10 = vpop.f32.mrb[5].mxu0  ;;  %v1362_v11 = vpop.f32.mrb[5].mxu1 }
 0x104   : > { %1067 = vst [vmem:[%s1685_s15] sm:$0xff] %v1035_v4  ;;  %1083 = vst [vmem:[%s1685_s15 + $0x80] sm:$0xff] %v1051_v5  ;;  %v1036_v12 = vmax.f32 %v1004_v6, 0.0  ;;  %v1052_v13 = vmax.f32 %v1020_v7, 0.0  ;;  %v1315_v14 = vadd.f32 %v1314_v10, %v1313_v8  ;;  %v1363_v15 = vadd.f32 %v1362_v11, %v1361_v9  ;;  %v1316_v16 = vpop.f32.mrb[6].mxu0  ;;  %v1364_v17 = vpop.f32.mrb[6].mxu1 }
 0x105   : > { %v1317_v18 = vpop.f32.mrb[7].mxu0  ;;  %v1365_v19 = vpop.f32.mrb[7].mxu1 }
 0x106   : > { %1068 = vst [vmem:[%s1685_s15 + $0x8] sm:$0xff] %v1036_v12  ;;  %1084 = vst [vmem:[%s1685_s15 + $0x88] sm:$0xff] %v1052_v13  ;;  %v966_v20 = vmul.f32 %v1315_v14, %v1667_v51  ;;  %v982_v21 = vmul.f32 %v1363_v15, %v1667_v51  ;;  %v1318_v22 = vadd.f32 %v1317_v18, %v1316_v16 }
 0x107   : > { %v1366_v23 = vadd.f32 %v1365_v19, %v1364_v17 }
 0x108   : > { %v1005_v24 = vadd.f32 %v1672_v57, %v966_v20  ;;  %v1021_v25 = vadd.f32 %v1672_v57, %v982_v21  ;;  %v967_v26 = vmul.f32 %v1318_v22, %v1667_v51 }
 0x109   : > { %v983_v27 = vmul.f32 %v1366_v23, %v1667_v51 }
 0x10a   : > { %v1037_v28 = vmax.f32 %v1005_v24, 0.0  ;;  %v1053_v29 = vmax.f32 %v1021_v25, 0.0  ;;  %v1006_v30 = vadd.f32 %v1672_v57, %v967_v26  ;;  %v1319_v32 = vpop.f32.mrb[8].mxu0  ;;  %v1367_v33 = vpop.f32.mrb[8].mxu1 }
 0x10b   : > { %v1022_v31 = vadd.f32 %v1672_v57, %v983_v27  ;;  %v1320_v34 = vpop.f32.mrb[9].mxu0  ;;  %v1368_v35 = vpop.f32.mrb[9].mxu1 }
 0x10c   : > { %1069 = vst [vmem:[%s1685_s15 + $0x10] sm:$0xff] %v1037_v28  ;;  %1085 = vst [vmem:[%s1685_s15 + $0x90] sm:$0xff] %v1053_v29  ;;  %v1038_v36 = vmax.f32 %v1006_v30, 0.0  ;;  %v1321_v38 = vadd.f32 %v1320_v34, %v1319_v32  ;;  %v1369_v39 = vadd.f32 %v1368_v35, %v1367_v33  ;;  %v1322_v40 = vpop.f32.mrb[10].mxu0  ;;  %v1370_v41 = vpop.f32.mrb[10].mxu1 }
 0x10d   : > { %v1054_v37 = vmax.f32 %v1022_v31, 0.0  ;;  %v1323_v42 = vpop.f32.mrb[11].mxu0  ;;  %v1371_v43 = vpop.f32.mrb[11].mxu1 }
 0x10e   : > { %1070 = vst [vmem:[%s1685_s15 + $0x18] sm:$0xff] %v1038_v36  ;;  %v968_v44 = vmul.f32 %v1321_v38, %v1667_v51  ;;  %v984_v45 = vmul.f32 %v1369_v39, %v1667_v51  ;;  %v1324_v46 = vadd.f32 %v1323_v42, %v1322_v40  ;;  %v1372_v47 = vadd.f32 %v1371_v43, %v1370_v41 }
 0x10f   : > { %1086 = vst [vmem:[%s1685_s15 + $0x98] sm:$0xff] %v1054_v37 }
 0x110   : > { %v1007_v48 = vadd.f32 %v1672_v57, %v968_v44  ;;  %v1023_v49 = vadd.f32 %v1672_v57, %v984_v45  ;;  %v969_v50 = vmul.f32 %v1324_v46, %v1667_v51  ;;  %v985_v52 = vmul.f32 %v1372_v47, %v1667_v51 }
 0x112   : > { %v1039_v53 = vmax.f32 %v1007_v48, 0.0  ;;  %v1055_v54 = vmax.f32 %v1023_v49, 0.0  ;;  %v1008_v55 = vadd.f32 %v1672_v57, %v969_v50  ;;  %v1024_v56 = vadd.f32 %v1672_v57, %v985_v52  ;;  %v1325_v58 = vpop.f32.mrb[12].mxu0  ;;  %v1373_v59 = vpop.f32.mrb[12].mxu1 }
 0x113   : > { %v1326_v60 = vpop.f32.mrb[13].mxu0  ;;  %v1374_v61 = vpop.f32.mrb[13].mxu1 }
 0x114   : > { %1071 = vst [vmem:[%s1685_s15 + $0x20] sm:$0xff] %v1039_v53  ;;  %1087 = vst [vmem:[%s1685_s15 + $0xa0] sm:$0xff] %v1055_v54  ;;  %v1040_v62 = vmax.f32 %v1008_v55, 0.0  ;;  %v1056_v63 = vmax.f32 %v1024_v56, 0.0  ;;  %v1327_v0 = vadd.f32 %v1326_v60, %v1325_v58  ;;  %v1375_v1 = vadd.f32 %v1374_v61, %v1373_v59  ;;  %v1328_v2 = vpop.f32.mrb[14].mxu0  ;;  %v1376_v3 = vpop.f32.mrb[14].mxu1 }
 0x115   : > { %v1329_v4 = vpop.f32.mrb[15].mxu0  ;;  %v1377_v5 = vpop.f32.mrb[15].mxu1 }
 0x116   : > { %1072 = vst [vmem:[%s1685_s15 + $0x28] sm:$0xff] %v1040_v62  ;;  %1088 = vst [vmem:[%s1685_s15 + $0xa8] sm:$0xff] %v1056_v63  ;;  %v970_v6 = vmul.f32 %v1327_v0, %v1667_v51  ;;  %v986_v7 = vmul.f32 %v1375_v1, %v1667_v51  ;;  %v1330_v8 = vadd.f32 %v1329_v4, %v1328_v2 }
 0x117   : > { %v1378_v9 = vadd.f32 %v1377_v5, %v1376_v3 }
 0x118   : > { %v1009_v10 = vadd.f32 %v1672_v57, %v970_v6  ;;  %v1025_v11 = vadd.f32 %v1672_v57, %v986_v7  ;;  %v971_v12 = vmul.f32 %v1330_v8, %v1667_v51 }
 0x119   : > { %v987_v13 = vmul.f32 %v1378_v9, %v1667_v51 }
 0x11a   : > { %v1041_v14 = vmax.f32 %v1009_v10, 0.0  ;;  %v1057_v15 = vmax.f32 %v1025_v11, 0.0  ;;  %v1010_v16 = vadd.f32 %v1672_v57, %v971_v12  ;;  %v1331_v18 = vpop.f32.mrb[16].mxu0  ;;  %v1379_v19 = vpop.f32.mrb[16].mxu1 }
 0x11b   : > { %v1026_v17 = vadd.f32 %v1672_v57, %v987_v13  ;;  %v1332_v20 = vpop.f32.mrb[17].mxu0  ;;  %v1380_v21 = vpop.f32.mrb[17].mxu1 }
 0x11c   : > { %1073 = vst [vmem:[%s1685_s15 + $0x30] sm:$0xff] %v1041_v14  ;;  %1089 = vst [vmem:[%s1685_s15 + $0xb0] sm:$0xff] %v1057_v15  ;;  %v1042_v22 = vmax.f32 %v1010_v16, 0.0  ;;  %v1333_v24 = vadd.f32 %v1332_v20, %v1331_v18  ;;  %v1381_v25 = vadd.f32 %v1380_v21, %v1379_v19  ;;  %v1334_v26 = vpop.f32.mrb[18].mxu0  ;;  %v1382_v27 = vpop.f32.mrb[18].mxu1 }
 0x11d   : > { %v1058_v23 = vmax.f32 %v1026_v17, 0.0  ;;  %v1335_v28 = vpop.f32.mrb[19].mxu0  ;;  %v1383_v29 = vpop.f32.mrb[19].mxu1 }
 0x11e   : > { %1074 = vst [vmem:[%s1685_s15 + $0x38] sm:$0xff] %v1042_v22  ;;  %v972_v30 = vmul.f32 %v1333_v24, %v1667_v51  ;;  %v988_v31 = vmul.f32 %v1381_v25, %v1667_v51  ;;  %v1336_v32 = vadd.f32 %v1335_v28, %v1334_v26  ;;  %v1384_v33 = vadd.f32 %v1383_v29, %v1382_v27 }
 0x11f   : > { %1090 = vst [vmem:[%s1685_s15 + $0xb8] sm:$0xff] %v1058_v23 }
 0x120   : > { %v1011_v34 = vadd.f32 %v1672_v57, %v972_v30  ;;  %v1027_v35 = vadd.f32 %v1672_v57, %v988_v31  ;;  %v973_v36 = vmul.f32 %v1336_v32, %v1667_v51  ;;  %v989_v37 = vmul.f32 %v1384_v33, %v1667_v51 }
 0x122   : > { %v1043_v38 = vmax.f32 %v1011_v34, 0.0  ;;  %v1059_v39 = vmax.f32 %v1027_v35, 0.0  ;;  %v1012_v40 = vadd.f32 %v1672_v57, %v973_v36  ;;  %v1028_v41 = vadd.f32 %v1672_v57, %v989_v37  ;;  %v1337_v42 = vpop.f32.mrb[20].mxu0  ;;  %v1385_v43 = vpop.f32.mrb[20].mxu1 }
 0x123   : > { %v1338_v44 = vpop.f32.mrb[21].mxu0  ;;  %v1386_v45 = vpop.f32.mrb[21].mxu1 }
 0x124   : > { %1075 = vst [vmem:[%s1685_s15 + $0x40] sm:$0xff] %v1043_v38  ;;  %1091 = vst [vmem:[%s1685_s15 + $0xc0] sm:$0xff] %v1059_v39  ;;  %v1044_v46 = vmax.f32 %v1012_v40, 0.0  ;;  %v1060_v47 = vmax.f32 %v1028_v41, 0.0  ;;  %v1339_v48 = vadd.f32 %v1338_v44, %v1337_v42  ;;  %v1387_v49 = vadd.f32 %v1386_v45, %v1385_v43  ;;  %v1340_v50 = vpop.f32.mrb[22].mxu0  ;;  %v1388_v52 = vpop.f32.mrb[22].mxu1 }
 0x125   : > { %v1341_v53 = vpop.f32.mrb[23].mxu0  ;;  %v1389_v54 = vpop.f32.mrb[23].mxu1 }
 0x126   : > { %1076 = vst [vmem:[%s1685_s15 + $0x48] sm:$0xff] %v1044_v46  ;;  %1092 = vst [vmem:[%s1685_s15 + $0xc8] sm:$0xff] %v1060_v47  ;;  %v974_v55 = vmul.f32 %v1339_v48, %v1667_v51  ;;  %v990_v56 = vmul.f32 %v1387_v49, %v1667_v51  ;;  %v1342_v58 = vadd.f32 %v1341_v53, %v1340_v50 }
 0x127   : > { %v1390_v59 = vadd.f32 %v1389_v54, %v1388_v52 }
 0x128   : > { %v1013_v60 = vadd.f32 %v1672_v57, %v974_v55  ;;  %v1029_v61 = vadd.f32 %v1672_v57, %v990_v56  ;;  %v975_v62 = vmul.f32 %v1342_v58, %v1667_v51 }
 0x129   : > { %v991_v63 = vmul.f32 %v1390_v59, %v1667_v51 }
 0x12a   : > { %v1045_v0 = vmax.f32 %v1013_v60, 0.0  ;;  %v1061_v1 = vmax.f32 %v1029_v61, 0.0  ;;  %v1014_v2 = vadd.f32 %v1672_v57, %v975_v62  ;;  %v1343_v4 = vpop.f32.mrb[24].mxu0  ;;  %v1391_v5 = vpop.f32.mrb[24].mxu1 }
 0x12b   : > { %v1030_v3 = vadd.f32 %v1672_v57, %v991_v63  ;;  %v1344_v6 = vpop.f32.mrb[25].mxu0  ;;  %v1392_v7 = vpop.f32.mrb[25].mxu1 }
 0x12c   : > { %1077 = vst [vmem:[%s1685_s15 + $0x50] sm:$0xff] %v1045_v0  ;;  %1093 = vst [vmem:[%s1685_s15 + $0xd0] sm:$0xff] %v1061_v1  ;;  %v1046_v8 = vmax.f32 %v1014_v2, 0.0  ;;  %v1345_v10 = vadd.f32 %v1344_v6, %v1343_v4  ;;  %v1393_v11 = vadd.f32 %v1392_v7, %v1391_v5  ;;  %v1346_v12 = vpop.f32.mrb[26].mxu0  ;;  %v1394_v13 = vpop.f32.mrb[26].mxu1 }
 0x12d   : > { %v1062_v9 = vmax.f32 %v1030_v3, 0.0  ;;  %v1347_v14 = vpop.f32.mrb[27].mxu0  ;;  %v1395_v15 = vpop.f32.mrb[27].mxu1 }
 0x12e   : > { %1078 = vst [vmem:[%s1685_s15 + $0x58] sm:$0xff] %v1046_v8  ;;  %v976_v16 = vmul.f32 %v1345_v10, %v1667_v51  ;;  %v992_v17 = vmul.f32 %v1393_v11, %v1667_v51  ;;  %v1348_v18 = vadd.f32 %v1347_v14, %v1346_v12  ;;  %v1396_v19 = vadd.f32 %v1395_v15, %v1394_v13 }
 0x12f   : > { %1094 = vst [vmem:[%s1685_s15 + $0xd8] sm:$0xff] %v1062_v9 }
 0x130   : > { %v1015_v20 = vadd.f32 %v1672_v57, %v976_v16  ;;  %v1031_v21 = vadd.f32 %v1672_v57, %v992_v17  ;;  %v977_v22 = vmul.f32 %v1348_v18, %v1667_v51  ;;  %v993_v23 = vmul.f32 %v1396_v19, %v1667_v51 }
 0x132   : > { %v1047_v24 = vmax.f32 %v1015_v20, 0.0  ;;  %v1063_v25 = vmax.f32 %v1031_v21, 0.0  ;;  %v1016_v26 = vadd.f32 %v1672_v57, %v977_v22  ;;  %v1032_v27 = vadd.f32 %v1672_v57, %v993_v23  ;;  %v1349_v28 = vpop.f32.mrb[28].mxu0  ;;  %v1397_v29 = vpop.f32.mrb[28].mxu1 }
 0x133   : > { %v1350_v30 = vpop.f32.mrb[29].mxu0  ;;  %v1398_v31 = vpop.f32.mrb[29].mxu1 }
 0x134   : > { %1079 = vst [vmem:[%s1685_s15 + $0x60] sm:$0xff] %v1047_v24  ;;  %1095 = vst [vmem:[%s1685_s15 + $0xe0] sm:$0xff] %v1063_v25  ;;  %v1048_v32 = vmax.f32 %v1016_v26, 0.0  ;;  %v1064_v33 = vmax.f32 %v1032_v27, 0.0  ;;  %v1351_v34 = vadd.f32 %v1350_v30, %v1349_v28  ;;  %v1399_v35 = vadd.f32 %v1398_v31, %v1397_v29  ;;  %v1352_v36 = vpop.f32.mrb[30].mxu0  ;;  %v1400_v37 = vpop.f32.mrb[30].mxu1 }
 0x135   : > { %v1353_v38 = vpop.f32.mrb[31].mxu0  ;;  %v1401_v39 = vpop.f32.mrb[31].mxu1 }
 0x136   : > { %1080 = vst [vmem:[%s1685_s15 + $0x68] sm:$0xff] %v1048_v32  ;;  %1096 = vst [vmem:[%s1685_s15 + $0xe8] sm:$0xff] %v1064_v33  ;;  %v978_v40 = vmul.f32 %v1351_v34, %v1667_v51  ;;  %v994_v41 = vmul.f32 %v1399_v35, %v1667_v51  ;;  %v1354_v42 = vadd.f32 %v1353_v38, %v1352_v36 }
 0x137   : > { %v1402_v43 = vadd.f32 %v1401_v39, %v1400_v37 }
 0x138   : > { %v1017_v44 = vadd.f32 %v1672_v57, %v978_v40  ;;  %v1033_v45 = vadd.f32 %v1672_v57, %v994_v41  ;;  %v979_v46 = vmul.f32 %v1354_v42, %v1667_v51 }
 0x139   : > { %v995_v47 = vmul.f32 %v1402_v43, %v1667_v51 }
 0x13a   : > { %v1049_v48 = vmax.f32 %v1017_v44, 0.0  ;;  %v1065_v49 = vmax.f32 %v1033_v45, 0.0  ;;  %v1018_v50 = vadd.f32 %v1672_v57, %v979_v46 }
 0x13b   : > { %v1034_v52 = vadd.f32 %v1672_v57, %v995_v47 }
 0x13c   : > { %1081 = vst [vmem:[%s1685_s15 + $0x70] sm:$0xff] %v1049_v48  ;;  %1097 = vst [vmem:[%s1685_s15 + $0xf0] sm:$0xff] %v1065_v49  ;;  %v1050_v53 = vmax.f32 %v1018_v50, 0.0 }
 0x13d   : > { %v1066_v54 = vmax.f32 %v1034_v52, 0.0 }
 0x13e   : > { %1082 = vst [vmem:[%s1685_s15 + $0x78] sm:$0xff] %v1050_v53 }
 0x13f   : > { %1098 = vst [vmem:[%s1685_s15 + $0xf8] sm:$0xff] %v1066_v54 }
 0x140 PF: > { %s14_s17 = sadd.s32 1, %s1529_s17   ;;  %s1791_s15 = smov %s1525_s16 }
 0x141   : > { %p11_p5 = scmp.ge.s32.totalorder %s14_s17, 10   ;;  %s1792_s16 = smov %s1794_s18 }
 0x143   :  { %13 = sbr.rel (!%p11_p5) target bundleno = 2 (0x2), region = 83 }

// kernel: resnet18_forward.22
= control target key start
LH: loop header
LB: loop body
LE: loop exit
PB: predicated region body
PF: predicated region fallthrough
CT: control target
= control target key end

     0   :  { %s1548_s15 = smov 0   ;;  %s1550_s16 = smov 0   ;;  %s1846_s0 = inlined_call_operand.vmem [shape: bf16[512,640], index: 0, kind: input, shape index: {}]   ;;  %s1847_s1 = inlined_call_operand.vmem [shape: bf16[640,128], index: 1, kind: input, shape index: {}]   ;;  %s1848_s2 = inlined_call_operand.vmem [shape: f32[1,128], index: 2, kind: input, shape index: {}]   ;;  %s1849_s3 = inlined_call_operand.vmem [shape: f32[1,128], index: 3, kind: input, shape index: {}]   ;;  %s1850_s4 = inlined_call_operand.vmem [shape: f32[512,128], index: 4, kind: output, shape index: {}]  }
   0x1   :  { %s1552_s17 = smov 0   ;;  %s1554_s18 = smov 0  }
   0x2   :  { %s1556_s19 = smov 0   ;;  %s1558_s20 = smov 0  }
   0x3   :  { %s1560_s21 = smov 0  }
   0x4 LB: > { %s26_s22 = sadd.s32 1, %s1512_s19  ;;  %s33_s23 = sadd.s32 1, %s1516_s20  ;;  %s1520_s21 = sphi %s1560_s21, %s14_s21   ;;  %s1516_s20 = sphi %s1558_s20, %s1856_s20   ;;  %s1512_s19 = sphi %s1556_s19, %s1855_s19   ;;  %s1508_s18 = sphi %s1554_s18, %s1854_s18   ;;  %s1504_s17 = sphi %s1552_s17, %s1853_s17   ;;  %s1500_s16 = sphi %s1550_s16, %s1852_s16   ;;  %s1496_s15 = sphi %s1548_s15, %s1851_s15  }
   0x5   : > { %p27_p0 = scmp.ge.s32.totalorder %s26_s22, 5  ;;  %p49_p1 = scmp.ne.s32.totalorder %s1500_s16, %s1496_s15 }
   0x6   : > { %p50_p2 = scmp.eq.s32.totalorder %s1520_s21, 0  ;;  %s42_s27 = sadd.s32 1, %s1500_s16 }
   0x7   : > { %s1858_s22 = smov (%p27_p0, %s26_s22), 0  ;;  %s1860_s23 = smov (!%p27_p0, %s33_s23), %s1516_s20 }
   0x8   : > { %p51_p3 = por %p50_p2, %p49_p1  ;;  %p35_p4 = scmp.ge.s32.totalorder %s1860_s23, 2 }
   0x9   : > { %s38_s24 = ssub.s32 %s1512_s19, %s1858_s22  ;;  %p1255_p6 = scmp.ge.s32.totalorder %s1520_s21, 10 }
   0xa   : > { %s1862_s23 = smov (%p35_p4, %s1860_s23), 0 }
   0xb   : > { %s37_s25 = ssub.s32 %s1516_s20, %s1862_s23  ;;  %195 = sbr.rel (%p1255_p6) target bundleno = 46 (0x2e), region = 24 }
   0xc   : > { %s39_s26 = sor.u32 %s38_s24, %s37_s25 }
   0xd   : > { %p40_p5 = scmp.eq.s32.totalorder %s39_s26, 0 }
   0xf   : > { %s1599_s28 = scalar_select %p40_p5, %s1500_s16, %s42_s27  }
  0x12   : > { %198 = sbr.rel (!%p51_p3) target bundleno = 46 (0x2e), region = 28  ;;  %s200_s29 = sand.u32 (%p51_p3), 1, %s1500_s16  }
  0x13   : > { %s1384_s30 = smul.u32 (%p51_p3), 160, %s1516_s20  ;;  %s1256_s5 = sshll.u32 (%p51_p3), %s200_s29, 7 }
  0x14   : > { %s1613_s11 = scalar_lea.vmem (%p51_p3), [#allocation3], %s1256_s5 }
  0x15   : > { %s205_s6 = sadd.s32 (%p51_p3), %s1512_s19, %s1384_s30 }
  0x16   : > { %s1259_s7 = sshll.u32 (%p51_p3), %s205_s6, 2 }
  0x17   : > { %s1608_s10 = scalar_lea.vmem (%p51_p3), %s1846_s0, %s1259_s7 }
  0x18   : > { %v223_v0 = vld [vmem:[%s1608_s10] sm:$0xf] (%p51_p3)  ;;  %v225_v1 = vld [vmem:[%s1608_s10 + $0x14] sm:$0xf] (%p51_p3)  ;;  %v227_v2 = vld [vmem:[%s1608_s10 + $0x28] sm:$0xf] (%p51_p3) }
  0x19   : > { %224 = vst [vmem:[%s1613_s11] sm:$0xf] %v223_v0  ;;  %226 = vst [vmem:[%s1613_s11 + $0x4] sm:$0xf] %v225_v1  ;;  %v229_v3 = vld [vmem:[%s1608_s10 + $0x3c] sm:$0xf] }
  0x1a   : > { %228 = vst [vmem:[%s1613_s11 + $0x8] sm:$0xf] %v227_v2  ;;  %v231_v4 = vld [vmem:[%s1608_s10 + $0x50] sm:$0xf]  ;;  %v233_v5 = vld [vmem:[%s1608_s10 + $0x64] sm:$0xf] }
  0x1b   : > { %230 = vst [vmem:[%s1613_s11 + $0xc] sm:$0xf] %v229_v3  ;;  %232 = vst [vmem:[%s1613_s11 + $0x10] sm:$0xf] %v231_v4  ;;  %v235_v6 = vld [vmem:[%s1608_s10 + $0x78] sm:$0xf] }
  0x1c   : > { %234 = vst [vmem:[%s1613_s11 + $0x14] sm:$0xf] %v233_v5  ;;  %v237_v7 = vld [vmem:[%s1608_s10 + $0x8c] sm:$0xf]  ;;  %v239_v8 = vld [vmem:[%s1608_s10 + $0xa0] sm:$0xf] }
  0x1d   : > { %236 = vst [vmem:[%s1613_s11 + $0x18] sm:$0xf] %v235_v6  ;;  %238 = vst [vmem:[%s1613_s11 + $0x1c] sm:$0xf] %v237_v7  ;;  %v241_v9 = vld [vmem:[%s1608_s10 + $0xb4] sm:$0xf] }
  0x1e   : > { %240 = vst [vmem:[%s1613_s11 + $0x20] sm:$0xf] %v239_v8  ;;  %v243_v10 = vld [vmem:[%s1608_s10 + $0xc8] sm:$0xf]  ;;  %v245_v11 = vld [vmem:[%s1608_s10 + $0xdc] sm:$0xf] }
  0x1f   : > { %242 = vst [vmem:[%s1613_s11 + $0x24] sm:$0xf] %v241_v9  ;;  %244 = vst [vmem:[%s1613_s11 + $0x28] sm:$0xf] %v243_v10  ;;  %v247_v12 = vld [vmem:[%s1608_s10 + $0xf0] sm:$0xf] }
  0x20   : > { %246 = vst [vmem:[%s1613_s11 + $0x2c] sm:$0xf] %v245_v11  ;;  %v249_v13 = vld [vmem:[%s1608_s10 + $0x104] sm:$0xf]  ;;  %v251_v14 = vld [vmem:[%s1608_s10 + $0x118] sm:$0xf] }
  0x21   : > { %248 = vst [vmem:[%s1613_s11 + $0x30] sm:$0xf] %v247_v12  ;;  %250 = vst [vmem:[%s1613_s11 + $0x34] sm:$0xf] %v249_v13  ;;  %v253_v15 = vld [vmem:[%s1608_s10 + $0x12c] sm:$0xf] }
  0x22   : > { %252 = vst [vmem:[%s1613_s11 + $0x38] sm:$0xf] %v251_v14  ;;  %v255_v16 = vld [vmem:[%s1608_s10 + $0x140] sm:$0xf]  ;;  %v257_v17 = vld [vmem:[%s1608_s10 + $0x154] sm:$0xf] }
  0x23   : > { %254 = vst [vmem:[%s1613_s11 + $0x3c] sm:$0xf] %v253_v15  ;;  %256 = vst [vmem:[%s1613_s11 + $0x40] sm:$0xf] %v255_v16  ;;  %v259_v18 = vld [vmem:[%s1608_s10 + $0x168] sm:$0xf] }
  0x24   : > { %258 = vst [vmem:[%s1613_s11 + $0x44] sm:$0xf] %v257_v17  ;;  %v261_v19 = vld [vmem:[%s1608_s10 + $0x17c] sm:$0xf]  ;;  %v263_v20 = vld [vmem:[%s1608_s10 + $0x190] sm:$0xf] }
  0x25   : > { %260 = vst [vmem:[%s1613_s11 + $0x48] sm:$0xf] %v259_v18  ;;  %262 = vst [vmem:[%s1613_s11 + $0x4c] sm:$0xf] %v261_v19  ;;  %v265_v21 = vld [vmem:[%s1608_s10 + $0x1a4] sm:$0xf] }
  0x26   : > { %264 = vst [vmem:[%s1613_s11 + $0x50] sm:$0xf] %v263_v20  ;;  %v267_v22 = vld [vmem:[%s1608_s10 + $0x1b8] sm:$0xf]  ;;  %v269_v23 = vld [vmem:[%s1608_s10 + $0x1cc] sm:$0xf] }
  0x27   : > { %266 = vst [vmem:[%s1613_s11 + $0x54] sm:$0xf] %v265_v21  ;;  %268 = vst [vmem:[%s1613_s11 + $0x58] sm:$0xf] %v267_v22  ;;  %v271_v24 = vld [vmem:[%s1608_s10 + $0x1e0] sm:$0xf] }
  0x28   : > { %270 = vst [vmem:[%s1613_s11 + $0x5c] sm:$0xf] %v269_v23  ;;  %v273_v25 = vld [vmem:[%s1608_s10 + $0x1f4] sm:$0xf]  ;;  %v275_v26 = vld [vmem:[%s1608_s10 + $0x208] sm:$0xf] }
  0x29   : > { %272 = vst [vmem:[%s1613_s11 + $0x60] sm:$0xf] %v271_v24  ;;  %274 = vst [vmem:[%s1613_s11 + $0x64] sm:$0xf] %v273_v25  ;;  %v277_v27 = vld [vmem:[%s1608_s10 + $0x21c] sm:$0xf] }
  0x2a   : > { %276 = vst [vmem:[%s1613_s11 + $0x68] sm:$0xf] %v275_v26  ;;  %v279_v28 = vld [vmem:[%s1608_s10 + $0x230] sm:$0xf]  ;;  %v281_v29 = vld [vmem:[%s1608_s10 + $0x244] sm:$0xf] }
  0x2b   : > { %278 = vst [vmem:[%s1613_s11 + $0x6c] sm:$0xf] %v277_v27  ;;  %280 = vst [vmem:[%s1613_s11 + $0x70] sm:$0xf] %v279_v28  ;;  %v283_v30 = vld [vmem:[%s1608_s10 + $0x258] sm:$0xf] }
  0x2c   : > { %282 = vst [vmem:[%s1613_s11 + $0x74] sm:$0xf] %v281_v29  ;;  %v285_v31 = vld [vmem:[%s1608_s10 + $0x26c] sm:$0xf]  ;;  %284 = vst [vmem:[%s1613_s11 + $0x78] sm:$0xf] %v283_v30 }
  0x2d   : > { %286 = vst [vmem:[%s1613_s11 + $0x7c] sm:$0xf] %v285_v31 }
  0x2e PF: > { %p1260_p7 = scmp.ge.s32.totalorder %s1520_s21, 1  ;;  %p384_p8 = scmp.lt.s32.totalorder %s1520_s21, 11 }
  0x30   : > { %p385_p9 = pnand %p1260_p7, %p384_p8 }
  0x31   : > { %s391_s12 = sand.u32 (!%p385_p9), 1, %s1496_s15   ;;  %s1262_s13 = sshll.u32 (!%p385_p9), %s1504_s17, 4 }
  0x32   : > { %388 = sbr.rel (%p385_p9) target bundleno = 368 (0x170), region = 73  ;;  %s1261_s14 = sshll.u32 (!%p385_p9), %s391_s12, 7 }
  0x33   : > { %p435_p10 = scmp.lt.s32.totalorder (!%p385_p9), %s1262_s13, 79  ;;  %s1264_s24 = sshll.u32 (!%p385_p9), %s1508_s18, 5 }
  0x34   : > { %p450_p11 = scmp.lt.s32.totalorder (!%p385_p9), %s1264_s24, 63  ;;  %s1691_s15 = scalar_lea.vmem (!%p385_p9), [#allocation3], %s1261_s14 }
  0x35   : > { %p1266_p12 = scmp.ne.s32.totalorder (!%p385_p9), %s1504_s17, 0 }
  0x39   : > { %s1864_s13 = smov (!%p435_p10, %s1262_s13), 79  ;;  %s1866_s24 = smov (!%p450_p11, %s1264_s24), 63 }
  0x3a   : > { %s1263_s25 = sshll.u32 %s1864_s13, 2  ;;  %s1265_s30 = sshll.u32 %s1866_s24, 3  ;;  %v1522_v32 = vmov (!%p1266_p12), 0.0  }
  0x3b   : > { %s1684_s29 = scalar_lea.vmem %s1847_s1, %s1263_s25  ;;  %s1689_s7 = scalar_lea.vmem %s1850_s4, %s1265_s30  ;;  %463 = vst [vmem:[#allocation2] sm:$0xff] (!%p1266_p12), %v1522_v32  ;;  %464 = vst [vmem:[#allocation2 + $0x8] sm:$0xff] (!%p1266_p12), %v1522_v32 }
  0x3c   : > { %462 = sbr.rel (%p1266_p12) target bundleno = 75 (0x4b), region = 81  ;;  %465 = vst [vmem:[#allocation2 + $0x10] sm:$0xff] (!%p1266_p12), %v1522_v32  ;;  %466 = vst [vmem:[#allocation2 + $0x18] sm:$0xff] (!%p1266_p12), %v1522_v32 }
  0x3d   : > { %467 = vst [vmem:[#allocation2 + $0x20] sm:$0xff] (!%p1266_p12), %v1522_v32  ;;  %468 = vst [vmem:[#allocation2 + $0x28] sm:$0xff] (!%p1266_p12), %v1522_v32 }
  0x3e   : > { %469 = vst [vmem:[#allocation2 + $0x30] sm:$0xff] (!%p1266_p12), %v1522_v32  ;;  %470 = vst [vmem:[#allocation2 + $0x38] sm:$0xff] (!%p1266_p12), %v1522_v32 }
  0x3f   : > { %471 = vst [vmem:[#allocation2 + $0x40] sm:$0xff] (!%p1266_p12), %v1522_v32  ;;  %472 = vst [vmem:[#allocation2 + $0x48] sm:$0xff] (!%p1266_p12), %v1522_v32 }
  0x40   : > { %473 = vst [vmem:[#allocation2 + $0x50] sm:$0xff] (!%p1266_p12), %v1522_v32  ;;  %474 = vst [vmem:[#allocation2 + $0x58] sm:$0xff] (!%p1266_p12), %v1522_v32 }
  0x41   : > { %475 = vst [vmem:[#allocation2 + $0x60] sm:$0xff] (!%p1266_p12), %v1522_v32  ;;  %476 = vst [vmem:[#allocation2 + $0x68] sm:$0xff] (!%p1266_p12), %v1522_v32 }
  0x42   : > { %477 = vst [vmem:[#allocation2 + $0x70] sm:$0xff] (!%p1266_p12), %v1522_v32  ;;  %478 = vst [vmem:[#allocation2 + $0x78] sm:$0xff] (!%p1266_p12), %v1522_v32 }
  0x43   : > { %479 = vst [vmem:[#allocation2 + $0x80] sm:$0xff] %v1522_v32  ;;  %480 = vst [vmem:[#allocation2 + $0x88] sm:$0xff] %v1522_v32 }
  0x44   : > { %481 = vst [vmem:[#allocation2 + $0x90] sm:$0xff] %v1522_v32  ;;  %482 = vst [vmem:[#allocation2 + $0x98] sm:$0xff] %v1522_v32 }
  0x45   : > { %483 = vst [vmem:[#allocation2 + $0xa0] sm:$0xff] %v1522_v32  ;;  %484 = vst [vmem:[#allocation2 + $0xa8] sm:$0xff] %v1522_v32 }
  0x46   : > { %485 = vst [vmem:[#allocation2 + $0xb0] sm:$0xff] %v1522_v32  ;;  %486 = vst [vmem:[#allocation2 + $0xb8] sm:$0xff] %v1522_v32 }
  0x47   : > { %487 = vst [vmem:[#allocation2 + $0xc0] sm:$0xff] %v1522_v32  ;;  %488 = vst [vmem:[#allocation2 + $0xc8] sm:$0xff] %v1522_v32 }
  0x48   : > { %489 = vst [vmem:[#allocation2 + $0xd0] sm:$0xff] %v1522_v32  ;;  %490 = vst [vmem:[#allocation2 + $0xd8] sm:$0xff] %v1522_v32 }
  0x49   : > { %491 = vst [vmem:[#allocation2 + $0xe0] sm:$0xff] %v1522_v32  ;;  %492 = vst [vmem:[#allocation2 + $0xe8] sm:$0xff] %v1522_v32 }
  0x4a   : > { %493 = vst [vmem:[#allocation2 + $0xf0] sm:$0xff] %v1522_v32  ;;  %494 = vst [vmem:[#allocation2 + $0xf8] sm:$0xff] %v1522_v32 }
  0x4b PF: > { %v1442_v33 = vld [vmem:[%s1684_s29] sm:$0xff]   ;;  %v1443_v34 = vld [vmem:[%s1684_s29 + $0x8] sm:$0xff]   ;;  %v1444_v35 = vld [vmem:[%s1684_s29 + $0x10] sm:$0xff]   ;;  %p1291_p13 = scmp.ne.s32.totalorder %s1504_s17, 4 }
  0x4c   : > { %1320 = vmatprep.subr.bf16.mxu0 %v1442_v33  ;;  %1368 = vmatprep.subr.bf16.mxu1 %v1442_v33  ;;  %v1445_v36 = vld [vmem:[%s1684_s29 + $0x18] sm:$0xff]   ;;  %v1450_v37 = vld [vmem:[%s1691_s15] sm:$0xff]   ;;  %v1447_v40 = vld [vmem:[%s1684_s29 + $0x28] sm:$0xff]  }
  0x4d   : > { %1321 = vmatpush3.bf16.msra.mxu0 %v1442_v33  ;;  %1376 = vmatpush3.bf16.msra.mxu1 %v1442_v33  ;;  %v1451_v38 = vld [vmem:[%s1691_s15 + $0x40] sm:$0xff]   ;;  %v1448_v41 = vld [vmem:[%s1684_s29 + $0x30] sm:$0xff]   ;;  %v1449_v42 = vld [vmem:[%s1684_s29 + $0x38] sm:$0xff]  }
  0x4e   : > { %1322 = vmatprep.subr.bf16.mxu0 %v1443_v34  ;;  %1369 = vmatprep.subr.bf16.mxu1 %v1443_v34  ;;  %v1446_v39 = vld [vmem:[%s1684_s29 + $0x20] sm:$0xff]   ;;  %v1452_v43 = vld [vmem:[%s1691_s15 + $0x8] sm:$0xff]   ;;  %v1454_v45 = vld [vmem:[%s1691_s15 + $0x10] sm:$0xff]  }
  0x4f   : > { %1336 = vmatprep.mubr.bf16.mxu0 %v1450_v37  ;;  %1352 = vmatprep.mubr.bf16.mxu1 %v1451_v38  ;;  %v1453_v44 = vld [vmem:[%s1691_s15 + $0x48] sm:$0xff]   ;;  %v1455_v46 = vld [vmem:[%s1691_s15 + $0x50] sm:$0xff]   ;;  %v1456_v47 = vld [vmem:[%s1691_s15 + $0x18] sm:$0xff]  }
  0x50   : > { %v1457_v48 = vld [vmem:[%s1691_s15 + $0x58] sm:$0xff]   ;;  %v1458_v49 = vld [vmem:[%s1691_s15 + $0x20] sm:$0xff]   ;;  %v1460_v51 = vld [vmem:[%s1691_s15 + $0x28] sm:$0xff]  }
  0x51   : > { %1323 = vmatpush3.bf16.msra.mxu0 %v1443_v34  ;;  %1377 = vmatpush3.bf16.msra.mxu1 %v1443_v34  ;;  %v1459_v50 = vld [vmem:[%s1691_s15 + $0x60] sm:$0xff]   ;;  %v1461_v52 = vld [vmem:[%s1691_s15 + $0x68] sm:$0xff]   ;;  %v1462_v53 = vld [vmem:[%s1691_s15 + $0x30] sm:$0xff]  }
  0x52   : > { %1324 = vmatprep.subr.bf16.mxu0 %v1444_v35  ;;  %1370 = vmatprep.subr.bf16.mxu1 %v1444_v35  ;;  %v1463_v54 = vld [vmem:[%s1691_s15 + $0x70] sm:$0xff]   ;;  %v1464_v55 = vld [vmem:[%s1691_s15 + $0x38] sm:$0xff]   ;;  %v495_v59 = vld [vmem:[#allocation2] sm:$0xff] }
  0x53   : > { %v1465_v56 = vld [vmem:[%s1691_s15 + $0x78] sm:$0xff]   ;;  %v497_v57 = vld [vmem:[#allocation2 + $0x10] sm:$0xff]  ;;  %v511_v60 = vld [vmem:[#allocation2 + $0x80] sm:$0xff] }
  0x54   : > { %v513_v58 = vld [vmem:[#allocation2 + $0x90] sm:$0xff]  ;;  %v498_v63 = vld [vmem:[#allocation2 + $0x18] sm:$0xff]  ;;  %v496_v5 = vld [vmem:[#allocation2 + $0x8] sm:$0xff] }
  0x55   : > { %1325 = vmatpush3.bf16.msra.mxu0 %v1444_v35  ;;  %1378 = vmatpush3.bf16.msra.mxu1 %v1444_v35  ;;  %v514_v0 = vld [vmem:[#allocation2 + $0x98] sm:$0xff]  ;;  %v512_v6 = vld [vmem:[#allocation2 + $0x88] sm:$0xff]  ;;  %v501_v17 = vld [vmem:[#allocation2 + $0x30] sm:$0xff] }
  0x56   : > { %1326 = vmatprep.subr.bf16.mxu0 %v1445_v36  ;;  %1371 = vmatprep.subr.bf16.mxu1 %v1445_v36  ;;  %v517_v18 = vld [vmem:[#allocation2 + $0xb0] sm:$0xff]  ;;  %v499_v19 = vld [vmem:[#allocation2 + $0x20] sm:$0xff]  ;;  %v502_v23 = vld [vmem:[#allocation2 + $0x38] sm:$0xff] }
  0x57   : > { %v515_v20 = vld [vmem:[#allocation2 + $0xa0] sm:$0xff]  ;;  %v518_v24 = vld [vmem:[#allocation2 + $0xb8] sm:$0xff]  ;;  %v500_v29 = vld [vmem:[#allocation2 + $0x28] sm:$0xff] }
  0x58   : > { %v516_v30 = vld [vmem:[#allocation2 + $0xa8] sm:$0xff] }
  0x59   : > { %1327 = vmatpush3.bf16.msra.mxu0 %v1445_v36  ;;  %1379 = vmatpush3.bf16.msra.mxu1 %v1445_v36 }
  0x5a   : > { %1328 = vmatprep.subr.bf16.mxu0 %v1446_v39  ;;  %1372 = vmatprep.subr.bf16.mxu1 %v1446_v39 }
  0x5d   : > { %1329 = vmatpush3.bf16.msra.mxu0 %v1446_v39  ;;  %1380 = vmatpush3.bf16.msra.mxu1 %v1446_v39 }
  0x5e   : > { %1330 = vmatprep.subr.bf16.mxu0 %v1447_v40  ;;  %1373 = vmatprep.subr.bf16.mxu1 %v1447_v40 }
  0x61   : > { %1331 = vmatpush3.bf16.msra.mxu0 %v1447_v40  ;;  %1381 = vmatpush3.bf16.msra.mxu1 %v1447_v40 }
  0x62   : > { %1332 = vmatprep.subr.bf16.mxu0 %v1448_v41  ;;  %1374 = vmatprep.subr.bf16.mxu1 %v1448_v41 }
  0x65   : > { %1333 = vmatpush3.bf16.msra.mxu0 %v1448_v41  ;;  %1382 = vmatpush3.bf16.msra.mxu1 %v1448_v41  ;;  %v505_v41 = vld [vmem:[#allocation2 + $0x50] sm:$0xff] }
  0x66   : > { %1334 = vmatprep.subr.bf16.mxu0 %v1449_v42  ;;  %1375 = vmatprep.subr.bf16.mxu1 %v1449_v42 }
  0x69   : > { %1335 = vmatpush3.bf16.msra.mxu0 %v1449_v42  ;;  %1383 = vmatpush3.bf16.msra.mxu1 %v1449_v42  ;;  %v521_v42 = vld [vmem:[#allocation2 + $0xd0] sm:$0xff] }
  0x6c   : > { %1337 = vmatmul.mubr.bf16.vlgmr.msra.gmra.mrb[0].mxu0 %v1452_v43  ;;  %1353 = vmatmul.mubr.bf16.vlgmr.msra.gmra.mrb[0].mxu1 %v1453_v44  ;;  %v503_v43 = vld [vmem:[#allocation2 + $0x40] sm:$0xff] }
  0x6d   : > { %1340 = vmatprep.mubr.bf16.mxu0 %v1454_v45  ;;  %1356 = vmatprep.mubr.bf16.mxu1 %v1455_v46  ;;  %v519_v44 = vld [vmem:[#allocation2 + $0xc0] sm:$0xff] }
  0x74   : > { %1341 = vmatmul.mubr.bf16.gmra.mrb[4].mxu0 %v1456_v47  ;;  %1357 = vmatmul.mubr.bf16.gmra.mrb[4].mxu1 %v1457_v48  ;;  %v506_v47 = vld [vmem:[#allocation2 + $0x58] sm:$0xff] }
  0x75   : > { %1344 = vmatprep.mubr.bf16.mxu0 %v1458_v49  ;;  %1360 = vmatprep.mubr.bf16.mxu1 %v1459_v50  ;;  %v522_v48 = vld [vmem:[#allocation2 + $0xd8] sm:$0xff] }
  0x7c   : > { %1345 = vmatmul.mubr.bf16.gmra.mrb[8].mxu0 %v1460_v51  ;;  %1361 = vmatmul.mubr.bf16.gmra.mrb[8].mxu1 %v1461_v52 }
  0x7d   : > { %1348 = vmatprep.mubr.bf16.mxu0 %v1462_v53  ;;  %1364 = vmatprep.mubr.bf16.mxu1 %v1463_v54  ;;  %v504_v53 = vld [vmem:[#allocation2 + $0x48] sm:$0xff] }
  0x7e   : > { %v520_v54 = vld [vmem:[#allocation2 + $0xc8] sm:$0xff] }
  0x84   : > { %1349 = vmatmul.mubr.bf16.gmra.mrb[12].mxu0 %v1464_v55  ;;  %1365 = vmatmul.mubr.bf16.gmra.mrb[12].mxu1 %v1465_v56 }
 0x13f   : > { %v1338_v61 = vpop.f32.mrb[0].mxu0  ;;  %v1354_v62 = vpop.f32.mrb[0].mxu1 }
 0x140   : > { %v882_v1 = vadd.f32 %v1338_v61, %v497_v57  ;;  %v898_v2 = vadd.f32 %v1354_v62, %v513_v58  ;;  %v753_v3 = vpop.f32.mrb[1].mxu0  ;;  %v817_v4 = vpop.f32.mrb[1].mxu1 }
 0x141   : > { %v880_v7 = vadd.f32 %v753_v3, %v495_v59  ;;  %v896_v8 = vadd.f32 %v817_v4, %v511_v60  ;;  %v1339_v9 = vpop.f32.mrb[2].mxu0  ;;  %v1355_v10 = vpop.f32.mrb[2].mxu1  ;;  %v507_v3 = vld [vmem:[#allocation2 + $0x60] sm:$0xff] }
 0x142   : > { %914 = vst [vmem:[#allocation2 + $0x10] sm:$0xff] %v882_v1  ;;  %930 = vst [vmem:[#allocation2 + $0x90] sm:$0xff] %v898_v2  ;;  %v883_v11 = vadd.f32 %v1339_v9, %v498_v63  ;;  %v899_v12 = vadd.f32 %v1355_v10, %v514_v0  ;;  %v756_v13 = vpop.f32.mrb[3].mxu0  ;;  %v820_v14 = vpop.f32.mrb[3].mxu1  ;;  %v509_v1 = vld [vmem:[#allocation2 + $0x70] sm:$0xff]  ;;  %v523_v4 = vld [vmem:[#allocation2 + $0xe0] sm:$0xff] }
 0x143   : > { %912 = vst [vmem:[#allocation2] sm:$0xff] %v880_v7  ;;  %928 = vst [vmem:[#allocation2 + $0x80] sm:$0xff] %v896_v8  ;;  %v881_v15 = vadd.f32 %v756_v13, %v496_v5  ;;  %v897_v16 = vadd.f32 %v820_v14, %v512_v6  ;;  %v525_v2 = vld [vmem:[#allocation2 + $0xf0] sm:$0xff]  ;;  %v510_v7 = vld [vmem:[#allocation2 + $0x78] sm:$0xff] }
 0x144   : > { %915 = vst [vmem:[#allocation2 + $0x18] sm:$0xff] %v883_v11  ;;  %931 = vst [vmem:[#allocation2 + $0x98] sm:$0xff] %v899_v12  ;;  %v526_v8 = vld [vmem:[#allocation2 + $0xf8] sm:$0xff]  ;;  %v508_v13 = vld [vmem:[#allocation2 + $0x68] sm:$0xff] }
 0x145   : > { %913 = vst [vmem:[#allocation2 + $0x8] sm:$0xff] %v881_v15  ;;  %929 = vst [vmem:[#allocation2 + $0x88] sm:$0xff] %v897_v16  ;;  %v524_v14 = vld [vmem:[#allocation2 + $0xe8] sm:$0xff] }
 0x147   : > { %v1342_v21 = vpop.f32.mrb[4].mxu0  ;;  %v1358_v22 = vpop.f32.mrb[4].mxu1 }
 0x148   : > { %v886_v25 = vadd.f32 %v1342_v21, %v501_v17  ;;  %v902_v26 = vadd.f32 %v1358_v22, %v517_v18  ;;  %v769_v27 = vpop.f32.mrb[5].mxu0  ;;  %v833_v28 = vpop.f32.mrb[5].mxu1 }
 0x149   : > { %v884_v31 = vadd.f32 %v769_v27, %v499_v19  ;;  %v900_v32 = vadd.f32 %v833_v28, %v515_v20  ;;  %v1343_v33 = vpop.f32.mrb[6].mxu0  ;;  %v1359_v34 = vpop.f32.mrb[6].mxu1  ;;  %v1727_v27 = vld [vmem:[%s1849_s3] ss:$0 sm:$0xff] (!%p1291_p13) }
 0x14a   : > { %918 = vst [vmem:[#allocation2 + $0x30] sm:$0xff] %v886_v25  ;;  %934 = vst [vmem:[#allocation2 + $0xb0] sm:$0xff] %v902_v26  ;;  %v887_v35 = vadd.f32 %v1343_v33, %v502_v23  ;;  %v903_v36 = vadd.f32 %v1359_v34, %v518_v24  ;;  %v772_v37 = vpop.f32.mrb[7].mxu0  ;;  %v836_v38 = vpop.f32.mrb[7].mxu1  ;;  %v948_v25 = vld [vmem:[#allocation2] sm:$0xff] (!%p1291_p13) }
 0x14b   : > { %916 = vst [vmem:[#allocation2 + $0x20] sm:$0xff] %v884_v31  ;;  %932 = vst [vmem:[#allocation2 + $0xa0] sm:$0xff] %v900_v32  ;;  %v885_v39 = vadd.f32 %v772_v37, %v500_v29  ;;  %v901_v40 = vadd.f32 %v836_v38, %v516_v30  ;;  %v1722_v26 = vld [vmem:[%s1848_s2] ss:$0 sm:$0xff] (!%p1291_p13)  ;;  %v950_v30 = vld [vmem:[#allocation2 + $0x10] sm:$0xff] (!%p1291_p13) }
 0x14c   : > { %919 = vst [vmem:[#allocation2 + $0x38] sm:$0xff] %v887_v35  ;;  %935 = vst [vmem:[#allocation2 + $0xb8] sm:$0xff] %v903_v36  ;;  %v987_v28 = vmul.f32 (!%p1291_p13), %v1722_v26, %v948_v25  ;;  %v949_v29 = vld [vmem:[#allocation2 + $0x8] sm:$0xff] (!%p1291_p13)  ;;  %v951_v31 = vld [vmem:[#allocation2 + $0x18] sm:$0xff] (!%p1291_p13)  ;;  %v989_v33 = vmul.f32 (!%p1291_p13), %v1722_v26, %v950_v30 }
 0x14d   : > { %917 = vst [vmem:[#allocation2 + $0x28] sm:$0xff] %v885_v39  ;;  %933 = vst [vmem:[#allocation2 + $0xa8] sm:$0xff] %v901_v40  ;;  %v988_v32 = vmul.f32 (!%p1291_p13), %v1722_v26, %v949_v29  ;;  %v990_v34 = vmul.f32 (!%p1291_p13), %v1722_v26, %v951_v31 }
 0x14e   : > { %v1026_v38 = vadd.f32 (!%p1291_p13), %v1727_v27, %v987_v28 }
 0x14f   : > { %v1346_v45 = vpop.f32.mrb[8].mxu0  ;;  %v1362_v46 = vpop.f32.mrb[8].mxu1 }
 0x150   : > { %v890_v49 = vadd.f32 %v1346_v45, %v505_v41  ;;  %v906_v50 = vadd.f32 %v1362_v46, %v521_v42  ;;  %v785_v51 = vpop.f32.mrb[9].mxu0  ;;  %v849_v52 = vpop.f32.mrb[9].mxu1  ;;  %v1029_v45 = vadd.f32 (!%p1291_p13), %v1727_v27, %v990_v34 }
 0x151   : > { %v888_v55 = vadd.f32 %v785_v51, %v503_v43  ;;  %v904_v56 = vadd.f32 %v849_v52, %v519_v44  ;;  %v1347_v57 = vpop.f32.mrb[10].mxu0  ;;  %v1363_v58 = vpop.f32.mrb[10].mxu1  ;;  %v954_v37 = vld [vmem:[#allocation2 + $0x30] sm:$0xff] (!%p1291_p13)  ;;  %v1027_v43 = vadd.f32 (!%p1291_p13), %v1727_v27, %v988_v32  ;;  %v1028_v44 = vadd.f32 (!%p1291_p13), %v1727_v27, %v989_v33 }
 0x152   : > { %922 = vst [vmem:[#allocation2 + $0x50] sm:$0xff] %v890_v49  ;;  %938 = vst [vmem:[#allocation2 + $0xd0] sm:$0xff] %v906_v50  ;;  %v891_v59 = vadd.f32 %v1347_v57, %v506_v47  ;;  %v907_v60 = vadd.f32 %v1363_v58, %v522_v48  ;;  %v788_v61 = vpop.f32.mrb[11].mxu0  ;;  %v852_v62 = vpop.f32.mrb[11].mxu1  ;;  %v952_v35 = vld [vmem:[#allocation2 + $0x20] sm:$0xff] (!%p1291_p13)  ;;  %v993_v41 = vmul.f32 (!%p1291_p13), %v1722_v26, %v954_v37  ;;  %v1058_v48 = vmax.f32 (!%p1291_p13), %v1026_v38, 0.0 }
 0x153   : > { %920 = vst [vmem:[#allocation2 + $0x40] sm:$0xff] %v888_v55  ;;  %936 = vst [vmem:[#allocation2 + $0xc0] sm:$0xff] %v904_v56  ;;  %v889_v63 = vadd.f32 %v788_v61, %v504_v53  ;;  %v905_v0 = vadd.f32 %v852_v62, %v520_v54  ;;  %v991_v39 = vmul.f32 (!%p1291_p13), %v1722_v26, %v952_v35  ;;  %v955_v42 = vld [vmem:[#allocation2 + $0x38] sm:$0xff] (!%p1291_p13)  ;;  %v1059_v55 = vmax.f32 (!%p1291_p13), %v1027_v43, 0.0  ;;  %v968_v29 = vld [vmem:[#allocation2 + $0xa0] sm:$0xff] (!%p1291_p13) }
 0x154   : > { %923 = vst [vmem:[#allocation2 + $0x58] sm:$0xff] %v891_v59  ;;  %939 = vst [vmem:[#allocation2 + $0xd8] sm:$0xff] %v907_v60  ;;  %v953_v36 = vld [vmem:[#allocation2 + $0x28] sm:$0xff] (!%p1291_p13)  ;;  %v994_v46 = vmul.f32 (!%p1291_p13), %v1722_v26, %v955_v42  ;;  %v1032_v51 = vadd.f32 (!%p1291_p13), %v1727_v27, %v993_v41  ;;  %v1060_v56 = vmax.f32 (!%p1291_p13), %v1028_v44, 0.0  ;;  %v1061_v57 = vmax.f32 (!%p1291_p13), %v1029_v45, 0.0  ;;  %v970_v31 = vld [vmem:[#allocation2 + $0xb0] sm:$0xff] (!%p1291_p13) }
 0x155   : > { %921 = vst [vmem:[#allocation2 + $0x48] sm:$0xff] %v889_v63  ;;  %937 = vst [vmem:[#allocation2 + $0xc8] sm:$0xff] %v905_v0  ;;  %v992_v40 = vmul.f32 (!%p1291_p13), %v1722_v26, %v953_v36  ;;  %v1030_v49 = vadd.f32 (!%p1291_p13), %v1727_v27, %v991_v39  ;;  %v969_v30 = vld [vmem:[#allocation2 + $0xa8] sm:$0xff] (!%p1291_p13)  ;;  %v971_v36 = vld [vmem:[#allocation2 + $0xb8] sm:$0xff] (!%p1291_p13)  ;;  %v1007_v42 = vmul.f32 (!%p1291_p13), %v1722_v26, %v968_v29 }
 0x156   : > { %v1033_v58 = vadd.f32 (!%p1291_p13), %v1727_v27, %v994_v46  ;;  %1090 = vst [vmem:[%s1689_s7] sm:$0xff] (!%p1291_p13), %v1058_v48  ;;  %v1064_v0 = vmax.f32 (!%p1291_p13), %v1032_v51, 0.0  ;;  %1091 = vst [vmem:[%s1689_s7 + $0x8] sm:$0xff] (!%p1291_p13), %v1059_v55  ;;  %v1008_v43 = vmul.f32 (!%p1291_p13), %v1722_v26, %v969_v30  ;;  %v1009_v44 = vmul.f32 (!%p1291_p13), %v1722_v26, %v970_v31 }
 0x157   : > { %v1350_v5 = vpop.f32.mrb[12].mxu0  ;;  %v1366_v6 = vpop.f32.mrb[12].mxu1  ;;  %947 = sbr.rel (%p1291_p13) target bundleno = 368 (0x170), region = 85  ;;  %v1031_v50 = vadd.f32 (!%p1291_p13), %v1727_v27, %v992_v40  ;;  %v1062_v62 = vmax.f32 (!%p1291_p13), %v1030_v49, 0.0  ;;  %1092 = vst [vmem:[%s1689_s7 + $0x10] sm:$0xff] (!%p1291_p13), %v1060_v56  ;;  %1093 = vst [vmem:[%s1689_s7 + $0x18] sm:$0xff] (!%p1291_p13), %v1061_v57  ;;  %v1010_v48 = vmul.f32 (!%p1291_p13), %v1722_v26, %v971_v36  ;;  %v1046_v51 = vadd.f32 (!%p1291_p13), %v1727_v27, %v1007_v42 }
 0x158   : > { %v894_v9 = vadd.f32 %v1350_v5, %v509_v1  ;;  %v910_v10 = vadd.f32 %v1366_v6, %v525_v2  ;;  %v801_v11 = vpop.f32.mrb[13].mxu0  ;;  %v865_v12 = vpop.f32.mrb[13].mxu1  ;;  %1096 = vst [vmem:[%s1689_s7 + $0x30] sm:$0xff] (!%p1291_p13), %v1064_v0 }
 0x159   : > { %v892_v15 = vadd.f32 %v801_v11, %v507_v3  ;;  %v908_v16 = vadd.f32 %v865_v12, %v523_v4  ;;  %v1351_v17 = vpop.f32.mrb[14].mxu0  ;;  %v1367_v18 = vpop.f32.mrb[14].mxu1  ;;  %v958_v53 = vld [vmem:[#allocation2 + $0x50] sm:$0xff] (!%p1291_p13)  ;;  %v1063_v63 = vmax.f32 (!%p1291_p13), %v1031_v50, 0.0  ;;  %v1065_v3 = vmax.f32 (!%p1291_p13), %v1033_v58, 0.0  ;;  %1094 = vst [vmem:[%s1689_s7 + $0x20] sm:$0xff] (!%p1291_p13), %v1062_v62 }
 0x15a   : > { %926 = vst [vmem:[#allocation2 + $0x70] sm:$0xff] %v894_v9  ;;  %942 = vst [vmem:[#allocation2 + $0xf0] sm:$0xff] %v910_v10  ;;  %v895_v19 = vadd.f32 %v1351_v17, %v510_v7  ;;  %v911_v20 = vadd.f32 %v1367_v18, %v526_v8  ;;  %v804_v21 = vpop.f32.mrb[15].mxu0  ;;  %v868_v22 = vpop.f32.mrb[15].mxu1  ;;  %v956_v47 = vld [vmem:[#allocation2 + $0x40] sm:$0xff] (!%p1291_p13)  ;;  %v997_v5 = vmul.f32 (!%p1291_p13), %v1722_v26, %v958_v53  ;;  %v974_v55 = vld [vmem:[#allocation2 + $0xd0] sm:$0xff] (!%p1291_p13) }
 0x15b   : > { %924 = vst [vmem:[#allocation2 + $0x60] sm:$0xff] %v892_v15  ;;  %940 = vst [vmem:[#allocation2 + $0xe0] sm:$0xff] %v908_v16  ;;  %v893_v23 = vadd.f32 %v804_v21, %v508_v13  ;;  %v909_v24 = vadd.f32 %v868_v22, %v524_v14  ;;  %v959_v54 = vld [vmem:[#allocation2 + $0x58] sm:$0xff] (!%p1291_p13)  ;;  %v995_v1 = vmul.f32 (!%p1291_p13), %v1722_v26, %v956_v47  ;;  %v964_v15 = vld [vmem:[#allocation2 + $0x80] sm:$0xff] (!%p1291_p13)  ;;  %v1078_v0 = vmax.f32 (!%p1291_p13), %v1046_v51, 0.0 }
 0x15c   : > { %927 = vst [vmem:[#allocation2 + $0x78] sm:$0xff] %v895_v19  ;;  %943 = vst [vmem:[#allocation2 + $0xf8] sm:$0xff] %v911_v20  ;;  %v957_v52 = vld [vmem:[#allocation2 + $0x48] sm:$0xff] (!%p1291_p13)  ;;  %v998_v6 = vmul.f32 (!%p1291_p13), %v1722_v26, %v959_v54  ;;  %v1036_v12 = vadd.f32 (!%p1291_p13), %v1727_v27, %v997_v5  ;;  %v966_v21 = vld [vmem:[#allocation2 + $0x90] sm:$0xff] (!%p1291_p13)  ;;  %v1003_v35 = vmul.f32 (!%p1291_p13), %v1722_v26, %v964_v15 }
 0x15d   : > { %925 = vst [vmem:[#allocation2 + $0x68] sm:$0xff] %v893_v23  ;;  %941 = vst [vmem:[#allocation2 + $0xe8] sm:$0xff] %v909_v24  ;;  %v996_v4 = vmul.f32 (!%p1291_p13), %v1722_v26, %v957_v52  ;;  %v1034_v7 = vadd.f32 (!%p1291_p13), %v1727_v27, %v995_v1  ;;  %v965_v20 = vld [vmem:[#allocation2 + $0x88] sm:$0xff] (!%p1291_p13)  ;;  %v967_v22 = vld [vmem:[#allocation2 + $0x98] sm:$0xff] (!%p1291_p13)  ;;  %v1005_v39 = vmul.f32 (!%p1291_p13), %v1722_v26, %v966_v21 }
 0x15e   : > { %1095 = vst [vmem:[%s1689_s7 + $0x28] sm:$0xff] %v1063_v63  ;;  %1097 = vst [vmem:[%s1689_s7 + $0x38] sm:$0xff] %v1065_v3  ;;  %v1037_v13 = vadd.f32 %v1727_v27, %v998_v6  ;;  %v1068_v24 = vmax.f32 %v1036_v12, 0.0  ;;  %v1004_v38 = vmul.f32 %v1722_v26, %v965_v20  ;;  %v1006_v40 = vmul.f32 %v1722_v26, %v967_v22  ;;  %v972_v49 = vld [vmem:[#allocation2 + $0xc0] sm:$0xff]  ;;  %v973_v54 = vld [vmem:[#allocation2 + $0xc8] sm:$0xff] }
 0x15f   : > { %v1035_v11 = vadd.f32 %v1727_v27, %v996_v4  ;;  %v1066_v16 = vmax.f32 %v1034_v7, 0.0  ;;  %v1042_v41 = vadd.f32 %v1727_v27, %v1003_v35  ;;  %v1044_v46 = vadd.f32 %v1727_v27, %v1005_v39  ;;  %v975_v56 = vld [vmem:[#allocation2 + $0xd8] sm:$0xff]  ;;  %1110 = vst [vmem:[%s1689_s7 + $0xa0] sm:$0xff] %v1078_v0 }
 0x160   : > { %v1069_v25 = vmax.f32 %v1037_v13, 0.0  ;;  %1100 = vst [vmem:[%s1689_s7 + $0x50] sm:$0xff] %v1068_v24  ;;  %v1043_v45 = vadd.f32 %v1727_v27, %v1004_v38  ;;  %v1045_v47 = vadd.f32 %v1727_v27, %v1006_v40  ;;  %v1047_v52 = vadd.f32 %v1727_v27, %v1008_v43 }
 0x161   : > { %v962_v61 = vld [vmem:[#allocation2 + $0x70] sm:$0xff]  ;;  %v1067_v23 = vmax.f32 %v1035_v11, 0.0  ;;  %1098 = vst [vmem:[%s1689_s7 + $0x40] sm:$0xff] %v1066_v16  ;;  %v1074_v50 = vmax.f32 %v1042_v41, 0.0  ;;  %v1048_v53 = vadd.f32 %v1727_v27, %v1009_v44  ;;  %v1076_v58 = vmax.f32 %v1044_v46, 0.0 }
 0x162   : > { %v960_v59 = vld [vmem:[#allocation2 + $0x60] sm:$0xff]  ;;  %v1001_v10 = vmul.f32 %v1722_v26, %v962_v61  ;;  %1101 = vst [vmem:[%s1689_s7 + $0x58] sm:$0xff] %v1069_v25  ;;  %v1075_v57 = vmax.f32 %v1043_v45, 0.0  ;;  %v978_v63 = vld [vmem:[#allocation2 + $0xf0] sm:$0xff]  ;;  %v1079_v1 = vmax.f32 %v1047_v52, 0.0  ;;  %v1011_v3 = vmul.f32 %v1722_v26, %v972_v49 }
 0x163   : > { %v963_v2 = vld [vmem:[#allocation2 + $0x78] sm:$0xff]  ;;  %v999_v8 = vmul.f32 %v1722_v26, %v960_v59  ;;  %1099 = vst [vmem:[%s1689_s7 + $0x48] sm:$0xff] %v1067_v23  ;;  %v1077_v59 = vmax.f32 %v1045_v47, 0.0  ;;  %v976_v61 = vld [vmem:[#allocation2 + $0xe0] sm:$0xff]  ;;  %1106 = vst [vmem:[%s1689_s7 + $0x80] sm:$0xff] %v1074_v50  ;;  %v1012_v6 = vmul.f32 %v1722_v26, %v973_v54  ;;  %v1013_v7 = vmul.f32 %v1722_v26, %v974_v55 }
 0x164   : > { %v961_v60 = vld [vmem:[#allocation2 + $0x68] sm:$0xff]  ;;  %v1002_v14 = vmul.f32 %v1722_v26, %v963_v2  ;;  %v1040_v19 = vadd.f32 %v1727_v27, %v1001_v10  ;;  %v1080_v2 = vmax.f32 %v1048_v53, 0.0  ;;  %v979_v4 = vld [vmem:[#allocation2 + $0xf8] sm:$0xff]  ;;  %1107 = vst [vmem:[%s1689_s7 + $0x88] sm:$0xff] %v1075_v57  ;;  %1108 = vst [vmem:[%s1689_s7 + $0x90] sm:$0xff] %v1076_v58  ;;  %v1015_v10 = vmul.f32 %v1722_v26, %v976_v61 }
 0x165   : > { %v1000_v9 = vmul.f32 %v1722_v26, %v961_v60  ;;  %v1038_v17 = vadd.f32 %v1727_v27, %v999_v8  ;;  %v1049_v60 = vadd.f32 %v1727_v27, %v1010_v48  ;;  %v977_v62 = vld [vmem:[#allocation2 + $0xe8] sm:$0xff]  ;;  %1109 = vst [vmem:[%s1689_s7 + $0x98] sm:$0xff] %v1077_v59  ;;  %v1014_v8 = vmul.f32 %v1722_v26, %v975_v56 }
 0x166   : > { %v1041_v28 = vadd.f32 %v1727_v27, %v1002_v14  ;;  %v1072_v34 = vmax.f32 %v1040_v19, 0.0  ;;  %1111 = vst [vmem:[%s1689_s7 + $0xa8] sm:$0xff] %v1079_v1  ;;  %1112 = vst [vmem:[%s1689_s7 + $0xb0] sm:$0xff] %v1080_v2  ;;  %v1016_v11 = vmul.f32 %v1722_v26, %v977_v62  ;;  %v1017_v12 = vmul.f32 %v1722_v26, %v978_v63 }
 0x167   : > { %v1039_v18 = vadd.f32 %v1727_v27, %v1000_v9  ;;  %v1070_v32 = vmax.f32 %v1038_v17, 0.0  ;;  %v1081_v5 = vmax.f32 %v1049_v60, 0.0  ;;  %v1050_v9 = vadd.f32 %v1727_v27, %v1011_v3 }
 0x168   : > { %v1073_v37 = vmax.f32 %v1041_v28, 0.0  ;;  %1104 = vst [vmem:[%s1689_s7 + $0x70] sm:$0xff] %v1072_v34  ;;  %v1051_v13 = vadd.f32 %v1727_v27, %v1012_v6  ;;  %v1052_v14 = vadd.f32 %v1727_v27, %v1013_v7  ;;  %v1053_v15 = vadd.f32 %v1727_v27, %v1014_v8 }
 0x169   : > { %v1071_v33 = vmax.f32 %v1039_v18, 0.0  ;;  %1102 = vst [vmem:[%s1689_s7 + $0x60] sm:$0xff] %v1070_v32  ;;  %1113 = vst [vmem:[%s1689_s7 + $0xb8] sm:$0xff] %v1081_v5  ;;  %v1018_v16 = vmul.f32 %v1722_v26, %v979_v4  ;;  %v1082_v17 = vmax.f32 %v1050_v9, 0.0  ;;  %v1054_v18 = vadd.f32 %v1727_v27, %v1015_v10 }
 0x16a   : > { %1105 = vst [vmem:[%s1689_s7 + $0x78] sm:$0xff] %v1073_v37  ;;  %v1055_v19 = vadd.f32 %v1727_v27, %v1016_v11  ;;  %v1056_v20 = vadd.f32 %v1727_v27, %v1017_v12  ;;  %v1083_v21 = vmax.f32 %v1051_v13, 0.0  ;;  %v1084_v22 = vmax.f32 %v1052_v14, 0.0 }
 0x16b   : > { %1103 = vst [vmem:[%s1689_s7 + $0x68] sm:$0xff] %v1071_v33  ;;  %v1085_v23 = vmax.f32 %v1053_v15, 0.0  ;;  %v1057_v24 = vadd.f32 %v1727_v27, %v1018_v16  ;;  %1114 = vst [vmem:[%s1689_s7 + $0xc0] sm:$0xff] %v1082_v17  ;;  %v1086_v25 = vmax.f32 %v1054_v18, 0.0 }
 0x16c   : > { %v1087_v28 = vmax.f32 %v1055_v19, 0.0  ;;  %v1088_v26 = vmax.f32 %v1056_v20, 0.0  ;;  %1115 = vst [vmem:[%s1689_s7 + $0xc8] sm:$0xff] %v1083_v21  ;;  %1116 = vst [vmem:[%s1689_s7 + $0xd0] sm:$0xff] %v1084_v22 }
 0x16d   : > { %1117 = vst [vmem:[%s1689_s7 + $0xd8] sm:$0xff] %v1085_v23  ;;  %v1089_v29 = vmax.f32 %v1057_v24, 0.0  ;;  %1118 = vst [vmem:[%s1689_s7 + $0xe0] sm:$0xff] %v1086_v25 }
 0x16e   : > { %1119 = vst [vmem:[%s1689_s7 + $0xe8] sm:$0xff] %v1087_v28  ;;  %1120 = vst [vmem:[%s1689_s7 + $0xf0] sm:$0xff] %v1088_v26 }
 0x16f   : > { %1121 = vst [vmem:[%s1689_s7 + $0xf8] sm:$0xff] %v1089_v29 }
 0x170 PF: > { %s14_s21 = sadd.s32 1, %s1520_s21   ;;  %s1851_s15 = smov %s1500_s16 }
 0x171   : > { %p11_p0 = scmp.ge.s32.totalorder %s14_s21, 12   ;;  %s1852_s16 = smov %s1599_s28 }
 0x172   : > { %s1853_s17 = smov %s1512_s19  ;;  %s1854_s18 = smov %s1516_s20 }
 0x173   : > { %s1855_s19 = smov %s1858_s22  ;;  %s1856_s20 = smov %s1862_s23 }
 0x174   :  { %13 = sbr.rel (!%p11_p0) target bundleno = 4 (0x4), region = 129 }

// kernel: resnet18_forward.23
= control target key start
LH: loop header
LB: loop body
LE: loop exit
PB: predicated region body
PF: predicated region fallthrough
CT: control target
= control target key end

     0   :  { %s1694_s18 = smov 0   ;;  %s1696_s19 = smov 0   ;;  %s2029_s0 = inlined_call_operand.vmem [shape: bf16[512,640], index: 0, kind: input, shape index: {}]   ;;  %s2030_s1 = inlined_call_operand.vmem [shape: bf16[640,128], index: 1, kind: input, shape index: {}]   ;;  %s2031_s2 = inlined_call_operand.vmem [shape: f32[1,128], index: 2, kind: input, shape index: {}]   ;;  %s2032_s3 = inlined_call_operand.vmem [shape: f32[1,128], index: 3, kind: input, shape index: {}]   ;;  %s2033_s4 = inlined_call_operand.vmem [shape: f32[512,128], index: 4, kind: input, shape index: {}]   ;;  %s2034_s5 = inlined_call_operand.vmem [shape: f32[512,128], index: 5, kind: output, shape index: {}]  }
   0x1   :  { %s1698_s20 = smov 0   ;;  %s1700_s21 = smov 0  }
   0x2   :  { %s1702_s22 = smov 0   ;;  %s1704_s23 = smov 0  }
   0x3   :  { %s1706_s24 = smov 0  }
   0x4 LB: > { %s27_s25 = sadd.s32 1, %s1653_s22  ;;  %s34_s26 = sadd.s32 1, %s1657_s23  ;;  %s1661_s24 = sphi %s1706_s24, %s15_s24   ;;  %s1657_s23 = sphi %s1704_s23, %s2040_s23   ;;  %s1653_s22 = sphi %s1702_s22, %s2039_s22   ;;  %s1649_s21 = sphi %s1700_s21, %s2038_s21   ;;  %s1645_s20 = sphi %s1698_s20, %s2037_s20   ;;  %s1641_s19 = sphi %s1696_s19, %s2036_s19   ;;  %s1637_s18 = sphi %s1694_s18, %s2035_s18  }
   0x5   : > { %p28_p0 = scmp.ge.s32.totalorder %s27_s25, 5  ;;  %p50_p1 = scmp.ne.s32.totalorder %s1641_s19, %s1637_s18 }
   0x6   : > { %p51_p2 = scmp.eq.s32.totalorder %s1661_s24, 0  ;;  %s43_s30 = sadd.s32 1, %s1641_s19 }
   0x7   : > { %s2042_s25 = smov (%p28_p0, %s27_s25), 0  ;;  %s2044_s26 = smov (!%p28_p0, %s34_s26), %s1657_s23 }
   0x8   : > { %p52_p3 = por %p51_p2, %p50_p1  ;;  %p36_p4 = scmp.ge.s32.totalorder %s2044_s26, 2 }
   0x9   : > { %s39_s27 = ssub.s32 %s1653_s22, %s2042_s25  ;;  %p1394_p6 = scmp.ge.s32.totalorder %s1661_s24, 10 }
   0xa   : > { %s2046_s26 = smov (%p36_p4, %s2044_s26), 0 }
   0xb   : > { %s38_s28 = ssub.s32 %s1657_s23, %s2046_s26  ;;  %224 = sbr.rel (%p1394_p6) target bundleno = 46 (0x2e), region = 24 }
   0xc   : > { %s40_s29 = sor.u32 %s39_s27, %s38_s28 }
   0xd   : > { %p41_p5 = scmp.eq.s32.totalorder %s40_s29, 0 }
   0xf   : > { %s1745_s6 = scalar_select %p41_p5, %s1641_s19, %s43_s30  }
  0x12   : > { %227 = sbr.rel (!%p52_p3) target bundleno = 46 (0x2e), region = 28  ;;  %s229_s7 = sand.u32 (%p52_p3), 1, %s1641_s19  }
  0x13   : > { %s1525_s8 = smul.u32 (%p52_p3), 160, %s1657_s23  ;;  %s1395_s9 = sshll.u32 (%p52_p3), %s229_s7, 7 }
  0x14   : > { %s1759_s15 = scalar_lea.vmem (%p52_p3), [#allocation3], %s1395_s9 }
  0x15   : > { %s234_s10 = sadd.s32 (%p52_p3), %s1653_s22, %s1525_s8 }
  0x16   : > { %s1398_s11 = sshll.u32 (%p52_p3), %s234_s10, 2 }
  0x17   : > { %s1754_s14 = scalar_lea.vmem (%p52_p3), %s2029_s0, %s1398_s11 }
  0x18   : > { %v252_v0 = vld [vmem:[%s1754_s14] sm:$0xf] (%p52_p3)  ;;  %v254_v1 = vld [vmem:[%s1754_s14 + $0x14] sm:$0xf] (%p52_p3)  ;;  %v256_v2 = vld [vmem:[%s1754_s14 + $0x28] sm:$0xf] (%p52_p3) }
  0x19   : > { %253 = vst [vmem:[%s1759_s15] sm:$0xf] %v252_v0  ;;  %255 = vst [vmem:[%s1759_s15 + $0x4] sm:$0xf] %v254_v1  ;;  %v258_v3 = vld [vmem:[%s1754_s14 + $0x3c] sm:$0xf] }
  0x1a   : > { %257 = vst [vmem:[%s1759_s15 + $0x8] sm:$0xf] %v256_v2  ;;  %v260_v4 = vld [vmem:[%s1754_s14 + $0x50] sm:$0xf]  ;;  %v262_v5 = vld [vmem:[%s1754_s14 + $0x64] sm:$0xf] }
  0x1b   : > { %259 = vst [vmem:[%s1759_s15 + $0xc] sm:$0xf] %v258_v3  ;;  %261 = vst [vmem:[%s1759_s15 + $0x10] sm:$0xf] %v260_v4  ;;  %v264_v6 = vld [vmem:[%s1754_s14 + $0x78] sm:$0xf] }
  0x1c   : > { %263 = vst [vmem:[%s1759_s15 + $0x14] sm:$0xf] %v262_v5  ;;  %v266_v7 = vld [vmem:[%s1754_s14 + $0x8c] sm:$0xf]  ;;  %v268_v8 = vld [vmem:[%s1754_s14 + $0xa0] sm:$0xf] }
  0x1d   : > { %265 = vst [vmem:[%s1759_s15 + $0x18] sm:$0xf] %v264_v6  ;;  %267 = vst [vmem:[%s1759_s15 + $0x1c] sm:$0xf] %v266_v7  ;;  %v270_v9 = vld [vmem:[%s1754_s14 + $0xb4] sm:$0xf] }
  0x1e   : > { %269 = vst [vmem:[%s1759_s15 + $0x20] sm:$0xf] %v268_v8  ;;  %v272_v10 = vld [vmem:[%s1754_s14 + $0xc8] sm:$0xf]  ;;  %v274_v11 = vld [vmem:[%s1754_s14 + $0xdc] sm:$0xf] }
  0x1f   : > { %271 = vst [vmem:[%s1759_s15 + $0x24] sm:$0xf] %v270_v9  ;;  %273 = vst [vmem:[%s1759_s15 + $0x28] sm:$0xf] %v272_v10  ;;  %v276_v12 = vld [vmem:[%s1754_s14 + $0xf0] sm:$0xf] }
  0x20   : > { %275 = vst [vmem:[%s1759_s15 + $0x2c] sm:$0xf] %v274_v11  ;;  %v278_v13 = vld [vmem:[%s1754_s14 + $0x104] sm:$0xf]  ;;  %v280_v14 = vld [vmem:[%s1754_s14 + $0x118] sm:$0xf] }
  0x21   : > { %277 = vst [vmem:[%s1759_s15 + $0x30] sm:$0xf] %v276_v12  ;;  %279 = vst [vmem:[%s1759_s15 + $0x34] sm:$0xf] %v278_v13  ;;  %v282_v15 = vld [vmem:[%s1754_s14 + $0x12c] sm:$0xf] }
  0x22   : > { %281 = vst [vmem:[%s1759_s15 + $0x38] sm:$0xf] %v280_v14  ;;  %v284_v16 = vld [vmem:[%s1754_s14 + $0x140] sm:$0xf]  ;;  %v286_v17 = vld [vmem:[%s1754_s14 + $0x154] sm:$0xf] }
  0x23   : > { %283 = vst [vmem:[%s1759_s15 + $0x3c] sm:$0xf] %v282_v15  ;;  %285 = vst [vmem:[%s1759_s15 + $0x40] sm:$0xf] %v284_v16  ;;  %v288_v18 = vld [vmem:[%s1754_s14 + $0x168] sm:$0xf] }
  0x24   : > { %287 = vst [vmem:[%s1759_s15 + $0x44] sm:$0xf] %v286_v17  ;;  %v290_v19 = vld [vmem:[%s1754_s14 + $0x17c] sm:$0xf]  ;;  %v292_v20 = vld [vmem:[%s1754_s14 + $0x190] sm:$0xf] }
  0x25   : > { %289 = vst [vmem:[%s1759_s15 + $0x48] sm:$0xf] %v288_v18  ;;  %291 = vst [vmem:[%s1759_s15 + $0x4c] sm:$0xf] %v290_v19  ;;  %v294_v21 = vld [vmem:[%s1754_s14 + $0x1a4] sm:$0xf] }
  0x26   : > { %293 = vst [vmem:[%s1759_s15 + $0x50] sm:$0xf] %v292_v20  ;;  %v296_v22 = vld [vmem:[%s1754_s14 + $0x1b8] sm:$0xf]  ;;  %v298_v23 = vld [vmem:[%s1754_s14 + $0x1cc] sm:$0xf] }
  0x27   : > { %295 = vst [vmem:[%s1759_s15 + $0x54] sm:$0xf] %v294_v21  ;;  %297 = vst [vmem:[%s1759_s15 + $0x58] sm:$0xf] %v296_v22  ;;  %v300_v24 = vld [vmem:[%s1754_s14 + $0x1e0] sm:$0xf] }
  0x28   : > { %299 = vst [vmem:[%s1759_s15 + $0x5c] sm:$0xf] %v298_v23  ;;  %v302_v25 = vld [vmem:[%s1754_s14 + $0x1f4] sm:$0xf]  ;;  %v304_v26 = vld [vmem:[%s1754_s14 + $0x208] sm:$0xf] }
  0x29   : > { %301 = vst [vmem:[%s1759_s15 + $0x60] sm:$0xf] %v300_v24  ;;  %303 = vst [vmem:[%s1759_s15 + $0x64] sm:$0xf] %v302_v25  ;;  %v306_v27 = vld [vmem:[%s1754_s14 + $0x21c] sm:$0xf] }
  0x2a   : > { %305 = vst [vmem:[%s1759_s15 + $0x68] sm:$0xf] %v304_v26  ;;  %v308_v28 = vld [vmem:[%s1754_s14 + $0x230] sm:$0xf]  ;;  %v310_v29 = vld [vmem:[%s1754_s14 + $0x244] sm:$0xf] }
  0x2b   : > { %307 = vst [vmem:[%s1759_s15 + $0x6c] sm:$0xf] %v306_v27  ;;  %309 = vst [vmem:[%s1759_s15 + $0x70] sm:$0xf] %v308_v28  ;;  %v312_v30 = vld [vmem:[%s1754_s14 + $0x258] sm:$0xf] }
  0x2c   : > { %311 = vst [vmem:[%s1759_s15 + $0x74] sm:$0xf] %v310_v29  ;;  %v314_v31 = vld [vmem:[%s1754_s14 + $0x26c] sm:$0xf]  ;;  %313 = vst [vmem:[%s1759_s15 + $0x78] sm:$0xf] %v312_v30 }
  0x2d   : > { %315 = vst [vmem:[%s1759_s15 + $0x7c] sm:$0xf] %v314_v31 }
  0x2e PF: > { %p1399_p7 = scmp.ge.s32.totalorder %s1661_s24, 1  ;;  %p425_p8 = scmp.lt.s32.totalorder %s1661_s24, 11 }
  0x30   : > { %p426_p9 = pnand %p1399_p7, %p425_p8 }
  0x31   : > { %s432_s16 = sand.u32 (!%p426_p9), 1, %s1637_s18   ;;  %s1401_s17 = sshll.u32 (!%p426_p9), %s1645_s20, 4 }
  0x32   : > { %429 = sbr.rel (%p426_p9) target bundleno = 379 (0x17b), region = 77  ;;  %s1400_s27 = sshll.u32 (!%p426_p9), %s432_s16, 7 }
  0x33   : > { %p486_p10 = scmp.lt.s32.totalorder (!%p426_p9), %s1401_s17, 79  ;;  %s1403_s28 = sshll.u32 (!%p426_p9), %s1649_s21, 5 }
  0x34   : > { %p501_p11 = scmp.lt.s32.totalorder (!%p426_p9), %s1403_s28, 63  ;;  %s1842_s21 = scalar_lea.vmem (!%p426_p9), [#allocation3], %s1400_s27 }
  0x35   : > { %p1407_p12 = scmp.ne.s32.totalorder (!%p426_p9), %s1645_s20, 0 }
  0x39   : > { %s2048_s17 = smov (!%p486_p10, %s1401_s17), 79  ;;  %s2050_s28 = smov (!%p501_p11, %s1403_s28), 63 }
  0x3a   : > { %s1402_s29 = sshll.u32 %s2048_s17, 2  ;;  %s1404_s9 = sshll.u32 %s2050_s28, 3  ;;  %v1663_v32 = vmov (!%p1407_p12), 0.0  }
  0x3b   : > { %s1830_s8 = scalar_lea.vmem %s2030_s1, %s1402_s29  ;;  %s1835_s12 = scalar_lea.vmem %s2033_s4, %s1404_s9  ;;  %523 = vst [vmem:[#allocation2] sm:$0xff] (!%p1407_p12), %v1663_v32  ;;  %524 = vst [vmem:[#allocation2 + $0x8] sm:$0xff] (!%p1407_p12), %v1663_v32 }
  0x3c   : > { %s1840_s14 = scalar_lea.vmem %s2034_s5, %s1404_s9  ;;  %522 = sbr.rel (%p1407_p12) target bundleno = 75 (0x4b), region = 85  ;;  %525 = vst [vmem:[#allocation2 + $0x10] sm:$0xff] (!%p1407_p12), %v1663_v32  ;;  %526 = vst [vmem:[#allocation2 + $0x18] sm:$0xff] (!%p1407_p12), %v1663_v32 }
  0x3d   : > { %527 = vst [vmem:[#allocation2 + $0x20] sm:$0xff] (!%p1407_p12), %v1663_v32  ;;  %528 = vst [vmem:[#allocation2 + $0x28] sm:$0xff] (!%p1407_p12), %v1663_v32 }
  0x3e   : > { %529 = vst [vmem:[#allocation2 + $0x30] sm:$0xff] (!%p1407_p12), %v1663_v32  ;;  %530 = vst [vmem:[#allocation2 + $0x38] sm:$0xff] (!%p1407_p12), %v1663_v32 }
  0x3f   : > { %531 = vst [vmem:[#allocation2 + $0x40] sm:$0xff] (!%p1407_p12), %v1663_v32  ;;  %532 = vst [vmem:[#allocation2 + $0x48] sm:$0xff] (!%p1407_p12), %v1663_v32 }
  0x40   : > { %533 = vst [vmem:[#allocation2 + $0x50] sm:$0xff] (!%p1407_p12), %v1663_v32  ;;  %534 = vst [vmem:[#allocation2 + $0x58] sm:$0xff] (!%p1407_p12), %v1663_v32 }
  0x41   : > { %535 = vst [vmem:[#allocation2 + $0x60] sm:$0xff] (!%p1407_p12), %v1663_v32  ;;  %536 = vst [vmem:[#allocation2 + $0x68] sm:$0xff] (!%p1407_p12), %v1663_v32 }
  0x42   : > { %537 = vst [vmem:[#allocation2 + $0x70] sm:$0xff] (!%p1407_p12), %v1663_v32  ;;  %538 = vst [vmem:[#allocation2 + $0x78] sm:$0xff] (!%p1407_p12), %v1663_v32 }
  0x43   : > { %539 = vst [vmem:[#allocation2 + $0x80] sm:$0xff] %v1663_v32  ;;  %540 = vst [vmem:[#allocation2 + $0x88] sm:$0xff] %v1663_v32 }
  0x44   : > { %541 = vst [vmem:[#allocation2 + $0x90] sm:$0xff] %v1663_v32  ;;  %542 = vst [vmem:[#allocation2 + $0x98] sm:$0xff] %v1663_v32 }
  0x45   : > { %543 = vst [vmem:[#allocation2 + $0xa0] sm:$0xff] %v1663_v32  ;;  %544 = vst [vmem:[#allocation2 + $0xa8] sm:$0xff] %v1663_v32 }
  0x46   : > { %545 = vst [vmem:[#allocation2 + $0xb0] sm:$0xff] %v1663_v32  ;;  %546 = vst [vmem:[#allocation2 + $0xb8] sm:$0xff] %v1663_v32 }
  0x47   : > { %547 = vst [vmem:[#allocation2 + $0xc0] sm:$0xff] %v1663_v32  ;;  %548 = vst [vmem:[#allocation2 + $0xc8] sm:$0xff] %v1663_v32 }
  0x48   : > { %549 = vst [vmem:[#allocation2 + $0xd0] sm:$0xff] %v1663_v32  ;;  %550 = vst [vmem:[#allocation2 + $0xd8] sm:$0xff] %v1663_v32 }
  0x49   : > { %551 = vst [vmem:[#allocation2 + $0xe0] sm:$0xff] %v1663_v32  ;;  %552 = vst [vmem:[#allocation2 + $0xe8] sm:$0xff] %v1663_v32 }
  0x4a   : > { %553 = vst [vmem:[#allocation2 + $0xf0] sm:$0xff] %v1663_v32  ;;  %554 = vst [vmem:[#allocation2 + $0xf8] sm:$0xff] %v1663_v32 }
  0x4b PF: > { %v1583_v33 = vld [vmem:[%s1830_s8] sm:$0xff]   ;;  %v1584_v34 = vld [vmem:[%s1830_s8 + $0x8] sm:$0xff]   ;;  %v1585_v35 = vld [vmem:[%s1830_s8 + $0x10] sm:$0xff]   ;;  %p1432_p13 = scmp.ne.s32.totalorder %s1645_s20, 4 }
  0x4c   : > { %1461 = vmatprep.subr.bf16.mxu0 %v1583_v33  ;;  %1509 = vmatprep.subr.bf16.mxu1 %v1583_v33  ;;  %v1586_v36 = vld [vmem:[%s1830_s8 + $0x18] sm:$0xff]   ;;  %v1591_v37 = vld [vmem:[%s1842_s21] sm:$0xff]   ;;  %v1588_v40 = vld [vmem:[%s1830_s8 + $0x28] sm:$0xff]  }
  0x4d   : > { %1462 = vmatpush3.bf16.msra.mxu0 %v1583_v33  ;;  %1517 = vmatpush3.bf16.msra.mxu1 %v1583_v33  ;;  %v1592_v38 = vld [vmem:[%s1842_s21 + $0x40] sm:$0xff]   ;;  %v1589_v41 = vld [vmem:[%s1830_s8 + $0x30] sm:$0xff]   ;;  %v1590_v42 = vld [vmem:[%s1830_s8 + $0x38] sm:$0xff]  }
  0x4e   : > { %1463 = vmatprep.subr.bf16.mxu0 %v1584_v34  ;;  %1510 = vmatprep.subr.bf16.mxu1 %v1584_v34  ;;  %v1587_v39 = vld [vmem:[%s1830_s8 + $0x20] sm:$0xff]   ;;  %v1593_v43 = vld [vmem:[%s1842_s21 + $0x8] sm:$0xff]   ;;  %v1595_v45 = vld [vmem:[%s1842_s21 + $0x10] sm:$0xff]  }
  0x4f   : > { %1477 = vmatprep.mubr.bf16.mxu0 %v1591_v37  ;;  %1493 = vmatprep.mubr.bf16.mxu1 %v1592_v38  ;;  %v1594_v44 = vld [vmem:[%s1842_s21 + $0x48] sm:$0xff]   ;;  %v1596_v46 = vld [vmem:[%s1842_s21 + $0x50] sm:$0xff]   ;;  %v1597_v47 = vld [vmem:[%s1842_s21 + $0x18] sm:$0xff]  }
  0x50   : > { %v1598_v48 = vld [vmem:[%s1842_s21 + $0x58] sm:$0xff]   ;;  %v1599_v49 = vld [vmem:[%s1842_s21 + $0x20] sm:$0xff]   ;;  %v1601_v51 = vld [vmem:[%s1842_s21 + $0x28] sm:$0xff]  }
  0x51   : > { %1464 = vmatpush3.bf16.msra.mxu0 %v1584_v34  ;;  %1518 = vmatpush3.bf16.msra.mxu1 %v1584_v34  ;;  %v1600_v50 = vld [vmem:[%s1842_s21 + $0x60] sm:$0xff]   ;;  %v1602_v52 = vld [vmem:[%s1842_s21 + $0x68] sm:$0xff]   ;;  %v1603_v53 = vld [vmem:[%s1842_s21 + $0x30] sm:$0xff]  }
  0x52   : > { %1465 = vmatprep.subr.bf16.mxu0 %v1585_v35  ;;  %1511 = vmatprep.subr.bf16.mxu1 %v1585_v35  ;;  %v1604_v54 = vld [vmem:[%s1842_s21 + $0x70] sm:$0xff]   ;;  %v1605_v55 = vld [vmem:[%s1842_s21 + $0x38] sm:$0xff]   ;;  %v555_v59 = vld [vmem:[#allocation2] sm:$0xff] }
  0x53   : > { %v1606_v56 = vld [vmem:[%s1842_s21 + $0x78] sm:$0xff]   ;;  %v557_v57 = vld [vmem:[#allocation2 + $0x10] sm:$0xff]  ;;  %v571_v60 = vld [vmem:[#allocation2 + $0x80] sm:$0xff] }
  0x54   : > { %v573_v58 = vld [vmem:[#allocation2 + $0x90] sm:$0xff]  ;;  %v558_v63 = vld [vmem:[#allocation2 + $0x18] sm:$0xff]  ;;  %v556_v5 = vld [vmem:[#allocation2 + $0x8] sm:$0xff] }
  0x55   : > { %1466 = vmatpush3.bf16.msra.mxu0 %v1585_v35  ;;  %1519 = vmatpush3.bf16.msra.mxu1 %v1585_v35  ;;  %v574_v0 = vld [vmem:[#allocation2 + $0x98] sm:$0xff]  ;;  %v572_v6 = vld [vmem:[#allocation2 + $0x88] sm:$0xff]  ;;  %v561_v17 = vld [vmem:[#allocation2 + $0x30] sm:$0xff] }
  0x56   : > { %1467 = vmatprep.subr.bf16.mxu0 %v1586_v36  ;;  %1512 = vmatprep.subr.bf16.mxu1 %v1586_v36  ;;  %v577_v18 = vld [vmem:[#allocation2 + $0xb0] sm:$0xff]  ;;  %v559_v19 = vld [vmem:[#allocation2 + $0x20] sm:$0xff]  ;;  %v562_v23 = vld [vmem:[#allocation2 + $0x38] sm:$0xff] }
  0x57   : > { %v575_v20 = vld [vmem:[#allocation2 + $0xa0] sm:$0xff]  ;;  %v578_v24 = vld [vmem:[#allocation2 + $0xb8] sm:$0xff]  ;;  %v560_v29 = vld [vmem:[#allocation2 + $0x28] sm:$0xff] }
  0x58   : > { %v576_v30 = vld [vmem:[#allocation2 + $0xa8] sm:$0xff] }
  0x59   : > { %1468 = vmatpush3.bf16.msra.mxu0 %v1586_v36  ;;  %1520 = vmatpush3.bf16.msra.mxu1 %v1586_v36 }
  0x5a   : > { %1469 = vmatprep.subr.bf16.mxu0 %v1587_v39  ;;  %1513 = vmatprep.subr.bf16.mxu1 %v1587_v39 }
  0x5d   : > { %1470 = vmatpush3.bf16.msra.mxu0 %v1587_v39  ;;  %1521 = vmatpush3.bf16.msra.mxu1 %v1587_v39 }
  0x5e   : > { %1471 = vmatprep.subr.bf16.mxu0 %v1588_v40  ;;  %1514 = vmatprep.subr.bf16.mxu1 %v1588_v40 }
  0x61   : > { %1472 = vmatpush3.bf16.msra.mxu0 %v1588_v40  ;;  %1522 = vmatpush3.bf16.msra.mxu1 %v1588_v40 }
  0x62   : > { %1473 = vmatprep.subr.bf16.mxu0 %v1589_v41  ;;  %1515 = vmatprep.subr.bf16.mxu1 %v1589_v41 }
  0x65   : > { %1474 = vmatpush3.bf16.msra.mxu0 %v1589_v41  ;;  %1523 = vmatpush3.bf16.msra.mxu1 %v1589_v41  ;;  %v565_v41 = vld [vmem:[#allocation2 + $0x50] sm:$0xff] }
  0x66   : > { %1475 = vmatprep.subr.bf16.mxu0 %v1590_v42  ;;  %1516 = vmatprep.subr.bf16.mxu1 %v1590_v42 }
  0x69   : > { %1476 = vmatpush3.bf16.msra.mxu0 %v1590_v42  ;;  %1524 = vmatpush3.bf16.msra.mxu1 %v1590_v42  ;;  %v581_v42 = vld [vmem:[#allocation2 + $0xd0] sm:$0xff] }
  0x6c   : > { %1478 = vmatmul.mubr.bf16.vlgmr.msra.gmra.mrb[0].mxu0 %v1593_v43  ;;  %1494 = vmatmul.mubr.bf16.vlgmr.msra.gmra.mrb[0].mxu1 %v1594_v44  ;;  %v563_v43 = vld [vmem:[#allocation2 + $0x40] sm:$0xff] }
  0x6d   : > { %1481 = vmatprep.mubr.bf16.mxu0 %v1595_v45  ;;  %1497 = vmatprep.mubr.bf16.mxu1 %v1596_v46  ;;  %v579_v44 = vld [vmem:[#allocation2 + $0xc0] sm:$0xff] }
  0x74   : > { %1482 = vmatmul.mubr.bf16.gmra.mrb[4].mxu0 %v1597_v47  ;;  %1498 = vmatmul.mubr.bf16.gmra.mrb[4].mxu1 %v1598_v48  ;;  %v566_v47 = vld [vmem:[#allocation2 + $0x58] sm:$0xff] }
  0x75   : > { %1485 = vmatprep.mubr.bf16.mxu0 %v1599_v49  ;;  %1501 = vmatprep.mubr.bf16.mxu1 %v1600_v50  ;;  %v582_v48 = vld [vmem:[#allocation2 + $0xd8] sm:$0xff] }
  0x7c   : > { %1486 = vmatmul.mubr.bf16.gmra.mrb[8].mxu0 %v1601_v51  ;;  %1502 = vmatmul.mubr.bf16.gmra.mrb[8].mxu1 %v1602_v52 }
  0x7d   : > { %1489 = vmatprep.mubr.bf16.mxu0 %v1603_v53  ;;  %1505 = vmatprep.mubr.bf16.mxu1 %v1604_v54  ;;  %v564_v53 = vld [vmem:[#allocation2 + $0x48] sm:$0xff] }
  0x7e   : > { %v580_v54 = vld [vmem:[#allocation2 + $0xc8] sm:$0xff] }
  0x84   : > { %1490 = vmatmul.mubr.bf16.gmra.mrb[12].mxu0 %v1605_v55  ;;  %1506 = vmatmul.mubr.bf16.gmra.mrb[12].mxu1 %v1606_v56 }
 0x13f   : > { %v1479_v61 = vpop.f32.mrb[0].mxu0  ;;  %v1495_v62 = vpop.f32.mrb[0].mxu1 }
 0x140   : > { %v942_v1 = vadd.f32 %v1479_v61, %v557_v57  ;;  %v958_v2 = vadd.f32 %v1495_v62, %v573_v58  ;;  %v813_v3 = vpop.f32.mrb[1].mxu0  ;;  %v877_v4 = vpop.f32.mrb[1].mxu1 }
 0x141   : > { %v940_v7 = vadd.f32 %v813_v3, %v555_v59  ;;  %v956_v8 = vadd.f32 %v877_v4, %v571_v60  ;;  %v1480_v9 = vpop.f32.mrb[2].mxu0  ;;  %v1496_v10 = vpop.f32.mrb[2].mxu1  ;;  %v567_v3 = vld [vmem:[#allocation2 + $0x60] sm:$0xff] }
 0x142   : > { %974 = vst [vmem:[#allocation2 + $0x10] sm:$0xff] %v942_v1  ;;  %990 = vst [vmem:[#allocation2 + $0x90] sm:$0xff] %v958_v2  ;;  %v943_v11 = vadd.f32 %v1480_v9, %v558_v63  ;;  %v959_v12 = vadd.f32 %v1496_v10, %v574_v0  ;;  %v816_v13 = vpop.f32.mrb[3].mxu0  ;;  %v880_v14 = vpop.f32.mrb[3].mxu1  ;;  %v569_v1 = vld [vmem:[#allocation2 + $0x70] sm:$0xff]  ;;  %v583_v4 = vld [vmem:[#allocation2 + $0xe0] sm:$0xff] }
 0x143   : > { %972 = vst [vmem:[#allocation2] sm:$0xff] %v940_v7  ;;  %988 = vst [vmem:[#allocation2 + $0x80] sm:$0xff] %v956_v8  ;;  %v941_v15 = vadd.f32 %v816_v13, %v556_v5  ;;  %v957_v16 = vadd.f32 %v880_v14, %v572_v6  ;;  %v585_v2 = vld [vmem:[#allocation2 + $0xf0] sm:$0xff]  ;;  %v570_v7 = vld [vmem:[#allocation2 + $0x78] sm:$0xff] }
 0x144   : > { %975 = vst [vmem:[#allocation2 + $0x18] sm:$0xff] %v943_v11  ;;  %991 = vst [vmem:[#allocation2 + $0x98] sm:$0xff] %v959_v12  ;;  %v586_v8 = vld [vmem:[#allocation2 + $0xf8] sm:$0xff]  ;;  %v568_v13 = vld [vmem:[#allocation2 + $0x68] sm:$0xff] }
 0x145   : > { %973 = vst [vmem:[#allocation2 + $0x8] sm:$0xff] %v941_v15  ;;  %989 = vst [vmem:[#allocation2 + $0x88] sm:$0xff] %v957_v16  ;;  %v584_v14 = vld [vmem:[#allocation2 + $0xe8] sm:$0xff] }
 0x147   : > { %v1483_v21 = vpop.f32.mrb[4].mxu0  ;;  %v1499_v22 = vpop.f32.mrb[4].mxu1 }
 0x148   : > { %v946_v25 = vadd.f32 %v1483_v21, %v561_v17  ;;  %v962_v26 = vadd.f32 %v1499_v22, %v577_v18  ;;  %v829_v27 = vpop.f32.mrb[5].mxu0  ;;  %v893_v28 = vpop.f32.mrb[5].mxu1 }
 0x149   : > { %v944_v31 = vadd.f32 %v829_v27, %v559_v19  ;;  %v960_v32 = vadd.f32 %v893_v28, %v575_v20  ;;  %v1484_v33 = vpop.f32.mrb[6].mxu0  ;;  %v1500_v34 = vpop.f32.mrb[6].mxu1  ;;  %v1878_v27 = vld [vmem:[%s2032_s3] ss:$0 sm:$0xff] (!%p1432_p13) }
 0x14a   : > { %978 = vst [vmem:[#allocation2 + $0x30] sm:$0xff] %v946_v25  ;;  %994 = vst [vmem:[#allocation2 + $0xb0] sm:$0xff] %v962_v26  ;;  %v947_v35 = vadd.f32 %v1484_v33, %v562_v23  ;;  %v963_v36 = vadd.f32 %v1500_v34, %v578_v24  ;;  %v832_v37 = vpop.f32.mrb[7].mxu0  ;;  %v896_v38 = vpop.f32.mrb[7].mxu1  ;;  %v1008_v25 = vld [vmem:[#allocation2] sm:$0xff] (!%p1432_p13) }
 0x14b   : > { %976 = vst [vmem:[#allocation2 + $0x20] sm:$0xff] %v944_v31  ;;  %992 = vst [vmem:[#allocation2 + $0xa0] sm:$0xff] %v960_v32  ;;  %v945_v39 = vadd.f32 %v832_v37, %v560_v29  ;;  %v961_v40 = vadd.f32 %v896_v38, %v576_v30  ;;  %v1873_v26 = vld [vmem:[%s2031_s2] ss:$0 sm:$0xff] (!%p1432_p13)  ;;  %v1010_v32 = vld [vmem:[#allocation2 + $0x10] sm:$0xff] (!%p1432_p13) }
 0x14c   : > { %979 = vst [vmem:[#allocation2 + $0x38] sm:$0xff] %v947_v35  ;;  %995 = vst [vmem:[#allocation2 + $0xb8] sm:$0xff] %v963_v36  ;;  %v1047_v28 = vmul.f32 (!%p1432_p13), %v1873_v26, %v1008_v25  ;;  %v1009_v29 = vld [vmem:[#allocation2 + $0x8] sm:$0xff] (!%p1432_p13)  ;;  %v1118_v30 = vld [vmem:[%s1835_s12] sm:$0xff] (!%p1432_p13)  ;;  %v1049_v36 = vmul.f32 (!%p1432_p13), %v1873_v26, %v1010_v32 }
 0x14d   : > { %977 = vst [vmem:[#allocation2 + $0x28] sm:$0xff] %v945_v39  ;;  %993 = vst [vmem:[#allocation2 + $0xa8] sm:$0xff] %v961_v40  ;;  %v1048_v31 = vmul.f32 (!%p1432_p13), %v1873_v26, %v1009_v29  ;;  %v1011_v33 = vld [vmem:[#allocation2 + $0x18] sm:$0xff] (!%p1432_p13)  ;;  %v1119_v35 = vld [vmem:[%s1835_s12 + $0x8] sm:$0xff] (!%p1432_p13) }
 0x14e   : > { %v1086_v34 = vadd.f32 (!%p1432_p13), %v1878_v27, %v1047_v28  ;;  %v1120_v37 = vld [vmem:[%s1835_s12 + $0x10] sm:$0xff] (!%p1432_p13)  ;;  %v1050_v38 = vmul.f32 (!%p1432_p13), %v1873_v26, %v1011_v33 }
 0x14f   : > { %v1487_v45 = vpop.f32.mrb[8].mxu0  ;;  %v1503_v46 = vpop.f32.mrb[8].mxu1  ;;  %v1087_v40 = vadd.f32 (!%p1432_p13), %v1878_v27, %v1048_v31  ;;  %v1128_v29 = vld [vmem:[%s1835_s12 + $0x50] sm:$0xff] (!%p1432_p13) }
 0x150   : > { %v950_v49 = vadd.f32 %v1487_v45, %v565_v41  ;;  %v966_v50 = vadd.f32 %v1503_v46, %v581_v42  ;;  %v845_v51 = vpop.f32.mrb[9].mxu0  ;;  %v909_v52 = vpop.f32.mrb[9].mxu1  ;;  %v1121_v41 = vld [vmem:[%s1835_s12 + $0x18] sm:$0xff] (!%p1432_p13)  ;;  %v1150_v45 = vadd.f32 (!%p1432_p13), %v1118_v30, %v1086_v34  ;;  %v1088_v46 = vadd.f32 (!%p1432_p13), %v1878_v27, %v1049_v36 }
 0x151   : > { %v948_v55 = vadd.f32 %v845_v51, %v563_v43  ;;  %v964_v56 = vadd.f32 %v909_v52, %v579_v44  ;;  %v1488_v57 = vpop.f32.mrb[10].mxu0  ;;  %v1504_v58 = vpop.f32.mrb[10].mxu1  ;;  %v1014_v44 = vld [vmem:[#allocation2 + $0x30] sm:$0xff] (!%p1432_p13)  ;;  %v1151_v51 = vadd.f32 (!%p1432_p13), %v1119_v35, %v1087_v40  ;;  %v1129_v30 = vld [vmem:[%s1835_s12 + $0x58] sm:$0xff] (!%p1432_p13)  ;;  %v1130_v35 = vld [vmem:[%s1835_s12 + $0x60] sm:$0xff] (!%p1432_p13) }
 0x152   : > { %982 = vst [vmem:[#allocation2 + $0x50] sm:$0xff] %v950_v49  ;;  %998 = vst [vmem:[#allocation2 + $0xd0] sm:$0xff] %v966_v50  ;;  %v951_v59 = vadd.f32 %v1488_v57, %v566_v47  ;;  %v967_v60 = vadd.f32 %v1504_v58, %v582_v48  ;;  %v848_v61 = vpop.f32.mrb[11].mxu0  ;;  %v912_v62 = vpop.f32.mrb[11].mxu1  ;;  %v1012_v39 = vld [vmem:[#allocation2 + $0x20] sm:$0xff] (!%p1432_p13)  ;;  %v1089_v47 = vadd.f32 (!%p1432_p13), %v1878_v27, %v1050_v38  ;;  %v1182_v57 = vmax.f32 (!%p1432_p13), %v1150_v45, 0.0 }
 0x153   : > { %980 = vst [vmem:[#allocation2 + $0x40] sm:$0xff] %v948_v55  ;;  %996 = vst [vmem:[#allocation2 + $0xc0] sm:$0xff] %v964_v56  ;;  %v949_v63 = vadd.f32 %v848_v61, %v564_v53  ;;  %v965_v0 = vadd.f32 %v912_v62, %v580_v54  ;;  %v1051_v42 = vmul.f32 (!%p1432_p13), %v1873_v26, %v1012_v39  ;;  %v1122_v48 = vld [vmem:[%s1835_s12 + $0x20] sm:$0xff] (!%p1432_p13)  ;;  %v1015_v50 = vld [vmem:[#allocation2 + $0x38] sm:$0xff] (!%p1432_p13) }
 0x154   : > { %983 = vst [vmem:[#allocation2 + $0x58] sm:$0xff] %v951_v59  ;;  %999 = vst [vmem:[#allocation2 + $0xd8] sm:$0xff] %v967_v60  ;;  %v1013_v43 = vld [vmem:[#allocation2 + $0x28] sm:$0xff] (!%p1432_p13)  ;;  %v1053_v54 = vmul.f32 (!%p1432_p13), %v1873_v26, %v1014_v44  ;;  %v1054_v55 = vmul.f32 (!%p1432_p13), %v1873_v26, %v1015_v50  ;;  %v1152_v58 = vadd.f32 (!%p1432_p13), %v1120_v37, %v1088_v46  ;;  %v1124_v61 = vld [vmem:[%s1835_s12 + $0x30] sm:$0xff] (!%p1432_p13) }
 0x155   : > { %981 = vst [vmem:[#allocation2 + $0x48] sm:$0xff] %v949_v63  ;;  %997 = vst [vmem:[#allocation2 + $0xc8] sm:$0xff] %v965_v0  ;;  %v1052_v49 = vmul.f32 (!%p1432_p13), %v1873_v26, %v1013_v43  ;;  %v1090_v52 = vadd.f32 (!%p1432_p13), %v1878_v27, %v1051_v42  ;;  %v1123_v53 = vld [vmem:[%s1835_s12 + $0x28] sm:$0xff] (!%p1432_p13)  ;;  %v1153_v59 = vadd.f32 (!%p1432_p13), %v1121_v41, %v1089_v47  ;;  %v1125_v62 = vld [vmem:[%s1835_s12 + $0x38] sm:$0xff] (!%p1432_p13)  ;;  %v1183_v0 = vmax.f32 (!%p1432_p13), %v1151_v51, 0.0 }
 0x156   : > { %1214 = vst [vmem:[%s1840_s14] sm:$0xff] (!%p1432_p13), %v1182_v57  ;;  %v1131_v39 = vld [vmem:[%s1835_s12 + $0x68] sm:$0xff] (!%p1432_p13)  ;;  %v1024_v42 = vld [vmem:[#allocation2 + $0x80] sm:$0xff] (!%p1432_p13)  ;;  %v1132_v47 = vld [vmem:[%s1835_s12 + $0x70] sm:$0xff] (!%p1432_p13) }
 0x157   : > { %v1491_v5 = vpop.f32.mrb[12].mxu0  ;;  %v1507_v6 = vpop.f32.mrb[12].mxu1  ;;  %1007 = sbr.rel (%p1432_p13) target bundleno = 379 (0x17b), region = 89  ;;  %v1091_v60 = vadd.f32 (!%p1432_p13), %v1878_v27, %v1052_v49  ;;  %1215 = vst [vmem:[%s1840_s14 + $0x8] sm:$0xff] (!%p1432_p13), %v1183_v0  ;;  %v1025_v49 = vld [vmem:[#allocation2 + $0x88] sm:$0xff] (!%p1432_p13)  ;;  %v1134_v0 = vld [vmem:[%s1835_s12 + $0x80] sm:$0xff] (!%p1432_p13) }
 0x158   : > { %v954_v9 = vadd.f32 %v1491_v5, %v569_v1  ;;  %v970_v10 = vadd.f32 %v1507_v6, %v585_v2  ;;  %v861_v11 = vpop.f32.mrb[13].mxu0  ;;  %v925_v12 = vpop.f32.mrb[13].mxu1  ;;  %v1154_v1 = vadd.f32 (!%p1432_p13), %v1122_v48, %v1090_v52  ;;  %v1092_v2 = vadd.f32 (!%p1432_p13), %v1878_v27, %v1053_v54  ;;  %v1133_v48 = vld [vmem:[%s1835_s12 + $0x78] sm:$0xff] (!%p1432_p13)  ;;  %v1026_v54 = vld [vmem:[#allocation2 + $0x90] sm:$0xff] (!%p1432_p13) }
 0x159   : > { %v952_v15 = vadd.f32 %v861_v11, %v567_v3  ;;  %v968_v16 = vadd.f32 %v925_v12, %v583_v4  ;;  %v1492_v17 = vpop.f32.mrb[14].mxu0  ;;  %v1508_v18 = vpop.f32.mrb[14].mxu1  ;;  %v1093_v3 = vadd.f32 (!%p1432_p13), %v1878_v27, %v1054_v55  ;;  %v1018_v4 = vld [vmem:[#allocation2 + $0x50] sm:$0xff] (!%p1432_p13)  ;;  %v1184_v6 = vmax.f32 (!%p1432_p13), %v1152_v58, 0.0  ;;  %v1027_v55 = vld [vmem:[#allocation2 + $0x98] sm:$0xff] (!%p1432_p13) }
 0x15a   : > { %986 = vst [vmem:[#allocation2 + $0x70] sm:$0xff] %v954_v9  ;;  %1002 = vst [vmem:[#allocation2 + $0xf0] sm:$0xff] %v970_v10  ;;  %v955_v19 = vadd.f32 %v1492_v17, %v570_v7  ;;  %v971_v20 = vadd.f32 %v1508_v18, %v586_v8  ;;  %v864_v21 = vpop.f32.mrb[15].mxu0  ;;  %v928_v22 = vpop.f32.mrb[15].mxu1  ;;  %v1016_v56 = vld [vmem:[#allocation2 + $0x40] sm:$0xff] (!%p1432_p13)  ;;  %v1185_v7 = vmax.f32 (!%p1432_p13), %v1153_v59, 0.0  ;;  %v1155_v8 = vadd.f32 (!%p1432_p13), %v1123_v53, %v1091_v60 }
 0x15b   : > { %984 = vst [vmem:[#allocation2 + $0x60] sm:$0xff] %v952_v15  ;;  %1000 = vst [vmem:[#allocation2 + $0xe0] sm:$0xff] %v968_v16  ;;  %v953_v23 = vadd.f32 %v864_v21, %v568_v13  ;;  %v969_v24 = vadd.f32 %v928_v22, %v584_v14  ;;  %v1019_v5 = vld [vmem:[#allocation2 + $0x58] sm:$0xff] (!%p1432_p13)  ;;  %v1055_v9 = vmul.f32 (!%p1432_p13), %v1873_v26, %v1016_v56  ;;  %v1186_v11 = vmax.f32 (!%p1432_p13), %v1154_v1, 0.0  ;;  %v1126_v14 = vld [vmem:[%s1835_s12 + $0x40] sm:$0xff] (!%p1432_p13) }
 0x15c   : > { %987 = vst [vmem:[#allocation2 + $0x78] sm:$0xff] %v955_v19  ;;  %1003 = vst [vmem:[#allocation2 + $0xf8] sm:$0xff] %v971_v20  ;;  %v1017_v63 = vld [vmem:[#allocation2 + $0x48] sm:$0xff] (!%p1432_p13)  ;;  %v1156_v12 = vadd.f32 (!%p1432_p13), %v1124_v61, %v1092_v2  ;;  %v1157_v13 = vadd.f32 (!%p1432_p13), %v1125_v62, %v1093_v3  ;;  %v1187_v17 = vmax.f32 (!%p1432_p13), %v1155_v8, 0.0  ;;  %v1057_v20 = vmul.f32 (!%p1432_p13), %v1873_v26, %v1018_v4  ;;  %v1028_v60 = vld [vmem:[#allocation2 + $0xa0] sm:$0xff] (!%p1432_p13) }
 0x15d   : > { %985 = vst [vmem:[#allocation2 + $0x68] sm:$0xff] %v953_v23  ;;  %1001 = vst [vmem:[#allocation2 + $0xe8] sm:$0xff] %v969_v24  ;;  %v1056_v15 = vmul.f32 (!%p1432_p13), %v1873_v26, %v1017_v63  ;;  %v1094_v18 = vadd.f32 (!%p1432_p13), %v1878_v27, %v1055_v9  ;;  %v1127_v19 = vld [vmem:[%s1835_s12 + $0x48] sm:$0xff] (!%p1432_p13)  ;;  %v1058_v21 = vmul.f32 (!%p1432_p13), %v1873_v26, %v1019_v5  ;;  %v1030_v8 = vld [vmem:[#allocation2 + $0xb0] sm:$0xff] (!%p1432_p13) }
 0x15e   : > { %1216 = vst [vmem:[%s1840_s14 + $0x10] sm:$0xff] %v1184_v6  ;;  %1217 = vst [vmem:[%s1840_s14 + $0x18] sm:$0xff] %v1185_v7  ;;  %v1188_v24 = vmax.f32 %v1156_v12, 0.0  ;;  %v1189_v25 = vmax.f32 %v1157_v13, 0.0  ;;  %v1096_v33 = vadd.f32 %v1878_v27, %v1057_v20  ;;  %v1063_v59 = vmul.f32 %v1873_v26, %v1024_v42  ;;  %v1029_v2 = vld [vmem:[#allocation2 + $0xa8] sm:$0xff]  ;;  %v1031_v9 = vld [vmem:[#allocation2 + $0xb8] sm:$0xff] }
 0x15f   : > { %1218 = vst [vmem:[%s1840_s14 + $0x20] sm:$0xff] %v1186_v11  ;;  %v1095_v28 = vadd.f32 %v1878_v27, %v1056_v15  ;;  %1219 = vst [vmem:[%s1840_s14 + $0x28] sm:$0xff] %v1187_v17  ;;  %v1158_v32 = vadd.f32 %v1126_v14, %v1094_v18  ;;  %v1097_v34 = vadd.f32 %v1878_v27, %v1058_v21  ;;  %v1135_v5 = vld [vmem:[%s1835_s12 + $0x88] sm:$0xff]  ;;  %v1136_v13 = vld [vmem:[%s1835_s12 + $0x90] sm:$0xff] }
 0x160   : > { %1220 = vst [vmem:[%s1840_s14 + $0x30] sm:$0xff] %v1188_v24  ;;  %1221 = vst [vmem:[%s1840_s14 + $0x38] sm:$0xff] %v1189_v25  ;;  %v1160_v44 = vadd.f32 %v1128_v29, %v1096_v33  ;;  %v1064_v1 = vmul.f32 %v1873_v26, %v1025_v49  ;;  %v1102_v4 = vadd.f32 %v1878_v27, %v1063_v59  ;;  %v1137_v14 = vld [vmem:[%s1835_s12 + $0x98] sm:$0xff]  ;;  %v1140_v33 = vld [vmem:[%s1835_s12 + $0xb0] sm:$0xff] }
 0x161   : > { %v1022_v22 = vld [vmem:[#allocation2 + $0x70] sm:$0xff]  ;;  %v1159_v37 = vadd.f32 %v1127_v19, %v1095_v28  ;;  %v1190_v43 = vmax.f32 %v1158_v32, 0.0  ;;  %v1161_v45 = vadd.f32 %v1129_v30, %v1097_v34  ;;  %v1065_v6 = vmul.f32 %v1873_v26, %v1026_v54  ;;  %v1138_v19 = vld [vmem:[%s1835_s12 + $0xa0] sm:$0xff]  ;;  %v1141_v34 = vld [vmem:[%s1835_s12 + $0xb8] sm:$0xff] }
 0x162   : > { %v1020_v10 = vld [vmem:[#allocation2 + $0x60] sm:$0xff]  ;;  %v1061_v40 = vmul.f32 %v1873_v26, %v1022_v22  ;;  %v1192_v56 = vmax.f32 %v1160_v44, 0.0  ;;  %v1066_v7 = vmul.f32 %v1873_v26, %v1027_v55  ;;  %v1103_v12 = vadd.f32 %v1878_v27, %v1064_v1  ;;  %v1143_v55 = vld [vmem:[%s1835_s12 + $0xc8] sm:$0xff] }
 0x163   : > { %v1023_v23 = vld [vmem:[#allocation2 + $0x78] sm:$0xff]  ;;  %v1059_v31 = vmul.f32 %v1873_v26, %v1020_v10  ;;  %v1191_v50 = vmax.f32 %v1159_v37, 0.0  ;;  %1222 = vst [vmem:[%s1840_s14 + $0x40] sm:$0xff] %v1190_v43  ;;  %v1193_v57 = vmax.f32 %v1161_v45, 0.0  ;;  %v1067_v15 = vmul.f32 %v1873_v26, %v1028_v60  ;;  %v1032_v28 = vld [vmem:[#allocation2 + $0xc0] sm:$0xff] }
 0x164   : > { %v1021_v16 = vld [vmem:[#allocation2 + $0x68] sm:$0xff]  ;;  %v1062_v41 = vmul.f32 %v1873_v26, %v1023_v23  ;;  %v1100_v52 = vadd.f32 %v1878_v27, %v1061_v40  ;;  %1224 = vst [vmem:[%s1840_s14 + $0x50] sm:$0xff] %v1192_v56  ;;  %v1104_v17 = vadd.f32 %v1878_v27, %v1065_v6  ;;  %v1105_v18 = vadd.f32 %v1878_v27, %v1066_v7  ;;  %v1034_v40 = vld [vmem:[#allocation2 + $0xd0] sm:$0xff]  ;;  %v1039_v59 = vld [vmem:[#allocation2 + $0xf8] sm:$0xff] }
 0x165   : > { %v1060_v36 = vmul.f32 %v1873_v26, %v1021_v16  ;;  %v1098_v38 = vadd.f32 %v1878_v27, %v1059_v31  ;;  %1223 = vst [vmem:[%s1840_s14 + $0x48] sm:$0xff] %v1191_v50  ;;  %1225 = vst [vmem:[%s1840_s14 + $0x58] sm:$0xff] %v1193_v57  ;;  %v1166_v16 = vadd.f32 %v1134_v0, %v1102_v4  ;;  %v1139_v23 = vld [vmem:[%s1835_s12 + $0xa8] sm:$0xff]  ;;  %v1142_v50 = vld [vmem:[%s1835_s12 + $0xc0] sm:$0xff] }
 0x166   : > { %v1101_v53 = vadd.f32 %v1878_v27, %v1062_v41  ;;  %v1164_v62 = vadd.f32 %v1132_v47, %v1100_v52  ;;  %v1068_v20 = vmul.f32 %v1873_v26, %v1029_v2  ;;  %v1167_v21 = vadd.f32 %v1135_v5, %v1103_v12  ;;  %v1035_v41 = vld [vmem:[#allocation2 + $0xd8] sm:$0xff]  ;;  %v1037_v52 = vld [vmem:[#allocation2 + $0xe8] sm:$0xff]  ;;  %v1146_v5 = vld [vmem:[%s1835_s12 + $0xe0] sm:$0xff] }
 0x167   : > { %v1099_v46 = vadd.f32 %v1878_v27, %v1060_v36  ;;  %v1162_v51 = vadd.f32 %v1130_v35, %v1098_v38  ;;  %v1106_v22 = vadd.f32 %v1878_v27, %v1067_v15  ;;  %v1069_v24 = vmul.f32 %v1873_v26, %v1030_v8  ;;  %v1033_v35 = vld [vmem:[#allocation2 + $0xc8] sm:$0xff]  ;;  %v1145_v0 = vld [vmem:[%s1835_s12 + $0xd8] sm:$0xff] }
 0x168   : > { %v1165_v63 = vadd.f32 %v1133_v48, %v1101_v53  ;;  %v1196_v10 = vmax.f32 %v1164_v62, 0.0  ;;  %v1070_v25 = vmul.f32 %v1873_v26, %v1031_v9  ;;  %v1198_v29 = vmax.f32 %v1166_v16, 0.0  ;;  %v1147_v9 = vld [vmem:[%s1835_s12 + $0xe8] sm:$0xff]  ;;  %v1148_v16 = vld [vmem:[%s1835_s12 + $0xf0] sm:$0xff] }
 0x169   : > { %v1163_v58 = vadd.f32 %v1131_v39, %v1099_v46  ;;  %v1194_v61 = vmax.f32 %v1162_v51, 0.0  ;;  %v1168_v30 = vadd.f32 %v1136_v13, %v1104_v17  ;;  %v1169_v31 = vadd.f32 %v1137_v14, %v1105_v18  ;;  %v1036_v46 = vld [vmem:[#allocation2 + $0xe0] sm:$0xff]  ;;  %v1149_v17 = vld [vmem:[%s1835_s12 + $0xf8] sm:$0xff] }
 0x16a   : > { %v1197_v11 = vmax.f32 %v1165_v63, 0.0  ;;  %1228 = vst [vmem:[%s1840_s14 + $0x70] sm:$0xff] %v1196_v10  ;;  %v1107_v32 = vadd.f32 %v1878_v27, %v1068_v20  ;;  %v1199_v36 = vmax.f32 %v1167_v21, 0.0  ;;  %v1170_v37 = vadd.f32 %v1138_v19, %v1106_v22  ;;  %1230 = vst [vmem:[%s1840_s14 + $0x80] sm:$0xff] %v1198_v29  ;;  %v1144_v63 = vld [vmem:[%s1835_s12 + $0xd0] sm:$0xff] }
 0x16b   : > { %v1195_v3 = vmax.f32 %v1163_v58, 0.0  ;;  %1226 = vst [vmem:[%s1840_s14 + $0x60] sm:$0xff] %v1194_v61  ;;  %v1108_v38 = vadd.f32 %v1878_v27, %v1069_v24  ;;  %v1109_v39 = vadd.f32 %v1878_v27, %v1070_v25  ;;  %v1200_v42 = vmax.f32 %v1168_v30, 0.0  ;;  %v1038_v58 = vld [vmem:[#allocation2 + $0xf0] sm:$0xff] }
 0x16c   : > { %1229 = vst [vmem:[%s1840_s14 + $0x78] sm:$0xff] %v1197_v11  ;;  %v1201_v43 = vmax.f32 %v1169_v31, 0.0  ;;  %v1171_v44 = vadd.f32 %v1139_v23, %v1107_v32  ;;  %v1071_v45 = vmul.f32 %v1873_v26, %v1032_v28  ;;  %1231 = vst [vmem:[%s1840_s14 + $0x88] sm:$0xff] %v1199_v36  ;;  %v1202_v47 = vmax.f32 %v1170_v37, 0.0 }
 0x16d   : > { %1227 = vst [vmem:[%s1840_s14 + $0x68] sm:$0xff] %v1195_v3  ;;  %v1172_v48 = vadd.f32 %v1140_v33, %v1108_v38  ;;  %v1173_v49 = vadd.f32 %v1141_v34, %v1109_v39  ;;  %v1072_v51 = vmul.f32 %v1873_v26, %v1033_v35  ;;  %1232 = vst [vmem:[%s1840_s14 + $0x90] sm:$0xff] %v1200_v42 }
 0x16e   : > { %1233 = vst [vmem:[%s1840_s14 + $0x98] sm:$0xff] %v1201_v43  ;;  %v1203_v53 = vmax.f32 %v1171_v44, 0.0  ;;  %v1110_v54 = vadd.f32 %v1878_v27, %v1071_v45  ;;  %v1073_v56 = vmul.f32 %v1873_v26, %v1034_v40  ;;  %v1074_v57 = vmul.f32 %v1873_v26, %v1035_v41  ;;  %1234 = vst [vmem:[%s1840_s14 + $0xa0] sm:$0xff] %v1202_v47 }
 0x16f   : > { %v1204_v60 = vmax.f32 %v1172_v48, 0.0  ;;  %v1205_v61 = vmax.f32 %v1173_v49, 0.0  ;;  %v1111_v62 = vadd.f32 %v1878_v27, %v1072_v51  ;;  %v1075_v1 = vmul.f32 %v1873_v26, %v1036_v46 }
 0x170   : > { %1235 = vst [vmem:[%s1840_s14 + $0xa8] sm:$0xff] %v1203_v53  ;;  %v1174_v2 = vadd.f32 %v1142_v50, %v1110_v54  ;;  %v1112_v3 = vadd.f32 %v1878_v27, %v1073_v56  ;;  %v1113_v4 = vadd.f32 %v1878_v27, %v1074_v57  ;;  %v1076_v6 = vmul.f32 %v1873_v26, %v1037_v52 }
 0x171   : > { %1236 = vst [vmem:[%s1840_s14 + $0xb0] sm:$0xff] %v1204_v60  ;;  %1237 = vst [vmem:[%s1840_s14 + $0xb8] sm:$0xff] %v1205_v61  ;;  %v1175_v7 = vadd.f32 %v1143_v55, %v1111_v62  ;;  %v1114_v8 = vadd.f32 %v1878_v27, %v1075_v1  ;;  %v1077_v10 = vmul.f32 %v1873_v26, %v1038_v58 }
 0x172   : > { %v1078_v11 = vmul.f32 %v1873_v26, %v1039_v59  ;;  %v1206_v12 = vmax.f32 %v1174_v2, 0.0  ;;  %v1176_v13 = vadd.f32 %v1144_v63, %v1112_v3  ;;  %v1177_v14 = vadd.f32 %v1145_v0, %v1113_v4 }
 0x173   : > { %v1115_v15 = vadd.f32 %v1878_v27, %v1076_v6  ;;  %v1207_v18 = vmax.f32 %v1175_v7, 0.0  ;;  %v1178_v19 = vadd.f32 %v1146_v5, %v1114_v8  ;;  %v1116_v20 = vadd.f32 %v1878_v27, %v1077_v10 }
 0x174   : > { %v1117_v21 = vadd.f32 %v1878_v27, %v1078_v11  ;;  %1238 = vst [vmem:[%s1840_s14 + $0xc0] sm:$0xff] %v1206_v12  ;;  %v1208_v26 = vmax.f32 %v1176_v13, 0.0  ;;  %v1209_v22 = vmax.f32 %v1177_v14, 0.0 }
 0x175   : > { %v1179_v23 = vadd.f32 %v1147_v9, %v1115_v15  ;;  %1239 = vst [vmem:[%s1840_s14 + $0xc8] sm:$0xff] %v1207_v18  ;;  %v1210_v24 = vmax.f32 %v1178_v19, 0.0  ;;  %v1180_v25 = vadd.f32 %v1148_v16, %v1116_v20 }
 0x176   : > { %v1181_v28 = vadd.f32 %v1149_v17, %v1117_v21  ;;  %1240 = vst [vmem:[%s1840_s14 + $0xd0] sm:$0xff] %v1208_v26  ;;  %1241 = vst [vmem:[%s1840_s14 + $0xd8] sm:$0xff] %v1209_v22 }
 0x177   : > { %v1211_v29 = vmax.f32 %v1179_v23, 0.0  ;;  %1242 = vst [vmem:[%s1840_s14 + $0xe0] sm:$0xff] %v1210_v24  ;;  %v1212_v30 = vmax.f32 %v1180_v25, 0.0 }
 0x178   : > { %v1213_v31 = vmax.f32 %v1181_v28, 0.0 }
 0x179   : > { %1243 = vst [vmem:[%s1840_s14 + $0xe8] sm:$0xff] %v1211_v29  ;;  %1244 = vst [vmem:[%s1840_s14 + $0xf0] sm:$0xff] %v1212_v30 }
 0x17a   : > { %1245 = vst [vmem:[%s1840_s14 + $0xf8] sm:$0xff] %v1213_v31 }
 0x17b PF: > { %s15_s24 = sadd.s32 1, %s1661_s24   ;;  %s2035_s18 = smov %s1641_s19 }
 0x17c   : > { %p12_p0 = scmp.ge.s32.totalorder %s15_s24, 12   ;;  %s2036_s19 = smov %s1745_s6 }
 0x17d   : > { %s2037_s20 = smov %s1653_s22  ;;  %s2038_s21 = smov %s1657_s23 }
 0x17e   : > { %s2039_s22 = smov %s2042_s25  ;;  %s2040_s23 = smov %s2046_s26 }
 0x17f   :  { %14 = sbr.rel (!%p12_p0) target bundleno = 4 (0x4), region = 136 }

// kernel: resnet18_forward.26
= control target key start
LH: loop header
LB: loop body
LE: loop exit
PB: predicated region body
PF: predicated region fallthrough
CT: control target
= control target key end

     0   :  { %s1130_s15 = smov 0   ;;  %s1132_s16 = smov 0   ;;  %s1307_s0 = inlined_call_operand.vmem [shape: bf16[128,640], index: 0, kind: input, shape index: {}]   ;;  %s1308_s1 = inlined_call_operand.vmem [shape: bf16[640,128], index: 1, kind: input, shape index: {}]   ;;  %s1309_s2 = inlined_call_operand.vmem [shape: f32[1,128], index: 2, kind: input, shape index: {}]   ;;  %s1310_s3 = inlined_call_operand.vmem [shape: f32[1,128], index: 3, kind: input, shape index: {}]   ;;  %s1311_s4 = inlined_call_operand.vmem [shape: f32[128,128], index: 4, kind: output, shape index: {}]  }
   0x1   :  { %s1134_s17 = smov 0   ;;  %s1136_s18 = smov 0  }
   0x2   :  { %s1138_s19 = smov 0  }
   0x3 LB: > { %s26_s20 = sadd.s32 1, %s1098_s18  ;;  %p49_p1 = scmp.ne.s32.totalorder %s1090_s16, %s1086_s15  ;;  %s1102_s19 = sphi %s1138_s19, %s14_s19   ;;  %s1098_s18 = sphi %s1136_s18, %s1315_s18   ;;  %s1094_s17 = sphi %s1134_s17, %s1314_s17   ;;  %s1090_s16 = sphi %s1132_s16, %s1313_s16   ;;  %s1086_s15 = sphi %s1130_s15, %s1312_s15  }
   0x4   : > { %p27_p0 = scmp.ge.s32.totalorder %s26_s20, 5  ;;  %p50_p2 = scmp.eq.s32.totalorder %s1102_s19, 0 }
   0x5   : > { %s42_s22 = sadd.s32 1, %s1090_s16  ;;  %p912_p5 = scmp.ge.s32.totalorder %s1102_s19, 5 }
   0x6   : > { %s1317_s20 = smov (%p27_p0, %s26_s20), 0  ;;  %p51_p3 = por %p50_p2, %p49_p1 }
   0x7   : > { %s38_s21 = ssub.s32 %s1098_s18, %s1317_s20  ;;  %195 = sbr.rel (%p912_p5) target bundleno = 28 (0x1c), region = 24 }
   0x8   : > { %p40_p4 = scmp.eq.s32.totalorder %s38_s21, 0 }
   0xa   : > { %s1165_s23 = scalar_select %p40_p4, %s1090_s16, %s42_s22  }
   0xe   : > { %198 = sbr.rel (!%p51_p3) target bundleno = 28 (0x1c), region = 28  ;;  %s200_s24 = sand.u32 (%p51_p3), 1, %s1090_s16  }
   0xf   : > { %s914_s25 = sshll.u32 (%p51_p3), %s1098_s18, 2  ;;  %s913_s26 = sshll.u32 (%p51_p3), %s200_s24, 6 }
  0x10   : > { %s1173_s29 = scalar_lea.vmem (%p51_p3), %s1307_s0, %s914_s25  ;;  %s202_s30 = scalar_lea.vmem (%p51_p3), [#allocation3], %s913_s26 }
  0x11   : > { %v223_v0 = vld [vmem:[%s1173_s29] sm:$0xf] (%p51_p3)  ;;  %v225_v1 = vld [vmem:[%s1173_s29 + $0x14] sm:$0xf] (%p51_p3)  ;;  %v227_v2 = vld [vmem:[%s1173_s29 + $0x28] sm:$0xf] (%p51_p3) }
  0x12   : > { %224 = vst [vmem:[%s202_s30] sm:$0xf] (%p51_p3), %v223_v0  ;;  %226 = vst [vmem:[%s202_s30 + $0x4] sm:$0xf] (%p51_p3), %v225_v1  ;;  %v229_v3 = vld [vmem:[%s1173_s29 + $0x3c] sm:$0xf] (%p51_p3) }
  0x13   : > { %v231_v4 = vld [vmem:[%s1173_s29 + $0x50] sm:$0xf] (%p51_p3)  ;;  %228 = vst [vmem:[%s202_s30 + $0x8] sm:$0xf] (%p51_p3), %v227_v2  ;;  %230 = vst [vmem:[%s202_s30 + $0xc] sm:$0xf] (%p51_p3), %v229_v3 }
  0x14   : > { %232 = vst [vmem:[%s202_s30 + $0x10] sm:$0xf] (%p51_p3), %v231_v4  ;;  %v233_v5 = vld [vmem:[%s1173_s29 + $0x64] sm:$0xf] (%p51_p3)  ;;  %v235_v6 = vld [vmem:[%s1173_s29 + $0x78] sm:$0xf] (%p51_p3) }
  0x15   : > { %v237_v7 = vld [vmem:[%s1173_s29 + $0x8c] sm:$0xf]  ;;  %234 = vst [vmem:[%s202_s30 + $0x14] sm:$0xf] %v233_v5  ;;  %236 = vst [vmem:[%s202_s30 + $0x18] sm:$0xf] %v235_v6 }
  0x16   : > { %238 = vst [vmem:[%s202_s30 + $0x1c] sm:$0xf] %v237_v7  ;;  %v239_v8 = vld [vmem:[%s1173_s29 + $0xa0] sm:$0xf]  ;;  %v241_v9 = vld [vmem:[%s1173_s29 + $0xb4] sm:$0xf] }
  0x17   : > { %v243_v10 = vld [vmem:[%s1173_s29 + $0xc8] sm:$0xf]  ;;  %240 = vst [vmem:[%s202_s30 + $0x20] sm:$0xf] %v239_v8  ;;  %242 = vst [vmem:[%s202_s30 + $0x24] sm:$0xf] %v241_v9 }
  0x18   : > { %244 = vst [vmem:[%s202_s30 + $0x28] sm:$0xf] %v243_v10  ;;  %v245_v11 = vld [vmem:[%s1173_s29 + $0xdc] sm:$0xf]  ;;  %v247_v12 = vld [vmem:[%s1173_s29 + $0xf0] sm:$0xf] }
  0x19   : > { %v249_v13 = vld [vmem:[%s1173_s29 + $0x104] sm:$0xf]  ;;  %246 = vst [vmem:[%s202_s30 + $0x2c] sm:$0xf] %v245_v11  ;;  %248 = vst [vmem:[%s202_s30 + $0x30] sm:$0xf] %v247_v12 }
  0x1a   : > { %250 = vst [vmem:[%s202_s30 + $0x34] sm:$0xf] %v249_v13  ;;  %v251_v14 = vld [vmem:[%s1173_s29 + $0x118] sm:$0xf]  ;;  %v253_v15 = vld [vmem:[%s1173_s29 + $0x12c] sm:$0xf] }
  0x1b   : > { %252 = vst [vmem:[%s202_s30 + $0x38] sm:$0xf] %v251_v14  ;;  %254 = vst [vmem:[%s202_s30 + $0x3c] sm:$0xf] %v253_v15 }
  0x1c PF: > { %p915_p6 = scmp.ge.s32.totalorder %s1102_s19, 1  ;;  %p320_p7 = scmp.lt.s32.totalorder %s1102_s19, 6 }
  0x1e   : > { %p321_p8 = pnand %p915_p6, %p320_p7 }
  0x1f   : > { %s327_s5 = sand.u32 (!%p321_p8), 1, %s1086_s15   ;;  %s917_s6 = sshll.u32 (!%p321_p8), %s1094_s17, 4 }
  0x20   : > { %324 = sbr.rel (%p321_p8) target bundleno = 323 (0x143), region = 73  ;;  %s916_s7 = sshll.u32 (!%p321_p8), %s327_s5, 6 }
  0x21   : > { %p371_p9 = scmp.lt.s32.totalorder (!%p321_p8), %s917_s6, 79  ;;  %s1200_s12 = scalar_lea.vmem (!%p321_p8), [#allocation3], %s916_s7 }
  0x22   : > { %p919_p10 = scmp.ne.s32.totalorder (!%p321_p8), %s1094_s17, 0 }
  0x27   : > { %s1319_s6 = smov (!%p371_p9, %s917_s6), 79  ;;  %398 = sbr.rel (%p919_p10) target bundleno = 49 (0x31), region = 81 }
  0x28   : > { %s918_s8 = sshll.u32 %s1319_s6, 2  ;;  %v1104_v16 = vmov (!%p919_p10), 0.0  }
  0x29   : > { %s1198_s11 = scalar_lea.vmem %s1308_s1, %s918_s8  ;;  %399 = vst [vmem:[#allocation2] sm:$0xff] (!%p919_p10), %v1104_v16  ;;  %400 = vst [vmem:[#allocation2 + $0x8] sm:$0xff] (!%p919_p10), %v1104_v16 }
  0x2a   : > { %401 = vst [vmem:[#allocation2 + $0x10] sm:$0xff] (!%p919_p10), %v1104_v16  ;;  %402 = vst [vmem:[#allocation2 + $0x18] sm:$0xff] (!%p919_p10), %v1104_v16 }
  0x2b   : > { %403 = vst [vmem:[#allocation2 + $0x20] sm:$0xff] (!%p919_p10), %v1104_v16  ;;  %404 = vst [vmem:[#allocation2 + $0x28] sm:$0xff] (!%p919_p10), %v1104_v16 }
  0x2c   : > { %405 = vst [vmem:[#allocation2 + $0x30] sm:$0xff] (!%p919_p10), %v1104_v16  ;;  %406 = vst [vmem:[#allocation2 + $0x38] sm:$0xff] (!%p919_p10), %v1104_v16 }
  0x2d   : > { %407 = vst [vmem:[#allocation2 + $0x40] sm:$0xff] (!%p919_p10), %v1104_v16  ;;  %408 = vst [vmem:[#allocation2 + $0x48] sm:$0xff] (!%p919_p10), %v1104_v16 }
  0x2e   : > { %409 = vst [vmem:[#allocation2 + $0x50] sm:$0xff] %v1104_v16  ;;  %410 = vst [vmem:[#allocation2 + $0x58] sm:$0xff] %v1104_v16 }
  0x2f   : > { %411 = vst [vmem:[#allocation2 + $0x60] sm:$0xff] %v1104_v16  ;;  %412 = vst [vmem:[#allocation2 + $0x68] sm:$0xff] %v1104_v16 }
  0x30   : > { %413 = vst [vmem:[#allocation2 + $0x70] sm:$0xff] %v1104_v16  ;;  %414 = vst [vmem:[#allocation2 + $0x78] sm:$0xff] %v1104_v16 }
  0x31 PF: > { %v1048_v17 = vld [vmem:[%s1198_s11] sm:$0xff]   ;;  %v1049_v18 = vld [vmem:[%s1198_s11 + $0x8] sm:$0xff]   ;;  %v1050_v19 = vld [vmem:[%s1198_s11 + $0x10] sm:$0xff]   ;;  %p936_p11 = scmp.ne.s32.totalorder %s1094_s17, 4 }
  0x32   : > { %959 = vmatprep.subr.bf16.mxu0 %v1048_v17  ;;  %991 = vmatprep.subr.bf16.mxu1 %v1048_v17  ;;  %v1051_v20 = vld [vmem:[%s1198_s11 + $0x18] sm:$0xff]   ;;  %v1056_v21 = vld [vmem:[%s1200_s12] sm:$0xff]   ;;  %v1053_v24 = vld [vmem:[%s1198_s11 + $0x28] sm:$0xff]  }
  0x33   : > { %960 = vmatpush3.bf16.msra.mxu0 %v1048_v17  ;;  %999 = vmatpush3.bf16.msra.mxu1 %v1048_v17  ;;  %v1057_v22 = vld [vmem:[%s1200_s12 + $0x20] sm:$0xff]   ;;  %v1054_v25 = vld [vmem:[%s1198_s11 + $0x30] sm:$0xff]   ;;  %v1055_v26 = vld [vmem:[%s1198_s11 + $0x38] sm:$0xff]  }
  0x34   : > { %961 = vmatprep.subr.bf16.mxu0 %v1049_v18  ;;  %992 = vmatprep.subr.bf16.mxu1 %v1049_v18  ;;  %v1052_v23 = vld [vmem:[%s1198_s11 + $0x20] sm:$0xff]   ;;  %v1058_v27 = vld [vmem:[%s1200_s12 + $0x8] sm:$0xff]   ;;  %v1060_v29 = vld [vmem:[%s1200_s12 + $0x10] sm:$0xff]  }
  0x35   : > { %975 = vmatprep.mubr.bf16.mxu0 %v1056_v21  ;;  %983 = vmatprep.mubr.bf16.mxu1 %v1057_v22  ;;  %v1059_v28 = vld [vmem:[%s1200_s12 + $0x28] sm:$0xff]   ;;  %v1061_v30 = vld [vmem:[%s1200_s12 + $0x30] sm:$0xff]   ;;  %v1062_v31 = vld [vmem:[%s1200_s12 + $0x18] sm:$0xff]  }
  0x36   : > { %v1063_v32 = vld [vmem:[%s1200_s12 + $0x38] sm:$0xff]   ;;  %v417_v33 = vld [vmem:[#allocation2 + $0x10] sm:$0xff]  ;;  %v415_v35 = vld [vmem:[#allocation2] sm:$0xff] }
  0x37   : > { %962 = vmatpush3.bf16.msra.mxu0 %v1049_v18  ;;  %1000 = vmatpush3.bf16.msra.mxu1 %v1049_v18  ;;  %v425_v34 = vld [vmem:[#allocation2 + $0x50] sm:$0xff]  ;;  %v423_v36 = vld [vmem:[#allocation2 + $0x40] sm:$0xff]  ;;  %v418_v39 = vld [vmem:[#allocation2 + $0x18] sm:$0xff] }
  0x38   : > { %963 = vmatprep.subr.bf16.mxu0 %v1050_v19  ;;  %993 = vmatprep.subr.bf16.mxu1 %v1050_v19  ;;  %v426_v40 = vld [vmem:[#allocation2 + $0x58] sm:$0xff]  ;;  %v416_v45 = vld [vmem:[#allocation2 + $0x8] sm:$0xff]  ;;  %v421_v57 = vld [vmem:[#allocation2 + $0x30] sm:$0xff] }
  0x39   : > { %v424_v46 = vld [vmem:[#allocation2 + $0x48] sm:$0xff]  ;;  %v429_v58 = vld [vmem:[#allocation2 + $0x70] sm:$0xff]  ;;  %v419_v59 = vld [vmem:[#allocation2 + $0x20] sm:$0xff] }
  0x3a   : > { %v427_v60 = vld [vmem:[#allocation2 + $0x60] sm:$0xff]  ;;  %v422_v63 = vld [vmem:[#allocation2 + $0x38] sm:$0xff]  ;;  %v420_v5 = vld [vmem:[#allocation2 + $0x28] sm:$0xff] }
  0x3b   : > { %964 = vmatpush3.bf16.msra.mxu0 %v1050_v19  ;;  %1001 = vmatpush3.bf16.msra.mxu1 %v1050_v19  ;;  %v430_v0 = vld [vmem:[#allocation2 + $0x78] sm:$0xff]  ;;  %v428_v6 = vld [vmem:[#allocation2 + $0x68] sm:$0xff]  ;;  %v937_v18 = vld [vmem:[%s1309_s2] ss:$0 sm:$0xff] (!%p936_p11) }
  0x3c   : > { %965 = vmatprep.subr.bf16.mxu0 %v1051_v20  ;;  %994 = vmatprep.subr.bf16.mxu1 %v1051_v20  ;;  %v1226_v19 = vld [vmem:[%s1310_s3] ss:$0 sm:$0xff] (!%p936_p11) }
  0x3f   : > { %966 = vmatpush3.bf16.msra.mxu0 %v1051_v20  ;;  %1002 = vmatpush3.bf16.msra.mxu1 %v1051_v20 }
  0x40   : > { %967 = vmatprep.subr.bf16.mxu0 %v1052_v23  ;;  %995 = vmatprep.subr.bf16.mxu1 %v1052_v23 }
  0x43   : > { %968 = vmatpush3.bf16.msra.mxu0 %v1052_v23  ;;  %1003 = vmatpush3.bf16.msra.mxu1 %v1052_v23 }
  0x44   : > { %969 = vmatprep.subr.bf16.mxu0 %v1053_v24  ;;  %996 = vmatprep.subr.bf16.mxu1 %v1053_v24 }
  0x47   : > { %970 = vmatpush3.bf16.msra.mxu0 %v1053_v24  ;;  %1004 = vmatpush3.bf16.msra.mxu1 %v1053_v24 }
  0x48   : > { %971 = vmatprep.subr.bf16.mxu0 %v1054_v25  ;;  %997 = vmatprep.subr.bf16.mxu1 %v1054_v25 }
  0x4b   : > { %972 = vmatpush3.bf16.msra.mxu0 %v1054_v25  ;;  %1005 = vmatpush3.bf16.msra.mxu1 %v1054_v25 }
  0x4c   : > { %973 = vmatprep.subr.bf16.mxu0 %v1055_v26  ;;  %998 = vmatprep.subr.bf16.mxu1 %v1055_v26 }
  0x4f   : > { %974 = vmatpush3.bf16.msra.mxu0 %v1055_v26  ;;  %1006 = vmatpush3.bf16.msra.mxu1 %v1055_v26 }
  0x52   : > { %976 = vmatmul.mubr.bf16.vlgmr.msra.gmra.mrb[0].mxu0 %v1058_v27  ;;  %984 = vmatmul.mubr.bf16.vlgmr.msra.gmra.mrb[0].mxu1 %v1059_v28 }
  0x53   : > { %979 = vmatprep.mubr.bf16.mxu0 %v1060_v29  ;;  %987 = vmatprep.mubr.bf16.mxu1 %v1061_v30 }
  0x5a   : > { %980 = vmatmul.mubr.bf16.gmra.mrb[4].mxu0 %v1062_v31  ;;  %988 = vmatmul.mubr.bf16.gmra.mrb[4].mxu1 %v1063_v32 }
 0x125   : > { %v977_v37 = vpop.f32.mrb[0].mxu0  ;;  %v985_v38 = vpop.f32.mrb[0].mxu1 }
 0x126   : > { %v658_v41 = vadd.f32 %v977_v37, %v417_v33  ;;  %v666_v42 = vadd.f32 %v985_v38, %v425_v34  ;;  %v593_v43 = vpop.f32.mrb[1].mxu0  ;;  %v625_v44 = vpop.f32.mrb[1].mxu1 }
 0x127   : > { %v656_v47 = vadd.f32 %v593_v43, %v415_v35  ;;  %v664_v48 = vadd.f32 %v625_v44, %v423_v36  ;;  %v978_v49 = vpop.f32.mrb[2].mxu0  ;;  %v986_v50 = vpop.f32.mrb[2].mxu1 }
 0x128   : > { %674 = vst [vmem:[#allocation2 + $0x10] sm:$0xff] %v658_v41  ;;  %682 = vst [vmem:[#allocation2 + $0x50] sm:$0xff] %v666_v42  ;;  %v659_v51 = vadd.f32 %v978_v49, %v418_v39  ;;  %v667_v52 = vadd.f32 %v986_v50, %v426_v40  ;;  %v596_v53 = vpop.f32.mrb[3].mxu0  ;;  %v628_v54 = vpop.f32.mrb[3].mxu1 }
 0x129   : > { %672 = vst [vmem:[#allocation2] sm:$0xff] %v656_v47  ;;  %680 = vst [vmem:[#allocation2 + $0x40] sm:$0xff] %v664_v48  ;;  %v657_v55 = vadd.f32 %v596_v53, %v416_v45  ;;  %v665_v56 = vadd.f32 %v628_v54, %v424_v46 }
 0x12a   : > { %675 = vst [vmem:[#allocation2 + $0x18] sm:$0xff] %v659_v51  ;;  %683 = vst [vmem:[#allocation2 + $0x58] sm:$0xff] %v667_v52 }
 0x12b   : > { %673 = vst [vmem:[#allocation2 + $0x8] sm:$0xff] %v657_v55  ;;  %681 = vst [vmem:[#allocation2 + $0x48] sm:$0xff] %v665_v56 }
 0x12d   : > { %v981_v61 = vpop.f32.mrb[4].mxu0  ;;  %v989_v62 = vpop.f32.mrb[4].mxu1  ;;  %691 = sbr.rel (%p936_p11) target bundleno = 323 (0x143), region = 85 }
 0x12e   : > { %v662_v1 = vadd.f32 %v981_v61, %v421_v57  ;;  %v670_v2 = vadd.f32 %v989_v62, %v429_v58  ;;  %v609_v3 = vpop.f32.mrb[5].mxu0  ;;  %v641_v4 = vpop.f32.mrb[5].mxu1 }
 0x12f   : > { %v660_v7 = vadd.f32 %v609_v3, %v419_v59  ;;  %v668_v8 = vadd.f32 %v641_v4, %v427_v60  ;;  %v982_v9 = vpop.f32.mrb[6].mxu0  ;;  %v990_v10 = vpop.f32.mrb[6].mxu1  ;;  %v694_v22 = vld [vmem:[#allocation2 + $0x10] sm:$0xff] (!%p936_p11) }
 0x130   : > { %678 = vst [vmem:[#allocation2 + $0x30] sm:$0xff] %v662_v1  ;;  %686 = vst [vmem:[#allocation2 + $0x70] sm:$0xff] %v670_v2  ;;  %v663_v11 = vadd.f32 %v982_v9, %v422_v63  ;;  %v671_v12 = vadd.f32 %v990_v10, %v430_v0  ;;  %v612_v13 = vpop.f32.mrb[7].mxu0  ;;  %v644_v14 = vpop.f32.mrb[7].mxu1  ;;  %v692_v17 = vld [vmem:[#allocation2] sm:$0xff] (!%p936_p11)  ;;  %v717_v25 = vmul.f32 (!%p936_p11), %v937_v18, %v694_v22  ;;  %v702_v45 = vld [vmem:[#allocation2 + $0x50] sm:$0xff] (!%p936_p11) }
 0x131   : > { %676 = vst [vmem:[#allocation2 + $0x20] sm:$0xff] %v660_v7  ;;  %684 = vst [vmem:[#allocation2 + $0x60] sm:$0xff] %v668_v8  ;;  %v661_v15 = vadd.f32 %v612_v13, %v420_v5  ;;  %v669_v16 = vadd.f32 %v644_v14, %v428_v6  ;;  %v715_v20 = vmul.f32 (!%p936_p11), %v937_v18, %v692_v17  ;;  %v695_v23 = vld [vmem:[#allocation2 + $0x18] sm:$0xff] (!%p936_p11)  ;;  %v700_v39 = vld [vmem:[#allocation2 + $0x40] sm:$0xff] (!%p936_p11) }
 0x132   : > { %679 = vst [vmem:[#allocation2 + $0x38] sm:$0xff] %v663_v11  ;;  %687 = vst [vmem:[#allocation2 + $0x78] sm:$0xff] %v671_v12  ;;  %v693_v21 = vld [vmem:[#allocation2 + $0x8] sm:$0xff] (!%p936_p11)  ;;  %v718_v26 = vmul.f32 (!%p936_p11), %v937_v18, %v695_v23  ;;  %v740_v36 = vadd.f32 (!%p936_p11), %v1226_v19, %v717_v25  ;;  %v703_v46 = vld [vmem:[#allocation2 + $0x58] sm:$0xff] (!%p936_p11)  ;;  %v723_v57 = vmul.f32 (!%p936_p11), %v937_v18, %v700_v39 }
 0x133   : > { %677 = vst [vmem:[#allocation2 + $0x28] sm:$0xff] %v661_v15  ;;  %685 = vst [vmem:[#allocation2 + $0x68] sm:$0xff] %v669_v16  ;;  %v716_v24 = vmul.f32 (!%p936_p11), %v937_v18, %v693_v21  ;;  %v738_v30 = vadd.f32 (!%p936_p11), %v1226_v19, %v715_v20  ;;  %v701_v44 = vld [vmem:[#allocation2 + $0x48] sm:$0xff] (!%p936_p11)  ;;  %v725_v61 = vmul.f32 (!%p936_p11), %v937_v18, %v702_v45 }
 0x134   : > { %v741_v37 = vadd.f32 %v1226_v19, %v718_v26  ;;  %v756_v48 = vmax.f32 %v740_v36, 0.0  ;;  %v724_v60 = vmul.f32 %v937_v18, %v701_v44  ;;  %v726_v62 = vmul.f32 %v937_v18, %v703_v46 }
 0x135   : > { %v739_v35 = vadd.f32 %v1226_v19, %v716_v24  ;;  %v754_v40 = vmax.f32 %v738_v30, 0.0  ;;  %v746_v63 = vadd.f32 %v1226_v19, %v723_v57  ;;  %v748_v4 = vadd.f32 %v1226_v19, %v725_v61 }
 0x136   : > { %v757_v49 = vmax.f32 %v741_v37, 0.0  ;;  %772 = vst [vmem:[%s1311_s4 + $0x10] sm:$0xff] %v756_v48  ;;  %v747_v3 = vadd.f32 %v1226_v19, %v724_v60  ;;  %v749_v5 = vadd.f32 %v1226_v19, %v726_v62 }
 0x137   : > { %v698_v29 = vld [vmem:[#allocation2 + $0x30] sm:$0xff]  ;;  %v755_v47 = vmax.f32 %v739_v35, 0.0  ;;  %770 = vst [vmem:[%s1311_s4] sm:$0xff] %v754_v40  ;;  %v762_v7 = vmax.f32 %v746_v63, 0.0  ;;  %v764_v12 = vmax.f32 %v748_v4, 0.0 }
 0x138   : > { %v696_v27 = vld [vmem:[#allocation2 + $0x20] sm:$0xff]  ;;  %v721_v33 = vmul.f32 %v937_v18, %v698_v29  ;;  %v706_v53 = vld [vmem:[#allocation2 + $0x70] sm:$0xff]  ;;  %773 = vst [vmem:[%s1311_s4 + $0x18] sm:$0xff] %v757_v49  ;;  %v763_v11 = vmax.f32 %v747_v3, 0.0  ;;  %v765_v13 = vmax.f32 %v749_v5, 0.0 }
 0x139   : > { %v719_v31 = vmul.f32 %v937_v18, %v696_v27  ;;  %v699_v34 = vld [vmem:[#allocation2 + $0x38] sm:$0xff]  ;;  %v704_v51 = vld [vmem:[#allocation2 + $0x60] sm:$0xff]  ;;  %771 = vst [vmem:[%s1311_s4 + $0x8] sm:$0xff] %v755_v47  ;;  %v729_v2 = vmul.f32 %v937_v18, %v706_v53  ;;  %778 = vst [vmem:[%s1311_s4 + $0x40] sm:$0xff] %v762_v7 }
 0x13a   : > { %v697_v28 = vld [vmem:[#allocation2 + $0x28] sm:$0xff]  ;;  %v722_v38 = vmul.f32 %v937_v18, %v699_v34  ;;  %v744_v43 = vadd.f32 %v1226_v19, %v721_v33  ;;  %v707_v58 = vld [vmem:[#allocation2 + $0x78] sm:$0xff]  ;;  %v727_v0 = vmul.f32 %v937_v18, %v704_v51  ;;  %779 = vst [vmem:[%s1311_s4 + $0x48] sm:$0xff] %v763_v11  ;;  %780 = vst [vmem:[%s1311_s4 + $0x50] sm:$0xff] %v764_v12 }
 0x13b   : > { %v720_v32 = vmul.f32 %v937_v18, %v697_v28  ;;  %v742_v41 = vadd.f32 %v1226_v19, %v719_v31  ;;  %v705_v52 = vld [vmem:[#allocation2 + $0x68] sm:$0xff]  ;;  %v730_v6 = vmul.f32 %v937_v18, %v707_v58  ;;  %v752_v10 = vadd.f32 %v1226_v19, %v729_v2  ;;  %781 = vst [vmem:[%s1311_s4 + $0x58] sm:$0xff] %v765_v13 }
 0x13c   : > { %v745_v50 = vadd.f32 %v1226_v19, %v722_v38  ;;  %v760_v56 = vmax.f32 %v744_v43, 0.0  ;;  %v728_v1 = vmul.f32 %v937_v18, %v705_v52  ;;  %v750_v8 = vadd.f32 %v1226_v19, %v727_v0 }
 0x13d   : > { %v743_v42 = vadd.f32 %v1226_v19, %v720_v32  ;;  %v758_v54 = vmax.f32 %v742_v41, 0.0  ;;  %v753_v14 = vadd.f32 %v1226_v19, %v730_v6  ;;  %v768_v17 = vmax.f32 %v752_v10, 0.0 }
 0x13e   : > { %v761_v59 = vmax.f32 %v745_v50, 0.0  ;;  %776 = vst [vmem:[%s1311_s4 + $0x30] sm:$0xff] %v760_v56  ;;  %v751_v9 = vadd.f32 %v1226_v19, %v728_v1  ;;  %v766_v15 = vmax.f32 %v750_v8, 0.0 }
 0x13f   : > { %v759_v55 = vmax.f32 %v743_v42, 0.0  ;;  %774 = vst [vmem:[%s1311_s4 + $0x20] sm:$0xff] %v758_v54  ;;  %v769_v18 = vmax.f32 %v753_v14, 0.0  ;;  %784 = vst [vmem:[%s1311_s4 + $0x70] sm:$0xff] %v768_v17 }
 0x140   : > { %777 = vst [vmem:[%s1311_s4 + $0x38] sm:$0xff] %v761_v59  ;;  %v767_v16 = vmax.f32 %v751_v9, 0.0  ;;  %782 = vst [vmem:[%s1311_s4 + $0x60] sm:$0xff] %v766_v15 }
 0x141   : > { %775 = vst [vmem:[%s1311_s4 + $0x28] sm:$0xff] %v759_v55  ;;  %785 = vst [vmem:[%s1311_s4 + $0x78] sm:$0xff] %v769_v18 }
 0x142   : > { %783 = vst [vmem:[%s1311_s4 + $0x68] sm:$0xff] %v767_v16 }
 0x143 PF: > { %s14_s19 = sadd.s32 1, %s1102_s19   ;;  %s1312_s15 = smov %s1090_s16 }
 0x144   : > { %p11_p12 = scmp.ge.s32.totalorder %s14_s19, 7   ;;  %s1313_s16 = smov %s1165_s23 }
 0x145   : > { %s1314_s17 = smov %s1098_s18  ;;  %s1315_s18 = smov %s1317_s20 }
 0x146   :  { %13 = sbr.rel (!%p11_p12) target bundleno = 3 (0x3), region = 129 }

// kernel: resnet18_forward.27
= control target key start
LH: loop header
LB: loop body
LE: loop exit
PB: predicated region body
PF: predicated region fallthrough
CT: control target
= control target key end

     0   :  { %s621_s1 = inlined_call_operand.vmem [shape: bf16[128,128], index: 1, kind: input, shape index: {}]   ;;  %s622_s0 = inlined_call_operand.vmem [shape: bf16[128,128], index: 0, kind: input, shape index: {}]   ;;  %s623_s2 = inlined_call_operand.vmem [shape: f32[1,128], index: 2, kind: input, shape index: {}]   ;;  %s624_s3 = inlined_call_operand.vmem [shape: f32[1,128], index: 3, kind: input, shape index: {}]   ;;  %s625_s4 = inlined_call_operand.vmem [shape: f32[128,128], index: 4, kind: output, shape index: {}]  }
   0x1   :  { %v478_v0 = vld [vmem:[%s621_s1] sm:$0xff]   ;;  %v479_v1 = vld [vmem:[%s621_s1 + $0x8] sm:$0xff]   ;;  %v480_v2 = vld [vmem:[%s621_s1 + $0x10] sm:$0xff]  }
   0x2   :  { %430 = vmatprep.subr.bf16.mxu0 %v478_v0  ;;  %462 = vmatprep.subr.bf16.mxu1 %v478_v0  ;;  %v481_v3 = vld [vmem:[%s621_s1 + $0x18] sm:$0xff]   ;;  %v486_v4 = vld [vmem:[%s622_s0] sm:$0xff]   ;;  %v483_v7 = vld [vmem:[%s621_s1 + $0x28] sm:$0xff]  }
   0x3   :  { %431 = vmatpush3.bf16.msra.mxu0 %v478_v0  ;;  %470 = vmatpush3.bf16.msra.mxu1 %v478_v0  ;;  %v487_v5 = vld [vmem:[%s622_s0 + $0x20] sm:$0xff]   ;;  %v484_v8 = vld [vmem:[%s621_s1 + $0x30] sm:$0xff]   ;;  %v485_v9 = vld [vmem:[%s621_s1 + $0x38] sm:$0xff]  }
   0x4   :  { %432 = vmatprep.subr.bf16.mxu0 %v479_v1  ;;  %463 = vmatprep.subr.bf16.mxu1 %v479_v1  ;;  %v482_v6 = vld [vmem:[%s621_s1 + $0x20] sm:$0xff]   ;;  %v488_v10 = vld [vmem:[%s622_s0 + $0x8] sm:$0xff]   ;;  %v490_v12 = vld [vmem:[%s622_s0 + $0x10] sm:$0xff]  }
   0x5   :  { %446 = vmatprep.mubr.bf16.mxu0 %v486_v4  ;;  %454 = vmatprep.mubr.bf16.mxu1 %v487_v5  ;;  %v489_v11 = vld [vmem:[%s622_s0 + $0x28] sm:$0xff]   ;;  %v491_v13 = vld [vmem:[%s622_s0 + $0x30] sm:$0xff]   ;;  %v492_v14 = vld [vmem:[%s622_s0 + $0x18] sm:$0xff]  }
   0x6   :  { %v493_v15 = vld [vmem:[%s622_s0 + $0x38] sm:$0xff]   ;;  %v412_v16 = vld [vmem:[%s623_s2] ss:$0 sm:$0xff] }
   0x7   :  { %433 = vmatpush3.bf16.msra.mxu0 %v479_v1  ;;  %471 = vmatpush3.bf16.msra.mxu1 %v479_v1  ;;  %v413_v18 = vld [vmem:[%s624_s3] ss:$0 sm:$0xff] }
   0x8   :  { %434 = vmatprep.subr.bf16.mxu0 %v480_v2  ;;  %464 = vmatprep.subr.bf16.mxu1 %v480_v2 }
   0xb   :  { %435 = vmatpush3.bf16.msra.mxu0 %v480_v2  ;;  %472 = vmatpush3.bf16.msra.mxu1 %v480_v2 }
   0xc   :  { %436 = vmatprep.subr.bf16.mxu0 %v481_v3  ;;  %465 = vmatprep.subr.bf16.mxu1 %v481_v3 }
   0xf   :  { %437 = vmatpush3.bf16.msra.mxu0 %v481_v3  ;;  %473 = vmatpush3.bf16.msra.mxu1 %v481_v3 }
  0x10   :  { %438 = vmatprep.subr.bf16.mxu0 %v482_v6  ;;  %466 = vmatprep.subr.bf16.mxu1 %v482_v6 }
  0x13   :  { %439 = vmatpush3.bf16.msra.mxu0 %v482_v6  ;;  %474 = vmatpush3.bf16.msra.mxu1 %v482_v6 }
  0x14   :  { %440 = vmatprep.subr.bf16.mxu0 %v483_v7  ;;  %467 = vmatprep.subr.bf16.mxu1 %v483_v7 }
  0x17   :  { %441 = vmatpush3.bf16.msra.mxu0 %v483_v7  ;;  %475 = vmatpush3.bf16.msra.mxu1 %v483_v7 }
  0x18   :  { %442 = vmatprep.subr.bf16.mxu0 %v484_v8  ;;  %468 = vmatprep.subr.bf16.mxu1 %v484_v8 }
  0x1b   :  { %443 = vmatpush3.bf16.msra.mxu0 %v484_v8  ;;  %476 = vmatpush3.bf16.msra.mxu1 %v484_v8 }
  0x1c   :  { %444 = vmatprep.subr.bf16.mxu0 %v485_v9  ;;  %469 = vmatprep.subr.bf16.mxu1 %v485_v9 }
  0x1f   :  { %445 = vmatpush3.bf16.msra.mxu0 %v485_v9  ;;  %477 = vmatpush3.bf16.msra.mxu1 %v485_v9 }
  0x22   :  { %447 = vmatmul.mubr.bf16.vlgmr.msra.gmra.mrb[0].mxu0 %v488_v10  ;;  %455 = vmatmul.mubr.bf16.vlgmr.msra.gmra.mrb[0].mxu1 %v489_v11 }
  0x23   :  { %450 = vmatprep.mubr.bf16.mxu0 %v490_v12  ;;  %458 = vmatprep.mubr.bf16.mxu1 %v491_v13 }
  0x2a   :  { %451 = vmatmul.mubr.bf16.gmra.mrb[4].mxu0 %v492_v14  ;;  %459 = vmatmul.mubr.bf16.gmra.mrb[4].mxu1 %v493_v15 }
  0xf5   :  { %v448_v17 = vpop.f32.mrb[0].mxu0  ;;  %v456_v19 = vpop.f32.mrb[0].mxu1 }
  0xf6   :  { %v339_v20 = vmul.f32 %v448_v17, %v412_v16  ;;  %v347_v21 = vmul.f32 %v456_v19, %v412_v16  ;;  %v216_v22 = vpop.f32.mrb[1].mxu0  ;;  %v248_v23 = vpop.f32.mrb[1].mxu1 }
  0xf7   :  { %v337_v24 = vmul.f32 %v412_v16, %v216_v22  ;;  %v345_v25 = vmul.f32 %v412_v16, %v248_v23  ;;  %v449_v26 = vpop.f32.mrb[2].mxu0  ;;  %v457_v27 = vpop.f32.mrb[2].mxu1 }
  0xf8   :  { %v362_v28 = vadd.f32 %v413_v18, %v339_v20  ;;  %v370_v29 = vadd.f32 %v413_v18, %v347_v21  ;;  %v340_v30 = vmul.f32 %v449_v26, %v412_v16  ;;  %v348_v31 = vmul.f32 %v457_v27, %v412_v16  ;;  %v219_v32 = vpop.f32.mrb[3].mxu0  ;;  %v251_v33 = vpop.f32.mrb[3].mxu1 }
  0xf9   :  { %v360_v34 = vadd.f32 %v413_v18, %v337_v24  ;;  %v368_v35 = vadd.f32 %v413_v18, %v345_v25  ;;  %v338_v36 = vmul.f32 %v412_v16, %v219_v32  ;;  %v346_v37 = vmul.f32 %v412_v16, %v251_v33 }
  0xfa   :  { %378 = vst [vmem:[%s625_s4 + $0x10] sm:$0xff] %v362_v28  ;;  %386 = vst [vmem:[%s625_s4 + $0x50] sm:$0xff] %v370_v29  ;;  %v363_v38 = vadd.f32 %v413_v18, %v340_v30  ;;  %v371_v39 = vadd.f32 %v413_v18, %v348_v31 }
  0xfb   :  { %376 = vst [vmem:[%s625_s4] sm:$0xff] %v360_v34  ;;  %384 = vst [vmem:[%s625_s4 + $0x40] sm:$0xff] %v368_v35  ;;  %v361_v40 = vadd.f32 %v413_v18, %v338_v36  ;;  %v369_v41 = vadd.f32 %v413_v18, %v346_v37 }
  0xfc   :  { %379 = vst [vmem:[%s625_s4 + $0x18] sm:$0xff] %v363_v38  ;;  %387 = vst [vmem:[%s625_s4 + $0x58] sm:$0xff] %v371_v39 }
  0xfd   :  { %377 = vst [vmem:[%s625_s4 + $0x8] sm:$0xff] %v361_v40  ;;  %385 = vst [vmem:[%s625_s4 + $0x48] sm:$0xff] %v369_v41  ;;  %v452_v42 = vpop.f32.mrb[4].mxu0  ;;  %v460_v43 = vpop.f32.mrb[4].mxu1 }
  0xfe   :  { %v343_v44 = vmul.f32 %v452_v42, %v412_v16  ;;  %v351_v45 = vmul.f32 %v460_v43, %v412_v16  ;;  %v232_v46 = vpop.f32.mrb[5].mxu0  ;;  %v264_v47 = vpop.f32.mrb[5].mxu1 }
  0xff   :  { %v341_v48 = vmul.f32 %v412_v16, %v232_v46  ;;  %v349_v49 = vmul.f32 %v412_v16, %v264_v47  ;;  %v453_v50 = vpop.f32.mrb[6].mxu0  ;;  %v461_v51 = vpop.f32.mrb[6].mxu1 }
 0x100   :  { %v366_v52 = vadd.f32 %v413_v18, %v343_v44  ;;  %v374_v53 = vadd.f32 %v413_v18, %v351_v45  ;;  %v344_v54 = vmul.f32 %v453_v50, %v412_v16  ;;  %v352_v55 = vmul.f32 %v461_v51, %v412_v16  ;;  %v235_v56 = vpop.f32.mrb[7].mxu0  ;;  %v267_v57 = vpop.f32.mrb[7].mxu1 }
 0x101   :  { %v364_v58 = vadd.f32 %v413_v18, %v341_v48  ;;  %v372_v59 = vadd.f32 %v413_v18, %v349_v49  ;;  %v342_v60 = vmul.f32 %v412_v16, %v235_v56  ;;  %v350_v61 = vmul.f32 %v412_v16, %v267_v57 }
 0x102   :  { %382 = vst [vmem:[%s625_s4 + $0x30] sm:$0xff] %v366_v52  ;;  %390 = vst [vmem:[%s625_s4 + $0x70] sm:$0xff] %v374_v53  ;;  %v367_v62 = vadd.f32 %v413_v18, %v344_v54  ;;  %v375_v63 = vadd.f32 %v413_v18, %v352_v55 }
 0x103   :  { %380 = vst [vmem:[%s625_s4 + $0x20] sm:$0xff] %v364_v58  ;;  %388 = vst [vmem:[%s625_s4 + $0x60] sm:$0xff] %v372_v59  ;;  %v365_v0 = vadd.f32 %v413_v18, %v342_v60  ;;  %v373_v1 = vadd.f32 %v413_v18, %v350_v61 }
 0x104   :  { %383 = vst [vmem:[%s625_s4 + $0x38] sm:$0xff] %v367_v62  ;;  %391 = vst [vmem:[%s625_s4 + $0x78] sm:$0xff] %v375_v63 }
 0x105   :  { %381 = vst [vmem:[%s625_s4 + $0x28] sm:$0xff] %v365_v0  ;;  %389 = vst [vmem:[%s625_s4 + $0x68] sm:$0xff] %v373_v1 }

// kernel: resnet18_forward.28
= control target key start
LH: loop header
LB: loop body
LE: loop exit
PB: predicated region body
PF: predicated region fallthrough
CT: control target
= control target key end

     0   :  { %s1715_s18 = smov 0   ;;  %s1717_s19 = smov 0   ;;  %s2040_s0 = inlined_call_operand.vmem [shape: bf16[128,1152], index: 0, kind: input, shape index: {}]   ;;  %s2041_s1 = inlined_call_operand.vmem [shape: bf16[1152,128], index: 1, kind: input, shape index: {}]   ;;  %s2042_s2 = inlined_call_operand.vmem [shape: f32[1,128], index: 2, kind: input, shape index: {}]   ;;  %s2043_s3 = inlined_call_operand.vmem [shape: f32[1,128], index: 3, kind: input, shape index: {}]   ;;  %s2044_s4 = inlined_call_operand.vmem [shape: f32[128,128], index: 4, kind: input, shape index: {}]   ;;  %s2045_s5 = inlined_call_operand.vmem [shape: f32[128,128], index: 5, kind: output, shape index: {}]  }
   0x1   :  { %s1719_s20 = smov 0   ;;  %s1721_s21 = smov 0  }
   0x2   :  { %s1723_s22 = smov 0  }
   0x3 LB: > { %s27_s23 = sadd.s32 1, %s1678_s21  ;;  %p50_p1 = scmp.ne.s32.totalorder %s1670_s19, %s1666_s18  ;;  %s1682_s22 = sphi %s1723_s22, %s15_s22   ;;  %s1678_s21 = sphi %s1721_s21, %s2049_s21   ;;  %s1674_s20 = sphi %s1719_s20, %s2048_s20   ;;  %s1670_s19 = sphi %s1717_s19, %s2047_s19   ;;  %s1666_s18 = sphi %s1715_s18, %s2046_s18  }
   0x4   : > { %p28_p0 = scmp.ge.s32.totalorder %s27_s23, 3  ;;  %p51_p2 = scmp.eq.s32.totalorder %s1682_s22, 0 }
   0x5   : > { %s43_s25 = sadd.s32 1, %s1670_s19  ;;  %p1340_p5 = scmp.ge.s32.totalorder %s1682_s22, 3 }
   0x6   : > { %s2051_s23 = smov (%p28_p0, %s27_s23), 0  ;;  %p52_p3 = por %p51_p2, %p50_p1 }
   0x7   : > { %s39_s24 = ssub.s32 %s1678_s21, %s2051_s23  ;;  %236 = sbr.rel (%p1340_p5) target bundleno = 37 (0x25), region = 28 }
   0x8   : > { %p41_p4 = scmp.eq.s32.totalorder %s39_s24, 0 }
   0xa   : > { %s1750_s26 = scalar_select %p41_p4, %s1670_s19, %s43_s25  }
   0xe   : > { %239 = sbr.rel (!%p52_p3) target bundleno = 37 (0x25), region = 32  ;;  %s241_s27 = sand.u32 (%p52_p3), 1, %s1670_s19  }
   0xf   : > { %s1432_s28 = smul.u32 (%p52_p3), 12, %s1678_s21 }
  0x10   : > { %s1545_s29 = smul.u32 (%p52_p3), 192, %s241_s27 }
  0x11   : > { %s1758_s7 = scalar_lea.vmem (%p52_p3), %s2040_s0, %s1432_s28 }
  0x12   : > { %v264_v0 = vld [vmem:[%s1758_s7] sm:$0xff] (%p52_p3)  ;;  %v268_v2 = vld [vmem:[%s1758_s7 + $0x48] sm:$0xff] (%p52_p3)  ;;  %s1763_s8 = scalar_lea.vmem (%p52_p3), [#allocation3], %s1545_s29  ;;  %v272_v4 = vld [vmem:[%s1758_s7 + $0x90] sm:$0xff] (%p52_p3) }
  0x13   : > { %v266_v1 = vld [vmem:[%s1758_s7 + $0x24] sm:$0xff] (%p52_p3)  ;;  %265 = vst [vmem:[%s1763_s8] sm:$0xff] (%p52_p3), %v264_v0  ;;  %269 = vst [vmem:[%s1763_s8 + $0x18] sm:$0xff] (%p52_p3), %v268_v2  ;;  %v270_v3 = vld [vmem:[%s1758_s7 + $0x6c] sm:$0xff] (%p52_p3) }
  0x14   : > { %267 = vst [vmem:[%s1763_s8 + $0xc] sm:$0xff] (%p52_p3), %v266_v1  ;;  %v274_v5 = vld [vmem:[%s1758_s7 + $0xb4] sm:$0xff] (%p52_p3)  ;;  %271 = vst [vmem:[%s1763_s8 + $0x24] sm:$0xff] (%p52_p3), %v270_v3  ;;  %v278_v7 = vld [vmem:[%s1758_s7 + $0xfc] sm:$0xff] (%p52_p3) }
  0x15   : > { %273 = vst [vmem:[%s1763_s8 + $0x30] sm:$0xff] %v272_v4  ;;  %275 = vst [vmem:[%s1763_s8 + $0x3c] sm:$0xff] %v274_v5  ;;  %v276_v6 = vld [vmem:[%s1758_s7 + $0xd8] sm:$0xff]  ;;  %v280_v8 = vld [vmem:[%s1758_s7 + $0x120] sm:$0xff] }
  0x16   : > { %277 = vst [vmem:[%s1763_s8 + $0x48] sm:$0xff] %v276_v6  ;;  %279 = vst [vmem:[%s1763_s8 + $0x54] sm:$0xff] %v278_v7  ;;  %v282_v9 = vld [vmem:[%s1758_s7 + $0x144] sm:$0xff]  ;;  %v286_v11 = vld [vmem:[%s1758_s7 + $0x18c] sm:$0xff] }
  0x17   : > { %281 = vst [vmem:[%s1763_s8 + $0x60] sm:$0xff] %v280_v8  ;;  %v284_v10 = vld [vmem:[%s1758_s7 + $0x168] sm:$0xff]  ;;  %283 = vst [vmem:[%s1763_s8 + $0x6c] sm:$0xff] %v282_v9  ;;  %v288_v12 = vld [vmem:[%s1758_s7 + $0x1b0] sm:$0xff] }
  0x18   : > { %285 = vst [vmem:[%s1763_s8 + $0x78] sm:$0xff] %v284_v10  ;;  %287 = vst [vmem:[%s1763_s8 + $0x84] sm:$0xff] %v286_v11  ;;  %v290_v13 = vld [vmem:[%s1758_s7 + $0x1d4] sm:$0xff]  ;;  %v294_v15 = vld [vmem:[%s1758_s7 + $0x21c] sm:$0xff] }
  0x19   : > { %v292_v14 = vld [vmem:[%s1758_s7 + $0x1f8] sm:$0xff]  ;;  %289 = vst [vmem:[%s1763_s8 + $0x90] sm:$0xff] %v288_v12  ;;  %291 = vst [vmem:[%s1763_s8 + $0x9c] sm:$0xff] %v290_v13  ;;  %v1342_v16 = vld [vmem:[%s1758_s7 + $0x8] sm:$0xf] }
  0x1a   : > { %293 = vst [vmem:[%s1763_s8 + $0xa8] sm:$0xff] %v292_v14  ;;  %v1344_v17 = vld [vmem:[%s1758_s7 + $0x2c] sm:$0xf]  ;;  %295 = vst [vmem:[%s1763_s8 + $0xb4] sm:$0xff] %v294_v15  ;;  %v1346_v18 = vld [vmem:[%s1758_s7 + $0x50] sm:$0xf] }
  0x1b   : > { %1343 = vst [vmem:[%s1763_s8 + $0x8] sm:$0xf] %v1342_v16  ;;  %1345 = vst [vmem:[%s1763_s8 + $0x14] sm:$0xf] %v1344_v17  ;;  %v1348_v19 = vld [vmem:[%s1758_s7 + $0x74] sm:$0xf] }
  0x1c   : > { %v1350_v20 = vld [vmem:[%s1758_s7 + $0x98] sm:$0xf]  ;;  %1347 = vst [vmem:[%s1763_s8 + $0x20] sm:$0xf] %v1346_v18  ;;  %1349 = vst [vmem:[%s1763_s8 + $0x2c] sm:$0xf] %v1348_v19 }
  0x1d   : > { %1351 = vst [vmem:[%s1763_s8 + $0x38] sm:$0xf] %v1350_v20  ;;  %v1352_v21 = vld [vmem:[%s1758_s7 + $0xbc] sm:$0xf]  ;;  %v1354_v22 = vld [vmem:[%s1758_s7 + $0xe0] sm:$0xf] }
  0x1e   : > { %v1356_v23 = vld [vmem:[%s1758_s7 + $0x104] sm:$0xf]  ;;  %1353 = vst [vmem:[%s1763_s8 + $0x44] sm:$0xf] %v1352_v21  ;;  %1355 = vst [vmem:[%s1763_s8 + $0x50] sm:$0xf] %v1354_v22 }
  0x1f   : > { %1357 = vst [vmem:[%s1763_s8 + $0x5c] sm:$0xf] %v1356_v23  ;;  %v1358_v24 = vld [vmem:[%s1758_s7 + $0x128] sm:$0xf]  ;;  %v1360_v25 = vld [vmem:[%s1758_s7 + $0x14c] sm:$0xf] }
  0x20   : > { %v1362_v26 = vld [vmem:[%s1758_s7 + $0x170] sm:$0xf]  ;;  %1359 = vst [vmem:[%s1763_s8 + $0x68] sm:$0xf] %v1358_v24  ;;  %1361 = vst [vmem:[%s1763_s8 + $0x74] sm:$0xf] %v1360_v25 }
  0x21   : > { %1363 = vst [vmem:[%s1763_s8 + $0x80] sm:$0xf] %v1362_v26  ;;  %v1364_v27 = vld [vmem:[%s1758_s7 + $0x194] sm:$0xf]  ;;  %v1366_v28 = vld [vmem:[%s1758_s7 + $0x1b8] sm:$0xf] }
  0x22   : > { %v1368_v29 = vld [vmem:[%s1758_s7 + $0x1dc] sm:$0xf]  ;;  %1365 = vst [vmem:[%s1763_s8 + $0x8c] sm:$0xf] %v1364_v27  ;;  %1367 = vst [vmem:[%s1763_s8 + $0x98] sm:$0xf] %v1366_v28 }
  0x23   : > { %1369 = vst [vmem:[%s1763_s8 + $0xa4] sm:$0xf] %v1368_v29  ;;  %v1370_v30 = vld [vmem:[%s1758_s7 + $0x200] sm:$0xf]  ;;  %v1372_v31 = vld [vmem:[%s1758_s7 + $0x224] sm:$0xf] }
  0x24   : > { %1371 = vst [vmem:[%s1763_s8 + $0xb0] sm:$0xf] %v1370_v30  ;;  %1373 = vst [vmem:[%s1763_s8 + $0xbc] sm:$0xf] %v1372_v31 }
  0x25 PF: > { %p1374_p6 = scmp.ge.s32.totalorder %s1682_s22, 1  ;;  %p351_p7 = scmp.lt.s32.totalorder %s1682_s22, 4 }
  0x27   : > { %p352_p8 = pnand %p1374_p6, %p351_p7 }
  0x28   : > { %s358_s9 = sand.u32 (!%p352_p8), 1, %s1666_s18   ;;  %s412_s10 = smul.u32 (!%p352_p8), 48, %s1674_s20 }
  0x29   : > { %355 = sbr.rel (%p352_p8) target bundleno = 385 (0x181), region = 62  ;;  %p1376_p10 = scmp.ne.s32.totalorder (!%p352_p8), %s1674_s20, 0 }
  0x2a   : > { %s1546_s11 = smul.u32 (!%p352_p8), 192, %s358_s9  ;;  %p413_p9 = scmp.lt.s32.totalorder (!%p352_p8), %s412_s10, 143 }
  0x2c   : > { %s1835_s16 = scalar_lea.vmem (!%p352_p8), [#allocation3], %s1546_s11 }
  0x30   : > { %s2053_s10 = smov (!%p413_p9, %s412_s10), 143  ;;  %449 = sbr.rel (%p1376_p10) target bundleno = 58 (0x3a), region = 70 }
  0x31   : > { %s1375_s12 = sshll.u32 %s2053_s10, 2  ;;  %v1684_v32 = vmov (!%p1376_p10), 0.0  }
  0x32   : > { %s1833_s15 = scalar_lea.vmem %s2041_s1, %s1375_s12  ;;  %450 = vst [vmem:[#allocation2] sm:$0xff] (!%p1376_p10), %v1684_v32  ;;  %451 = vst [vmem:[#allocation2 + $0x8] sm:$0xff] (!%p1376_p10), %v1684_v32 }
  0x33   : > { %452 = vst [vmem:[#allocation2 + $0x10] sm:$0xff] (!%p1376_p10), %v1684_v32  ;;  %453 = vst [vmem:[#allocation2 + $0x18] sm:$0xff] (!%p1376_p10), %v1684_v32 }
  0x34   : > { %454 = vst [vmem:[#allocation2 + $0x20] sm:$0xff] (!%p1376_p10), %v1684_v32  ;;  %455 = vst [vmem:[#allocation2 + $0x28] sm:$0xff] (!%p1376_p10), %v1684_v32 }
  0x35   : > { %456 = vst [vmem:[#allocation2 + $0x30] sm:$0xff] (!%p1376_p10), %v1684_v32  ;;  %457 = vst [vmem:[#allocation2 + $0x38] sm:$0xff] (!%p1376_p10), %v1684_v32 }
  0x36   : > { %458 = vst [vmem:[#allocation2 + $0x40] sm:$0xff] (!%p1376_p10), %v1684_v32  ;;  %459 = vst [vmem:[#allocation2 + $0x48] sm:$0xff] (!%p1376_p10), %v1684_v32 }
  0x37   : > { %460 = vst [vmem:[#allocation2 + $0x50] sm:$0xff] %v1684_v32  ;;  %461 = vst [vmem:[#allocation2 + $0x58] sm:$0xff] %v1684_v32 }
  0x38   : > { %462 = vst [vmem:[#allocation2 + $0x60] sm:$0xff] %v1684_v32  ;;  %463 = vst [vmem:[#allocation2 + $0x68] sm:$0xff] %v1684_v32 }
  0x39   : > { %464 = vst [vmem:[#allocation2 + $0x70] sm:$0xff] %v1684_v32  ;;  %465 = vst [vmem:[#allocation2 + $0x78] sm:$0xff] %v1684_v32 }
  0x3a PF: > { %v1588_v33 = vld [vmem:[%s1833_s15 + $0x40] sm:$0xff]   ;;  %v1591_v36 = vld [vmem:[%s1833_s15 + $0x48] sm:$0xff]   ;;  %v1594_v39 = vld [vmem:[%s1833_s15 + $0x50] sm:$0xff]   ;;  %p1425_p11 = scmp.ne.s32.totalorder %s1674_s20, 2 }
  0x3b   : > { %v1589_v34 = vld [vmem:[%s1833_s15] sm:$0xff]   ;;  %1433 = vmatprep.subr.bf16.mxu0 %v1588_v33  ;;  %v1592_v37 = vld [vmem:[%s1833_s15 + $0x8] sm:$0xff]   ;;  %v1595_v40 = vld [vmem:[%s1833_s15 + $0x10] sm:$0xff]  }
  0x3c   : > { %v1590_v35 = vld [vmem:[%s1833_s15 + $0x80] sm:$0xff]   ;;  %1434 = vmatpush3.bf16.msra.mxu0 %v1589_v34  ;;  %v1593_v38 = vld [vmem:[%s1833_s15 + $0x88] sm:$0xff]   ;;  %v1596_v41 = vld [vmem:[%s1833_s15 + $0x90] sm:$0xff]  }
  0x3d   : > { %1513 = vmatprep.subr.bf16.mxu1 %v1590_v35  ;;  %1435 = vmatprep.subr.bf16.mxu0 %v1591_v36  ;;  %v1597_v42 = vld [vmem:[%s1833_s15 + $0x58] sm:$0xff]   ;;  %v1600_v45 = vld [vmem:[%s1833_s15 + $0x60] sm:$0xff]   ;;  %v1603_v48 = vld [vmem:[%s1833_s15 + $0x68] sm:$0xff]  }
  0x3e   : > { %1514 = vmatpush3.bf16.msra.mxu1 %v1590_v35  ;;  %v1598_v43 = vld [vmem:[%s1833_s15 + $0x18] sm:$0xff]   ;;  %v1602_v46 = vld [vmem:[%s1833_s15 + $0xa0] sm:$0xff]   ;;  %v1605_v49 = vld [vmem:[%s1833_s15 + $0xa8] sm:$0xff]  }
  0x3f   : > { %1515 = vmatprep.subr.bf16.mxu1 %v1593_v38  ;;  %v1599_v44 = vld [vmem:[%s1833_s15 + $0x98] sm:$0xff]   ;;  %v1601_v47 = vld [vmem:[%s1833_s15 + $0x20] sm:$0xff]   ;;  %v1604_v50 = vld [vmem:[%s1833_s15 + $0x28] sm:$0xff]  }
  0x40   : > { %1436 = vmatpush3.bf16.msra.mxu0 %v1592_v37  ;;  %v1606_v51 = vld [vmem:[%s1833_s15 + $0x70] sm:$0xff]   ;;  %v1609_v54 = vld [vmem:[%s1833_s15 + $0x78] sm:$0xff]   ;;  %v1612_v59 = vld [vmem:[%s1835_s16] ss:$12 sps:$4 sm:$0xff]  }
  0x41   : > { %1437 = vmatprep.subr.bf16.mxu0 %v1594_v39  ;;  %v1607_v52 = vld [vmem:[%s1833_s15 + $0x30] sm:$0xff]   ;;  %v1611_v55 = vld [vmem:[%s1833_s15 + $0xb8] sm:$0xff]   ;;  %v1616_v61 = vld [vmem:[%s1835_s16 + $0x20] ss:$12 sps:$4 sm:$0xff]  }
  0x42   : > { %1516 = vmatpush3.bf16.msra.mxu1 %v1593_v38  ;;  %v1608_v53 = vld [vmem:[%s1833_s15 + $0xb0] sm:$0xff]   ;;  %v1610_v58 = vld [vmem:[%s1833_s15 + $0x38] sm:$0xff]   ;;  %v1632_v5 = vld [vmem:[%s1835_s16 + $0x80] ss:$12 sps:$4 sm:$0xff]  }
  0x43   : > { %1517 = vmatprep.subr.bf16.mxu1 %v1596_v41  ;;  %v1614_v56 = vld [vmem:[%s1835_s16 + $0x4] ss:$12 sps:$4 sm:$0xff]   ;;  %v1615_v57 = vld [vmem:[%s1835_s16 + $0x8] ss:$12 sps:$4 sm:$0xff]   ;;  %v1625_v4 = vld [vmem:[%s1835_s16 + $0x4c] ss:$12 sps:$4 sm:$0xff]  }
  0x44   : > { %1438 = vmatpush3.bf16.msra.mxu0 %v1595_v40  ;;  %866 = vmatprep.mubr.bf16.mxu0 %v1614_v56  ;;  %v1617_v60 = vld [vmem:[%s1835_s16 + $0x1c] ss:$12 sps:$4 sm:$0xff]   ;;  %v1623_v62 = vld [vmem:[%s1835_s16 + $0x38] ss:$12 sps:$4 sm:$0xff]   ;;  %v1620_v0 = vld [vmem:[%s1835_s16 + $0x34] ss:$12 sps:$4 sm:$0xff]  }
  0x45   : > { %1439 = vmatprep.subr.bf16.mxu0 %v1597_v42  ;;  %1529 = vmatprep.mubr.bf16.mxu1 %v1615_v57  ;;  %v1619_v63 = vld [vmem:[%s1835_s16 + $0x18] ss:$12 sps:$4 sm:$0xff]   ;;  %v1624_v1 = vld [vmem:[%s1835_s16 + $0x50] ss:$12 sps:$4 sm:$0xff]   ;;  %v1631_v2 = vld [vmem:[%s1835_s16 + $0x68] ss:$12 sps:$4 sm:$0xff]  }
  0x46   : > { %1518 = vmatpush3.bf16.msra.mxu1 %v1596_v41  ;;  %v1622_v3 = vld [vmem:[%s1835_s16 + $0x30] ss:$12 sps:$4 sm:$0xff]   ;;  %v1639_v6 = vld [vmem:[%s1835_s16 + $0x98] ss:$12 sps:$4 sm:$0xff]   ;;  %v1627_v7 = vld [vmem:[%s1835_s16 + $0x48] ss:$12 sps:$4 sm:$0xff]  }
  0x47   : > { %1519 = vmatprep.subr.bf16.mxu1 %v1599_v44  ;;  %v1628_v8 = vld [vmem:[%s1835_s16 + $0x64] ss:$12 sps:$4 sm:$0xff]   ;;  %v1630_v10 = vld [vmem:[%s1835_s16 + $0x60] ss:$12 sps:$4 sm:$0xff]   ;;  %v1633_v11 = vld [vmem:[%s1835_s16 + $0x7c] ss:$12 sps:$4 sm:$0xff]  }
  0x48   : > { %1440 = vmatpush3.bf16.msra.mxu0 %v1598_v43  ;;  %v1640_v9 = vld [vmem:[%s1835_s16 + $0xb0] ss:$12 sps:$4 sm:$0xff]   ;;  %v1635_v12 = vld [vmem:[%s1835_s16 + $0x78] ss:$12 sps:$4 sm:$0xff]   ;;  %v1636_v13 = vld [vmem:[%s1835_s16 + $0x94] ss:$12 sps:$4 sm:$0xff]  }
  0x49   : > { %1441 = vmatprep.subr.bf16.mxu0 %v1600_v45  ;;  %v1638_v14 = vld [vmem:[%s1835_s16 + $0x90] ss:$12 sps:$4 sm:$0xff]   ;;  %v1641_v15 = vld [vmem:[%s1835_s16 + $0xac] ss:$12 sps:$4 sm:$0xff]   ;;  %v1643_v16 = vld [vmem:[%s1835_s16 + $0xa8] ss:$12 sps:$4 sm:$0xff]  }
  0x4a   : > { %1520 = vmatpush3.bf16.msra.mxu1 %v1599_v44  ;;  %v466_v23 = vld [vmem:[#allocation2] sm:$0xff]  ;;  %v467_v28 = vld [vmem:[#allocation2 + $0x8] sm:$0xff]  ;;  %v468_v38 = vld [vmem:[#allocation2 + $0x10] sm:$0xff] }
  0x4b   : > { %1521 = vmatprep.subr.bf16.mxu1 %v1602_v46  ;;  %v469_v44 = vld [vmem:[#allocation2 + $0x18] sm:$0xff] }
  0x4c   : > { %1442 = vmatpush3.bf16.msra.mxu0 %v1601_v47 }
  0x4d   : > { %1443 = vmatprep.subr.bf16.mxu0 %v1603_v48 }
  0x4e   : > { %1522 = vmatpush3.bf16.msra.mxu1 %v1602_v46 }
  0x4f   : > { %1523 = vmatprep.subr.bf16.mxu1 %v1605_v49 }
  0x50   : > { %1444 = vmatpush3.bf16.msra.mxu0 %v1604_v50 }
  0x51   : > { %1445 = vmatprep.subr.bf16.mxu0 %v1606_v51 }
  0x52   : > { %1524 = vmatpush3.bf16.msra.mxu1 %v1605_v49 }
  0x53   : > { %1525 = vmatprep.subr.bf16.mxu1 %v1608_v53 }
  0x54   : > { %1446 = vmatpush3.bf16.msra.mxu0 %v1607_v52 }
  0x55   : > { %1447 = vmatprep.subr.bf16.mxu0 %v1609_v54 }
  0x56   : > { %1526 = vmatpush3.bf16.msra.mxu1 %v1608_v53 }
  0x57   : > { %1527 = vmatprep.subr.bf16.mxu1 %v1611_v55 }
  0x58   : > { %1448 = vmatpush3.bf16.msra.mxu0 %v1610_v58 }
  0x5a   : > { %1528 = vmatpush3.bf16.msra.mxu1 %v1611_v55  ;;  %v470_v55 = vld [vmem:[#allocation2 + $0x20] sm:$0xff] }
  0x5b   : > { %867 = vmatmul.mubr.bf16.vlgmr.msra.gmra.mrb[0].mxu0 %v1612_v59 }
  0x5c   : > { %874 = vmatprep.mubr.bf16.mxu0 %v1617_v60  ;;  %v471_v60 = vld [vmem:[#allocation2 + $0x28] sm:$0xff] }
  0x5d   : > { %1530 = vmatmul.mubr.bf16.vlgmr.msra.gmra.mrb[0].mxu1 %v1616_v61 }
  0x5e   : > { %1533 = vmatprep.mubr.bf16.mxu1 %v1623_v62 }
  0x63   : > { %875 = vmatmul.mubr.bf16.gmra.mrb[4].mxu0 %v1619_v63 }
  0x64   : > { %882 = vmatprep.mubr.bf16.mxu0 %v1620_v0 }
  0x65   : > { %1534 = vmatmul.mubr.bf16.gmra.mrb[4].mxu1 %v1624_v1 }
  0x66   : > { %1537 = vmatprep.mubr.bf16.mxu1 %v1631_v2 }
  0x6b   : > { %883 = vmatmul.mubr.bf16.gmra.mrb[8].mxu0 %v1622_v3 }
  0x6c   : > { %890 = vmatprep.mubr.bf16.mxu0 %v1625_v4 }
  0x6d   : > { %1538 = vmatmul.mubr.bf16.gmra.mrb[8].mxu1 %v1632_v5 }
  0x6e   : > { %1541 = vmatprep.mubr.bf16.mxu1 %v1639_v6  ;;  %v472_v6 = vld [vmem:[#allocation2 + $0x30] sm:$0xff] }
  0x73   : > { %891 = vmatmul.mubr.bf16.gmra.mrb[12].mxu0 %v1627_v7 }
  0x74   : > { %898 = vmatprep.mubr.bf16.mxu0 %v1628_v8 }
  0x75   : > { %1542 = vmatmul.mubr.bf16.gmra.mrb[12].mxu1 %v1640_v9 }
  0x7b   : > { %899 = vmatmul.mubr.bf16.gmra.mrb[16].mxu0 %v1630_v10 }
  0x7c   : > { %906 = vmatprep.mubr.bf16.mxu0 %v1633_v11 }
  0x83   : > { %907 = vmatmul.mubr.bf16.gmra.mrb[20].mxu0 %v1635_v12  ;;  %v473_v12 = vld [vmem:[#allocation2 + $0x38] sm:$0xff] }
  0x84   : > { %914 = vmatprep.mubr.bf16.mxu0 %v1636_v13 }
  0x8b   : > { %915 = vmatmul.mubr.bf16.gmra.mrb[24].mxu0 %v1638_v14 }
  0x8c   : > { %922 = vmatprep.mubr.bf16.mxu0 %v1641_v15 }
  0x93   : > { %923 = vmatmul.mubr.bf16.gmra.mrb[28].mxu0 %v1643_v16 }
 0x12e   : > { %v1449_v17 = vpop.f32.mrb[0].mxu0 }
 0x12f   : > { %v1450_v18 = vpop.f32.mrb[1].mxu0 }
 0x130   : > { %v1451_v19 = vadd.f32 %v1450_v18, %v1449_v17  ;;  %v1452_v20 = vpop.f32.mrb[2].mxu0  ;;  %v1531_v21 = vpop.f32.mrb[0].mxu1 }
 0x131   : > { %v1453_v22 = vpop.f32.mrb[3].mxu0  ;;  %v965_v24 = vpop.f32.mrb[1].mxu1 }
 0x132   : > { %v1454_v25 = vadd.f32 %v1453_v22, %v1452_v20  ;;  %v966_v26 = vadd.f32 %v1451_v19, %v965_v24  ;;  %v1532_v27 = vpop.f32.mrb[2].mxu1  ;;  %v474_v22 = vld [vmem:[#allocation2 + $0x40] sm:$0xff] }
 0x133   : > { %v968_v29 = vpop.f32.mrb[3].mxu1 }
 0x134   : > { %v1028_v30 = vadd.f32 %v966_v26, %v466_v23  ;;  %v969_v31 = vadd.f32 %v1454_v25, %v968_v29  ;;  %v475_v25 = vld [vmem:[#allocation2 + $0x48] sm:$0xff] }
 0x136   : > { %1044 = vst [vmem:[#allocation2] sm:$0xff] %v1028_v30  ;;  %v1029_v32 = vadd.f32 %v969_v31, %v467_v28  ;;  %v1455_v33 = vpop.f32.mrb[4].mxu0 }
 0x137   : > { %v1456_v34 = vpop.f32.mrb[5].mxu0 }
 0x138   : > { %1045 = vst [vmem:[#allocation2 + $0x8] sm:$0xff] %v1029_v32  ;;  %v1457_v35 = vadd.f32 %v1456_v34, %v1455_v33  ;;  %v1458_v36 = vpop.f32.mrb[6].mxu0  ;;  %v1535_v37 = vpop.f32.mrb[4].mxu1  ;;  %v476_v33 = vld [vmem:[#allocation2 + $0x50] sm:$0xff] }
 0x139   : > { %v1459_v39 = vpop.f32.mrb[7].mxu0  ;;  %v981_v40 = vpop.f32.mrb[5].mxu1 }
 0x13a   : > { %v974_v41 = vadd.f32 %v1531_v21, %v1457_v35  ;;  %v1460_v42 = vadd.f32 %v1459_v39, %v1458_v36  ;;  %v1536_v43 = vpop.f32.mrb[6].mxu1 }
 0x13b   : > { %v984_v45 = vpop.f32.mrb[7].mxu1 }
 0x13c   : > { %v1030_v46 = vadd.f32 %v974_v41, %v468_v38  ;;  %v977_v47 = vadd.f32 %v1532_v27, %v1460_v42 }
 0x13e   : > { %1046 = vst [vmem:[#allocation2 + $0x10] sm:$0xff] %v1030_v46  ;;  %v1031_v48 = vadd.f32 %v977_v47, %v469_v44  ;;  %v1461_v49 = vpop.f32.mrb[8].mxu0  ;;  %v478_v46 = vld [vmem:[#allocation2 + $0x60] sm:$0xff] }
 0x13f   : > { %v1462_v50 = vpop.f32.mrb[9].mxu0 }
 0x140   : > { %1047 = vst [vmem:[#allocation2 + $0x18] sm:$0xff] %v1031_v48  ;;  %v1463_v51 = vadd.f32 %v1462_v50, %v1461_v49  ;;  %v1464_v52 = vpop.f32.mrb[10].mxu0  ;;  %v1539_v53 = vpop.f32.mrb[8].mxu1  ;;  %v479_v49 = vld [vmem:[#allocation2 + $0x68] sm:$0xff] }
 0x141   : > { %v1465_v54 = vpop.f32.mrb[11].mxu0  ;;  %v997_v56 = vpop.f32.mrb[9].mxu1 }
 0x142   : > { %v1466_v57 = vadd.f32 %v1465_v54, %v1464_v52  ;;  %v982_v58 = vadd.f32 %v1463_v51, %v981_v40  ;;  %v1540_v59 = vpop.f32.mrb[10].mxu1 }
 0x143   : > { %v1000_v61 = vpop.f32.mrb[11].mxu1 }
 0x144   : > { %v1032_v62 = vadd.f32 %v982_v58, %v470_v55  ;;  %v985_v63 = vadd.f32 %v1466_v57, %v984_v45  ;;  %v480_v57 = vld [vmem:[#allocation2 + $0x70] sm:$0xff] }
 0x146   : > { %1048 = vst [vmem:[#allocation2 + $0x20] sm:$0xff] %v1032_v62  ;;  %v1033_v0 = vadd.f32 %v985_v63, %v471_v60  ;;  %v1467_v1 = vpop.f32.mrb[12].mxu0 }
 0x147   : > { %v1468_v2 = vpop.f32.mrb[13].mxu0 }
 0x148   : > { %1049 = vst [vmem:[#allocation2 + $0x28] sm:$0xff] %v1033_v0  ;;  %v1469_v3 = vadd.f32 %v1468_v2, %v1467_v1  ;;  %v1470_v4 = vpop.f32.mrb[14].mxu0  ;;  %v1543_v5 = vpop.f32.mrb[12].mxu1  ;;  %v1064_v1 = vld [vmem:[#allocation2] sm:$0xff] (!%p1425_p11) }
 0x149   : > { %v1471_v7 = vpop.f32.mrb[15].mxu0  ;;  %v1013_v8 = vpop.f32.mrb[13].mxu1  ;;  %v1890_v2 = vld [vmem:[%s2042_s2] ss:$0 sm:$0xff] (!%p1425_p11) }
 0x14a   : > { %v990_v9 = vadd.f32 %v1535_v37, %v1469_v3  ;;  %v1472_v10 = vadd.f32 %v1471_v7, %v1470_v4  ;;  %v1544_v11 = vpop.f32.mrb[14].mxu1  ;;  %v477_v37 = vld [vmem:[#allocation2 + $0x58] sm:$0xff]  ;;  %v1895_v3 = vld [vmem:[%s2043_s3] ss:$0 sm:$0xff] (!%p1425_p11)  ;;  %v1087_v4 = vmul.f32 (!%p1425_p11), %v1890_v2, %v1064_v1 }
 0x14b   : > { %v1016_v13 = vpop.f32.mrb[15].mxu1 }
 0x14c   : > { %v1034_v14 = vadd.f32 %v990_v9, %v472_v6  ;;  %v993_v15 = vadd.f32 %v1536_v43, %v1472_v10  ;;  %v1126_v6 = vld [vmem:[%s2044_s4] sm:$0xff] (!%p1425_p11)  ;;  %v1067_v9 = vld [vmem:[#allocation2 + $0x18] sm:$0xff] (!%p1425_p11)  ;;  %v1110_v10 = vadd.f32 (!%p1425_p11), %v1895_v3, %v1087_v4 }
 0x14e   : > { %1050 = vst [vmem:[#allocation2 + $0x30] sm:$0xff] %v1034_v14  ;;  %v1035_v16 = vadd.f32 %v993_v15, %v473_v12  ;;  %v1473_v17 = vpop.f32.mrb[16].mxu0  ;;  %v1090_v14 = vmul.f32 (!%p1425_p11), %v1890_v2, %v1067_v9  ;;  %v1068_v15 = vld [vmem:[#allocation2 + $0x20] sm:$0xff] (!%p1425_p11) }
 0x14f   : > { %v1474_v18 = vpop.f32.mrb[17].mxu0 }
 0x150   : > { %1051 = vst [vmem:[#allocation2 + $0x38] sm:$0xff] %v1035_v16  ;;  %v1475_v19 = vadd.f32 %v1474_v18, %v1473_v17  ;;  %v1476_v20 = vpop.f32.mrb[18].mxu0  ;;  %v1129_v17 = vld [vmem:[%s2044_s4 + $0x18] sm:$0xff] (!%p1425_p11)  ;;  %v1091_v18 = vmul.f32 (!%p1425_p11), %v1890_v2, %v1068_v15  ;;  %v1139_v15 = vld [vmem:[%s2044_s4 + $0x68] sm:$0xff] (!%p1425_p11) }
 0x151   : > { %v1477_v21 = vpop.f32.mrb[19].mxu0 }
 0x152   : > { %v1478_v23 = vadd.f32 %v1477_v21, %v1476_v20  ;;  %v998_v24 = vadd.f32 %v1475_v19, %v997_v56  ;;  %v1069_v19 = vld [vmem:[#allocation2 + $0x28] sm:$0xff] (!%p1425_p11)  ;;  %v1142_v21 = vadd.f32 (!%p1425_p11), %v1126_v6, %v1110_v10  ;;  %v1137_v6 = vld [vmem:[%s2044_s4 + $0x58] sm:$0xff] (!%p1425_p11) }
 0x154   : > { %v1036_v26 = vadd.f32 %v998_v24, %v474_v22  ;;  %v1001_v27 = vadd.f32 %v1478_v23, %v1000_v61  ;;  %v481_v61 = vld [vmem:[#allocation2 + $0x78] sm:$0xff]  ;;  %v1113_v23 = vadd.f32 (!%p1425_p11), %v1895_v3, %v1090_v14  ;;  %v1130_v24 = vld [vmem:[%s2044_s4 + $0x20] sm:$0xff] (!%p1425_p11) }
 0x155   : > { %v1070_v20 = vld [vmem:[#allocation2 + $0x30] sm:$0xff] (!%p1425_p11) }
 0x156   : > { %1052 = vst [vmem:[#allocation2 + $0x40] sm:$0xff] %v1036_v26  ;;  %v1037_v28 = vadd.f32 %v1001_v27, %v475_v25  ;;  %v1479_v29 = vpop.f32.mrb[20].mxu0  ;;  %v1092_v25 = vmul.f32 (!%p1425_p11), %v1890_v2, %v1069_v19 }
 0x157   : > { %v1480_v30 = vpop.f32.mrb[21].mxu0  ;;  %v1071_v26 = vld [vmem:[#allocation2 + $0x38] sm:$0xff] (!%p1425_p11) }
 0x158   : > { %1053 = vst [vmem:[#allocation2 + $0x48] sm:$0xff] %v1037_v28  ;;  %v1481_v31 = vadd.f32 %v1480_v30, %v1479_v29  ;;  %v1482_v32 = vpop.f32.mrb[22].mxu0  ;;  %v1114_v28 = vadd.f32 (!%p1425_p11), %v1895_v3, %v1091_v18  ;;  %v1131_v29 = vld [vmem:[%s2044_s4 + $0x28] sm:$0xff] (!%p1425_p11)  ;;  %v1093_v30 = vmul.f32 (!%p1425_p11), %v1890_v2, %v1070_v20 }
 0x159   : > { %v1483_v34 = vpop.f32.mrb[23].mxu0 }
 0x15a   : > { %v1006_v35 = vadd.f32 %v1539_v53, %v1481_v31  ;;  %v1484_v36 = vadd.f32 %v1483_v34, %v1482_v32  ;;  %v1094_v31 = vmul.f32 (!%p1425_p11), %v1890_v2, %v1071_v26 }
 0x15c   : > { %v1038_v38 = vadd.f32 %v1006_v35, %v476_v33  ;;  %v1009_v39 = vadd.f32 %v1540_v59, %v1484_v36  ;;  %v1158_v33 = vmax.f32 (!%p1425_p11), %v1142_v21, 0.0  ;;  %v1145_v35 = vadd.f32 (!%p1425_p11), %v1129_v17, %v1113_v23  ;;  %v1141_v23 = vld [vmem:[%s2044_s4 + $0x78] sm:$0xff] (!%p1425_p11) }
 0x15d   : > { %v1072_v32 = vld [vmem:[#allocation2 + $0x40] sm:$0xff] (!%p1425_p11)  ;;  %v1115_v36 = vadd.f32 (!%p1425_p11), %v1895_v3, %v1092_v25 }
 0x15e   : > { %1054 = vst [vmem:[#allocation2 + $0x50] sm:$0xff] %v1038_v38  ;;  %v1039_v40 = vadd.f32 %v1009_v39, %v477_v37  ;;  %v1485_v41 = vpop.f32.mrb[24].mxu0  ;;  %v1132_v37 = vld [vmem:[%s2044_s4 + $0x30] sm:$0xff] (!%p1425_p11)  ;;  %v1133_v38 = vld [vmem:[%s2044_s4 + $0x38] sm:$0xff] (!%p1425_p11)  ;;  %1174 = vst [vmem:[%s2045_s5] sm:$0xff] (!%p1425_p11), %v1158_v33 }
 0x15f   : > { %v1486_v42 = vpop.f32.mrb[25].mxu0  ;;  %v1073_v39 = vld [vmem:[#allocation2 + $0x48] sm:$0xff] (!%p1425_p11) }
 0x160   : > { %1055 = vst [vmem:[#allocation2 + $0x58] sm:$0xff] %v1039_v40  ;;  %v1487_v43 = vadd.f32 %v1486_v42, %v1485_v41  ;;  %v1488_v44 = vpop.f32.mrb[26].mxu0  ;;  %v1146_v41 = vadd.f32 (!%p1425_p11), %v1130_v24, %v1114_v28  ;;  %v1116_v42 = vadd.f32 (!%p1425_p11), %v1895_v3, %v1093_v30 }
 0x161   : > { %v1489_v45 = vpop.f32.mrb[27].mxu0 }
 0x162   : > { %v1490_v47 = vadd.f32 %v1489_v45, %v1488_v44  ;;  %v1014_v48 = vadd.f32 %v1487_v43, %v1013_v8  ;;  %v1066_v8 = vld [vmem:[#allocation2 + $0x10] sm:$0xff] (!%p1425_p11)  ;;  %v1117_v43 = vadd.f32 (!%p1425_p11), %v1895_v3, %v1094_v31 }
 0x163   : > { %v1089_v12 = vmul.f32 (!%p1425_p11), %v1890_v2, %v1066_v8 }
 0x164   : > { %v1040_v50 = vadd.f32 %v1014_v48, %v478_v46  ;;  %v1017_v51 = vadd.f32 %v1490_v47, %v1016_v13  ;;  %v1128_v13 = vld [vmem:[%s2044_s4 + $0x10] sm:$0xff] (!%p1425_p11)  ;;  %v1161_v47 = vmax.f32 (!%p1425_p11), %v1145_v35, 0.0  ;;  %v1147_v48 = vadd.f32 (!%p1425_p11), %v1131_v29, %v1115_v36 }
 0x165   : > { %v1112_v22 = vadd.f32 (!%p1425_p11), %v1895_v3, %v1089_v12  ;;  %v1074_v44 = vld [vmem:[#allocation2 + $0x50] sm:$0xff] (!%p1425_p11) }
 0x166   : > { %1056 = vst [vmem:[#allocation2 + $0x60] sm:$0xff] %v1040_v50  ;;  %v1041_v52 = vadd.f32 %v1017_v51, %v479_v49  ;;  %v1491_v53 = vpop.f32.mrb[28].mxu0  ;;  %v1095_v49 = vmul.f32 (!%p1425_p11), %v1890_v2, %v1072_v32  ;;  %v1162_v51 = vmax.f32 (!%p1425_p11), %v1146_v41, 0.0  ;;  %1177 = vst [vmem:[%s2045_s5 + $0x18] sm:$0xff] (!%p1425_p11), %v1161_v47 }
 0x167   : > { %v1492_v54 = vpop.f32.mrb[29].mxu0  ;;  %v1144_v34 = vadd.f32 (!%p1425_p11), %v1128_v13, %v1112_v22  ;;  %v1075_v45 = vld [vmem:[#allocation2 + $0x58] sm:$0xff] (!%p1425_p11)  ;;  %v1140_v22 = vld [vmem:[%s2044_s4 + $0x70] sm:$0xff] (!%p1425_p11) }
 0x168   : > { %1057 = vst [vmem:[#allocation2 + $0x68] sm:$0xff] %v1041_v52  ;;  %v1493_v55 = vadd.f32 %v1492_v54, %v1491_v53  ;;  %v1494_v56 = vpop.f32.mrb[30].mxu0  ;;  %v1148_v52 = vadd.f32 (!%p1425_p11), %v1132_v37, %v1116_v42  ;;  %v1149_v53 = vadd.f32 (!%p1425_p11), %v1133_v38, %v1117_v43  ;;  %v1134_v54 = vld [vmem:[%s2044_s4 + $0x40] sm:$0xff] (!%p1425_p11)  ;;  %1178 = vst [vmem:[%s2045_s5 + $0x20] sm:$0xff] (!%p1425_p11), %v1162_v51 }
 0x169   : > { %v1495_v58 = vpop.f32.mrb[31].mxu0  ;;  %v1160_v46 = vmax.f32 (!%p1425_p11), %v1144_v34, 0.0 }
 0x16a   : > { %v1022_v59 = vadd.f32 %v1543_v5, %v1493_v55  ;;  %v1496_v60 = vadd.f32 %v1495_v58, %v1494_v56  ;;  %1063 = sbr.rel (%p1425_p11) target bundleno = 385 (0x181), region = 74  ;;  %v1065_v5 = vld [vmem:[#allocation2 + $0x8] sm:$0xff] (!%p1425_p11)  ;;  %v1096_v55 = vmul.f32 (!%p1425_p11), %v1890_v2, %v1073_v39  ;;  %v1118_v58 = vadd.f32 (!%p1425_p11), %v1895_v3, %v1095_v49 }
 0x16b   : > { %v1088_v7 = vmul.f32 (!%p1425_p11), %v1890_v2, %v1065_v5  ;;  %1176 = vst [vmem:[%s2045_s5 + $0x10] sm:$0xff] (!%p1425_p11), %v1160_v46  ;;  %v1165_v1 = vmax.f32 (!%p1425_p11), %v1149_v53, 0.0  ;;  %v1136_v5 = vld [vmem:[%s2044_s4 + $0x50] sm:$0xff] (!%p1425_p11) }
 0x16c   : > { %v1042_v62 = vadd.f32 %v1022_v59, %v480_v57  ;;  %v1025_v63 = vadd.f32 %v1544_v11, %v1496_v60  ;;  %v1127_v11 = vld [vmem:[%s2044_s4 + $0x8] sm:$0xff] (!%p1425_p11)  ;;  %v1163_v57 = vmax.f32 (!%p1425_p11), %v1147_v48, 0.0  ;;  %v1097_v60 = vmul.f32 (!%p1425_p11), %v1890_v2, %v1074_v44 }
 0x16d   : > { %v1111_v16 = vadd.f32 (!%p1425_p11), %v1895_v3, %v1088_v7  ;;  %v1076_v50 = vld [vmem:[#allocation2 + $0x60] sm:$0xff] (!%p1425_p11)  ;;  %v1135_v59 = vld [vmem:[%s2044_s4 + $0x48] sm:$0xff] (!%p1425_p11)  ;;  %v1119_v4 = vadd.f32 (!%p1425_p11), %v1895_v3, %v1096_v55  ;;  %v1150_v8 = vadd.f32 (!%p1425_p11), %v1134_v54, %v1118_v58  ;;  %1181 = vst [vmem:[%s2045_s5 + $0x38] sm:$0xff] (!%p1425_p11), %v1165_v1 }
 0x16e   : > { %1058 = vst [vmem:[#allocation2 + $0x70] sm:$0xff] %v1042_v62  ;;  %v1043_v0 = vadd.f32 %v1025_v63, %v481_v61  ;;  %v1098_v61 = vmul.f32 (!%p1425_p11), %v1890_v2, %v1075_v45  ;;  %v1099_v7 = vmul.f32 (!%p1425_p11), %v1890_v2, %v1076_v50  ;;  %1179 = vst [vmem:[%s2045_s5 + $0x28] sm:$0xff] (!%p1425_p11), %v1163_v57 }
 0x16f   : > { %v1143_v27 = vadd.f32 (!%p1425_p11), %v1127_v11, %v1111_v16  ;;  %v1077_v56 = vld [vmem:[#allocation2 + $0x68] sm:$0xff] (!%p1425_p11)  ;;  %v1120_v9 = vadd.f32 (!%p1425_p11), %v1895_v3, %v1097_v60  ;;  %v1138_v11 = vld [vmem:[%s2044_s4 + $0x60] sm:$0xff] (!%p1425_p11)  ;;  %v1151_v13 = vadd.f32 (!%p1425_p11), %v1135_v59, %v1119_v4  ;;  %v1166_v18 = vmax.f32 (!%p1425_p11), %v1150_v8, 0.0 }
 0x170   : > { %1059 = vst [vmem:[#allocation2 + $0x78] sm:$0xff] %v1043_v0  ;;  %v1164_v0 = vmax.f32 (!%p1425_p11), %v1148_v52, 0.0  ;;  %v1121_v10 = vadd.f32 (!%p1425_p11), %v1895_v3, %v1098_v61  ;;  %v1100_v12 = vmul.f32 (!%p1425_p11), %v1890_v2, %v1077_v56  ;;  %v1122_v14 = vadd.f32 (!%p1425_p11), %v1895_v3, %v1099_v7 }
 0x171   : > { %v1159_v40 = vmax.f32 %v1143_v27, 0.0  ;;  %v1152_v19 = vadd.f32 %v1136_v5, %v1120_v9  ;;  %v1167_v24 = vmax.f32 %v1151_v13, 0.0  ;;  %1182 = vst [vmem:[%s2045_s5 + $0x40] sm:$0xff] %v1166_v18 }
 0x172   : > { %1180 = vst [vmem:[%s2045_s5 + $0x30] sm:$0xff] %v1164_v0  ;;  %v1153_v20 = vadd.f32 %v1137_v6, %v1121_v10  ;;  %v1123_v21 = vadd.f32 %v1895_v3, %v1100_v12  ;;  %v1154_v25 = vadd.f32 %v1138_v11, %v1122_v14 }
 0x173   : > { %1175 = vst [vmem:[%s2045_s5 + $0x8] sm:$0xff] %v1159_v40  ;;  %1183 = vst [vmem:[%s2045_s5 + $0x48] sm:$0xff] %v1167_v24 }
 0x174   : > { %v1169_v28 = vmax.f32 %v1153_v20, 0.0  ;;  %v1155_v29 = vadd.f32 %v1139_v15, %v1123_v21  ;;  %v1170_v30 = vmax.f32 %v1154_v25, 0.0 }
 0x175   : > { %v1078_v62 = vld [vmem:[#allocation2 + $0x70] sm:$0xff] }
 0x176   : > { %v1101_v16 = vmul.f32 %v1890_v2, %v1078_v62  ;;  %1185 = vst [vmem:[%s2045_s5 + $0x58] sm:$0xff] %v1169_v28  ;;  %1186 = vst [vmem:[%s2045_s5 + $0x60] sm:$0xff] %v1170_v30 }
 0x177   : > { %v1079_v63 = vld [vmem:[#allocation2 + $0x78] sm:$0xff] }
 0x178   : > { %v1102_v17 = vmul.f32 %v1890_v2, %v1079_v63  ;;  %v1124_v26 = vadd.f32 %v1895_v3, %v1101_v16  ;;  %v1168_v2 = vmax.f32 %v1152_v19, 0.0 }
 0x17a   : > { %v1125_v27 = vadd.f32 %v1895_v3, %v1102_v17  ;;  %v1156_v31 = vadd.f32 %v1140_v22, %v1124_v26  ;;  %1184 = vst [vmem:[%s2045_s5 + $0x50] sm:$0xff] %v1168_v2  ;;  %v1171_v3 = vmax.f32 %v1155_v29, 0.0 }
 0x17c   : > { %v1157_v32 = vadd.f32 %v1141_v23, %v1125_v27  ;;  %v1172_v33 = vmax.f32 %v1156_v31, 0.0  ;;  %1187 = vst [vmem:[%s2045_s5 + $0x68] sm:$0xff] %v1171_v3 }
 0x17e   : > { %v1173_v34 = vmax.f32 %v1157_v32, 0.0  ;;  %1188 = vst [vmem:[%s2045_s5 + $0x70] sm:$0xff] %v1172_v33 }
 0x180   : > { %1189 = vst [vmem:[%s2045_s5 + $0x78] sm:$0xff] %v1173_v34 }
 0x181 PF: > { %s15_s22 = sadd.s32 1, %s1682_s22   ;;  %s2046_s18 = smov %s1670_s19 }
 0x182   : > { %p12_p12 = scmp.ge.s32.totalorder %s15_s22, 5   ;;  %s2047_s19 = smov %s1750_s26 }
 0x183   : > { %s2048_s20 = smov %s1678_s21  ;;  %s2049_s21 = smov %s2051_s23 }
 0x184   :  { %14 = sbr.rel (!%p12_p12) target bundleno = 3 (0x3), region = 127 }

// kernel: resnet18_forward.29
= control target key start
LH: loop header
LB: loop body
LE: loop exit
PB: predicated region body
PF: predicated region fallthrough
CT: control target
= control target key end

     0   :  { %s1599_s15 = smov 0   ;;  %s1601_s16 = smov 0   ;;  %s1858_s0 = inlined_call_operand.vmem [shape: bf16[128,1152], index: 0, kind: input, shape index: {}]   ;;  %s1859_s1 = inlined_call_operand.vmem [shape: bf16[1152,128], index: 1, kind: input, shape index: {}]   ;;  %s1860_s2 = inlined_call_operand.vmem [shape: f32[1,128], index: 2, kind: input, shape index: {}]   ;;  %s1861_s3 = inlined_call_operand.vmem [shape: f32[1,128], index: 3, kind: input, shape index: {}]   ;;  %s1862_s4 = inlined_call_operand.vmem [shape: f32[128,128], index: 4, kind: output, shape index: {}]  }
   0x1   :  { %s1603_s17 = smov 0   ;;  %s1605_s18 = smov 0  }
   0x2   :  { %s1607_s19 = smov 0  }
   0x3 LB: > { %s26_s20 = sadd.s32 1, %s1567_s18  ;;  %p49_p1 = scmp.ne.s32.totalorder %s1559_s16, %s1555_s15  ;;  %s1571_s19 = sphi %s1607_s19, %s14_s19   ;;  %s1567_s18 = sphi %s1605_s18, %s1866_s18   ;;  %s1563_s17 = sphi %s1603_s17, %s1865_s17   ;;  %s1559_s16 = sphi %s1601_s16, %s1864_s16   ;;  %s1555_s15 = sphi %s1599_s15, %s1863_s15  }
   0x4   : > { %p27_p0 = scmp.ge.s32.totalorder %s26_s20, 3  ;;  %p50_p2 = scmp.eq.s32.totalorder %s1571_s19, 0 }
   0x5   : > { %s42_s22 = sadd.s32 1, %s1559_s16  ;;  %p1229_p5 = scmp.ge.s32.totalorder %s1571_s19, 3 }
   0x6   : > { %s1868_s20 = smov (%p27_p0, %s26_s20), 0  ;;  %p51_p3 = por %p50_p2, %p49_p1 }
   0x7   : > { %s38_s21 = ssub.s32 %s1567_s18, %s1868_s20  ;;  %195 = sbr.rel (%p1229_p5) target bundleno = 37 (0x25), region = 24 }
   0x8   : > { %p40_p4 = scmp.eq.s32.totalorder %s38_s21, 0 }
   0xa   : > { %s1634_s23 = scalar_select %p40_p4, %s1559_s16, %s42_s22  }
   0xe   : > { %198 = sbr.rel (!%p51_p3) target bundleno = 37 (0x25), region = 28  ;;  %s200_s24 = sand.u32 (%p51_p3), 1, %s1559_s16  }
   0xf   : > { %s1321_s25 = smul.u32 (%p51_p3), 12, %s1567_s18 }
  0x10   : > { %s1434_s26 = smul.u32 (%p51_p3), 192, %s200_s24 }
  0x11   : > { %s1642_s29 = scalar_lea.vmem (%p51_p3), %s1858_s0, %s1321_s25 }
  0x12   : > { %v223_v0 = vld [vmem:[%s1642_s29] sm:$0xff] (%p51_p3)  ;;  %v227_v2 = vld [vmem:[%s1642_s29 + $0x48] sm:$0xff] (%p51_p3)  ;;  %s1647_s30 = scalar_lea.vmem (%p51_p3), [#allocation3], %s1434_s26  ;;  %v231_v4 = vld [vmem:[%s1642_s29 + $0x90] sm:$0xff] (%p51_p3) }
  0x13   : > { %v225_v1 = vld [vmem:[%s1642_s29 + $0x24] sm:$0xff] (%p51_p3)  ;;  %224 = vst [vmem:[%s1647_s30] sm:$0xff] (%p51_p3), %v223_v0  ;;  %228 = vst [vmem:[%s1647_s30 + $0x18] sm:$0xff] (%p51_p3), %v227_v2  ;;  %v229_v3 = vld [vmem:[%s1642_s29 + $0x6c] sm:$0xff] (%p51_p3) }
  0x14   : > { %226 = vst [vmem:[%s1647_s30 + $0xc] sm:$0xff] (%p51_p3), %v225_v1  ;;  %v233_v5 = vld [vmem:[%s1642_s29 + $0xb4] sm:$0xff] (%p51_p3)  ;;  %230 = vst [vmem:[%s1647_s30 + $0x24] sm:$0xff] (%p51_p3), %v229_v3  ;;  %v237_v7 = vld [vmem:[%s1642_s29 + $0xfc] sm:$0xff] (%p51_p3) }
  0x15   : > { %232 = vst [vmem:[%s1647_s30 + $0x30] sm:$0xff] %v231_v4  ;;  %234 = vst [vmem:[%s1647_s30 + $0x3c] sm:$0xff] %v233_v5  ;;  %v235_v6 = vld [vmem:[%s1642_s29 + $0xd8] sm:$0xff]  ;;  %v239_v8 = vld [vmem:[%s1642_s29 + $0x120] sm:$0xff] }
  0x16   : > { %236 = vst [vmem:[%s1647_s30 + $0x48] sm:$0xff] %v235_v6  ;;  %238 = vst [vmem:[%s1647_s30 + $0x54] sm:$0xff] %v237_v7  ;;  %v241_v9 = vld [vmem:[%s1642_s29 + $0x144] sm:$0xff]  ;;  %v245_v11 = vld [vmem:[%s1642_s29 + $0x18c] sm:$0xff] }
  0x17   : > { %240 = vst [vmem:[%s1647_s30 + $0x60] sm:$0xff] %v239_v8  ;;  %v243_v10 = vld [vmem:[%s1642_s29 + $0x168] sm:$0xff]  ;;  %242 = vst [vmem:[%s1647_s30 + $0x6c] sm:$0xff] %v241_v9  ;;  %v247_v12 = vld [vmem:[%s1642_s29 + $0x1b0] sm:$0xff] }
  0x18   : > { %244 = vst [vmem:[%s1647_s30 + $0x78] sm:$0xff] %v243_v10  ;;  %246 = vst [vmem:[%s1647_s30 + $0x84] sm:$0xff] %v245_v11  ;;  %v249_v13 = vld [vmem:[%s1642_s29 + $0x1d4] sm:$0xff]  ;;  %v253_v15 = vld [vmem:[%s1642_s29 + $0x21c] sm:$0xff] }
  0x19   : > { %v251_v14 = vld [vmem:[%s1642_s29 + $0x1f8] sm:$0xff]  ;;  %248 = vst [vmem:[%s1647_s30 + $0x90] sm:$0xff] %v247_v12  ;;  %250 = vst [vmem:[%s1647_s30 + $0x9c] sm:$0xff] %v249_v13  ;;  %v1231_v16 = vld [vmem:[%s1642_s29 + $0x8] sm:$0xf] }
  0x1a   : > { %252 = vst [vmem:[%s1647_s30 + $0xa8] sm:$0xff] %v251_v14  ;;  %v1233_v17 = vld [vmem:[%s1642_s29 + $0x2c] sm:$0xf]  ;;  %254 = vst [vmem:[%s1647_s30 + $0xb4] sm:$0xff] %v253_v15  ;;  %v1235_v18 = vld [vmem:[%s1642_s29 + $0x50] sm:$0xf] }
  0x1b   : > { %1232 = vst [vmem:[%s1647_s30 + $0x8] sm:$0xf] %v1231_v16  ;;  %1234 = vst [vmem:[%s1647_s30 + $0x14] sm:$0xf] %v1233_v17  ;;  %v1237_v19 = vld [vmem:[%s1642_s29 + $0x74] sm:$0xf] }
  0x1c   : > { %v1239_v20 = vld [vmem:[%s1642_s29 + $0x98] sm:$0xf]  ;;  %1236 = vst [vmem:[%s1647_s30 + $0x20] sm:$0xf] %v1235_v18  ;;  %1238 = vst [vmem:[%s1647_s30 + $0x2c] sm:$0xf] %v1237_v19 }
  0x1d   : > { %1240 = vst [vmem:[%s1647_s30 + $0x38] sm:$0xf] %v1239_v20  ;;  %v1241_v21 = vld [vmem:[%s1642_s29 + $0xbc] sm:$0xf]  ;;  %v1243_v22 = vld [vmem:[%s1642_s29 + $0xe0] sm:$0xf] }
  0x1e   : > { %v1245_v23 = vld [vmem:[%s1642_s29 + $0x104] sm:$0xf]  ;;  %1242 = vst [vmem:[%s1647_s30 + $0x44] sm:$0xf] %v1241_v21  ;;  %1244 = vst [vmem:[%s1647_s30 + $0x50] sm:$0xf] %v1243_v22 }
  0x1f   : > { %1246 = vst [vmem:[%s1647_s30 + $0x5c] sm:$0xf] %v1245_v23  ;;  %v1247_v24 = vld [vmem:[%s1642_s29 + $0x128] sm:$0xf]  ;;  %v1249_v25 = vld [vmem:[%s1642_s29 + $0x14c] sm:$0xf] }
  0x20   : > { %v1251_v26 = vld [vmem:[%s1642_s29 + $0x170] sm:$0xf]  ;;  %1248 = vst [vmem:[%s1647_s30 + $0x68] sm:$0xf] %v1247_v24  ;;  %1250 = vst [vmem:[%s1647_s30 + $0x74] sm:$0xf] %v1249_v25 }
  0x21   : > { %1252 = vst [vmem:[%s1647_s30 + $0x80] sm:$0xf] %v1251_v26  ;;  %v1253_v27 = vld [vmem:[%s1642_s29 + $0x194] sm:$0xf]  ;;  %v1255_v28 = vld [vmem:[%s1642_s29 + $0x1b8] sm:$0xf] }
  0x22   : > { %v1257_v29 = vld [vmem:[%s1642_s29 + $0x1dc] sm:$0xf]  ;;  %1254 = vst [vmem:[%s1647_s30 + $0x8c] sm:$0xf] %v1253_v27  ;;  %1256 = vst [vmem:[%s1647_s30 + $0x98] sm:$0xf] %v1255_v28 }
  0x23   : > { %1258 = vst [vmem:[%s1647_s30 + $0xa4] sm:$0xf] %v1257_v29  ;;  %v1259_v30 = vld [vmem:[%s1642_s29 + $0x200] sm:$0xf]  ;;  %v1261_v31 = vld [vmem:[%s1642_s29 + $0x224] sm:$0xf] }
  0x24   : > { %1260 = vst [vmem:[%s1647_s30 + $0xb0] sm:$0xf] %v1259_v30  ;;  %1262 = vst [vmem:[%s1647_s30 + $0xbc] sm:$0xf] %v1261_v31 }
  0x25 PF: > { %p1263_p6 = scmp.ge.s32.totalorder %s1571_s19, 1  ;;  %p310_p7 = scmp.lt.s32.totalorder %s1571_s19, 4 }
  0x27   : > { %p311_p8 = pnand %p1263_p6, %p310_p7 }
  0x28   : > { %s317_s5 = sand.u32 (!%p311_p8), 1, %s1555_s15   ;;  %s361_s6 = smul.u32 (!%p311_p8), 48, %s1563_s17 }
  0x29   : > { %314 = sbr.rel (%p311_p8) target bundleno = 383 (0x17f), region = 58  ;;  %p1265_p10 = scmp.ne.s32.totalorder (!%p311_p8), %s1563_s17, 0 }
  0x2a   : > { %s1435_s7 = smul.u32 (!%p311_p8), 192, %s317_s5  ;;  %p362_p9 = scmp.lt.s32.totalorder (!%p311_p8), %s361_s6, 143 }
  0x2c   : > { %s1719_s12 = scalar_lea.vmem (!%p311_p8), [#allocation3], %s1435_s7 }
  0x30   : > { %s1870_s6 = smov (!%p362_p9, %s361_s6), 143  ;;  %389 = sbr.rel (%p1265_p10) target bundleno = 58 (0x3a), region = 66 }
  0x31   : > { %s1264_s8 = sshll.u32 %s1870_s6, 2  ;;  %v1573_v32 = vmov (!%p1265_p10), 0.0  }
  0x32   : > { %s1717_s11 = scalar_lea.vmem %s1859_s1, %s1264_s8  ;;  %390 = vst [vmem:[#allocation2] sm:$0xff] (!%p1265_p10), %v1573_v32  ;;  %391 = vst [vmem:[#allocation2 + $0x8] sm:$0xff] (!%p1265_p10), %v1573_v32 }
  0x33   : > { %392 = vst [vmem:[#allocation2 + $0x10] sm:$0xff] (!%p1265_p10), %v1573_v32  ;;  %393 = vst [vmem:[#allocation2 + $0x18] sm:$0xff] (!%p1265_p10), %v1573_v32 }
  0x34   : > { %394 = vst [vmem:[#allocation2 + $0x20] sm:$0xff] (!%p1265_p10), %v1573_v32  ;;  %395 = vst [vmem:[#allocation2 + $0x28] sm:$0xff] (!%p1265_p10), %v1573_v32 }
  0x35   : > { %396 = vst [vmem:[#allocation2 + $0x30] sm:$0xff] (!%p1265_p10), %v1573_v32  ;;  %397 = vst [vmem:[#allocation2 + $0x38] sm:$0xff] (!%p1265_p10), %v1573_v32 }
  0x36   : > { %398 = vst [vmem:[#allocation2 + $0x40] sm:$0xff] (!%p1265_p10), %v1573_v32  ;;  %399 = vst [vmem:[#allocation2 + $0x48] sm:$0xff] (!%p1265_p10), %v1573_v32 }
  0x37   : > { %400 = vst [vmem:[#allocation2 + $0x50] sm:$0xff] %v1573_v32  ;;  %401 = vst [vmem:[#allocation2 + $0x58] sm:$0xff] %v1573_v32 }
  0x38   : > { %402 = vst [vmem:[#allocation2 + $0x60] sm:$0xff] %v1573_v32  ;;  %403 = vst [vmem:[#allocation2 + $0x68] sm:$0xff] %v1573_v32 }
  0x39   : > { %404 = vst [vmem:[#allocation2 + $0x70] sm:$0xff] %v1573_v32  ;;  %405 = vst [vmem:[#allocation2 + $0x78] sm:$0xff] %v1573_v32 }
  0x3a PF: > { %v1477_v33 = vld [vmem:[%s1717_s11 + $0x40] sm:$0xff]   ;;  %v1480_v36 = vld [vmem:[%s1717_s11 + $0x48] sm:$0xff]   ;;  %v1483_v39 = vld [vmem:[%s1717_s11 + $0x50] sm:$0xff]   ;;  %p1314_p11 = scmp.ne.s32.totalorder %s1563_s17, 2 }
  0x3b   : > { %v1478_v34 = vld [vmem:[%s1717_s11] sm:$0xff]   ;;  %1322 = vmatprep.subr.bf16.mxu0 %v1477_v33  ;;  %v1481_v37 = vld [vmem:[%s1717_s11 + $0x8] sm:$0xff]   ;;  %v1484_v40 = vld [vmem:[%s1717_s11 + $0x10] sm:$0xff]  }
  0x3c   : > { %v1479_v35 = vld [vmem:[%s1717_s11 + $0x80] sm:$0xff]   ;;  %1323 = vmatpush3.bf16.msra.mxu0 %v1478_v34  ;;  %v1482_v38 = vld [vmem:[%s1717_s11 + $0x88] sm:$0xff]   ;;  %v1485_v41 = vld [vmem:[%s1717_s11 + $0x90] sm:$0xff]  }
  0x3d   : > { %1402 = vmatprep.subr.bf16.mxu1 %v1479_v35  ;;  %1324 = vmatprep.subr.bf16.mxu0 %v1480_v36  ;;  %v1486_v42 = vld [vmem:[%s1717_s11 + $0x58] sm:$0xff]   ;;  %v1489_v45 = vld [vmem:[%s1717_s11 + $0x60] sm:$0xff]   ;;  %v1492_v48 = vld [vmem:[%s1717_s11 + $0x68] sm:$0xff]  }
  0x3e   : > { %1403 = vmatpush3.bf16.msra.mxu1 %v1479_v35  ;;  %v1487_v43 = vld [vmem:[%s1717_s11 + $0x18] sm:$0xff]   ;;  %v1491_v46 = vld [vmem:[%s1717_s11 + $0xa0] sm:$0xff]   ;;  %v1494_v49 = vld [vmem:[%s1717_s11 + $0xa8] sm:$0xff]  }
  0x3f   : > { %1404 = vmatprep.subr.bf16.mxu1 %v1482_v38  ;;  %v1488_v44 = vld [vmem:[%s1717_s11 + $0x98] sm:$0xff]   ;;  %v1490_v47 = vld [vmem:[%s1717_s11 + $0x20] sm:$0xff]   ;;  %v1493_v50 = vld [vmem:[%s1717_s11 + $0x28] sm:$0xff]  }
  0x40   : > { %1325 = vmatpush3.bf16.msra.mxu0 %v1481_v37  ;;  %v1495_v51 = vld [vmem:[%s1717_s11 + $0x70] sm:$0xff]   ;;  %v1498_v54 = vld [vmem:[%s1717_s11 + $0x78] sm:$0xff]   ;;  %v1501_v59 = vld [vmem:[%s1719_s12] ss:$12 sps:$4 sm:$0xff]  }
  0x41   : > { %1326 = vmatprep.subr.bf16.mxu0 %v1483_v39  ;;  %v1496_v52 = vld [vmem:[%s1717_s11 + $0x30] sm:$0xff]   ;;  %v1500_v55 = vld [vmem:[%s1717_s11 + $0xb8] sm:$0xff]   ;;  %v1505_v61 = vld [vmem:[%s1719_s12 + $0x20] ss:$12 sps:$4 sm:$0xff]  }
  0x42   : > { %1405 = vmatpush3.bf16.msra.mxu1 %v1482_v38  ;;  %v1497_v53 = vld [vmem:[%s1717_s11 + $0xb0] sm:$0xff]   ;;  %v1499_v58 = vld [vmem:[%s1717_s11 + $0x38] sm:$0xff]   ;;  %v1521_v5 = vld [vmem:[%s1719_s12 + $0x80] ss:$12 sps:$4 sm:$0xff]  }
  0x43   : > { %1406 = vmatprep.subr.bf16.mxu1 %v1485_v41  ;;  %v1503_v56 = vld [vmem:[%s1719_s12 + $0x4] ss:$12 sps:$4 sm:$0xff]   ;;  %v1504_v57 = vld [vmem:[%s1719_s12 + $0x8] ss:$12 sps:$4 sm:$0xff]   ;;  %v1514_v4 = vld [vmem:[%s1719_s12 + $0x4c] ss:$12 sps:$4 sm:$0xff]  }
  0x44   : > { %1327 = vmatpush3.bf16.msra.mxu0 %v1484_v40  ;;  %806 = vmatprep.mubr.bf16.mxu0 %v1503_v56  ;;  %v1506_v60 = vld [vmem:[%s1719_s12 + $0x1c] ss:$12 sps:$4 sm:$0xff]   ;;  %v1512_v62 = vld [vmem:[%s1719_s12 + $0x38] ss:$12 sps:$4 sm:$0xff]   ;;  %v1509_v0 = vld [vmem:[%s1719_s12 + $0x34] ss:$12 sps:$4 sm:$0xff]  }
  0x45   : > { %1328 = vmatprep.subr.bf16.mxu0 %v1486_v42  ;;  %1418 = vmatprep.mubr.bf16.mxu1 %v1504_v57  ;;  %v1508_v63 = vld [vmem:[%s1719_s12 + $0x18] ss:$12 sps:$4 sm:$0xff]   ;;  %v1513_v1 = vld [vmem:[%s1719_s12 + $0x50] ss:$12 sps:$4 sm:$0xff]   ;;  %v1520_v2 = vld [vmem:[%s1719_s12 + $0x68] ss:$12 sps:$4 sm:$0xff]  }
  0x46   : > { %1407 = vmatpush3.bf16.msra.mxu1 %v1485_v41  ;;  %v1511_v3 = vld [vmem:[%s1719_s12 + $0x30] ss:$12 sps:$4 sm:$0xff]   ;;  %v1528_v6 = vld [vmem:[%s1719_s12 + $0x98] ss:$12 sps:$4 sm:$0xff]   ;;  %v1516_v7 = vld [vmem:[%s1719_s12 + $0x48] ss:$12 sps:$4 sm:$0xff]  }
  0x47   : > { %1408 = vmatprep.subr.bf16.mxu1 %v1488_v44  ;;  %v1517_v8 = vld [vmem:[%s1719_s12 + $0x64] ss:$12 sps:$4 sm:$0xff]   ;;  %v1519_v10 = vld [vmem:[%s1719_s12 + $0x60] ss:$12 sps:$4 sm:$0xff]   ;;  %v1522_v11 = vld [vmem:[%s1719_s12 + $0x7c] ss:$12 sps:$4 sm:$0xff]  }
  0x48   : > { %1329 = vmatpush3.bf16.msra.mxu0 %v1487_v43  ;;  %v1529_v9 = vld [vmem:[%s1719_s12 + $0xb0] ss:$12 sps:$4 sm:$0xff]   ;;  %v1524_v12 = vld [vmem:[%s1719_s12 + $0x78] ss:$12 sps:$4 sm:$0xff]   ;;  %v1525_v13 = vld [vmem:[%s1719_s12 + $0x94] ss:$12 sps:$4 sm:$0xff]  }
  0x49   : > { %1330 = vmatprep.subr.bf16.mxu0 %v1489_v45  ;;  %v1527_v14 = vld [vmem:[%s1719_s12 + $0x90] ss:$12 sps:$4 sm:$0xff]   ;;  %v1530_v15 = vld [vmem:[%s1719_s12 + $0xac] ss:$12 sps:$4 sm:$0xff]   ;;  %v1532_v16 = vld [vmem:[%s1719_s12 + $0xa8] ss:$12 sps:$4 sm:$0xff]  }
  0x4a   : > { %1409 = vmatpush3.bf16.msra.mxu1 %v1488_v44  ;;  %v406_v23 = vld [vmem:[#allocation2] sm:$0xff]  ;;  %v407_v28 = vld [vmem:[#allocation2 + $0x8] sm:$0xff]  ;;  %v408_v38 = vld [vmem:[#allocation2 + $0x10] sm:$0xff] }
  0x4b   : > { %1410 = vmatprep.subr.bf16.mxu1 %v1491_v46  ;;  %v409_v44 = vld [vmem:[#allocation2 + $0x18] sm:$0xff] }
  0x4c   : > { %1331 = vmatpush3.bf16.msra.mxu0 %v1490_v47 }
  0x4d   : > { %1332 = vmatprep.subr.bf16.mxu0 %v1492_v48 }
  0x4e   : > { %1411 = vmatpush3.bf16.msra.mxu1 %v1491_v46 }
  0x4f   : > { %1412 = vmatprep.subr.bf16.mxu1 %v1494_v49 }
  0x50   : > { %1333 = vmatpush3.bf16.msra.mxu0 %v1493_v50 }
  0x51   : > { %1334 = vmatprep.subr.bf16.mxu0 %v1495_v51 }
  0x52   : > { %1413 = vmatpush3.bf16.msra.mxu1 %v1494_v49 }
  0x53   : > { %1414 = vmatprep.subr.bf16.mxu1 %v1497_v53 }
  0x54   : > { %1335 = vmatpush3.bf16.msra.mxu0 %v1496_v52 }
  0x55   : > { %1336 = vmatprep.subr.bf16.mxu0 %v1498_v54 }
  0x56   : > { %1415 = vmatpush3.bf16.msra.mxu1 %v1497_v53 }
  0x57   : > { %1416 = vmatprep.subr.bf16.mxu1 %v1500_v55 }
  0x58   : > { %1337 = vmatpush3.bf16.msra.mxu0 %v1499_v58 }
  0x5a   : > { %1417 = vmatpush3.bf16.msra.mxu1 %v1500_v55  ;;  %v410_v55 = vld [vmem:[#allocation2 + $0x20] sm:$0xff] }
  0x5b   : > { %807 = vmatmul.mubr.bf16.vlgmr.msra.gmra.mrb[0].mxu0 %v1501_v59 }
  0x5c   : > { %814 = vmatprep.mubr.bf16.mxu0 %v1506_v60  ;;  %v411_v60 = vld [vmem:[#allocation2 + $0x28] sm:$0xff] }
  0x5d   : > { %1419 = vmatmul.mubr.bf16.vlgmr.msra.gmra.mrb[0].mxu1 %v1505_v61 }
  0x5e   : > { %1422 = vmatprep.mubr.bf16.mxu1 %v1512_v62 }
  0x63   : > { %815 = vmatmul.mubr.bf16.gmra.mrb[4].mxu0 %v1508_v63 }
  0x64   : > { %822 = vmatprep.mubr.bf16.mxu0 %v1509_v0 }
  0x65   : > { %1423 = vmatmul.mubr.bf16.gmra.mrb[4].mxu1 %v1513_v1 }
  0x66   : > { %1426 = vmatprep.mubr.bf16.mxu1 %v1520_v2 }
  0x6b   : > { %823 = vmatmul.mubr.bf16.gmra.mrb[8].mxu0 %v1511_v3 }
  0x6c   : > { %830 = vmatprep.mubr.bf16.mxu0 %v1514_v4 }
  0x6d   : > { %1427 = vmatmul.mubr.bf16.gmra.mrb[8].mxu1 %v1521_v5 }
  0x6e   : > { %1430 = vmatprep.mubr.bf16.mxu1 %v1528_v6  ;;  %v412_v6 = vld [vmem:[#allocation2 + $0x30] sm:$0xff] }
  0x73   : > { %831 = vmatmul.mubr.bf16.gmra.mrb[12].mxu0 %v1516_v7 }
  0x74   : > { %838 = vmatprep.mubr.bf16.mxu0 %v1517_v8 }
  0x75   : > { %1431 = vmatmul.mubr.bf16.gmra.mrb[12].mxu1 %v1529_v9 }
  0x7b   : > { %839 = vmatmul.mubr.bf16.gmra.mrb[16].mxu0 %v1519_v10 }
  0x7c   : > { %846 = vmatprep.mubr.bf16.mxu0 %v1522_v11 }
  0x83   : > { %847 = vmatmul.mubr.bf16.gmra.mrb[20].mxu0 %v1524_v12  ;;  %v413_v12 = vld [vmem:[#allocation2 + $0x38] sm:$0xff] }
  0x84   : > { %854 = vmatprep.mubr.bf16.mxu0 %v1525_v13 }
  0x8b   : > { %855 = vmatmul.mubr.bf16.gmra.mrb[24].mxu0 %v1527_v14 }
  0x8c   : > { %862 = vmatprep.mubr.bf16.mxu0 %v1530_v15 }
  0x93   : > { %863 = vmatmul.mubr.bf16.gmra.mrb[28].mxu0 %v1532_v16 }
 0x12e   : > { %v1338_v17 = vpop.f32.mrb[0].mxu0 }
 0x12f   : > { %v1339_v18 = vpop.f32.mrb[1].mxu0 }
 0x130   : > { %v1340_v19 = vadd.f32 %v1339_v18, %v1338_v17  ;;  %v1341_v20 = vpop.f32.mrb[2].mxu0  ;;  %v1420_v21 = vpop.f32.mrb[0].mxu1 }
 0x131   : > { %v1342_v22 = vpop.f32.mrb[3].mxu0  ;;  %v905_v24 = vpop.f32.mrb[1].mxu1 }
 0x132   : > { %v1343_v25 = vadd.f32 %v1342_v22, %v1341_v20  ;;  %v906_v26 = vadd.f32 %v1340_v19, %v905_v24  ;;  %v1421_v27 = vpop.f32.mrb[2].mxu1  ;;  %v414_v22 = vld [vmem:[#allocation2 + $0x40] sm:$0xff] }
 0x133   : > { %v908_v29 = vpop.f32.mrb[3].mxu1 }
 0x134   : > { %v968_v30 = vadd.f32 %v906_v26, %v406_v23  ;;  %v909_v31 = vadd.f32 %v1343_v25, %v908_v29  ;;  %v415_v25 = vld [vmem:[#allocation2 + $0x48] sm:$0xff] }
 0x136   : > { %984 = vst [vmem:[#allocation2] sm:$0xff] %v968_v30  ;;  %v969_v32 = vadd.f32 %v909_v31, %v407_v28  ;;  %v1344_v33 = vpop.f32.mrb[4].mxu0 }
 0x137   : > { %v1345_v34 = vpop.f32.mrb[5].mxu0 }
 0x138   : > { %985 = vst [vmem:[#allocation2 + $0x8] sm:$0xff] %v969_v32  ;;  %v1346_v35 = vadd.f32 %v1345_v34, %v1344_v33  ;;  %v1347_v36 = vpop.f32.mrb[6].mxu0  ;;  %v1424_v37 = vpop.f32.mrb[4].mxu1  ;;  %v416_v33 = vld [vmem:[#allocation2 + $0x50] sm:$0xff] }
 0x139   : > { %v1348_v39 = vpop.f32.mrb[7].mxu0  ;;  %v921_v40 = vpop.f32.mrb[5].mxu1 }
 0x13a   : > { %v914_v41 = vadd.f32 %v1420_v21, %v1346_v35  ;;  %v1349_v42 = vadd.f32 %v1348_v39, %v1347_v36  ;;  %v1425_v43 = vpop.f32.mrb[6].mxu1 }
 0x13b   : > { %v924_v45 = vpop.f32.mrb[7].mxu1 }
 0x13c   : > { %v970_v46 = vadd.f32 %v914_v41, %v408_v38  ;;  %v917_v47 = vadd.f32 %v1421_v27, %v1349_v42 }
 0x13e   : > { %986 = vst [vmem:[#allocation2 + $0x10] sm:$0xff] %v970_v46  ;;  %v971_v48 = vadd.f32 %v917_v47, %v409_v44  ;;  %v1350_v49 = vpop.f32.mrb[8].mxu0  ;;  %v418_v46 = vld [vmem:[#allocation2 + $0x60] sm:$0xff] }
 0x13f   : > { %v1351_v50 = vpop.f32.mrb[9].mxu0 }
 0x140   : > { %987 = vst [vmem:[#allocation2 + $0x18] sm:$0xff] %v971_v48  ;;  %v1352_v51 = vadd.f32 %v1351_v50, %v1350_v49  ;;  %v1353_v52 = vpop.f32.mrb[10].mxu0  ;;  %v1428_v53 = vpop.f32.mrb[8].mxu1  ;;  %v419_v49 = vld [vmem:[#allocation2 + $0x68] sm:$0xff] }
 0x141   : > { %v1354_v54 = vpop.f32.mrb[11].mxu0  ;;  %v937_v56 = vpop.f32.mrb[9].mxu1 }
 0x142   : > { %v1355_v57 = vadd.f32 %v1354_v54, %v1353_v52  ;;  %v922_v58 = vadd.f32 %v1352_v51, %v921_v40  ;;  %v1429_v59 = vpop.f32.mrb[10].mxu1 }
 0x143   : > { %v940_v61 = vpop.f32.mrb[11].mxu1 }
 0x144   : > { %v972_v62 = vadd.f32 %v922_v58, %v410_v55  ;;  %v925_v63 = vadd.f32 %v1355_v57, %v924_v45  ;;  %v420_v57 = vld [vmem:[#allocation2 + $0x70] sm:$0xff] }
 0x146   : > { %988 = vst [vmem:[#allocation2 + $0x20] sm:$0xff] %v972_v62  ;;  %v973_v0 = vadd.f32 %v925_v63, %v411_v60  ;;  %v1356_v1 = vpop.f32.mrb[12].mxu0 }
 0x147   : > { %v1357_v2 = vpop.f32.mrb[13].mxu0 }
 0x148   : > { %989 = vst [vmem:[#allocation2 + $0x28] sm:$0xff] %v973_v0  ;;  %v1358_v3 = vadd.f32 %v1357_v2, %v1356_v1  ;;  %v1359_v4 = vpop.f32.mrb[14].mxu0  ;;  %v1432_v5 = vpop.f32.mrb[12].mxu1  ;;  %v1004_v1 = vld [vmem:[#allocation2] sm:$0xff] (!%p1314_p11) }
 0x149   : > { %v1360_v7 = vpop.f32.mrb[15].mxu0  ;;  %v953_v8 = vpop.f32.mrb[13].mxu1  ;;  %v1315_v2 = vld [vmem:[%s1860_s2] ss:$0 sm:$0xff] (!%p1314_p11) }
 0x14a   : > { %v930_v9 = vadd.f32 %v1424_v37, %v1358_v3  ;;  %v1361_v10 = vadd.f32 %v1360_v7, %v1359_v4  ;;  %v1433_v11 = vpop.f32.mrb[14].mxu1  ;;  %v417_v37 = vld [vmem:[#allocation2 + $0x58] sm:$0xff]  ;;  %v1777_v3 = vld [vmem:[%s1861_s3] ss:$0 sm:$0xff] (!%p1314_p11)  ;;  %v1027_v4 = vmul.f32 (!%p1314_p11), %v1315_v2, %v1004_v1 }
 0x14b   : > { %v956_v13 = vpop.f32.mrb[15].mxu1  ;;  %v1007_v7 = vld [vmem:[#allocation2 + $0x18] sm:$0xff] (!%p1314_p11) }
 0x14c   : > { %v974_v14 = vadd.f32 %v930_v9, %v412_v6  ;;  %v933_v15 = vadd.f32 %v1425_v43, %v1361_v10  ;;  %v1006_v6 = vld [vmem:[#allocation2 + $0x10] sm:$0xff] (!%p1314_p11)  ;;  %v1030_v10 = vmul.f32 (!%p1314_p11), %v1315_v2, %v1007_v7 }
 0x14d   : > { %v1029_v9 = vmul.f32 (!%p1314_p11), %v1315_v2, %v1006_v6 }
 0x14e   : > { %990 = vst [vmem:[#allocation2 + $0x30] sm:$0xff] %v974_v14  ;;  %v975_v16 = vadd.f32 %v933_v15, %v413_v12  ;;  %v1362_v17 = vpop.f32.mrb[16].mxu0  ;;  %v1050_v14 = vadd.f32 (!%p1314_p11), %v1777_v3, %v1027_v4 }
 0x14f   : > { %v1363_v18 = vpop.f32.mrb[17].mxu0  ;;  %v1009_v12 = vld [vmem:[#allocation2 + $0x28] sm:$0xff] (!%p1314_p11) }
 0x150   : > { %991 = vst [vmem:[#allocation2 + $0x38] sm:$0xff] %v975_v16  ;;  %v1364_v19 = vadd.f32 %v1363_v18, %v1362_v17  ;;  %v1365_v20 = vpop.f32.mrb[18].mxu0  ;;  %v1032_v16 = vmul.f32 (!%p1314_p11), %v1315_v2, %v1009_v12 }
 0x151   : > { %v1366_v21 = vpop.f32.mrb[19].mxu0 }
 0x152   : > { %v1367_v23 = vadd.f32 %v1366_v21, %v1365_v20  ;;  %v938_v24 = vadd.f32 %v1364_v19, %v937_v56  ;;  %v1052_v20 = vadd.f32 (!%p1314_p11), %v1777_v3, %v1029_v9  ;;  %v1053_v21 = vadd.f32 (!%p1314_p11), %v1777_v3, %v1030_v10 }
 0x154   : > { %v976_v26 = vadd.f32 %v938_v24, %v414_v22  ;;  %v941_v27 = vadd.f32 %v1367_v23, %v940_v61  ;;  %v421_v61 = vld [vmem:[#allocation2 + $0x78] sm:$0xff]  ;;  %v1066_v24 = vmax.f32 (!%p1314_p11), %v1050_v14, 0.0 }
 0x156   : > { %992 = vst [vmem:[#allocation2 + $0x40] sm:$0xff] %v976_v26  ;;  %v977_v28 = vadd.f32 %v941_v27, %v415_v25  ;;  %v1368_v29 = vpop.f32.mrb[20].mxu0  ;;  %v1055_v26 = vadd.f32 (!%p1314_p11), %v1777_v3, %v1032_v16  ;;  %1082 = vst [vmem:[%s1862_s4] sm:$0xff] (!%p1314_p11), %v1066_v24 }
 0x157   : > { %v1369_v30 = vpop.f32.mrb[21].mxu0  ;;  %v1011_v18 = vld [vmem:[#allocation2 + $0x38] sm:$0xff] (!%p1314_p11) }
 0x158   : > { %993 = vst [vmem:[#allocation2 + $0x48] sm:$0xff] %v977_v28  ;;  %v1370_v31 = vadd.f32 %v1369_v30, %v1368_v29  ;;  %v1371_v32 = vpop.f32.mrb[22].mxu0  ;;  %v1034_v22 = vmul.f32 (!%p1314_p11), %v1315_v2, %v1011_v18 }
 0x159   : > { %v1372_v34 = vpop.f32.mrb[23].mxu0 }
 0x15a   : > { %v946_v35 = vadd.f32 %v1428_v53, %v1370_v31  ;;  %v1373_v36 = vadd.f32 %v1372_v34, %v1371_v32  ;;  %v1068_v32 = vmax.f32 (!%p1314_p11), %v1052_v20, 0.0  ;;  %v1057_v34 = vadd.f32 (!%p1314_p11), %v1777_v3, %v1034_v22 }
 0x15c   : > { %v978_v38 = vadd.f32 %v946_v35, %v416_v33  ;;  %v949_v39 = vadd.f32 %v1429_v59, %v1373_v36  ;;  %v1069_v33 = vmax.f32 (!%p1314_p11), %v1053_v21, 0.0  ;;  %1084 = vst [vmem:[%s1862_s4 + $0x10] sm:$0xff] (!%p1314_p11), %v1068_v32 }
 0x15d   : > { %v1012_v23 = vld [vmem:[#allocation2 + $0x40] sm:$0xff] (!%p1314_p11) }
 0x15e   : > { %994 = vst [vmem:[#allocation2 + $0x50] sm:$0xff] %v978_v38  ;;  %v979_v40 = vadd.f32 %v949_v39, %v417_v37  ;;  %v1374_v41 = vpop.f32.mrb[24].mxu0  ;;  %v1071_v39 = vmax.f32 (!%p1314_p11), %v1055_v26, 0.0  ;;  %1085 = vst [vmem:[%s1862_s4 + $0x18] sm:$0xff] (!%p1314_p11), %v1069_v33 }
 0x15f   : > { %v1375_v42 = vpop.f32.mrb[25].mxu0  ;;  %v1013_v28 = vld [vmem:[#allocation2 + $0x48] sm:$0xff] (!%p1314_p11) }
 0x160   : > { %995 = vst [vmem:[#allocation2 + $0x58] sm:$0xff] %v979_v40  ;;  %v1376_v43 = vadd.f32 %v1375_v42, %v1374_v41  ;;  %v1377_v44 = vpop.f32.mrb[26].mxu0  ;;  %v1035_v41 = vmul.f32 (!%p1314_p11), %v1315_v2, %v1012_v23  ;;  %1087 = vst [vmem:[%s1862_s4 + $0x28] sm:$0xff] (!%p1314_p11), %v1071_v39 }
 0x161   : > { %v1378_v45 = vpop.f32.mrb[27].mxu0 }
 0x162   : > { %v1379_v47 = vadd.f32 %v1378_v45, %v1377_v44  ;;  %v954_v48 = vadd.f32 %v1376_v43, %v953_v8  ;;  %v1073_v43 = vmax.f32 (!%p1314_p11), %v1057_v34, 0.0  ;;  %v1036_v44 = vmul.f32 (!%p1314_p11), %v1315_v2, %v1013_v28 }
 0x164   : > { %v980_v50 = vadd.f32 %v954_v48, %v418_v46  ;;  %v957_v51 = vadd.f32 %v1379_v47, %v956_v13  ;;  %v1010_v13 = vld [vmem:[#allocation2 + $0x30] sm:$0xff] (!%p1314_p11)  ;;  %v1058_v47 = vadd.f32 (!%p1314_p11), %v1777_v3, %v1035_v41  ;;  %1089 = vst [vmem:[%s1862_s4 + $0x38] sm:$0xff] (!%p1314_p11), %v1073_v43 }
 0x165   : > { %v1033_v17 = vmul.f32 (!%p1314_p11), %v1315_v2, %v1010_v13  ;;  %v1014_v29 = vld [vmem:[#allocation2 + $0x50] sm:$0xff] (!%p1314_p11) }
 0x166   : > { %996 = vst [vmem:[#allocation2 + $0x60] sm:$0xff] %v980_v50  ;;  %v981_v52 = vadd.f32 %v957_v51, %v419_v49  ;;  %v1380_v53 = vpop.f32.mrb[28].mxu0  ;;  %v1037_v45 = vmul.f32 (!%p1314_p11), %v1315_v2, %v1014_v29  ;;  %v1059_v51 = vadd.f32 (!%p1314_p11), %v1777_v3, %v1036_v44 }
 0x167   : > { %v1381_v54 = vpop.f32.mrb[29].mxu0  ;;  %v1056_v27 = vadd.f32 (!%p1314_p11), %v1777_v3, %v1033_v17  ;;  %v1015_v30 = vld [vmem:[#allocation2 + $0x58] sm:$0xff] (!%p1314_p11) }
 0x168   : > { %997 = vst [vmem:[#allocation2 + $0x68] sm:$0xff] %v981_v52  ;;  %v1382_v55 = vadd.f32 %v1381_v54, %v1380_v53  ;;  %v1383_v56 = vpop.f32.mrb[30].mxu0  ;;  %v1038_v46 = vmul.f32 (!%p1314_p11), %v1315_v2, %v1015_v30  ;;  %v1060_v52 = vadd.f32 (!%p1314_p11), %v1777_v3, %v1037_v45 }
 0x169   : > { %v1384_v58 = vpop.f32.mrb[31].mxu0  ;;  %v1072_v40 = vmax.f32 (!%p1314_p11), %v1056_v27, 0.0 }
 0x16a   : > { %v962_v59 = vadd.f32 %v1432_v5, %v1382_v55  ;;  %v1385_v60 = vadd.f32 %v1384_v58, %v1383_v56  ;;  %1003 = sbr.rel (%p1314_p11) target bundleno = 383 (0x17f), region = 70  ;;  %v1005_v5 = vld [vmem:[#allocation2 + $0x8] sm:$0xff] (!%p1314_p11)  ;;  %v1061_v53 = vadd.f32 (!%p1314_p11), %v1777_v3, %v1038_v46  ;;  %v1074_v55 = vmax.f32 (!%p1314_p11), %v1058_v47, 0.0 }
 0x16b   : > { %v1028_v8 = vmul.f32 (!%p1314_p11), %v1315_v2, %v1005_v5  ;;  %1088 = vst [vmem:[%s1862_s4 + $0x30] sm:$0xff] (!%p1314_p11), %v1072_v40 }
 0x16c   : > { %v982_v62 = vadd.f32 %v962_v59, %v420_v57  ;;  %v965_v63 = vadd.f32 %v1433_v11, %v1385_v60  ;;  %v1008_v11 = vld [vmem:[#allocation2 + $0x20] sm:$0xff] (!%p1314_p11)  ;;  %v1075_v59 = vmax.f32 (!%p1314_p11), %v1059_v51, 0.0  ;;  %v1076_v60 = vmax.f32 (!%p1314_p11), %v1060_v52, 0.0  ;;  %1090 = vst [vmem:[%s1862_s4 + $0x40] sm:$0xff] (!%p1314_p11), %v1074_v55 }
 0x16d   : > { %v1031_v15 = vmul.f32 (!%p1314_p11), %v1315_v2, %v1008_v11  ;;  %v1051_v19 = vadd.f32 (!%p1314_p11), %v1777_v3, %v1028_v8  ;;  %v1016_v35 = vld [vmem:[#allocation2 + $0x60] sm:$0xff] (!%p1314_p11) }
 0x16e   : > { %998 = vst [vmem:[#allocation2 + $0x70] sm:$0xff] %v982_v62  ;;  %v983_v0 = vadd.f32 %v965_v63, %v421_v61  ;;  %v1039_v48 = vmul.f32 (!%p1314_p11), %v1315_v2, %v1016_v35  ;;  %v1077_v61 = vmax.f32 (!%p1314_p11), %v1061_v53, 0.0  ;;  %1091 = vst [vmem:[%s1862_s4 + $0x48] sm:$0xff] (!%p1314_p11), %v1075_v59 }
 0x16f   : > { %v1054_v25 = vadd.f32 (!%p1314_p11), %v1777_v3, %v1031_v15  ;;  %v1067_v31 = vmax.f32 (!%p1314_p11), %v1051_v19, 0.0  ;;  %v1017_v36 = vld [vmem:[#allocation2 + $0x68] sm:$0xff] (!%p1314_p11)  ;;  %1092 = vst [vmem:[%s1862_s4 + $0x50] sm:$0xff] (!%p1314_p11), %v1076_v60 }
 0x170   : > { %999 = vst [vmem:[#allocation2 + $0x78] sm:$0xff] %v983_v0  ;;  %v1040_v49 = vmul.f32 (!%p1314_p11), %v1315_v2, %v1017_v36  ;;  %v1062_v56 = vadd.f32 (!%p1314_p11), %v1777_v3, %v1039_v48  ;;  %1093 = vst [vmem:[%s1862_s4 + $0x58] sm:$0xff] (!%p1314_p11), %v1077_v61 }
 0x171   : > { %v1070_v38 = vmax.f32 %v1054_v25, 0.0  ;;  %1083 = vst [vmem:[%s1862_s4 + $0x8] sm:$0xff] %v1067_v31 }
 0x172   : > { %v1063_v57 = vadd.f32 %v1777_v3, %v1040_v49  ;;  %v1078_v63 = vmax.f32 %v1062_v56, 0.0 }
 0x173   : > { %1086 = vst [vmem:[%s1862_s4 + $0x20] sm:$0xff] %v1070_v38 }
 0x174   : > { %v1079_v0 = vmax.f32 %v1063_v57, 0.0  ;;  %1094 = vst [vmem:[%s1862_s4 + $0x60] sm:$0xff] %v1078_v63 }
 0x175   : > { %v1018_v37 = vld [vmem:[#allocation2 + $0x70] sm:$0xff] }
 0x176   : > { %v1041_v50 = vmul.f32 %v1315_v2, %v1018_v37  ;;  %1095 = vst [vmem:[%s1862_s4 + $0x68] sm:$0xff] %v1079_v0 }
 0x177   : > { %v1019_v42 = vld [vmem:[#allocation2 + $0x78] sm:$0xff] }
 0x178   : > { %v1042_v54 = vmul.f32 %v1315_v2, %v1019_v42  ;;  %v1064_v58 = vadd.f32 %v1777_v3, %v1041_v50 }
 0x17a   : > { %v1065_v62 = vadd.f32 %v1777_v3, %v1042_v54  ;;  %v1080_v1 = vmax.f32 %v1064_v58, 0.0 }
 0x17c   : > { %v1081_v2 = vmax.f32 %v1065_v62, 0.0  ;;  %1096 = vst [vmem:[%s1862_s4 + $0x70] sm:$0xff] %v1080_v1 }
 0x17e   : > { %1097 = vst [vmem:[%s1862_s4 + $0x78] sm:$0xff] %v1081_v2 }
 0x17f PF: > { %s14_s19 = sadd.s32 1, %s1571_s19   ;;  %s1863_s15 = smov %s1559_s16 }
 0x180   : > { %p11_p12 = scmp.ge.s32.totalorder %s14_s19, 5   ;;  %s1864_s16 = smov %s1634_s23 }
 0x181   : > { %s1865_s17 = smov %s1567_s18  ;;  %s1866_s18 = smov %s1868_s20 }
 0x182   :  { %13 = sbr.rel (!%p11_p12) target bundleno = 3 (0x3), region = 120 }

// kernel: resnet18_forward.31
= control target key start
LH: loop header
LB: loop body
LE: loop exit
PB: predicated region body
PF: predicated region fallthrough
CT: control target
= control target key end

     0   :  { %s1790_s0 = inlined_call_operand.vmem [shape: bf16[32,1152], index: 0, kind: input, shape index: {}]   ;;  %s1791_s1 = inlined_call_operand.vmem [shape: bf16[1152,256], index: 1, kind: input, shape index: {}]   ;;  %s1792_s2 = inlined_call_operand.vmem [shape: f32[1,256], index: 2, kind: input, shape index: {}]   ;;  %s1793_s3 = inlined_call_operand.vmem [shape: f32[1,256], index: 3, kind: input, shape index: {}]   ;;  %s1794_s4 = inlined_call_operand.vmem [shape: f32[32,256], index: 4, kind: output, shape index: {}]  }
   0x1   :  { %1798 = sst [smem:[#allocation9_spill]] %s1790_s0 }
   0x2   :  { %1799 = sst [smem:[#allocation10_spill]] %s1791_s1 }
   0x3   :  { %s1464_s15 = smov 0   ;;  %s1466_s16 = smov 0  }
   0x4   :  { %s1468_s17 = smov 0   ;;  %s1470_s18 = smov 0  }
   0x5   :  { %s1472_s19 = smov 0   ;;  %s1474_s20 = smov 0  }
   0x6   :  { %s1476_s21 = smov 0   ;;  %s1478_s22 = smov 0  }
   0x7   :  { %s1480_s23 = smov 0   ;;  %s1482_s24 = smov 0  }
   0x8   :  { %s1484_s25 = smov 0  }
   0x9 LB: > { %1800 = sst [smem:[#allocation6_spill]] %s1432_s24  ;;  %s1110_s26 = sadd.s32 4294967295, %s1436_s25   ;;  %s1436_s25 = sphi %s1484_s25, %s14_s25   ;;  %s1432_s24 = sphi %s1482_s24, %s1810_s24   ;;  %s1428_s23 = sphi %s1480_s23, %s1818_s23   ;;  %s1424_s22 = sphi %s1478_s22, %s1808_s22   ;;  %s1420_s21 = sphi %s1476_s21, %s1817_s21   ;;  %s1416_s20 = sphi %s1474_s20, %s1816_s20   ;;  %s1412_s19 = sphi %s1472_s19, %s1815_s19   ;;  %s1408_s18 = sphi %s1470_s18, %s1814_s18   ;;  %s1404_s17 = sphi %s1468_s17, %s1813_s17   ;;  %s1400_s16 = sphi %s1466_s16, %s1812_s16   ;;  %s1396_s15 = sphi %s1464_s15, %s1811_s15  }
   0xa   : > { %s26_s27 = sadd.s32 1, %s1428_s23  ;;  %s29_s28 = sadd.s32 1, %s1432_s24 }
   0xb   : > { %p27_p0 = scmp.ge.s32.totalorder %s26_s27, 3  ;;  %s42_s29 = sadd.s32 1, %s1416_s20 }
   0xc   : > { %p49_p1 = scmp.ne.s32.totalorder %s1416_s20, %s1412_s19  ;;  %p50_p2 = scmp.eq.s32.totalorder %s1436_s25, 0 }
   0xd   : > { %s1820_s27 = smov (%p27_p0, %s26_s27), 0  ;;  %s1822_s28 = smov (!%p27_p0, %s29_s28), %s1432_s24 }
   0xe   : > { %1801 = sst [smem:[#allocation7_spill]] %s1820_s27  ;;  %s38_s30 = ssub.s32 %s1428_s23, %s1820_s27 }
   0xf   : > { %p31_p3 = scmp.ge.s32.totalorder %s1822_s28, 2  ;;  %p40_p4 = scmp.eq.s32.totalorder %s38_s30, 0 }
  0x10   : > { %p1531_p5 = por %p50_p2, %p49_p1  ;;  %s70_s6 = sadd.s32 1, %s1408_s18 }
  0x11   : > { %s1824_s28 = smov (%p31_p3, %s1822_s28), 0  ;;  %p77_p6 = scmp.ne.s32.totalorder %s1408_s18, %s1404_s17 }
  0x12   : > { %1803 = sst [smem:[#allocation8_spill]] %s1824_s28  ;;  %s66_s8 = ssub.s32 %s1432_s24, %s1824_s28 }
  0x13   : > { %s1539_s7 = scalar_select %p40_p4, %s1416_s20, %s42_s29  }
  0x14   : > { %s67_s9 = sor.u32 %s66_s8, %s38_s30  ;;  %p148_p7 = scmp.eq.s32.totalorder %s66_s8, 0 }
  0x15   : > { %p68_p8 = scmp.eq.s32.totalorder %s67_s9, 0  ;;  %p1545_p9 = por %p77_p6, %p50_p2 }
  0x16   : > { %s150_s11 = sadd.s32 1, %s1400_s16  ;;  %p160_p10 = scmp.ne.s32.totalorder %s1400_s16, %s1396_s15 }
  0x17   : > { %s1553_s12 = scalar_select %p68_p8, %s1408_s18, %s70_s6  }
  0x18   : > { %s1556_s13 = scalar_select %p148_p7, %s1400_s16, %s150_s11  }
  0x19   : > { %p161_p11 = scmp.eq.s32.totalorder %s1110_s26, 5  ;;  %p1113_p13 = scmp.ge.s32.totalorder %s1436_s25, 6 }
  0x1b   : > { %p1558_p12 = por %p161_p11, %p160_p10  ;;  %183 = sbr.rel (%p1113_p13) target bundleno = 88 (0x58), region = 16 }
  0x22   : > { %186 = sbr.rel (!%p1531_p5) target bundleno = 47 (0x2f), region = 20  ;;  %s188_s29 = sand.u32 (%p1531_p5), 1, %s1416_s20  }
  0x23   : > { %s1165_s30 = smul.u32 (%p1531_p5), 12, %s1428_s23  ;;  %s1806_s0 = sld [smem:[#allocation9_spill]] (%p1531_p5) }
  0x24   : > { %s1225_s8 = smul.u32 (%p1531_p5), 48, %s188_s29 }
  0x26   : > { %s190_s26 = scalar_lea.vmem (%p1531_p5), [#allocation3], %s1225_s8 }
  0x29   : > { %s196_s11 = scalar_lea.vmem %s1806_s0, %s1165_s30 }
  0x2a   : > { %v211_v0 = vld [vmem:[%s196_s11] sm:$0xff]  ;;  %v215_v2 = vld [vmem:[%s196_s11 + $0x48] sm:$0xff]  ;;  %v1119_v6 = vld [vmem:[%s196_s11 + $0x50] sm:$0xf] }
  0x2b   : > { %v213_v1 = vld [vmem:[%s196_s11 + $0x24] sm:$0xff]  ;;  %212 = vst [vmem:[%s190_s26] sm:$0xff] %v211_v0  ;;  %216 = vst [vmem:[%s190_s26 + $0x18] sm:$0xff] %v215_v2  ;;  %v217_v3 = vld [vmem:[%s196_s11 + $0x6c] sm:$0xff] }
  0x2c   : > { %214 = vst [vmem:[%s190_s26 + $0xc] sm:$0xff] %v213_v1  ;;  %v1115_v4 = vld [vmem:[%s196_s11 + $0x8] sm:$0xf]  ;;  %v1117_v5 = vld [vmem:[%s196_s11 + $0x2c] sm:$0xf]  ;;  %218 = vst [vmem:[%s190_s26 + $0x24] sm:$0xff] %v217_v3 }
  0x2d   : > { %1116 = vst [vmem:[%s190_s26 + $0x8] sm:$0xf] %v1115_v4  ;;  %1118 = vst [vmem:[%s190_s26 + $0x14] sm:$0xf] %v1117_v5  ;;  %v1121_v7 = vld [vmem:[%s196_s11 + $0x74] sm:$0xf] }
  0x2e   : > { %1120 = vst [vmem:[%s190_s26 + $0x20] sm:$0xf] %v1119_v6  ;;  %1122 = vst [vmem:[%s190_s26 + $0x2c] sm:$0xf] %v1121_v7 }
  0x2f PF: > { %239 = sbr.rel (!%p1545_p9) target bundleno = 88 (0x58), region = 46  ;;  %s241_s5 = sand.u32 (%p1545_p9), 1, %s1408_s18  }
  0x30   : > { %s1166_s29 = smul.u32 (%p1545_p9), 96, %s1428_s23  ;;  %s1807_s1 = sld [smem:[#allocation10_spill]] (%p1545_p9) }
  0x31   : > { %s1226_s30 = smul.u32 (%p1545_p9), 192, %s241_s5 }
  0x32   : > { %s246_s8 = sadd.s32 (%p1545_p9), %s1432_s24, %s1166_s29 }
  0x33   : > { %s1124_s6 = sshll.u32 (%p1545_p9), %s246_s8, 2  ;;  %s1583_s10 = scalar_lea.vmem (%p1545_p9), [#allocation4], %s1226_s30 }
  0x36   : > { %s1578_s28 = scalar_lea.vmem %s1807_s1, %s1124_s6 }
  0x37   : > { %v264_v8 = vld [vmem:[%s1578_s28] sm:$0xf]  ;;  %v266_v9 = vld [vmem:[%s1578_s28 + $0x8] sm:$0xf]  ;;  %v268_v10 = vld [vmem:[%s1578_s28 + $0x10] sm:$0xf] }
  0x38   : > { %265 = vst [vmem:[%s1583_s10] sm:$0xf] %v264_v8  ;;  %267 = vst [vmem:[%s1583_s10 + $0x4] sm:$0xf] %v266_v9  ;;  %v270_v11 = vld [vmem:[%s1578_s28 + $0x18] sm:$0xf] }
  0x39   : > { %269 = vst [vmem:[%s1583_s10 + $0x8] sm:$0xf] %v268_v10  ;;  %v272_v12 = vld [vmem:[%s1578_s28 + $0x20] sm:$0xf]  ;;  %v274_v13 = vld [vmem:[%s1578_s28 + $0x28] sm:$0xf] }
  0x3a   : > { %271 = vst [vmem:[%s1583_s10 + $0xc] sm:$0xf] %v270_v11  ;;  %273 = vst [vmem:[%s1583_s10 + $0x10] sm:$0xf] %v272_v12  ;;  %v276_v14 = vld [vmem:[%s1578_s28 + $0x30] sm:$0xf] }
  0x3b   : > { %275 = vst [vmem:[%s1583_s10 + $0x14] sm:$0xf] %v274_v13  ;;  %v278_v15 = vld [vmem:[%s1578_s28 + $0x38] sm:$0xf]  ;;  %v280_v16 = vld [vmem:[%s1578_s28 + $0x40] sm:$0xf] }
  0x3c   : > { %277 = vst [vmem:[%s1583_s10 + $0x18] sm:$0xf] %v276_v14  ;;  %279 = vst [vmem:[%s1583_s10 + $0x1c] sm:$0xf] %v278_v15  ;;  %v282_v17 = vld [vmem:[%s1578_s28 + $0x48] sm:$0xf] }
  0x3d   : > { %281 = vst [vmem:[%s1583_s10 + $0x20] sm:$0xf] %v280_v16  ;;  %v284_v18 = vld [vmem:[%s1578_s28 + $0x50] sm:$0xf]  ;;  %v286_v19 = vld [vmem:[%s1578_s28 + $0x58] sm:$0xf] }
  0x3e   : > { %283 = vst [vmem:[%s1583_s10 + $0x24] sm:$0xf] %v282_v17  ;;  %285 = vst [vmem:[%s1583_s10 + $0x28] sm:$0xf] %v284_v18  ;;  %v288_v20 = vld [vmem:[%s1578_s28 + $0x60] sm:$0xf] }
  0x3f   : > { %287 = vst [vmem:[%s1583_s10 + $0x2c] sm:$0xf] %v286_v19  ;;  %v290_v21 = vld [vmem:[%s1578_s28 + $0x68] sm:$0xf]  ;;  %v292_v22 = vld [vmem:[%s1578_s28 + $0x70] sm:$0xf] }
  0x40   : > { %289 = vst [vmem:[%s1583_s10 + $0x30] sm:$0xf] %v288_v20  ;;  %291 = vst [vmem:[%s1583_s10 + $0x34] sm:$0xf] %v290_v21  ;;  %v294_v23 = vld [vmem:[%s1578_s28 + $0x78] sm:$0xf] }
  0x41   : > { %293 = vst [vmem:[%s1583_s10 + $0x38] sm:$0xf] %v292_v22  ;;  %v296_v24 = vld [vmem:[%s1578_s28 + $0x80] sm:$0xf]  ;;  %v298_v25 = vld [vmem:[%s1578_s28 + $0x88] sm:$0xf] }
  0x42   : > { %295 = vst [vmem:[%s1583_s10 + $0x3c] sm:$0xf] %v294_v23  ;;  %297 = vst [vmem:[%s1583_s10 + $0x40] sm:$0xf] %v296_v24  ;;  %v300_v26 = vld [vmem:[%s1578_s28 + $0x90] sm:$0xf] }
  0x43   : > { %299 = vst [vmem:[%s1583_s10 + $0x44] sm:$0xf] %v298_v25  ;;  %v302_v27 = vld [vmem:[%s1578_s28 + $0x98] sm:$0xf]  ;;  %v304_v28 = vld [vmem:[%s1578_s28 + $0xa0] sm:$0xf] }
  0x44   : > { %301 = vst [vmem:[%s1583_s10 + $0x48] sm:$0xf] %v300_v26  ;;  %303 = vst [vmem:[%s1583_s10 + $0x4c] sm:$0xf] %v302_v27  ;;  %v306_v29 = vld [vmem:[%s1578_s28 + $0xa8] sm:$0xf] }
  0x45   : > { %305 = vst [vmem:[%s1583_s10 + $0x50] sm:$0xf] %v304_v28  ;;  %v308_v30 = vld [vmem:[%s1578_s28 + $0xb0] sm:$0xf]  ;;  %v310_v31 = vld [vmem:[%s1578_s28 + $0xb8] sm:$0xf] }
  0x46   : > { %307 = vst [vmem:[%s1583_s10 + $0x54] sm:$0xf] %v306_v29  ;;  %309 = vst [vmem:[%s1583_s10 + $0x58] sm:$0xf] %v308_v30  ;;  %v312_v32 = vld [vmem:[%s1578_s28 + $0xc0] sm:$0xf] }
  0x47   : > { %311 = vst [vmem:[%s1583_s10 + $0x5c] sm:$0xf] %v310_v31  ;;  %v314_v33 = vld [vmem:[%s1578_s28 + $0xc8] sm:$0xf]  ;;  %v316_v34 = vld [vmem:[%s1578_s28 + $0xd0] sm:$0xf] }
  0x48   : > { %313 = vst [vmem:[%s1583_s10 + $0x60] sm:$0xf] %v312_v32  ;;  %315 = vst [vmem:[%s1583_s10 + $0x64] sm:$0xf] %v314_v33  ;;  %v318_v35 = vld [vmem:[%s1578_s28 + $0xd8] sm:$0xf] }
  0x49   : > { %317 = vst [vmem:[%s1583_s10 + $0x68] sm:$0xf] %v316_v34  ;;  %v320_v36 = vld [vmem:[%s1578_s28 + $0xe0] sm:$0xf]  ;;  %v322_v37 = vld [vmem:[%s1578_s28 + $0xe8] sm:$0xf] }
  0x4a   : > { %319 = vst [vmem:[%s1583_s10 + $0x6c] sm:$0xf] %v318_v35  ;;  %321 = vst [vmem:[%s1583_s10 + $0x70] sm:$0xf] %v320_v36  ;;  %v324_v38 = vld [vmem:[%s1578_s28 + $0xf0] sm:$0xf] }
  0x4b   : > { %323 = vst [vmem:[%s1583_s10 + $0x74] sm:$0xf] %v322_v37  ;;  %v326_v39 = vld [vmem:[%s1578_s28 + $0xf8] sm:$0xf]  ;;  %v328_v40 = vld [vmem:[%s1578_s28 + $0x100] sm:$0xf] }
  0x4c   : > { %325 = vst [vmem:[%s1583_s10 + $0x78] sm:$0xf] %v324_v38  ;;  %327 = vst [vmem:[%s1583_s10 + $0x7c] sm:$0xf] %v326_v39  ;;  %v330_v41 = vld [vmem:[%s1578_s28 + $0x108] sm:$0xf] }
  0x4d   : > { %329 = vst [vmem:[%s1583_s10 + $0x80] sm:$0xf] %v328_v40  ;;  %v332_v42 = vld [vmem:[%s1578_s28 + $0x110] sm:$0xf]  ;;  %v334_v43 = vld [vmem:[%s1578_s28 + $0x118] sm:$0xf] }
  0x4e   : > { %331 = vst [vmem:[%s1583_s10 + $0x84] sm:$0xf] %v330_v41  ;;  %333 = vst [vmem:[%s1583_s10 + $0x88] sm:$0xf] %v332_v42  ;;  %v336_v44 = vld [vmem:[%s1578_s28 + $0x120] sm:$0xf] }
  0x4f   : > { %335 = vst [vmem:[%s1583_s10 + $0x8c] sm:$0xf] %v334_v43  ;;  %v338_v45 = vld [vmem:[%s1578_s28 + $0x128] sm:$0xf]  ;;  %v340_v46 = vld [vmem:[%s1578_s28 + $0x130] sm:$0xf] }
  0x50   : > { %337 = vst [vmem:[%s1583_s10 + $0x90] sm:$0xf] %v336_v44  ;;  %339 = vst [vmem:[%s1583_s10 + $0x94] sm:$0xf] %v338_v45  ;;  %v342_v47 = vld [vmem:[%s1578_s28 + $0x138] sm:$0xf] }
  0x51   : > { %341 = vst [vmem:[%s1583_s10 + $0x98] sm:$0xf] %v340_v46  ;;  %v344_v48 = vld [vmem:[%s1578_s28 + $0x140] sm:$0xf]  ;;  %v346_v49 = vld [vmem:[%s1578_s28 + $0x148] sm:$0xf] }
  0x52   : > { %343 = vst [vmem:[%s1583_s10 + $0x9c] sm:$0xf] %v342_v47  ;;  %345 = vst [vmem:[%s1583_s10 + $0xa0] sm:$0xf] %v344_v48  ;;  %v348_v50 = vld [vmem:[%s1578_s28 + $0x150] sm:$0xf] }
  0x53   : > { %347 = vst [vmem:[%s1583_s10 + $0xa4] sm:$0xf] %v346_v49  ;;  %v350_v51 = vld [vmem:[%s1578_s28 + $0x158] sm:$0xf]  ;;  %v352_v52 = vld [vmem:[%s1578_s28 + $0x160] sm:$0xf] }
  0x54   : > { %349 = vst [vmem:[%s1583_s10 + $0xa8] sm:$0xf] %v348_v50  ;;  %351 = vst [vmem:[%s1583_s10 + $0xac] sm:$0xf] %v350_v51  ;;  %v354_v53 = vld [vmem:[%s1578_s28 + $0x168] sm:$0xf] }
  0x55   : > { %353 = vst [vmem:[%s1583_s10 + $0xb0] sm:$0xf] %v352_v52  ;;  %v356_v54 = vld [vmem:[%s1578_s28 + $0x170] sm:$0xf]  ;;  %v358_v55 = vld [vmem:[%s1578_s28 + $0x178] sm:$0xf] }
  0x56   : > { %355 = vst [vmem:[%s1583_s10 + $0xb4] sm:$0xf] %v354_v53  ;;  %357 = vst [vmem:[%s1583_s10 + $0xb8] sm:$0xf] %v356_v54 }
  0x57   : > { %359 = vst [vmem:[%s1583_s10 + $0xbc] sm:$0xf] %v358_v55 }
  0x58 PF: > { %p1125_p0 = scmp.ge.s32.totalorder %s1436_s25, 1  ;;  %p489_p1 = scmp.lt.s32.totalorder %s1436_s25, 7 }
  0x5a   : > { %p490_p2 = pnand %p1125_p0, %p489_p1 }
  0x5b   : > { %s496_s0 = sand.u32 (!%p490_p2), 1, %s1412_s19   ;;  %s503_s11 = sand.u32 (!%p490_p2), 1, %s1404_s17  }
  0x5c   : > { %493 = sbr.rel (%p490_p2) target bundleno = 392 (0x188), region = 95  ;;  %s534_s28 = sand.u32 (!%p490_p2), 1, %s1396_s15  }
  0x5d   : > { %s1227_s26 = smul.u32 (!%p490_p2), 48, %s496_s0  ;;  %s1126_s29 = sshll.u32 (!%p490_p2), %s534_s28, 5 }
  0x5e   : > { %s1228_s5 = smul.u32 (!%p490_p2), 192, %s503_s11  ;;  %p540_p3 = scmp.lt.s32.totalorder (!%p490_p2), %s1424_s22, 1 }
  0x5f   : > { %s1695_s24 = scalar_lea.vmem (!%p490_p2), [#allocation3], %s1227_s26  ;;  %s1699_s15 = scalar_lea.vmem (!%p490_p2), [#allocation5], %s1126_s29 }
  0x60   : > { %s1697_s17 = scalar_lea.vmem (!%p490_p2), [#allocation4], %s1228_s5  ;;  %p1127_p4 = scmp.ne.s32.totalorder (!%p490_p2), %s1420_s21, 0 }
  0x63   : > { %s1685_s30 = scalar_select %p540_p3, %s1424_s22, 1 }
  0x64   : > { %551 = sbr.rel (%p1127_p4) target bundleno = 107 (0x6b), region = 107  ;;  %v1438_v56 = vmov (!%p1127_p4), 0.0  }
  0x65   : > { %s542_s9 = scalar_lea.vmem %s1792_s2, %s1685_s30  ;;  %s545_s27 = scalar_lea.vmem %s1793_s3, %s1685_s30  ;;  %552 = vst [vmem:[#allocation2] sm:$0xff] (!%p1127_p4), %v1438_v56  ;;  %553 = vst [vmem:[#allocation2 + $0x8] sm:$0xff] (!%p1127_p4), %v1438_v56 }
  0x66   : > { %554 = vst [vmem:[#allocation2 + $0x10] sm:$0xff] (!%p1127_p4), %v1438_v56  ;;  %555 = vst [vmem:[#allocation2 + $0x18] sm:$0xff] (!%p1127_p4), %v1438_v56 }
  0x6b PF: > { %v1318_v57 = vld [vmem:[%s1697_s17 + $0x40] sm:$0xff]   ;;  %v1321_v60 = vld [vmem:[%s1697_s17 + $0x48] sm:$0xff]   ;;  %v1324_v63 = vld [vmem:[%s1697_s17 + $0x50] sm:$0xff]   ;;  %p1158_p5 = scmp.ne.s32.totalorder %s1420_s21, 2 }
  0x6c   : > { %v1319_v58 = vld [vmem:[%s1697_s17] sm:$0xff]   ;;  %1167 = vmatprep.subr.bf16.mxu0 %v1318_v57  ;;  %v1322_v61 = vld [vmem:[%s1697_s17 + $0x8] sm:$0xff]   ;;  %v1325_v0 = vld [vmem:[%s1697_s17 + $0x10] sm:$0xff]  }
  0x6d   : > { %v1320_v59 = vld [vmem:[%s1697_s17 + $0x80] sm:$0xff]   ;;  %1168 = vmatpush3.bf16.msra.mxu0 %v1319_v58  ;;  %v1323_v62 = vld [vmem:[%s1697_s17 + $0x88] sm:$0xff]   ;;  %v1326_v1 = vld [vmem:[%s1697_s17 + $0x90] sm:$0xff]  }
  0x6e   : > { %1205 = vmatprep.subr.bf16.mxu1 %v1320_v59  ;;  %1169 = vmatprep.subr.bf16.mxu0 %v1321_v60  ;;  %v1327_v2 = vld [vmem:[%s1697_s17 + $0x58] sm:$0xff]   ;;  %v1330_v5 = vld [vmem:[%s1697_s17 + $0x60] sm:$0xff]   ;;  %v1333_v8 = vld [vmem:[%s1697_s17 + $0x68] sm:$0xff]  }
  0x6f   : > { %1206 = vmatpush3.bf16.msra.mxu1 %v1320_v59  ;;  %v1328_v3 = vld [vmem:[%s1697_s17 + $0x18] sm:$0xff]   ;;  %v1332_v6 = vld [vmem:[%s1697_s17 + $0xa0] sm:$0xff]   ;;  %v1335_v9 = vld [vmem:[%s1697_s17 + $0xa8] sm:$0xff]  }
  0x70   : > { %1207 = vmatprep.subr.bf16.mxu1 %v1323_v62  ;;  %v1329_v4 = vld [vmem:[%s1697_s17 + $0x98] sm:$0xff]   ;;  %v1331_v7 = vld [vmem:[%s1697_s17 + $0x20] sm:$0xff]   ;;  %v1334_v10 = vld [vmem:[%s1697_s17 + $0x28] sm:$0xff]  }
  0x71   : > { %1170 = vmatpush3.bf16.msra.mxu0 %v1322_v61  ;;  %v1336_v11 = vld [vmem:[%s1697_s17 + $0x70] sm:$0xff]   ;;  %v1339_v14 = vld [vmem:[%s1697_s17 + $0x78] sm:$0xff]   ;;  %v556_v29 = vld [vmem:[#allocation2] sm:$0xff] }
  0x72   : > { %1171 = vmatprep.subr.bf16.mxu0 %v1324_v63  ;;  %v1337_v12 = vld [vmem:[%s1697_s17 + $0x30] sm:$0xff]   ;;  %v1341_v15 = vld [vmem:[%s1697_s17 + $0xb8] sm:$0xff]   ;;  %v557_v34 = vld [vmem:[#allocation2 + $0x8] sm:$0xff] }
  0x73   : > { %1208 = vmatpush3.bf16.msra.mxu1 %v1323_v62  ;;  %v1338_v13 = vld [vmem:[%s1697_s17 + $0xb0] sm:$0xff]   ;;  %v1340_v18 = vld [vmem:[%s1697_s17 + $0x38] sm:$0xff]   ;;  %v1159_v52 = vld [vmem:[%s542_s9] ss:$0 sm:$0xff] (!%p1158_p5) }
  0x74   : > { %1209 = vmatprep.subr.bf16.mxu1 %v1326_v1  ;;  %v1344_v16 = vld [vmem:[%s1695_s24 + $0x4] ss:$12 sps:$4 sm:$0xff]   ;;  %v1345_v17 = vld [vmem:[%s1695_s24 + $0x8] ss:$12 sps:$4 sm:$0xff]   ;;  %v1342_v19 = vld [vmem:[%s1695_s24] ss:$12 sps:$4 sm:$0xff]  }
  0x75   : > { %1172 = vmatpush3.bf16.msra.mxu0 %v1325_v0  ;;  %824 = vmatprep.mubr.bf16.mxu0 %v1344_v16  ;;  %v1347_v20 = vld [vmem:[%s1695_s24 + $0x1c] ss:$12 sps:$4 sm:$0xff]   ;;  %v1346_v21 = vld [vmem:[%s1695_s24 + $0x20] ss:$12 sps:$4 sm:$0xff]   ;;  %v1349_v22 = vld [vmem:[%s1695_s24 + $0x18] ss:$12 sps:$4 sm:$0xff]  }
  0x76   : > { %1173 = vmatprep.subr.bf16.mxu0 %v1327_v2  ;;  %1221 = vmatprep.mubr.bf16.mxu1 %v1345_v17  ;;  %v558_v43 = vld [vmem:[#allocation2 + $0x10] sm:$0xff]  ;;  %v559_v47 = vld [vmem:[#allocation2 + $0x18] sm:$0xff]  ;;  %v1160_v53 = vld [vmem:[%s545_s27] ss:$0 sm:$0xff] (!%p1158_p5) }
  0x77   : > { %1210 = vmatpush3.bf16.msra.mxu1 %v1326_v1 }
  0x78   : > { %1211 = vmatprep.subr.bf16.mxu1 %v1329_v4 }
  0x79   : > { %1174 = vmatpush3.bf16.msra.mxu0 %v1328_v3 }
  0x7a   : > { %1175 = vmatprep.subr.bf16.mxu0 %v1330_v5 }
  0x7b   : > { %1212 = vmatpush3.bf16.msra.mxu1 %v1329_v4 }
  0x7c   : > { %1213 = vmatprep.subr.bf16.mxu1 %v1332_v6 }
  0x7d   : > { %1176 = vmatpush3.bf16.msra.mxu0 %v1331_v7 }
  0x7e   : > { %1177 = vmatprep.subr.bf16.mxu0 %v1333_v8 }
  0x7f   : > { %1214 = vmatpush3.bf16.msra.mxu1 %v1332_v6 }
  0x80   : > { %1215 = vmatprep.subr.bf16.mxu1 %v1335_v9 }
  0x81   : > { %1178 = vmatpush3.bf16.msra.mxu0 %v1334_v10 }
  0x82   : > { %1179 = vmatprep.subr.bf16.mxu0 %v1336_v11 }
  0x83   : > { %1216 = vmatpush3.bf16.msra.mxu1 %v1335_v9 }
  0x84   : > { %1217 = vmatprep.subr.bf16.mxu1 %v1338_v13 }
  0x85   : > { %1180 = vmatpush3.bf16.msra.mxu0 %v1337_v12 }
  0x86   : > { %1181 = vmatprep.subr.bf16.mxu0 %v1339_v14 }
  0x87   : > { %1218 = vmatpush3.bf16.msra.mxu1 %v1338_v13 }
  0x88   : > { %1219 = vmatprep.subr.bf16.mxu1 %v1341_v15 }
  0x89   : > { %1182 = vmatpush3.bf16.msra.mxu0 %v1340_v18 }
  0x8b   : > { %1220 = vmatpush3.bf16.msra.mxu1 %v1341_v15 }
  0x8c   : > { %825 = vmatmul.mubr.bf16.vlgmr.msra.gmra.mrb[0].mxu0 %v1342_v19 }
  0x8d   : > { %832 = vmatprep.mubr.bf16.mxu0 %v1347_v20 }
  0x8e   : > { %1222 = vmatmul.mubr.bf16.vlgmr.msra.gmra.mrb[0].mxu1 %v1346_v21 }
  0x94   : > { %833 = vmatmul.mubr.bf16.gmra.mrb[4].mxu0 %v1349_v22 }
 0x15f   : > { %v1183_v23 = vpop.f32.mrb[0].mxu0 }
 0x160   : > { %v1184_v24 = vpop.f32.mrb[1].mxu0 }
 0x161   : > { %v1185_v25 = vadd.f32 %v1184_v24, %v1183_v23  ;;  %v1186_v26 = vpop.f32.mrb[2].mxu0  ;;  %v1223_v27 = vpop.f32.mrb[0].mxu1 }
 0x162   : > { %v1187_v28 = vpop.f32.mrb[3].mxu0  ;;  %v875_v30 = vpop.f32.mrb[1].mxu1 }
 0x163   : > { %v1188_v31 = vadd.f32 %v1187_v28, %v1186_v26  ;;  %v876_v32 = vadd.f32 %v1185_v25, %v875_v30  ;;  %v1224_v33 = vpop.f32.mrb[2].mxu1 }
 0x164   : > { %v878_v35 = vpop.f32.mrb[3].mxu1 }
 0x165   : > { %v890_v36 = vadd.f32 %v876_v32, %v556_v29  ;;  %v879_v37 = vadd.f32 %v1188_v31, %v878_v35 }
 0x167   : > { %894 = vst [vmem:[#allocation2] sm:$0xff] %v890_v36  ;;  %v891_v38 = vadd.f32 %v879_v37, %v557_v34  ;;  %v1189_v39 = vpop.f32.mrb[4].mxu0 }
 0x168   : > { %v1190_v40 = vpop.f32.mrb[5].mxu0 }
 0x169   : > { %895 = vst [vmem:[#allocation2 + $0x8] sm:$0xff] %v891_v38  ;;  %v1191_v41 = vadd.f32 %v1190_v40, %v1189_v39  ;;  %v1192_v42 = vpop.f32.mrb[6].mxu0 }
 0x16a   : > { %v1193_v44 = vpop.f32.mrb[7].mxu0 }
 0x16b   : > { %v884_v45 = vadd.f32 %v1223_v27, %v1191_v41  ;;  %v1194_v46 = vadd.f32 %v1193_v44, %v1192_v42  ;;  %901 = sbr.rel (%p1158_p5) target bundleno = 384 (0x180), region = 111 }
 0x16d   : > { %v892_v48 = vadd.f32 %v884_v45, %v558_v43  ;;  %v887_v49 = vadd.f32 %v1224_v33, %v1194_v46 }
 0x16e   : > { %v902_v51 = vld [vmem:[#allocation2] sm:$0xff] (!%p1158_p5) }
 0x16f   : > { %896 = vst [vmem:[#allocation2 + $0x10] sm:$0xff] %v892_v48  ;;  %v893_v50 = vadd.f32 %v887_v49, %v559_v47  ;;  %v913_v54 = vmul.f32 (!%p1158_p5), %v1159_v52, %v902_v51 }
 0x170   : > { %v903_v55 = vld [vmem:[#allocation2 + $0x8] sm:$0xff] (!%p1158_p5) }
 0x171   : > { %897 = vst [vmem:[#allocation2 + $0x18] sm:$0xff] %v893_v50  ;;  %v914_v58 = vmul.f32 (!%p1158_p5), %v1159_v52, %v903_v55  ;;  %v924_v61 = vadd.f32 (!%p1158_p5), %v1160_v53, %v913_v54 }
 0x173   : > { %v925_v62 = vadd.f32 %v1160_v53, %v914_v58  ;;  %v928_v1 = vmax.f32 %v924_v61, 0.0 }
 0x175   : > { %v929_v2 = vmax.f32 %v925_v62, 0.0  ;;  %932 = vst [vmem:[%s1699_s15] sm:$0xff] %v928_v1 }
 0x176   : > { %v904_v56 = vld [vmem:[#allocation2 + $0x10] sm:$0xff] }
 0x177   : > { %v915_v59 = vmul.f32 %v1159_v52, %v904_v56  ;;  %933 = vst [vmem:[%s1699_s15 + $0x8] sm:$0xff] %v929_v2 }
 0x178   : > { %v905_v57 = vld [vmem:[#allocation2 + $0x18] sm:$0xff] }
 0x179   : > { %v916_v60 = vmul.f32 %v1159_v52, %v905_v57  ;;  %v926_v63 = vadd.f32 %v1160_v53, %v915_v59 }
 0x17b   : > { %v927_v0 = vadd.f32 %v1160_v53, %v916_v60  ;;  %v930_v3 = vmax.f32 %v926_v63, 0.0 }
 0x17d   : > { %v931_v4 = vmax.f32 %v927_v0, 0.0  ;;  %934 = vst [vmem:[%s1699_s15 + $0x10] sm:$0xff] %v930_v3 }
 0x17f   : > { %935 = vst [vmem:[%s1699_s15 + $0x18] sm:$0xff] %v931_v4 }
 0x180 PF: > { %942 = sbr.rel (!%p1558_p12) target bundleno = 392 (0x188), region = 115  ;;  %s1162_s21 = sshll.u32 (%p1558_p12), %s1424_s22, 3  ;;  %v981_v5 = vld [vmem:[%s1699_s15] sm:$0xff] (%p1558_p12)  ;;  %v983_v6 = vld [vmem:[%s1699_s15 + $0x8] sm:$0xff] (%p1558_p12) }
 0x181   : > { %s947_s26 = scalar_lea.vmem (%p1558_p12), %s1794_s4, %s1162_s21 }
 0x182   : > { %982 = vst [vmem:[%s947_s26] sm:$0xff] (%p1558_p12), %v981_v5  ;;  %984 = vst [vmem:[%s947_s26 + $0x10] sm:$0xff] (%p1558_p12), %v983_v6 }
 0x184   : > { %v985_v7 = vld [vmem:[%s1699_s15 + $0x10] sm:$0xff] (%p1558_p12) }
 0x185   : > { %986 = vst [vmem:[%s947_s26 + $0x20] sm:$0xff] (%p1558_p12), %v985_v7 }
 0x186   : > { %v987_v8 = vld [vmem:[%s1699_s15 + $0x18] sm:$0xff] (%p1558_p12) }
 0x187   : > { %988 = vst [vmem:[%s947_s26 + $0x30] sm:$0xff] %v987_v8 }
 0x188 PF: > { %s14_s25 = sadd.s32 1, %s1436_s25   ;;  %s1808_s22 = sld [smem:[#allocation6_spill]] }
 0x189   : > { %p11_p6 = scmp.ge.s32.totalorder %s14_s25, 8   ;;  %s1809_s14 = sld [smem:[#allocation7_spill]] }
 0x18a   : > { %s1810_s24 = sld [smem:[#allocation8_spill]]  ;;  %s1811_s15 = smov %s1400_s16 }
 0x18b   : > { %s1812_s16 = smov %s1556_s13  ;;  %s1813_s17 = smov %s1408_s18 }
 0x18c   : > { %s1814_s18 = smov %s1553_s12  ;;  %s1815_s19 = smov %s1416_s20 }
 0x18d   : > { %s1816_s20 = smov %s1539_s7  ;;  %s1817_s21 = smov %s1428_s23 }
 0x18e   :  { %13 = sbr.rel (!%p11_p6) target bundleno = 9 (0x9), region = 204 }
 0x18f   : > { %s1818_s23 = smov %s1809_s14 }

// kernel: resnet18_forward.32
= control target key start
LH: loop header
LB: loop body
LE: loop exit
PB: predicated region body
PF: predicated region fallthrough
CT: control target
= control target key end

     0   :  { %s900_s15 = smov 0   ;;  %s902_s16 = smov 0   ;;  %s1008_s0 = inlined_call_operand.vmem [shape: bf16[32,128], index: 0, kind: input, shape index: {}]   ;;  %s1009_s1 = inlined_call_operand.vmem [shape: bf16[128,256], index: 1, kind: input, shape index: {}]   ;;  %s1010_s2 = inlined_call_operand.vmem [shape: f32[1,256], index: 2, kind: input, shape index: {}]   ;;  %s1011_s3 = inlined_call_operand.vmem [shape: f32[1,256], index: 3, kind: input, shape index: {}]   ;;  %s1012_s4 = inlined_call_operand.vmem [shape: f32[32,256], index: 4, kind: output, shape index: {}]  }
   0x1   :  { %s904_s17 = smov 0   ;;  %s906_s18 = smov 0  }
   0x2   :  { %s908_s19 = smov 0  }
   0x3 LB: > { %s29_s20 = sadd.s32 1, %s869_s18  ;;  %s729_s21 = sadd.s32 4294967295, %s873_s19   ;;  %s873_s19 = sphi %s908_s19, %s14_s19   ;;  %s869_s18 = sphi %s906_s18, %s1017_s18   ;;  %s865_s17 = sphi %s904_s17, %s1016_s17   ;;  %s861_s16 = sphi %s902_s16, %s1015_s16   ;;  %s857_s15 = sphi %s900_s15, %s1014_s15  }
   0x4   : > { %p31_p0 = scmp.ge.s32.totalorder %s29_s20, 2  ;;  %p77_p1 = scmp.ne.s32.totalorder %s861_s16, %s857_s15 }
   0x5   : > { %p78_p2 = scmp.eq.s32.totalorder %s873_s19, 0  ;;  %p161_p4 = scmp.eq.s32.totalorder %s729_s21, 1 }
   0x6   : > { %s1019_s20 = smov (%p31_p0, %s29_s20), 0  ;;  %s70_s23 = sadd.s32 1, %s861_s16 }
   0x7   : > { %p79_p3 = por %p78_p2, %p77_p1  ;;  %s66_s22 = ssub.s32 %s869_s18, %s1019_s20 }
   0x8   : > { %p68_p5 = scmp.eq.s32.totalorder %s66_s22, 0  ;;  %p935_p6 = por %p161_p4, %p77_p1 }
   0x9   : > { %p733_p7 = scmp.ge.s32.totalorder %s873_s19, 2 }
   0xa   : > { %s940_s25 = scalar_select %p68_p5, %s861_s16, %s70_s23  }
   0xb   : > { %195 = sbr.rel (%p733_p7) target bundleno = 32 (0x20), region = 20 }
  0x12   : > { %198 = sbr.rel (!%p79_p3) target bundleno = 32 (0x20), region = 24  ;;  %s200_s26 = sand.u32 (%p79_p3), 1, %s861_s16  }
  0x13   : > { %s735_s27 = sshll.u32 (%p79_p3), %s869_s18, 2  ;;  %s734_s28 = sshll.u32 (%p79_p3), %s200_s26, 6 }
  0x14   : > { %s948_s5 = scalar_lea.vmem (%p79_p3), %s1009_s1, %s735_s27  ;;  %s202_s6 = scalar_lea.vmem (%p79_p3), [#allocation3], %s734_s28 }
  0x15   : > { %v223_v0 = vld [vmem:[%s948_s5] sm:$0xf] (%p79_p3)  ;;  %v225_v1 = vld [vmem:[%s948_s5 + $0x8] sm:$0xf] (%p79_p3)  ;;  %v227_v2 = vld [vmem:[%s948_s5 + $0x10] sm:$0xf] (%p79_p3) }
  0x16   : > { %224 = vst [vmem:[%s202_s6] sm:$0xf] (%p79_p3), %v223_v0  ;;  %226 = vst [vmem:[%s202_s6 + $0x4] sm:$0xf] (%p79_p3), %v225_v1  ;;  %v229_v3 = vld [vmem:[%s948_s5 + $0x18] sm:$0xf] (%p79_p3) }
  0x17   : > { %v231_v4 = vld [vmem:[%s948_s5 + $0x20] sm:$0xf] (%p79_p3)  ;;  %228 = vst [vmem:[%s202_s6 + $0x8] sm:$0xf] (%p79_p3), %v227_v2  ;;  %230 = vst [vmem:[%s202_s6 + $0xc] sm:$0xf] (%p79_p3), %v229_v3 }
  0x18   : > { %232 = vst [vmem:[%s202_s6 + $0x10] sm:$0xf] (%p79_p3), %v231_v4  ;;  %v233_v5 = vld [vmem:[%s948_s5 + $0x28] sm:$0xf] (%p79_p3)  ;;  %v235_v6 = vld [vmem:[%s948_s5 + $0x30] sm:$0xf] (%p79_p3) }
  0x19   : > { %v237_v7 = vld [vmem:[%s948_s5 + $0x38] sm:$0xf]  ;;  %234 = vst [vmem:[%s202_s6 + $0x14] sm:$0xf] %v233_v5  ;;  %236 = vst [vmem:[%s202_s6 + $0x18] sm:$0xf] %v235_v6 }
  0x1a   : > { %238 = vst [vmem:[%s202_s6 + $0x1c] sm:$0xf] %v237_v7  ;;  %v239_v8 = vld [vmem:[%s948_s5 + $0x40] sm:$0xf]  ;;  %v241_v9 = vld [vmem:[%s948_s5 + $0x48] sm:$0xf] }
  0x1b   : > { %v243_v10 = vld [vmem:[%s948_s5 + $0x50] sm:$0xf]  ;;  %240 = vst [vmem:[%s202_s6 + $0x20] sm:$0xf] %v239_v8  ;;  %242 = vst [vmem:[%s202_s6 + $0x24] sm:$0xf] %v241_v9 }
  0x1c   : > { %244 = vst [vmem:[%s202_s6 + $0x28] sm:$0xf] %v243_v10  ;;  %v245_v11 = vld [vmem:[%s948_s5 + $0x58] sm:$0xf]  ;;  %v247_v12 = vld [vmem:[%s948_s5 + $0x60] sm:$0xf] }
  0x1d   : > { %v249_v13 = vld [vmem:[%s948_s5 + $0x68] sm:$0xf]  ;;  %246 = vst [vmem:[%s202_s6 + $0x2c] sm:$0xf] %v245_v11  ;;  %248 = vst [vmem:[%s202_s6 + $0x30] sm:$0xf] %v247_v12 }
  0x1e   : > { %250 = vst [vmem:[%s202_s6 + $0x34] sm:$0xf] %v249_v13  ;;  %v251_v14 = vld [vmem:[%s948_s5 + $0x70] sm:$0xf]  ;;  %v253_v15 = vld [vmem:[%s948_s5 + $0x78] sm:$0xf] }
  0x1f   : > { %252 = vst [vmem:[%s202_s6 + $0x38] sm:$0xf] %v251_v14  ;;  %254 = vst [vmem:[%s202_s6 + $0x3c] sm:$0xf] %v253_v15 }
  0x20 PF: > { %p736_p8 = scmp.ge.s32.totalorder %s873_s19, 1  ;;  %p320_p9 = scmp.lt.s32.totalorder %s873_s19, 3 }
  0x22   : > { %p321_p10 = pnand %p736_p8, %p320_p9 }
  0x23   : > { %s327_s7 = sand.u32 (!%p321_p10), 1, %s857_s15   ;;  %v833_v16 = vld [vmem:[%s1008_s0] sm:$0xff] (!%p321_p10)   ;;  %v834_v25 = vld [vmem:[%s1008_s0 + $0x8] sm:$0xff] (!%p321_p10)   ;;  %p375_p11 = scmp.lt.s32.totalorder (!%p321_p10), %s865_s17, 1 }
  0x24   : > { %324 = sbr.rel (%p321_p10) target bundleno = 299 (0x12b), region = 73  ;;  %s737_s10 = sshll.u32 (!%p321_p10), %s327_s7, 6  ;;  %781 = vmatprep.mubr.bf16.mxu0 (!%p321_p10), %v833_v16 }
  0x25   : > { %s329_s11 = scalar_lea.vmem (!%p321_p10), [#allocation3], %s737_s10  ;;  %s738_s29 = sshll.u32 (!%p321_p10), %s327_s7, 5 }
  0x26   : > { %v825_v17 = vld [vmem:[%s329_s11] sm:$0xff] (!%p321_p10)   ;;  %v826_v18 = vld [vmem:[%s329_s11 + $0x8] sm:$0xff] (!%p321_p10)   ;;  %v827_v19 = vld [vmem:[%s329_s11 + $0x10] sm:$0xff] (!%p321_p10)   ;;  %s364_s30 = scalar_lea.vmem (!%p321_p10), [#allocation4], %s738_s29 }
  0x27   : > { %765 = vmatprep.subr.bf16.mxu0 (!%p321_p10), %v825_v17  ;;  %v828_v20 = vld [vmem:[%s329_s11 + $0x18] sm:$0xff] (!%p321_p10)   ;;  %v829_v21 = vld [vmem:[%s329_s11 + $0x20] sm:$0xff] (!%p321_p10)   ;;  %v830_v22 = vld [vmem:[%s329_s11 + $0x28] sm:$0xff] (!%p321_p10)  }
  0x28   : > { %766 = vmatpush3.bf16.msra.mxu0 (!%p321_p10), %v825_v17  ;;  %v831_v23 = vld [vmem:[%s329_s11 + $0x30] sm:$0xff] (!%p321_p10)   ;;  %v832_v24 = vld [vmem:[%s329_s11 + $0x38] sm:$0xff] (!%p321_p10)  }
  0x29   : > { %767 = vmatprep.subr.bf16.mxu0 (!%p321_p10), %v826_v18 }
  0x2b   : > { %s376_s14 = scalar_select %p375_p11, %s865_s17, 1 }
  0x2c   : > { %768 = vmatpush3.bf16.msra.mxu0 %v826_v18  ;;  %s752_s15 = sshll.u32 (%p935_p6), %s865_s17, 3 }
  0x2d   : > { %769 = vmatprep.subr.bf16.mxu0 %v827_v19  ;;  %s377_s23 = scalar_lea.vmem %s1010_s2, %s376_s14  ;;  %s380_s28 = scalar_lea.vmem %s1011_s3, %s376_s14 }
  0x2e   : > { %v749_v26 = vld [vmem:[%s377_s23] ss:$0 sm:$0xff]  ;;  %s576_s7 = scalar_lea.vmem (%p935_p6), %s1012_s4, %s752_s15 }
  0x2f   : > { %v750_v28 = vld [vmem:[%s380_s28] ss:$0 sm:$0xff] }
  0x30   : > { %770 = vmatpush3.bf16.msra.mxu0 %v827_v19 }
  0x31   : > { %771 = vmatprep.subr.bf16.mxu0 %v828_v20 }
  0x34   : > { %772 = vmatpush3.bf16.msra.mxu0 %v828_v20 }
  0x35   : > { %773 = vmatprep.subr.bf16.mxu0 %v829_v21 }
  0x38   : > { %774 = vmatpush3.bf16.msra.mxu0 %v829_v21 }
  0x39   : > { %775 = vmatprep.subr.bf16.mxu0 %v830_v22 }
  0x3c   : > { %776 = vmatpush3.bf16.msra.mxu0 %v830_v22 }
  0x3d   : > { %777 = vmatprep.subr.bf16.mxu0 %v831_v23 }
  0x40   : > { %778 = vmatpush3.bf16.msra.mxu0 %v831_v23 }
  0x41   : > { %779 = vmatprep.subr.bf16.mxu0 %v832_v24 }
  0x44   : > { %780 = vmatpush3.bf16.msra.mxu0 %v832_v24 }
  0x47   : > { %782 = vmatmul.mubr.bf16.vlgmr.msra.gmra.mrb[0].mxu0 %v834_v25 }
 0x11a   : > { %v783_v27 = vpop.f32.mrb[0].mxu0 }
 0x11b   : > { %v548_v29 = vmul.f32 %v783_v27, %v749_v26  ;;  %v509_v30 = vpop.f32.mrb[1].mxu0 }
 0x11c   : > { %v546_v31 = vmul.f32 %v749_v26, %v509_v30  ;;  %v784_v32 = vpop.f32.mrb[2].mxu0  ;;  %571 = sbr.rel (!%p935_p6) target bundleno = 299 (0x12b), region = 89 }
 0x11d   : > { %v559_v33 = vadd.f32 %v750_v28, %v548_v29  ;;  %v549_v34 = vmul.f32 %v784_v32, %v749_v26  ;;  %v512_v35 = vpop.f32.mrb[3].mxu0 }
 0x11e   : > { %v557_v36 = vadd.f32 %v750_v28, %v546_v31  ;;  %v547_v37 = vmul.f32 %v749_v26, %v512_v35 }
 0x11f   : > { %563 = vst [vmem:[%s364_s30 + $0x10] sm:$0xff] %v559_v33  ;;  %v560_v38 = vadd.f32 %v750_v28, %v549_v34 }
 0x120   : > { %561 = vst [vmem:[%s364_s30] sm:$0xff] %v557_v36  ;;  %v558_v39 = vadd.f32 %v750_v28, %v547_v37 }
 0x121   : > { %564 = vst [vmem:[%s364_s30 + $0x18] sm:$0xff] %v560_v38 }
 0x122   : > { %562 = vst [vmem:[%s364_s30 + $0x8] sm:$0xff] %v558_v39 }
 0x126   : > { %v614_v42 = vld [vmem:[%s364_s30 + $0x10] sm:$0xff] }
 0x127   : > { %v610_v40 = vld [vmem:[%s364_s30] sm:$0xff]  ;;  %615 = vst [vmem:[%s576_s7 + $0x20] sm:$0xff] %v614_v42 }
 0x128   : > { %v616_v43 = vld [vmem:[%s364_s30 + $0x18] sm:$0xff]  ;;  %611 = vst [vmem:[%s576_s7] sm:$0xff] %v610_v40 }
 0x129   : > { %v612_v41 = vld [vmem:[%s364_s30 + $0x8] sm:$0xff]  ;;  %617 = vst [vmem:[%s576_s7 + $0x30] sm:$0xff] %v616_v43 }
 0x12a   : > { %613 = vst [vmem:[%s576_s7 + $0x10] sm:$0xff] %v612_v41 }
 0x12b PF: > { %s14_s19 = sadd.s32 1, %s873_s19   ;;  %s1014_s15 = smov %s861_s16 }
 0x12c   : > { %p11_p12 = scmp.ge.s32.totalorder %s14_s19, 4   ;;  %s1015_s16 = smov %s940_s25 }
 0x12d   : > { %s1016_s17 = smov %s869_s18  ;;  %s1017_s18 = smov %s1019_s20 }
 0x12e   :  { %13 = sbr.rel (!%p11_p12) target bundleno = 3 (0x3), region = 167 }

// kernel: resnet18_forward.33
= control target key start
LH: loop header
LB: loop body
LE: loop exit
PB: predicated region body
PF: predicated region fallthrough
CT: control target
= control target key end

     0   :  { %s1948_s0 = inlined_call_operand.vmem [shape: bf16[32,2304], index: 0, kind: input, shape index: {}]   ;;  %s1949_s1 = inlined_call_operand.vmem [shape: bf16[2304,256], index: 1, kind: input, shape index: {}]   ;;  %s1950_s2 = inlined_call_operand.vmem [shape: f32[1,256], index: 2, kind: input, shape index: {}]   ;;  %s1951_s3 = inlined_call_operand.vmem [shape: f32[1,256], index: 3, kind: input, shape index: {}]   ;;  %s1952_s4 = inlined_call_operand.vmem [shape: f32[32,256], index: 4, kind: input, shape index: {}]   ;;  %s1953_s5 = inlined_call_operand.vmem [shape: f32[32,256], index: 5, kind: output, shape index: {}]  }
   0x1   :  { %1956 = sst [smem:[#allocation10_spill]] %s1948_s0 }
   0x2   :  { %1957 = sst [smem:[#allocation11_spill]] %s1949_s1 }
   0x3   :  { %1958 = sst [smem:[#allocation12_spill]] %s1952_s4 }
   0x4   :  { %s1599_s18 = smov 0   ;;  %s1601_s19 = smov 0  }
   0x5   :  { %s1603_s20 = smov 0   ;;  %s1605_s21 = smov 0  }
   0x6   :  { %s1607_s22 = smov 0   ;;  %s1609_s23 = smov 0  }
   0x7   :  { %s1611_s24 = smov 0   ;;  %s1613_s25 = smov 0  }
   0x8   :  { %s1615_s26 = smov 0   ;;  %s1617_s27 = smov 0  }
   0x9   :  { %s1619_s28 = smov 0  }
   0xa LB: > { %s1237_s29 = sadd.s32 4294967295, %s1566_s28   ;;  %s27_s30 = sadd.s32 1, %s1558_s26  ;;  %s1566_s28 = sphi %s1619_s28, %s15_s28   ;;  %s1562_s27 = sphi %s1617_s27, %s1981_s27   ;;  %s1558_s26 = sphi %s1615_s26, %s1980_s26   ;;  %s1554_s25 = sphi %s1613_s25, %s1979_s25   ;;  %s1550_s24 = sphi %s1611_s24, %s1978_s24   ;;  %s1546_s23 = sphi %s1609_s23, %s1977_s23   ;;  %s1542_s22 = sphi %s1607_s22, %s1976_s22   ;;  %s1538_s21 = sphi %s1605_s21, %s1975_s21   ;;  %s1534_s20 = sphi %s1603_s20, %s1974_s20   ;;  %s1530_s19 = sphi %s1601_s19, %s1973_s19   ;;  %s1526_s18 = sphi %s1599_s18, %s1972_s18  }
   0xb   : > { %p28_p0 = scmp.ge.s32.totalorder %s27_s30, 6  ;;  %s30_s6 = sadd.s32 1, %s1562_s27 }
   0xc   : > { %s43_s7 = sadd.s32 1, %s1546_s23  ;;  %p50_p1 = scmp.ne.s32.totalorder %s1546_s23, %s1542_s22 }
   0xd   : > { %s1983_s30 = smov (%p28_p0, %s27_s30), 0  ;;  %s1985_s6 = smov (!%p28_p0, %s30_s6), %s1562_s27 }
   0xe   : > { %1959 = sst [smem:[#allocation7_spill]] %s1983_s30  ;;  %s39_s8 = ssub.s32 %s1558_s26, %s1983_s30 }
   0xf   : > { %p51_p2 = scmp.eq.s32.totalorder %s1566_s28, 0  ;;  %p32_p3 = scmp.ge.s32.totalorder %s1985_s6, 2 }
  0x10   : > { %p41_p4 = scmp.eq.s32.totalorder %s39_s8, 0  ;;  %s71_s10 = sadd.s32 1, %s1538_s21 }
  0x11   : > { %p1668_p5 = por %p51_p2, %p50_p1  ;;  %s1987_s6 = smov (%p32_p3, %s1985_s6), 0 }
  0x12   : > { %1961 = sst [smem:[#allocation8_spill]] %s1987_s6  ;;  %s67_s12 = ssub.s32 %s1562_s27, %s1987_s6 }
  0x13   : > { %s1676_s11 = scalar_select %p41_p4, %s1546_s23, %s43_s7  }
  0x14   : > { %p78_p6 = scmp.ne.s32.totalorder %s1538_s21, %s1534_s20  ;;  %s68_s13 = sor.u32 %s67_s12, %s39_s8 }
  0x15   : > { %1962 = sst [smem:[#allocation9_spill]] %s1676_s11  ;;  %p149_p7 = scmp.eq.s32.totalorder %s67_s12, 0 }
  0x16   : > { %p69_p8 = scmp.eq.s32.totalorder %s68_s13, 0  ;;  %p1684_p9 = por %p78_p6, %p51_p2 }
  0x17   : > { %s151_s15 = sadd.s32 1, %s1530_s19  ;;  %p158_p10 = scmp.ne.s32.totalorder %s1530_s19, %s1526_s18 }
  0x18   : > { %s1692_s16 = scalar_select %p69_p8, %s1538_s21, %s71_s10  }
  0x19   : > { %s1695_s17 = scalar_select %p149_p7, %s1530_s19, %s151_s15  }
  0x1a   : > { %p1699_p11 = por %p158_p10, %p51_p2  ;;  %p190_p12 = scmp.eq.s32.totalorder %s1237_s29, 11 }
  0x1b   : > { %p1240_p0 = scmp.ge.s32.totalorder %s1566_s28, 12 }
  0x1c   : > { %p1703_p13 = por %p190_p12, %p158_p10 }
  0x1d   : > { %212 = sbr.rel (%p1240_p0) target bundleno = 102 (0x66), region = 16 }
  0x24   : > { %215 = sbr.rel (!%p1668_p5) target bundleno = 49 (0x31), region = 20  ;;  %s217_s10 = sand.u32 (%p1668_p5), 1, %s1546_s23  }
  0x25   : > { %s1295_s12 = smul.u32 (%p1668_p5), 12, %s1558_s26  ;;  %s1966_s0 = sld [smem:[#allocation10_spill]] (%p1668_p5) }
  0x26   : > { %s1355_s13 = smul.u32 (%p1668_p5), 48, %s217_s10 }
  0x28   : > { %s219_s29 = scalar_lea.vmem (%p1668_p5), [#allocation3], %s1355_s13 }
  0x2b   : > { %s225_s30 = scalar_lea.vmem %s1966_s0, %s1295_s12 }
  0x2c   : > { %v240_v0 = vld [vmem:[%s225_s30] sm:$0xff]  ;;  %v242_v1 = vld [vmem:[%s225_s30 + $0x48] sm:$0xff]  ;;  %v244_v2 = vld [vmem:[%s225_s30 + $0x90] sm:$0xff] }
  0x2d   : > { %241 = vst [vmem:[%s219_s29] sm:$0xff] %v240_v0  ;;  %243 = vst [vmem:[%s219_s29 + $0xc] sm:$0xff] %v242_v1  ;;  %v246_v3 = vld [vmem:[%s225_s30 + $0xd8] sm:$0xff]  ;;  %v1242_v4 = vld [vmem:[%s225_s30 + $0x8] sm:$0xf] }
  0x2e   : > { %245 = vst [vmem:[%s219_s29 + $0x18] sm:$0xff] %v244_v2  ;;  %v1244_v5 = vld [vmem:[%s225_s30 + $0x50] sm:$0xf]  ;;  %247 = vst [vmem:[%s219_s29 + $0x24] sm:$0xff] %v246_v3  ;;  %v1246_v6 = vld [vmem:[%s225_s30 + $0x98] sm:$0xf] }
  0x2f   : > { %1243 = vst [vmem:[%s219_s29 + $0x8] sm:$0xf] %v1242_v4  ;;  %1245 = vst [vmem:[%s219_s29 + $0x14] sm:$0xf] %v1244_v5  ;;  %v1248_v7 = vld [vmem:[%s225_s30 + $0xe0] sm:$0xf] }
  0x30   : > { %1247 = vst [vmem:[%s219_s29 + $0x20] sm:$0xf] %v1246_v6  ;;  %1249 = vst [vmem:[%s219_s29 + $0x2c] sm:$0xf] %v1248_v7 }
  0x31 PF: > { %268 = sbr.rel (!%p1684_p9) target bundleno = 90 (0x5a), region = 46  ;;  %s270_s6 = sand.u32 (%p1684_p9), 1, %s1538_s21  }
  0x32   : > { %s1296_s9 = smul.u32 (%p1684_p9), 96, %s1558_s26  ;;  %s1967_s1 = sld [smem:[#allocation11_spill]] (%p1684_p9) }
  0x33   : > { %s1356_s10 = smul.u32 (%p1684_p9), 192, %s270_s6 }
  0x34   : > { %s275_s12 = sadd.s32 (%p1684_p9), %s1562_s27, %s1296_s9 }
  0x35   : > { %s1251_s13 = sshll.u32 (%p1684_p9), %s275_s12, 2  ;;  %s1728_s30 = scalar_lea.vmem (%p1684_p9), [#allocation4], %s1356_s10 }
  0x38   : > { %s1723_s11 = scalar_lea.vmem %s1967_s1, %s1251_s13 }
  0x39   : > { %v293_v8 = vld [vmem:[%s1723_s11] sm:$0xf]  ;;  %v295_v9 = vld [vmem:[%s1723_s11 + $0x8] sm:$0xf]  ;;  %v297_v10 = vld [vmem:[%s1723_s11 + $0x10] sm:$0xf] }
  0x3a   : > { %294 = vst [vmem:[%s1728_s30] sm:$0xf] %v293_v8  ;;  %296 = vst [vmem:[%s1728_s30 + $0x4] sm:$0xf] %v295_v9  ;;  %v299_v11 = vld [vmem:[%s1723_s11 + $0x18] sm:$0xf] }
  0x3b   : > { %298 = vst [vmem:[%s1728_s30 + $0x8] sm:$0xf] %v297_v10  ;;  %v301_v12 = vld [vmem:[%s1723_s11 + $0x20] sm:$0xf]  ;;  %v303_v13 = vld [vmem:[%s1723_s11 + $0x28] sm:$0xf] }
  0x3c   : > { %300 = vst [vmem:[%s1728_s30 + $0xc] sm:$0xf] %v299_v11  ;;  %302 = vst [vmem:[%s1728_s30 + $0x10] sm:$0xf] %v301_v12  ;;  %v305_v14 = vld [vmem:[%s1723_s11 + $0x30] sm:$0xf] }
  0x3d   : > { %304 = vst [vmem:[%s1728_s30 + $0x14] sm:$0xf] %v303_v13  ;;  %v307_v15 = vld [vmem:[%s1723_s11 + $0x38] sm:$0xf]  ;;  %v309_v16 = vld [vmem:[%s1723_s11 + $0x40] sm:$0xf] }
  0x3e   : > { %306 = vst [vmem:[%s1728_s30 + $0x18] sm:$0xf] %v305_v14  ;;  %308 = vst [vmem:[%s1728_s30 + $0x1c] sm:$0xf] %v307_v15  ;;  %v311_v17 = vld [vmem:[%s1723_s11 + $0x48] sm:$0xf] }
  0x3f   : > { %310 = vst [vmem:[%s1728_s30 + $0x20] sm:$0xf] %v309_v16  ;;  %v313_v18 = vld [vmem:[%s1723_s11 + $0x50] sm:$0xf]  ;;  %v315_v19 = vld [vmem:[%s1723_s11 + $0x58] sm:$0xf] }
  0x40   : > { %312 = vst [vmem:[%s1728_s30 + $0x24] sm:$0xf] %v311_v17  ;;  %314 = vst [vmem:[%s1728_s30 + $0x28] sm:$0xf] %v313_v18  ;;  %v317_v20 = vld [vmem:[%s1723_s11 + $0x60] sm:$0xf] }
  0x41   : > { %316 = vst [vmem:[%s1728_s30 + $0x2c] sm:$0xf] %v315_v19  ;;  %v319_v21 = vld [vmem:[%s1723_s11 + $0x68] sm:$0xf]  ;;  %v321_v22 = vld [vmem:[%s1723_s11 + $0x70] sm:$0xf] }
  0x42   : > { %318 = vst [vmem:[%s1728_s30 + $0x30] sm:$0xf] %v317_v20  ;;  %320 = vst [vmem:[%s1728_s30 + $0x34] sm:$0xf] %v319_v21  ;;  %v323_v23 = vld [vmem:[%s1723_s11 + $0x78] sm:$0xf] }
  0x43   : > { %322 = vst [vmem:[%s1728_s30 + $0x38] sm:$0xf] %v321_v22  ;;  %v325_v24 = vld [vmem:[%s1723_s11 + $0x80] sm:$0xf]  ;;  %v327_v25 = vld [vmem:[%s1723_s11 + $0x88] sm:$0xf] }
  0x44   : > { %324 = vst [vmem:[%s1728_s30 + $0x3c] sm:$0xf] %v323_v23  ;;  %326 = vst [vmem:[%s1728_s30 + $0x40] sm:$0xf] %v325_v24  ;;  %v329_v26 = vld [vmem:[%s1723_s11 + $0x90] sm:$0xf] }
  0x45   : > { %328 = vst [vmem:[%s1728_s30 + $0x44] sm:$0xf] %v327_v25  ;;  %v331_v27 = vld [vmem:[%s1723_s11 + $0x98] sm:$0xf]  ;;  %v333_v28 = vld [vmem:[%s1723_s11 + $0xa0] sm:$0xf] }
  0x46   : > { %330 = vst [vmem:[%s1728_s30 + $0x48] sm:$0xf] %v329_v26  ;;  %332 = vst [vmem:[%s1728_s30 + $0x4c] sm:$0xf] %v331_v27  ;;  %v335_v29 = vld [vmem:[%s1723_s11 + $0xa8] sm:$0xf] }
  0x47   : > { %334 = vst [vmem:[%s1728_s30 + $0x50] sm:$0xf] %v333_v28  ;;  %v337_v30 = vld [vmem:[%s1723_s11 + $0xb0] sm:$0xf]  ;;  %v339_v31 = vld [vmem:[%s1723_s11 + $0xb8] sm:$0xf] }
  0x48   : > { %336 = vst [vmem:[%s1728_s30 + $0x54] sm:$0xf] %v335_v29  ;;  %338 = vst [vmem:[%s1728_s30 + $0x58] sm:$0xf] %v337_v30  ;;  %v341_v32 = vld [vmem:[%s1723_s11 + $0xc0] sm:$0xf] }
  0x49   : > { %340 = vst [vmem:[%s1728_s30 + $0x5c] sm:$0xf] %v339_v31  ;;  %v343_v33 = vld [vmem:[%s1723_s11 + $0xc8] sm:$0xf]  ;;  %v345_v34 = vld [vmem:[%s1723_s11 + $0xd0] sm:$0xf] }
  0x4a   : > { %342 = vst [vmem:[%s1728_s30 + $0x60] sm:$0xf] %v341_v32  ;;  %344 = vst [vmem:[%s1728_s30 + $0x64] sm:$0xf] %v343_v33  ;;  %v347_v35 = vld [vmem:[%s1723_s11 + $0xd8] sm:$0xf] }
  0x4b   : > { %346 = vst [vmem:[%s1728_s30 + $0x68] sm:$0xf] %v345_v34  ;;  %v349_v36 = vld [vmem:[%s1723_s11 + $0xe0] sm:$0xf]  ;;  %v351_v37 = vld [vmem:[%s1723_s11 + $0xe8] sm:$0xf] }
  0x4c   : > { %348 = vst [vmem:[%s1728_s30 + $0x6c] sm:$0xf] %v347_v35  ;;  %350 = vst [vmem:[%s1728_s30 + $0x70] sm:$0xf] %v349_v36  ;;  %v353_v38 = vld [vmem:[%s1723_s11 + $0xf0] sm:$0xf] }
  0x4d   : > { %352 = vst [vmem:[%s1728_s30 + $0x74] sm:$0xf] %v351_v37  ;;  %v355_v39 = vld [vmem:[%s1723_s11 + $0xf8] sm:$0xf]  ;;  %v357_v40 = vld [vmem:[%s1723_s11 + $0x100] sm:$0xf] }
  0x4e   : > { %354 = vst [vmem:[%s1728_s30 + $0x78] sm:$0xf] %v353_v38  ;;  %356 = vst [vmem:[%s1728_s30 + $0x7c] sm:$0xf] %v355_v39  ;;  %v359_v41 = vld [vmem:[%s1723_s11 + $0x108] sm:$0xf] }
  0x4f   : > { %358 = vst [vmem:[%s1728_s30 + $0x80] sm:$0xf] %v357_v40  ;;  %v361_v42 = vld [vmem:[%s1723_s11 + $0x110] sm:$0xf]  ;;  %v363_v43 = vld [vmem:[%s1723_s11 + $0x118] sm:$0xf] }
  0x50   : > { %360 = vst [vmem:[%s1728_s30 + $0x84] sm:$0xf] %v359_v41  ;;  %362 = vst [vmem:[%s1728_s30 + $0x88] sm:$0xf] %v361_v42  ;;  %v365_v44 = vld [vmem:[%s1723_s11 + $0x120] sm:$0xf] }
  0x51   : > { %364 = vst [vmem:[%s1728_s30 + $0x8c] sm:$0xf] %v363_v43  ;;  %v367_v45 = vld [vmem:[%s1723_s11 + $0x128] sm:$0xf]  ;;  %v369_v46 = vld [vmem:[%s1723_s11 + $0x130] sm:$0xf] }
  0x52   : > { %366 = vst [vmem:[%s1728_s30 + $0x90] sm:$0xf] %v365_v44  ;;  %368 = vst [vmem:[%s1728_s30 + $0x94] sm:$0xf] %v367_v45  ;;  %v371_v47 = vld [vmem:[%s1723_s11 + $0x138] sm:$0xf] }
  0x53   : > { %370 = vst [vmem:[%s1728_s30 + $0x98] sm:$0xf] %v369_v46  ;;  %v373_v48 = vld [vmem:[%s1723_s11 + $0x140] sm:$0xf]  ;;  %v375_v49 = vld [vmem:[%s1723_s11 + $0x148] sm:$0xf] }
  0x54   : > { %372 = vst [vmem:[%s1728_s30 + $0x9c] sm:$0xf] %v371_v47  ;;  %374 = vst [vmem:[%s1728_s30 + $0xa0] sm:$0xf] %v373_v48  ;;  %v377_v50 = vld [vmem:[%s1723_s11 + $0x150] sm:$0xf] }
  0x55   : > { %376 = vst [vmem:[%s1728_s30 + $0xa4] sm:$0xf] %v375_v49  ;;  %v379_v51 = vld [vmem:[%s1723_s11 + $0x158] sm:$0xf]  ;;  %v381_v52 = vld [vmem:[%s1723_s11 + $0x160] sm:$0xf] }
  0x56   : > { %378 = vst [vmem:[%s1728_s30 + $0xa8] sm:$0xf] %v377_v50  ;;  %380 = vst [vmem:[%s1728_s30 + $0xac] sm:$0xf] %v379_v51  ;;  %v383_v53 = vld [vmem:[%s1723_s11 + $0x168] sm:$0xf] }
  0x57   : > { %382 = vst [vmem:[%s1728_s30 + $0xb0] sm:$0xf] %v381_v52  ;;  %v385_v54 = vld [vmem:[%s1723_s11 + $0x170] sm:$0xf]  ;;  %v387_v55 = vld [vmem:[%s1723_s11 + $0x178] sm:$0xf] }
  0x58   : > { %384 = vst [vmem:[%s1728_s30 + $0xb4] sm:$0xf] %v383_v53  ;;  %386 = vst [vmem:[%s1728_s30 + $0xb8] sm:$0xf] %v385_v54 }
  0x59   : > { %388 = vst [vmem:[%s1728_s30 + $0xbc] sm:$0xf] %v387_v55 }
  0x5a PF: > { %519 = sbr.rel (!%p1699_p11) target bundleno = 102 (0x66), region = 95  ;;  %s521_s0 = sand.u32 (%p1699_p11), 1, %s1530_s19  }
  0x5b   : > { %s1253_s14 = sshll.u32 (%p1699_p11), %s1562_s27, 3  ;;  %s1252_s29 = sshll.u32 (%p1699_p11), %s521_s0, 5 }
  0x5c   : > { %s1968_s4 = sld [smem:[#allocation12_spill]] (%p1699_p11)  ;;  %s523_s11 = scalar_lea.vmem (%p1699_p11), [#allocation5], %s1252_s29 }
  0x62   : > { %s528_s10 = scalar_lea.vmem %s1968_s4, %s1253_s14 }
  0x63   : > { %v562_v56 = vld [vmem:[%s528_s10] sm:$0xff]  ;;  %v564_v57 = vld [vmem:[%s528_s10 + $0x10] sm:$0xff] }
  0x64   : > { %v566_v58 = vld [vmem:[%s528_s10 + $0x20] sm:$0xff]  ;;  %563 = vst [vmem:[%s523_s11] sm:$0xff] %v562_v56  ;;  %565 = vst [vmem:[%s523_s11 + $0x8] sm:$0xff] %v564_v57  ;;  %v568_v59 = vld [vmem:[%s528_s10 + $0x30] sm:$0xff] }
  0x65   : > { %567 = vst [vmem:[%s523_s11 + $0x10] sm:$0xff] %v566_v58  ;;  %569 = vst [vmem:[%s523_s11 + $0x18] sm:$0xff] %v568_v59 }
  0x66 PF: > { %p1254_p1 = scmp.ge.s32.totalorder %s1566_s28, 1  ;;  %p574_p2 = scmp.lt.s32.totalorder %s1566_s28, 13 }
  0x68   : > { %p575_p3 = pnand %p1254_p1, %p574_p2 }
  0x69   : > { %s581_s7 = sand.u32 (!%p575_p3), 1, %s1542_s22   ;;  %s588_s12 = sand.u32 (!%p575_p3), 1, %s1534_s20  }
  0x6a   : > { %578 = sbr.rel (%p575_p3) target bundleno = 408 (0x198), region = 133  ;;  %s595_s15 = sand.u32 (!%p575_p3), 1, %s1526_s18  }
  0x6b   : > { %s1357_s13 = smul.u32 (!%p575_p3), 48, %s581_s7  ;;  %s1255_s0 = sshll.u32 (!%p575_p3), %s595_s15, 5 }
  0x6c   : > { %s1358_s30 = smul.u32 (!%p575_p3), 192, %s588_s12  ;;  %p638_p4 = scmp.lt.s32.totalorder (!%p575_p3), %s1554_s25, 1 }
  0x6d   : > { %s1847_s4 = scalar_lea.vmem (!%p575_p3), [#allocation3], %s1357_s13  ;;  %s1851_s18 = scalar_lea.vmem (!%p575_p3), [#allocation5], %s1255_s0 }
  0x6e   : > { %s1849_s20 = scalar_lea.vmem (!%p575_p3), [#allocation4], %s1358_s30  ;;  %s1853_s22 = scalar_lea.vmem (!%p575_p3), [#allocation6], %s1255_s0 }
  0x6f   : > { %p1257_p5 = scmp.ne.s32.totalorder (!%p575_p3), %s1550_s24, 0 }
  0x71   : > { %s1837_s14 = scalar_select %p638_p4, %s1554_s25, 1 }
  0x72   : > { %650 = sbr.rel (%p1257_p5) target bundleno = 121 (0x79), region = 149  ;;  %v1568_v60 = vmov (!%p1257_p5), 0.0  }
  0x73   : > { %s640_s9 = scalar_lea.vmem %s1950_s2, %s1837_s14  ;;  %s643_s1 = scalar_lea.vmem %s1951_s3, %s1837_s14  ;;  %651 = vst [vmem:[#allocation2] sm:$0xff] (!%p1257_p5), %v1568_v60  ;;  %652 = vst [vmem:[#allocation2 + $0x8] sm:$0xff] (!%p1257_p5), %v1568_v60 }
  0x74   : > { %653 = vst [vmem:[#allocation2 + $0x10] sm:$0xff] (!%p1257_p5), %v1568_v60  ;;  %654 = vst [vmem:[#allocation2 + $0x18] sm:$0xff] (!%p1257_p5), %v1568_v60 }
  0x79 PF: > { %v1448_v61 = vld [vmem:[%s1849_s20 + $0x40] sm:$0xff]   ;;  %v1451_v0 = vld [vmem:[%s1849_s20 + $0x48] sm:$0xff]   ;;  %v1454_v3 = vld [vmem:[%s1849_s20 + $0x50] sm:$0xff]   ;;  %p1288_p6 = scmp.ne.s32.totalorder %s1550_s24, 5 }
  0x7a   : > { %v1449_v62 = vld [vmem:[%s1849_s20] sm:$0xff]   ;;  %1297 = vmatprep.subr.bf16.mxu0 %v1448_v61  ;;  %v1452_v1 = vld [vmem:[%s1849_s20 + $0x8] sm:$0xff]   ;;  %v1455_v4 = vld [vmem:[%s1849_s20 + $0x10] sm:$0xff]  }
  0x7b   : > { %v1450_v63 = vld [vmem:[%s1849_s20 + $0x80] sm:$0xff]   ;;  %1298 = vmatpush3.bf16.msra.mxu0 %v1449_v62  ;;  %v1453_v2 = vld [vmem:[%s1849_s20 + $0x88] sm:$0xff]   ;;  %v1456_v5 = vld [vmem:[%s1849_s20 + $0x90] sm:$0xff]  }
  0x7c   : > { %1335 = vmatprep.subr.bf16.mxu1 %v1450_v63  ;;  %1299 = vmatprep.subr.bf16.mxu0 %v1451_v0  ;;  %v1457_v6 = vld [vmem:[%s1849_s20 + $0x58] sm:$0xff]   ;;  %v1460_v9 = vld [vmem:[%s1849_s20 + $0x60] sm:$0xff]   ;;  %v1463_v12 = vld [vmem:[%s1849_s20 + $0x68] sm:$0xff]  }
  0x7d   : > { %1336 = vmatpush3.bf16.msra.mxu1 %v1450_v63  ;;  %v1458_v7 = vld [vmem:[%s1849_s20 + $0x18] sm:$0xff]   ;;  %v1462_v10 = vld [vmem:[%s1849_s20 + $0xa0] sm:$0xff]   ;;  %v1465_v13 = vld [vmem:[%s1849_s20 + $0xa8] sm:$0xff]  }
  0x7e   : > { %1337 = vmatprep.subr.bf16.mxu1 %v1453_v2  ;;  %v1459_v8 = vld [vmem:[%s1849_s20 + $0x98] sm:$0xff]   ;;  %v1461_v11 = vld [vmem:[%s1849_s20 + $0x20] sm:$0xff]   ;;  %v1464_v14 = vld [vmem:[%s1849_s20 + $0x28] sm:$0xff]  }
  0x7f   : > { %1300 = vmatpush3.bf16.msra.mxu0 %v1452_v1  ;;  %v1466_v15 = vld [vmem:[%s1849_s20 + $0x70] sm:$0xff]   ;;  %v1469_v18 = vld [vmem:[%s1849_s20 + $0x78] sm:$0xff]   ;;  %v655_v33 = vld [vmem:[#allocation2] sm:$0xff] }
  0x80   : > { %1301 = vmatprep.subr.bf16.mxu0 %v1454_v3  ;;  %v1467_v16 = vld [vmem:[%s1849_s20 + $0x30] sm:$0xff]   ;;  %v1471_v19 = vld [vmem:[%s1849_s20 + $0xb8] sm:$0xff]   ;;  %v656_v38 = vld [vmem:[#allocation2 + $0x8] sm:$0xff] }
  0x81   : > { %1338 = vmatpush3.bf16.msra.mxu1 %v1453_v2  ;;  %v1468_v17 = vld [vmem:[%s1849_s20 + $0xb0] sm:$0xff]   ;;  %v1470_v22 = vld [vmem:[%s1849_s20 + $0x38] sm:$0xff]   ;;  %v1289_v56 = vld [vmem:[%s640_s9] ss:$0 sm:$0xff] (!%p1288_p6) }
  0x82   : > { %1339 = vmatprep.subr.bf16.mxu1 %v1456_v5  ;;  %v1474_v20 = vld [vmem:[%s1847_s4 + $0x4] ss:$12 sps:$4 sm:$0xff]   ;;  %v1475_v21 = vld [vmem:[%s1847_s4 + $0x8] ss:$12 sps:$4 sm:$0xff]   ;;  %v1472_v23 = vld [vmem:[%s1847_s4] ss:$12 sps:$4 sm:$0xff]  }
  0x83   : > { %1302 = vmatpush3.bf16.msra.mxu0 %v1455_v4  ;;  %923 = vmatprep.mubr.bf16.mxu0 %v1474_v20  ;;  %v1477_v24 = vld [vmem:[%s1847_s4 + $0x1c] ss:$12 sps:$4 sm:$0xff]   ;;  %v1476_v25 = vld [vmem:[%s1847_s4 + $0x20] ss:$12 sps:$4 sm:$0xff]   ;;  %v1479_v26 = vld [vmem:[%s1847_s4 + $0x18] ss:$12 sps:$4 sm:$0xff]  }
  0x84   : > { %1303 = vmatprep.subr.bf16.mxu0 %v1457_v6  ;;  %1351 = vmatprep.mubr.bf16.mxu1 %v1475_v21  ;;  %v657_v47 = vld [vmem:[#allocation2 + $0x10] sm:$0xff]  ;;  %v658_v51 = vld [vmem:[#allocation2 + $0x18] sm:$0xff]  ;;  %v1290_v57 = vld [vmem:[%s643_s1] ss:$0 sm:$0xff] (!%p1288_p6) }
  0x85   : > { %1340 = vmatpush3.bf16.msra.mxu1 %v1456_v5  ;;  %v1027_v60 = vld [vmem:[%s1851_s18] sm:$0xff] (!%p1288_p6)  ;;  %v1028_v1 = vld [vmem:[%s1851_s18 + $0x8] sm:$0xff] (!%p1288_p6)  ;;  %v1029_v5 = vld [vmem:[%s1851_s18 + $0x10] sm:$0xff] (!%p1288_p6) }
  0x86   : > { %1341 = vmatprep.subr.bf16.mxu1 %v1459_v8  ;;  %v1030_v6 = vld [vmem:[%s1851_s18 + $0x18] sm:$0xff] (!%p1288_p6) }
  0x87   : > { %1304 = vmatpush3.bf16.msra.mxu0 %v1458_v7 }
  0x88   : > { %1305 = vmatprep.subr.bf16.mxu0 %v1460_v9 }
  0x89   : > { %1342 = vmatpush3.bf16.msra.mxu1 %v1459_v8 }
  0x8a   : > { %1343 = vmatprep.subr.bf16.mxu1 %v1462_v10 }
  0x8b   : > { %1306 = vmatpush3.bf16.msra.mxu0 %v1461_v11 }
  0x8c   : > { %1307 = vmatprep.subr.bf16.mxu0 %v1463_v12 }
  0x8d   : > { %1344 = vmatpush3.bf16.msra.mxu1 %v1462_v10 }
  0x8e   : > { %1345 = vmatprep.subr.bf16.mxu1 %v1465_v13 }
  0x8f   : > { %1308 = vmatpush3.bf16.msra.mxu0 %v1464_v14 }
  0x90   : > { %1309 = vmatprep.subr.bf16.mxu0 %v1466_v15 }
  0x91   : > { %1346 = vmatpush3.bf16.msra.mxu1 %v1465_v13 }
  0x92   : > { %1347 = vmatprep.subr.bf16.mxu1 %v1468_v17 }
  0x93   : > { %1310 = vmatpush3.bf16.msra.mxu0 %v1467_v16 }
  0x94   : > { %1311 = vmatprep.subr.bf16.mxu0 %v1469_v18 }
  0x95   : > { %1348 = vmatpush3.bf16.msra.mxu1 %v1468_v17 }
  0x96   : > { %1349 = vmatprep.subr.bf16.mxu1 %v1471_v19 }
  0x97   : > { %1312 = vmatpush3.bf16.msra.mxu0 %v1470_v22 }
  0x99   : > { %1350 = vmatpush3.bf16.msra.mxu1 %v1471_v19 }
  0x9a   : > { %924 = vmatmul.mubr.bf16.vlgmr.msra.gmra.mrb[0].mxu0 %v1472_v23 }
  0x9b   : > { %931 = vmatprep.mubr.bf16.mxu0 %v1477_v24 }
  0x9c   : > { %1352 = vmatmul.mubr.bf16.vlgmr.msra.gmra.mrb[0].mxu1 %v1476_v25 }
  0xa2   : > { %932 = vmatmul.mubr.bf16.gmra.mrb[4].mxu0 %v1479_v26 }
 0x16d   : > { %v1313_v27 = vpop.f32.mrb[0].mxu0 }
 0x16e   : > { %v1314_v28 = vpop.f32.mrb[1].mxu0 }
 0x16f   : > { %v1315_v29 = vadd.f32 %v1314_v28, %v1313_v27  ;;  %v1316_v30 = vpop.f32.mrb[2].mxu0  ;;  %v1353_v31 = vpop.f32.mrb[0].mxu1 }
 0x170   : > { %v1317_v32 = vpop.f32.mrb[3].mxu0  ;;  %v974_v34 = vpop.f32.mrb[1].mxu1 }
 0x171   : > { %v1318_v35 = vadd.f32 %v1317_v32, %v1316_v30  ;;  %v975_v36 = vadd.f32 %v1315_v29, %v974_v34  ;;  %v1354_v37 = vpop.f32.mrb[2].mxu1 }
 0x172   : > { %v977_v39 = vpop.f32.mrb[3].mxu1 }
 0x173   : > { %v989_v40 = vadd.f32 %v975_v36, %v655_v33  ;;  %v978_v41 = vadd.f32 %v1318_v35, %v977_v39 }
 0x175   : > { %993 = vst [vmem:[#allocation2] sm:$0xff] %v989_v40  ;;  %v990_v42 = vadd.f32 %v978_v41, %v656_v38  ;;  %v1319_v43 = vpop.f32.mrb[4].mxu0 }
 0x176   : > { %v1320_v44 = vpop.f32.mrb[5].mxu0 }
 0x177   : > { %994 = vst [vmem:[#allocation2 + $0x8] sm:$0xff] %v990_v42  ;;  %v1321_v45 = vadd.f32 %v1320_v44, %v1319_v43  ;;  %v1322_v46 = vpop.f32.mrb[6].mxu0 }
 0x178   : > { %v1323_v48 = vpop.f32.mrb[7].mxu0 }
 0x179   : > { %v983_v49 = vadd.f32 %v1353_v31, %v1321_v45  ;;  %v1324_v50 = vadd.f32 %v1323_v48, %v1322_v46  ;;  %1000 = sbr.rel (%p1288_p6) target bundleno = 400 (0x190), region = 153 }
 0x17b   : > { %v991_v52 = vadd.f32 %v983_v49, %v657_v47  ;;  %v986_v53 = vadd.f32 %v1354_v37, %v1324_v50 }
 0x17c   : > { %v1001_v55 = vld [vmem:[#allocation2] sm:$0xff] (!%p1288_p6) }
 0x17d   : > { %995 = vst [vmem:[#allocation2 + $0x10] sm:$0xff] %v991_v52  ;;  %v992_v54 = vadd.f32 %v986_v53, %v658_v51  ;;  %v1012_v58 = vmul.f32 (!%p1288_p6), %v1289_v56, %v1001_v55 }
 0x17e   : > { %v1002_v59 = vld [vmem:[#allocation2 + $0x8] sm:$0xff] (!%p1288_p6) }
 0x17f   : > { %996 = vst [vmem:[#allocation2 + $0x18] sm:$0xff] %v992_v54  ;;  %v1013_v61 = vmul.f32 (!%p1288_p6), %v1289_v56, %v1002_v59  ;;  %v1023_v0 = vadd.f32 (!%p1288_p6), %v1290_v57, %v1012_v58 }
 0x181   : > { %v1024_v4 = vadd.f32 %v1290_v57, %v1013_v61  ;;  %v1031_v7 = vadd.f32 %v1027_v60, %v1023_v0 }
 0x183   : > { %v1032_v10 = vadd.f32 %v1028_v1, %v1024_v4  ;;  %v1035_v11 = vmax.f32 %v1031_v7, 0.0 }
 0x184   : > { %v1003_v62 = vld [vmem:[#allocation2 + $0x10] sm:$0xff] }
 0x185   : > { %v1014_v2 = vmul.f32 %v1289_v56, %v1003_v62  ;;  %v1036_v14 = vmax.f32 %v1032_v10, 0.0  ;;  %1039 = vst [vmem:[%s1853_s22] sm:$0xff] %v1035_v11 }
 0x186   : > { %v1004_v63 = vld [vmem:[#allocation2 + $0x18] sm:$0xff] }
 0x187   : > { %v1015_v3 = vmul.f32 %v1289_v56, %v1004_v63  ;;  %v1025_v8 = vadd.f32 %v1290_v57, %v1014_v2  ;;  %1040 = vst [vmem:[%s1853_s22 + $0x8] sm:$0xff] %v1036_v14 }
 0x189   : > { %v1026_v9 = vadd.f32 %v1290_v57, %v1015_v3  ;;  %v1033_v12 = vadd.f32 %v1029_v5, %v1025_v8 }
 0x18b   : > { %v1034_v13 = vadd.f32 %v1030_v6, %v1026_v9  ;;  %v1037_v15 = vmax.f32 %v1033_v12, 0.0 }
 0x18d   : > { %v1038_v16 = vmax.f32 %v1034_v13, 0.0  ;;  %1041 = vst [vmem:[%s1853_s22 + $0x10] sm:$0xff] %v1037_v15 }
 0x18f   : > { %1042 = vst [vmem:[%s1853_s22 + $0x18] sm:$0xff] %v1038_v16 }
 0x190 PF: > { %1049 = sbr.rel (!%p1703_p13) target bundleno = 408 (0x198), region = 157  ;;  %s1292_s1 = sshll.u32 (%p1703_p13), %s1554_s25, 3  ;;  %v1088_v17 = vld [vmem:[%s1853_s22] sm:$0xff] (%p1703_p13)  ;;  %v1090_v18 = vld [vmem:[%s1853_s22 + $0x8] sm:$0xff] (%p1703_p13) }
 0x191   : > { %s1054_s30 = scalar_lea.vmem (%p1703_p13), %s1953_s5, %s1292_s1 }
 0x192   : > { %1089 = vst [vmem:[%s1054_s30] sm:$0xff] (%p1703_p13), %v1088_v17  ;;  %1091 = vst [vmem:[%s1054_s30 + $0x10] sm:$0xff] (%p1703_p13), %v1090_v18 }
 0x194   : > { %v1092_v19 = vld [vmem:[%s1853_s22 + $0x10] sm:$0xff] (%p1703_p13) }
 0x195   : > { %1093 = vst [vmem:[%s1054_s30 + $0x20] sm:$0xff] (%p1703_p13), %v1092_v19 }
 0x196   : > { %v1094_v20 = vld [vmem:[%s1853_s22 + $0x18] sm:$0xff] (%p1703_p13) }
 0x197   : > { %1095 = vst [vmem:[%s1054_s30 + $0x30] sm:$0xff] %v1094_v20 }
 0x198 PF: > { %s15_s28 = sadd.s32 1, %s1566_s28   ;;  %s1969_s25 = sld [smem:[#allocation9_spill]] }
 0x199   : > { %p12_p7 = scmp.ge.s32.totalorder %s15_s28, 14   ;;  %s1970_s8 = sld [smem:[#allocation7_spill]] }
 0x19a   : > { %s1971_s0 = sld [smem:[#allocation8_spill]]  ;;  %s1972_s18 = smov %s1530_s19 }
 0x19b   : > { %s1973_s19 = smov %s1695_s17  ;;  %s1974_s20 = smov %s1538_s21 }
 0x19c   : > { %s1975_s21 = smov %s1692_s16  ;;  %s1976_s22 = smov %s1546_s23 }
 0x19d   : > { %s1978_s24 = smov %s1558_s26  ;;  %14 = sbr.rel (!%p12_p7) target bundleno = 10 (0xa), region = 254 }
 0x19e   : > { %s1977_s23 = smov %s1969_s25  ;;  %s1979_s25 = smov %s1562_s27 }
 0x19f   : > { %s1980_s26 = smov %s1970_s8 }
 0x1a0   : > { %s1981_s27 = smov %s1971_s0 }

// kernel: resnet18_forward.34
= control target key start
LH: loop header
LB: loop body
LE: loop exit
PB: predicated region body
PF: predicated region fallthrough
CT: control target
= control target key end

     0   :  { %s1790_s0 = inlined_call_operand.vmem [shape: bf16[32,2304], index: 0, kind: input, shape index: {}]   ;;  %s1791_s1 = inlined_call_operand.vmem [shape: bf16[2304,256], index: 1, kind: input, shape index: {}]   ;;  %s1792_s2 = inlined_call_operand.vmem [shape: f32[1,256], index: 2, kind: input, shape index: {}]   ;;  %s1793_s3 = inlined_call_operand.vmem [shape: f32[1,256], index: 3, kind: input, shape index: {}]   ;;  %s1794_s4 = inlined_call_operand.vmem [shape: f32[32,256], index: 4, kind: output, shape index: {}]  }
   0x1   :  { %1798 = sst [smem:[#allocation9_spill]] %s1790_s0 }
   0x2   :  { %1799 = sst [smem:[#allocation10_spill]] %s1791_s1 }
   0x3   :  { %s1464_s15 = smov 0   ;;  %s1466_s16 = smov 0  }
   0x4   :  { %s1468_s17 = smov 0   ;;  %s1470_s18 = smov 0  }
   0x5   :  { %s1472_s19 = smov 0   ;;  %s1474_s20 = smov 0  }
   0x6   :  { %s1476_s21 = smov 0   ;;  %s1478_s22 = smov 0  }
   0x7   :  { %s1480_s23 = smov 0   ;;  %s1482_s24 = smov 0  }
   0x8   :  { %s1484_s25 = smov 0  }
   0x9 LB: > { %1800 = sst [smem:[#allocation6_spill]] %s1432_s24  ;;  %s1110_s26 = sadd.s32 4294967295, %s1436_s25   ;;  %s1436_s25 = sphi %s1484_s25, %s14_s25   ;;  %s1432_s24 = sphi %s1482_s24, %s1810_s24   ;;  %s1428_s23 = sphi %s1480_s23, %s1818_s23   ;;  %s1424_s22 = sphi %s1478_s22, %s1808_s22   ;;  %s1420_s21 = sphi %s1476_s21, %s1817_s21   ;;  %s1416_s20 = sphi %s1474_s20, %s1816_s20   ;;  %s1412_s19 = sphi %s1472_s19, %s1815_s19   ;;  %s1408_s18 = sphi %s1470_s18, %s1814_s18   ;;  %s1404_s17 = sphi %s1468_s17, %s1813_s17   ;;  %s1400_s16 = sphi %s1466_s16, %s1812_s16   ;;  %s1396_s15 = sphi %s1464_s15, %s1811_s15  }
   0xa   : > { %s26_s27 = sadd.s32 1, %s1428_s23  ;;  %s29_s28 = sadd.s32 1, %s1432_s24 }
   0xb   : > { %p27_p0 = scmp.ge.s32.totalorder %s26_s27, 6  ;;  %s42_s29 = sadd.s32 1, %s1416_s20 }
   0xc   : > { %p49_p1 = scmp.ne.s32.totalorder %s1416_s20, %s1412_s19  ;;  %p50_p2 = scmp.eq.s32.totalorder %s1436_s25, 0 }
   0xd   : > { %s1820_s27 = smov (%p27_p0, %s26_s27), 0  ;;  %s1822_s28 = smov (!%p27_p0, %s29_s28), %s1432_s24 }
   0xe   : > { %1801 = sst [smem:[#allocation7_spill]] %s1820_s27  ;;  %s38_s30 = ssub.s32 %s1428_s23, %s1820_s27 }
   0xf   : > { %p31_p3 = scmp.ge.s32.totalorder %s1822_s28, 2  ;;  %p40_p4 = scmp.eq.s32.totalorder %s38_s30, 0 }
  0x10   : > { %p1531_p5 = por %p50_p2, %p49_p1  ;;  %s70_s6 = sadd.s32 1, %s1408_s18 }
  0x11   : > { %s1824_s28 = smov (%p31_p3, %s1822_s28), 0  ;;  %p77_p6 = scmp.ne.s32.totalorder %s1408_s18, %s1404_s17 }
  0x12   : > { %1803 = sst [smem:[#allocation8_spill]] %s1824_s28  ;;  %s66_s8 = ssub.s32 %s1432_s24, %s1824_s28 }
  0x13   : > { %s1539_s7 = scalar_select %p40_p4, %s1416_s20, %s42_s29  }
  0x14   : > { %s67_s9 = sor.u32 %s66_s8, %s38_s30  ;;  %p148_p7 = scmp.eq.s32.totalorder %s66_s8, 0 }
  0x15   : > { %p68_p8 = scmp.eq.s32.totalorder %s67_s9, 0  ;;  %p1545_p9 = por %p77_p6, %p50_p2 }
  0x16   : > { %s150_s11 = sadd.s32 1, %s1400_s16  ;;  %p160_p10 = scmp.ne.s32.totalorder %s1400_s16, %s1396_s15 }
  0x17   : > { %s1553_s12 = scalar_select %p68_p8, %s1408_s18, %s70_s6  }
  0x18   : > { %s1556_s13 = scalar_select %p148_p7, %s1400_s16, %s150_s11  }
  0x19   : > { %p161_p11 = scmp.eq.s32.totalorder %s1110_s26, 11  ;;  %p1113_p13 = scmp.ge.s32.totalorder %s1436_s25, 12 }
  0x1b   : > { %p1558_p12 = por %p161_p11, %p160_p10  ;;  %183 = sbr.rel (%p1113_p13) target bundleno = 88 (0x58), region = 16 }
  0x22   : > { %186 = sbr.rel (!%p1531_p5) target bundleno = 47 (0x2f), region = 20  ;;  %s188_s29 = sand.u32 (%p1531_p5), 1, %s1416_s20  }
  0x23   : > { %s1165_s30 = smul.u32 (%p1531_p5), 12, %s1428_s23  ;;  %s1806_s0 = sld [smem:[#allocation9_spill]] (%p1531_p5) }
  0x24   : > { %s1225_s8 = smul.u32 (%p1531_p5), 48, %s188_s29 }
  0x26   : > { %s190_s26 = scalar_lea.vmem (%p1531_p5), [#allocation3], %s1225_s8 }
  0x29   : > { %s196_s11 = scalar_lea.vmem %s1806_s0, %s1165_s30 }
  0x2a   : > { %v211_v0 = vld [vmem:[%s196_s11] sm:$0xff]  ;;  %v213_v1 = vld [vmem:[%s196_s11 + $0x48] sm:$0xff]  ;;  %v215_v2 = vld [vmem:[%s196_s11 + $0x90] sm:$0xff] }
  0x2b   : > { %212 = vst [vmem:[%s190_s26] sm:$0xff] %v211_v0  ;;  %214 = vst [vmem:[%s190_s26 + $0xc] sm:$0xff] %v213_v1  ;;  %v217_v3 = vld [vmem:[%s196_s11 + $0xd8] sm:$0xff]  ;;  %v1115_v4 = vld [vmem:[%s196_s11 + $0x8] sm:$0xf] }
  0x2c   : > { %216 = vst [vmem:[%s190_s26 + $0x18] sm:$0xff] %v215_v2  ;;  %v1117_v5 = vld [vmem:[%s196_s11 + $0x50] sm:$0xf]  ;;  %218 = vst [vmem:[%s190_s26 + $0x24] sm:$0xff] %v217_v3  ;;  %v1119_v6 = vld [vmem:[%s196_s11 + $0x98] sm:$0xf] }
  0x2d   : > { %1116 = vst [vmem:[%s190_s26 + $0x8] sm:$0xf] %v1115_v4  ;;  %1118 = vst [vmem:[%s190_s26 + $0x14] sm:$0xf] %v1117_v5  ;;  %v1121_v7 = vld [vmem:[%s196_s11 + $0xe0] sm:$0xf] }
  0x2e   : > { %1120 = vst [vmem:[%s190_s26 + $0x20] sm:$0xf] %v1119_v6  ;;  %1122 = vst [vmem:[%s190_s26 + $0x2c] sm:$0xf] %v1121_v7 }
  0x2f PF: > { %239 = sbr.rel (!%p1545_p9) target bundleno = 88 (0x58), region = 46  ;;  %s241_s5 = sand.u32 (%p1545_p9), 1, %s1408_s18  }
  0x30   : > { %s1166_s29 = smul.u32 (%p1545_p9), 96, %s1428_s23  ;;  %s1807_s1 = sld [smem:[#allocation10_spill]] (%p1545_p9) }
  0x31   : > { %s1226_s30 = smul.u32 (%p1545_p9), 192, %s241_s5 }
  0x32   : > { %s246_s8 = sadd.s32 (%p1545_p9), %s1432_s24, %s1166_s29 }
  0x33   : > { %s1124_s6 = sshll.u32 (%p1545_p9), %s246_s8, 2  ;;  %s1583_s10 = scalar_lea.vmem (%p1545_p9), [#allocation4], %s1226_s30 }
  0x36   : > { %s1578_s28 = scalar_lea.vmem %s1807_s1, %s1124_s6 }
  0x37   : > { %v264_v8 = vld [vmem:[%s1578_s28] sm:$0xf]  ;;  %v266_v9 = vld [vmem:[%s1578_s28 + $0x8] sm:$0xf]  ;;  %v268_v10 = vld [vmem:[%s1578_s28 + $0x10] sm:$0xf] }
  0x38   : > { %265 = vst [vmem:[%s1583_s10] sm:$0xf] %v264_v8  ;;  %267 = vst [vmem:[%s1583_s10 + $0x4] sm:$0xf] %v266_v9  ;;  %v270_v11 = vld [vmem:[%s1578_s28 + $0x18] sm:$0xf] }
  0x39   : > { %269 = vst [vmem:[%s1583_s10 + $0x8] sm:$0xf] %v268_v10  ;;  %v272_v12 = vld [vmem:[%s1578_s28 + $0x20] sm:$0xf]  ;;  %v274_v13 = vld [vmem:[%s1578_s28 + $0x28] sm:$0xf] }
  0x3a   : > { %271 = vst [vmem:[%s1583_s10 + $0xc] sm:$0xf] %v270_v11  ;;  %273 = vst [vmem:[%s1583_s10 + $0x10] sm:$0xf] %v272_v12  ;;  %v276_v14 = vld [vmem:[%s1578_s28 + $0x30] sm:$0xf] }
  0x3b   : > { %275 = vst [vmem:[%s1583_s10 + $0x14] sm:$0xf] %v274_v13  ;;  %v278_v15 = vld [vmem:[%s1578_s28 + $0x38] sm:$0xf]  ;;  %v280_v16 = vld [vmem:[%s1578_s28 + $0x40] sm:$0xf] }
  0x3c   : > { %277 = vst [vmem:[%s1583_s10 + $0x18] sm:$0xf] %v276_v14  ;;  %279 = vst [vmem:[%s1583_s10 + $0x1c] sm:$0xf] %v278_v15  ;;  %v282_v17 = vld [vmem:[%s1578_s28 + $0x48] sm:$0xf] }
  0x3d   : > { %281 = vst [vmem:[%s1583_s10 + $0x20] sm:$0xf] %v280_v16  ;;  %v284_v18 = vld [vmem:[%s1578_s28 + $0x50] sm:$0xf]  ;;  %v286_v19 = vld [vmem:[%s1578_s28 + $0x58] sm:$0xf] }
  0x3e   : > { %283 = vst [vmem:[%s1583_s10 + $0x24] sm:$0xf] %v282_v17  ;;  %285 = vst [vmem:[%s1583_s10 + $0x28] sm:$0xf] %v284_v18  ;;  %v288_v20 = vld [vmem:[%s1578_s28 + $0x60] sm:$0xf] }
  0x3f   : > { %287 = vst [vmem:[%s1583_s10 + $0x2c] sm:$0xf] %v286_v19  ;;  %v290_v21 = vld [vmem:[%s1578_s28 + $0x68] sm:$0xf]  ;;  %v292_v22 = vld [vmem:[%s1578_s28 + $0x70] sm:$0xf] }
  0x40   : > { %289 = vst [vmem:[%s1583_s10 + $0x30] sm:$0xf] %v288_v20  ;;  %291 = vst [vmem:[%s1583_s10 + $0x34] sm:$0xf] %v290_v21  ;;  %v294_v23 = vld [vmem:[%s1578_s28 + $0x78] sm:$0xf] }
  0x41   : > { %293 = vst [vmem:[%s1583_s10 + $0x38] sm:$0xf] %v292_v22  ;;  %v296_v24 = vld [vmem:[%s1578_s28 + $0x80] sm:$0xf]  ;;  %v298_v25 = vld [vmem:[%s1578_s28 + $0x88] sm:$0xf] }
  0x42   : > { %295 = vst [vmem:[%s1583_s10 + $0x3c] sm:$0xf] %v294_v23  ;;  %297 = vst [vmem:[%s1583_s10 + $0x40] sm:$0xf] %v296_v24  ;;  %v300_v26 = vld [vmem:[%s1578_s28 + $0x90] sm:$0xf] }
  0x43   : > { %299 = vst [vmem:[%s1583_s10 + $0x44] sm:$0xf] %v298_v25  ;;  %v302_v27 = vld [vmem:[%s1578_s28 + $0x98] sm:$0xf]  ;;  %v304_v28 = vld [vmem:[%s1578_s28 + $0xa0] sm:$0xf] }
  0x44   : > { %301 = vst [vmem:[%s1583_s10 + $0x48] sm:$0xf] %v300_v26  ;;  %303 = vst [vmem:[%s1583_s10 + $0x4c] sm:$0xf] %v302_v27  ;;  %v306_v29 = vld [vmem:[%s1578_s28 + $0xa8] sm:$0xf] }
  0x45   : > { %305 = vst [vmem:[%s1583_s10 + $0x50] sm:$0xf] %v304_v28  ;;  %v308_v30 = vld [vmem:[%s1578_s28 + $0xb0] sm:$0xf]  ;;  %v310_v31 = vld [vmem:[%s1578_s28 + $0xb8] sm:$0xf] }
  0x46   : > { %307 = vst [vmem:[%s1583_s10 + $0x54] sm:$0xf] %v306_v29  ;;  %309 = vst [vmem:[%s1583_s10 + $0x58] sm:$0xf] %v308_v30  ;;  %v312_v32 = vld [vmem:[%s1578_s28 + $0xc0] sm:$0xf] }
  0x47   : > { %311 = vst [vmem:[%s1583_s10 + $0x5c] sm:$0xf] %v310_v31  ;;  %v314_v33 = vld [vmem:[%s1578_s28 + $0xc8] sm:$0xf]  ;;  %v316_v34 = vld [vmem:[%s1578_s28 + $0xd0] sm:$0xf] }
  0x48   : > { %313 = vst [vmem:[%s1583_s10 + $0x60] sm:$0xf] %v312_v32  ;;  %315 = vst [vmem:[%s1583_s10 + $0x64] sm:$0xf] %v314_v33  ;;  %v318_v35 = vld [vmem:[%s1578_s28 + $0xd8] sm:$0xf] }
  0x49   : > { %317 = vst [vmem:[%s1583_s10 + $0x68] sm:$0xf] %v316_v34  ;;  %v320_v36 = vld [vmem:[%s1578_s28 + $0xe0] sm:$0xf]  ;;  %v322_v37 = vld [vmem:[%s1578_s28 + $0xe8] sm:$0xf] }
  0x4a   : > { %319 = vst [vmem:[%s1583_s10 + $0x6c] sm:$0xf] %v318_v35  ;;  %321 = vst [vmem:[%s1583_s10 + $0x70] sm:$0xf] %v320_v36  ;;  %v324_v38 = vld [vmem:[%s1578_s28 + $0xf0] sm:$0xf] }
  0x4b   : > { %323 = vst [vmem:[%s1583_s10 + $0x74] sm:$0xf] %v322_v37  ;;  %v326_v39 = vld [vmem:[%s1578_s28 + $0xf8] sm:$0xf]  ;;  %v328_v40 = vld [vmem:[%s1578_s28 + $0x100] sm:$0xf] }
  0x4c   : > { %325 = vst [vmem:[%s1583_s10 + $0x78] sm:$0xf] %v324_v38  ;;  %327 = vst [vmem:[%s1583_s10 + $0x7c] sm:$0xf] %v326_v39  ;;  %v330_v41 = vld [vmem:[%s1578_s28 + $0x108] sm:$0xf] }
  0x4d   : > { %329 = vst [vmem:[%s1583_s10 + $0x80] sm:$0xf] %v328_v40  ;;  %v332_v42 = vld [vmem:[%s1578_s28 + $0x110] sm:$0xf]  ;;  %v334_v43 = vld [vmem:[%s1578_s28 + $0x118] sm:$0xf] }
  0x4e   : > { %331 = vst [vmem:[%s1583_s10 + $0x84] sm:$0xf] %v330_v41  ;;  %333 = vst [vmem:[%s1583_s10 + $0x88] sm:$0xf] %v332_v42  ;;  %v336_v44 = vld [vmem:[%s1578_s28 + $0x120] sm:$0xf] }
  0x4f   : > { %335 = vst [vmem:[%s1583_s10 + $0x8c] sm:$0xf] %v334_v43  ;;  %v338_v45 = vld [vmem:[%s1578_s28 + $0x128] sm:$0xf]  ;;  %v340_v46 = vld [vmem:[%s1578_s28 + $0x130] sm:$0xf] }
  0x50   : > { %337 = vst [vmem:[%s1583_s10 + $0x90] sm:$0xf] %v336_v44  ;;  %339 = vst [vmem:[%s1583_s10 + $0x94] sm:$0xf] %v338_v45  ;;  %v342_v47 = vld [vmem:[%s1578_s28 + $0x138] sm:$0xf] }
  0x51   : > { %341 = vst [vmem:[%s1583_s10 + $0x98] sm:$0xf] %v340_v46  ;;  %v344_v48 = vld [vmem:[%s1578_s28 + $0x140] sm:$0xf]  ;;  %v346_v49 = vld [vmem:[%s1578_s28 + $0x148] sm:$0xf] }
  0x52   : > { %343 = vst [vmem:[%s1583_s10 + $0x9c] sm:$0xf] %v342_v47  ;;  %345 = vst [vmem:[%s1583_s10 + $0xa0] sm:$0xf] %v344_v48  ;;  %v348_v50 = vld [vmem:[%s1578_s28 + $0x150] sm:$0xf] }
  0x53   : > { %347 = vst [vmem:[%s1583_s10 + $0xa4] sm:$0xf] %v346_v49  ;;  %v350_v51 = vld [vmem:[%s1578_s28 + $0x158] sm:$0xf]  ;;  %v352_v52 = vld [vmem:[%s1578_s28 + $0x160] sm:$0xf] }
  0x54   : > { %349 = vst [vmem:[%s1583_s10 + $0xa8] sm:$0xf] %v348_v50  ;;  %351 = vst [vmem:[%s1583_s10 + $0xac] sm:$0xf] %v350_v51  ;;  %v354_v53 = vld [vmem:[%s1578_s28 + $0x168] sm:$0xf] }
  0x55   : > { %353 = vst [vmem:[%s1583_s10 + $0xb0] sm:$0xf] %v352_v52  ;;  %v356_v54 = vld [vmem:[%s1578_s28 + $0x170] sm:$0xf]  ;;  %v358_v55 = vld [vmem:[%s1578_s28 + $0x178] sm:$0xf] }
  0x56   : > { %355 = vst [vmem:[%s1583_s10 + $0xb4] sm:$0xf] %v354_v53  ;;  %357 = vst [vmem:[%s1583_s10 + $0xb8] sm:$0xf] %v356_v54 }
  0x57   : > { %359 = vst [vmem:[%s1583_s10 + $0xbc] sm:$0xf] %v358_v55 }
  0x58 PF: > { %p1125_p0 = scmp.ge.s32.totalorder %s1436_s25, 1  ;;  %p489_p1 = scmp.lt.s32.totalorder %s1436_s25, 13 }
  0x5a   : > { %p490_p2 = pnand %p1125_p0, %p489_p1 }
  0x5b   : > { %s496_s0 = sand.u32 (!%p490_p2), 1, %s1412_s19   ;;  %s503_s11 = sand.u32 (!%p490_p2), 1, %s1404_s17  }
  0x5c   : > { %493 = sbr.rel (%p490_p2) target bundleno = 392 (0x188), region = 95  ;;  %s534_s28 = sand.u32 (!%p490_p2), 1, %s1396_s15  }
  0x5d   : > { %s1227_s26 = smul.u32 (!%p490_p2), 48, %s496_s0  ;;  %s1126_s29 = sshll.u32 (!%p490_p2), %s534_s28, 5 }
  0x5e   : > { %s1228_s5 = smul.u32 (!%p490_p2), 192, %s503_s11  ;;  %p540_p3 = scmp.lt.s32.totalorder (!%p490_p2), %s1424_s22, 1 }
  0x5f   : > { %s1695_s24 = scalar_lea.vmem (!%p490_p2), [#allocation3], %s1227_s26  ;;  %s1699_s15 = scalar_lea.vmem (!%p490_p2), [#allocation5], %s1126_s29 }
  0x60   : > { %s1697_s17 = scalar_lea.vmem (!%p490_p2), [#allocation4], %s1228_s5  ;;  %p1127_p4 = scmp.ne.s32.totalorder (!%p490_p2), %s1420_s21, 0 }
  0x63   : > { %s1685_s30 = scalar_select %p540_p3, %s1424_s22, 1 }
  0x64   : > { %551 = sbr.rel (%p1127_p4) target bundleno = 107 (0x6b), region = 107  ;;  %v1438_v56 = vmov (!%p1127_p4), 0.0  }
  0x65   : > { %s542_s9 = scalar_lea.vmem %s1792_s2, %s1685_s30  ;;  %s545_s27 = scalar_lea.vmem %s1793_s3, %s1685_s30  ;;  %552 = vst [vmem:[#allocation2] sm:$0xff] (!%p1127_p4), %v1438_v56  ;;  %553 = vst [vmem:[#allocation2 + $0x8] sm:$0xff] (!%p1127_p4), %v1438_v56 }
  0x66   : > { %554 = vst [vmem:[#allocation2 + $0x10] sm:$0xff] (!%p1127_p4), %v1438_v56  ;;  %555 = vst [vmem:[#allocation2 + $0x18] sm:$0xff] (!%p1127_p4), %v1438_v56 }
  0x6b PF: > { %v1318_v57 = vld [vmem:[%s1697_s17 + $0x40] sm:$0xff]   ;;  %v1321_v60 = vld [vmem:[%s1697_s17 + $0x48] sm:$0xff]   ;;  %v1324_v63 = vld [vmem:[%s1697_s17 + $0x50] sm:$0xff]   ;;  %p1158_p5 = scmp.ne.s32.totalorder %s1420_s21, 5 }
  0x6c   : > { %v1319_v58 = vld [vmem:[%s1697_s17] sm:$0xff]   ;;  %1167 = vmatprep.subr.bf16.mxu0 %v1318_v57  ;;  %v1322_v61 = vld [vmem:[%s1697_s17 + $0x8] sm:$0xff]   ;;  %v1325_v0 = vld [vmem:[%s1697_s17 + $0x10] sm:$0xff]  }
  0x6d   : > { %v1320_v59 = vld [vmem:[%s1697_s17 + $0x80] sm:$0xff]   ;;  %1168 = vmatpush3.bf16.msra.mxu0 %v1319_v58  ;;  %v1323_v62 = vld [vmem:[%s1697_s17 + $0x88] sm:$0xff]   ;;  %v1326_v1 = vld [vmem:[%s1697_s17 + $0x90] sm:$0xff]  }
  0x6e   : > { %1205 = vmatprep.subr.bf16.mxu1 %v1320_v59  ;;  %1169 = vmatprep.subr.bf16.mxu0 %v1321_v60  ;;  %v1327_v2 = vld [vmem:[%s1697_s17 + $0x58] sm:$0xff]   ;;  %v1330_v5 = vld [vmem:[%s1697_s17 + $0x60] sm:$0xff]   ;;  %v1333_v8 = vld [vmem:[%s1697_s17 + $0x68] sm:$0xff]  }
  0x6f   : > { %1206 = vmatpush3.bf16.msra.mxu1 %v1320_v59  ;;  %v1328_v3 = vld [vmem:[%s1697_s17 + $0x18] sm:$0xff]   ;;  %v1332_v6 = vld [vmem:[%s1697_s17 + $0xa0] sm:$0xff]   ;;  %v1335_v9 = vld [vmem:[%s1697_s17 + $0xa8] sm:$0xff]  }
  0x70   : > { %1207 = vmatprep.subr.bf16.mxu1 %v1323_v62  ;;  %v1329_v4 = vld [vmem:[%s1697_s17 + $0x98] sm:$0xff]   ;;  %v1331_v7 = vld [vmem:[%s1697_s17 + $0x20] sm:$0xff]   ;;  %v1334_v10 = vld [vmem:[%s1697_s17 + $0x28] sm:$0xff]  }
  0x71   : > { %1170 = vmatpush3.bf16.msra.mxu0 %v1322_v61  ;;  %v1336_v11 = vld [vmem:[%s1697_s17 + $0x70] sm:$0xff]   ;;  %v1339_v14 = vld [vmem:[%s1697_s17 + $0x78] sm:$0xff]   ;;  %v556_v29 = vld [vmem:[#allocation2] sm:$0xff] }
  0x72   : > { %1171 = vmatprep.subr.bf16.mxu0 %v1324_v63  ;;  %v1337_v12 = vld [vmem:[%s1697_s17 + $0x30] sm:$0xff]   ;;  %v1341_v15 = vld [vmem:[%s1697_s17 + $0xb8] sm:$0xff]   ;;  %v557_v34 = vld [vmem:[#allocation2 + $0x8] sm:$0xff] }
  0x73   : > { %1208 = vmatpush3.bf16.msra.mxu1 %v1323_v62  ;;  %v1338_v13 = vld [vmem:[%s1697_s17 + $0xb0] sm:$0xff]   ;;  %v1340_v18 = vld [vmem:[%s1697_s17 + $0x38] sm:$0xff]   ;;  %v1159_v52 = vld [vmem:[%s542_s9] ss:$0 sm:$0xff] (!%p1158_p5) }
  0x74   : > { %1209 = vmatprep.subr.bf16.mxu1 %v1326_v1  ;;  %v1344_v16 = vld [vmem:[%s1695_s24 + $0x4] ss:$12 sps:$4 sm:$0xff]   ;;  %v1345_v17 = vld [vmem:[%s1695_s24 + $0x8] ss:$12 sps:$4 sm:$0xff]   ;;  %v1342_v19 = vld [vmem:[%s1695_s24] ss:$12 sps:$4 sm:$0xff]  }
  0x75   : > { %1172 = vmatpush3.bf16.msra.mxu0 %v1325_v0  ;;  %824 = vmatprep.mubr.bf16.mxu0 %v1344_v16  ;;  %v1347_v20 = vld [vmem:[%s1695_s24 + $0x1c] ss:$12 sps:$4 sm:$0xff]   ;;  %v1346_v21 = vld [vmem:[%s1695_s24 + $0x20] ss:$12 sps:$4 sm:$0xff]   ;;  %v1349_v22 = vld [vmem:[%s1695_s24 + $0x18] ss:$12 sps:$4 sm:$0xff]  }
  0x76   : > { %1173 = vmatprep.subr.bf16.mxu0 %v1327_v2  ;;  %1221 = vmatprep.mubr.bf16.mxu1 %v1345_v17  ;;  %v558_v43 = vld [vmem:[#allocation2 + $0x10] sm:$0xff]  ;;  %v559_v47 = vld [vmem:[#allocation2 + $0x18] sm:$0xff]  ;;  %v1160_v53 = vld [vmem:[%s545_s27] ss:$0 sm:$0xff] (!%p1158_p5) }
  0x77   : > { %1210 = vmatpush3.bf16.msra.mxu1 %v1326_v1 }
  0x78   : > { %1211 = vmatprep.subr.bf16.mxu1 %v1329_v4 }
  0x79   : > { %1174 = vmatpush3.bf16.msra.mxu0 %v1328_v3 }
  0x7a   : > { %1175 = vmatprep.subr.bf16.mxu0 %v1330_v5 }
  0x7b   : > { %1212 = vmatpush3.bf16.msra.mxu1 %v1329_v4 }
  0x7c   : > { %1213 = vmatprep.subr.bf16.mxu1 %v1332_v6 }
  0x7d   : > { %1176 = vmatpush3.bf16.msra.mxu0 %v1331_v7 }
  0x7e   : > { %1177 = vmatprep.subr.bf16.mxu0 %v1333_v8 }
  0x7f   : > { %1214 = vmatpush3.bf16.msra.mxu1 %v1332_v6 }
  0x80   : > { %1215 = vmatprep.subr.bf16.mxu1 %v1335_v9 }
  0x81   : > { %1178 = vmatpush3.bf16.msra.mxu0 %v1334_v10 }
  0x82   : > { %1179 = vmatprep.subr.bf16.mxu0 %v1336_v11 }
  0x83   : > { %1216 = vmatpush3.bf16.msra.mxu1 %v1335_v9 }
  0x84   : > { %1217 = vmatprep.subr.bf16.mxu1 %v1338_v13 }
  0x85   : > { %1180 = vmatpush3.bf16.msra.mxu0 %v1337_v12 }
  0x86   : > { %1181 = vmatprep.subr.bf16.mxu0 %v1339_v14 }
  0x87   : > { %1218 = vmatpush3.bf16.msra.mxu1 %v1338_v13 }
  0x88   : > { %1219 = vmatprep.subr.bf16.mxu1 %v1341_v15 }
  0x89   : > { %1182 = vmatpush3.bf16.msra.mxu0 %v1340_v18 }
  0x8b   : > { %1220 = vmatpush3.bf16.msra.mxu1 %v1341_v15 }
  0x8c   : > { %825 = vmatmul.mubr.bf16.vlgmr.msra.gmra.mrb[0].mxu0 %v1342_v19 }
  0x8d   : > { %832 = vmatprep.mubr.bf16.mxu0 %v1347_v20 }
  0x8e   : > { %1222 = vmatmul.mubr.bf16.vlgmr.msra.gmra.mrb[0].mxu1 %v1346_v21 }
  0x94   : > { %833 = vmatmul.mubr.bf16.gmra.mrb[4].mxu0 %v1349_v22 }
 0x15f   : > { %v1183_v23 = vpop.f32.mrb[0].mxu0 }
 0x160   : > { %v1184_v24 = vpop.f32.mrb[1].mxu0 }
 0x161   : > { %v1185_v25 = vadd.f32 %v1184_v24, %v1183_v23  ;;  %v1186_v26 = vpop.f32.mrb[2].mxu0  ;;  %v1223_v27 = vpop.f32.mrb[0].mxu1 }
 0x162   : > { %v1187_v28 = vpop.f32.mrb[3].mxu0  ;;  %v875_v30 = vpop.f32.mrb[1].mxu1 }
 0x163   : > { %v1188_v31 = vadd.f32 %v1187_v28, %v1186_v26  ;;  %v876_v32 = vadd.f32 %v1185_v25, %v875_v30  ;;  %v1224_v33 = vpop.f32.mrb[2].mxu1 }
 0x164   : > { %v878_v35 = vpop.f32.mrb[3].mxu1 }
 0x165   : > { %v890_v36 = vadd.f32 %v876_v32, %v556_v29  ;;  %v879_v37 = vadd.f32 %v1188_v31, %v878_v35 }
 0x167   : > { %894 = vst [vmem:[#allocation2] sm:$0xff] %v890_v36  ;;  %v891_v38 = vadd.f32 %v879_v37, %v557_v34  ;;  %v1189_v39 = vpop.f32.mrb[4].mxu0 }
 0x168   : > { %v1190_v40 = vpop.f32.mrb[5].mxu0 }
 0x169   : > { %895 = vst [vmem:[#allocation2 + $0x8] sm:$0xff] %v891_v38  ;;  %v1191_v41 = vadd.f32 %v1190_v40, %v1189_v39  ;;  %v1192_v42 = vpop.f32.mrb[6].mxu0 }
 0x16a   : > { %v1193_v44 = vpop.f32.mrb[7].mxu0 }
 0x16b   : > { %v884_v45 = vadd.f32 %v1223_v27, %v1191_v41  ;;  %v1194_v46 = vadd.f32 %v1193_v44, %v1192_v42  ;;  %901 = sbr.rel (%p1158_p5) target bundleno = 384 (0x180), region = 111 }
 0x16d   : > { %v892_v48 = vadd.f32 %v884_v45, %v558_v43  ;;  %v887_v49 = vadd.f32 %v1224_v33, %v1194_v46 }
 0x16e   : > { %v902_v51 = vld [vmem:[#allocation2] sm:$0xff] (!%p1158_p5) }
 0x16f   : > { %896 = vst [vmem:[#allocation2 + $0x10] sm:$0xff] %v892_v48  ;;  %v893_v50 = vadd.f32 %v887_v49, %v559_v47  ;;  %v913_v54 = vmul.f32 (!%p1158_p5), %v1159_v52, %v902_v51 }
 0x170   : > { %v903_v55 = vld [vmem:[#allocation2 + $0x8] sm:$0xff] (!%p1158_p5) }
 0x171   : > { %897 = vst [vmem:[#allocation2 + $0x18] sm:$0xff] %v893_v50  ;;  %v914_v58 = vmul.f32 (!%p1158_p5), %v1159_v52, %v903_v55  ;;  %v924_v61 = vadd.f32 (!%p1158_p5), %v1160_v53, %v913_v54 }
 0x173   : > { %v925_v62 = vadd.f32 %v1160_v53, %v914_v58  ;;  %v928_v1 = vmax.f32 %v924_v61, 0.0 }
 0x175   : > { %v929_v2 = vmax.f32 %v925_v62, 0.0  ;;  %932 = vst [vmem:[%s1699_s15] sm:$0xff] %v928_v1 }
 0x176   : > { %v904_v56 = vld [vmem:[#allocation2 + $0x10] sm:$0xff] }
 0x177   : > { %v915_v59 = vmul.f32 %v1159_v52, %v904_v56  ;;  %933 = vst [vmem:[%s1699_s15 + $0x8] sm:$0xff] %v929_v2 }
 0x178   : > { %v905_v57 = vld [vmem:[#allocation2 + $0x18] sm:$0xff] }
 0x179   : > { %v916_v60 = vmul.f32 %v1159_v52, %v905_v57  ;;  %v926_v63 = vadd.f32 %v1160_v53, %v915_v59 }
 0x17b   : > { %v927_v0 = vadd.f32 %v1160_v53, %v916_v60  ;;  %v930_v3 = vmax.f32 %v926_v63, 0.0 }
 0x17d   : > { %v931_v4 = vmax.f32 %v927_v0, 0.0  ;;  %934 = vst [vmem:[%s1699_s15 + $0x10] sm:$0xff] %v930_v3 }
 0x17f   : > { %935 = vst [vmem:[%s1699_s15 + $0x18] sm:$0xff] %v931_v4 }
 0x180 PF: > { %942 = sbr.rel (!%p1558_p12) target bundleno = 392 (0x188), region = 115  ;;  %s1162_s21 = sshll.u32 (%p1558_p12), %s1424_s22, 3  ;;  %v981_v5 = vld [vmem:[%s1699_s15] sm:$0xff] (%p1558_p12)  ;;  %v983_v6 = vld [vmem:[%s1699_s15 + $0x8] sm:$0xff] (%p1558_p12) }
 0x181   : > { %s947_s26 = scalar_lea.vmem (%p1558_p12), %s1794_s4, %s1162_s21 }
 0x182   : > { %982 = vst [vmem:[%s947_s26] sm:$0xff] (%p1558_p12), %v981_v5  ;;  %984 = vst [vmem:[%s947_s26 + $0x10] sm:$0xff] (%p1558_p12), %v983_v6 }
 0x184   : > { %v985_v7 = vld [vmem:[%s1699_s15 + $0x10] sm:$0xff] (%p1558_p12) }
 0x185   : > { %986 = vst [vmem:[%s947_s26 + $0x20] sm:$0xff] (%p1558_p12), %v985_v7 }
 0x186   : > { %v987_v8 = vld [vmem:[%s1699_s15 + $0x18] sm:$0xff] (%p1558_p12) }
 0x187   : > { %988 = vst [vmem:[%s947_s26 + $0x30] sm:$0xff] %v987_v8 }
 0x188 PF: > { %s14_s25 = sadd.s32 1, %s1436_s25   ;;  %s1808_s22 = sld [smem:[#allocation6_spill]] }
 0x189   : > { %p11_p6 = scmp.ge.s32.totalorder %s14_s25, 14   ;;  %s1809_s14 = sld [smem:[#allocation7_spill]] }
 0x18a   : > { %s1810_s24 = sld [smem:[#allocation8_spill]]  ;;  %s1811_s15 = smov %s1400_s16 }
 0x18b   : > { %s1812_s16 = smov %s1556_s13  ;;  %s1813_s17 = smov %s1408_s18 }
 0x18c   : > { %s1814_s18 = smov %s1553_s12  ;;  %s1815_s19 = smov %s1416_s20 }
 0x18d   : > { %s1816_s20 = smov %s1539_s7  ;;  %s1817_s21 = smov %s1428_s23 }
 0x18e   :  { %13 = sbr.rel (!%p11_p6) target bundleno = 9 (0x9), region = 204 }
 0x18f   : > { %s1818_s23 = smov %s1809_s14 }

// kernel: resnet18_forward.36
= control target key start
LH: loop header
LB: loop body
LE: loop exit
PB: predicated region body
PF: predicated region fallthrough
CT: control target
= control target key end

     0   :  { %s1234_s15 = smov 0   ;;  %s1236_s16 = smov 0   ;;  %s1483_s0 = inlined_call_operand.vmem [shape: bf16[8,2304], index: 0, kind: input, shape index: {}]   ;;  %s1484_s1 = inlined_call_operand.vmem [shape: bf16[2304,512], index: 1, kind: input, shape index: {}]   ;;  %s1485_s2 = inlined_call_operand.vmem [shape: f32[1,512], index: 2, kind: input, shape index: {}]   ;;  %s1486_s3 = inlined_call_operand.vmem [shape: f32[1,512], index: 3, kind: input, shape index: {}]   ;;  %s1487_s4 = inlined_call_operand.vmem [shape: f32[8,512], index: 4, kind: output, shape index: {}]  }
   0x1   :  { %s1238_s17 = smov 0   ;;  %s1240_s18 = smov 0  }
   0x2   :  { %s1242_s19 = smov 0   ;;  %s1244_s20 = smov 0  }
   0x3   :  { %s1246_s21 = smov 0  }
   0x4 LB: > { %s26_s22 = sadd.s32 1, %s1196_s19  ;;  %s29_s23 = sadd.s32 1, %s1200_s20  ;;  %s1204_s21 = sphi %s1246_s21, %s14_s21   ;;  %s1200_s20 = sphi %s1244_s20, %s1493_s20   ;;  %s1196_s19 = sphi %s1242_s19, %s1492_s19   ;;  %s1192_s18 = sphi %s1240_s18, %s1491_s18   ;;  %s1188_s17 = sphi %s1238_s17, %s1490_s17   ;;  %s1184_s16 = sphi %s1236_s16, %s1489_s16   ;;  %s1180_s15 = sphi %s1234_s15, %s1488_s15  }
   0x5   : > { %p27_p0 = scmp.ge.s32.totalorder %s26_s22, 6  ;;  %p77_p1 = scmp.ne.s32.totalorder %s1184_s16, %s1180_s15 }
   0x6   : > { %p78_p2 = scmp.eq.s32.totalorder %s1204_s21, 0  ;;  %s70_s27 = sadd.s32 1, %s1184_s16 }
   0x7   : > { %s1495_s22 = smov (%p27_p0, %s26_s22), 0  ;;  %s1497_s23 = smov (!%p27_p0, %s29_s23), %s1200_s20 }
   0x8   : > { %p79_p3 = por %p78_p2, %p77_p1  ;;  %p31_p4 = scmp.ge.s32.totalorder %s1497_s23, 4 }
   0x9   : > { %s65_s24 = ssub.s32 %s1196_s19, %s1495_s22  ;;  %p971_p6 = scmp.ge.s32.totalorder %s1204_s21, 24 }
   0xa   : > { %s1499_s23 = smov (%p31_p4, %s1497_s23), 0 }
   0xb   : > { %s66_s25 = ssub.s32 %s1200_s20, %s1499_s23  ;;  %183 = sbr.rel (%p971_p6) target bundleno = 57 (0x39), region = 16 }
   0xc   : > { %s67_s26 = sor.u32 %s66_s25, %s65_s24 }
   0xd   : > { %p68_p5 = scmp.eq.s32.totalorder %s67_s26, 0 }
   0xf   : > { %s1285_s28 = scalar_select %p68_p5, %s1184_s16, %s70_s27  }
  0x12   : > { %199 = sbr.rel (!%p79_p3) target bundleno = 57 (0x39), region = 24  ;;  %s201_s29 = sand.u32 (%p79_p3), 1, %s1184_s16  }
  0x13   : > { %s1010_s30 = smul.u32 (%p79_p3), 192, %s1196_s19 }
  0x14   : > { %s1062_s5 = smul.u32 (%p79_p3), 192, %s201_s29 }
  0x15   : > { %s206_s6 = sadd.s32 (%p79_p3), %s1200_s20, %s1010_s30 }
  0x16   : > { %s973_s7 = sshll.u32 (%p79_p3), %s206_s6, 2  ;;  %s1299_s11 = scalar_lea.vmem (%p79_p3), [#allocation3], %s1062_s5 }
  0x17   : > { %s1294_s10 = scalar_lea.vmem (%p79_p3), %s1484_s1, %s973_s7 }
  0x18   : > { %v224_v0 = vld [vmem:[%s1294_s10] sm:$0xf] (%p79_p3)  ;;  %v226_v1 = vld [vmem:[%s1294_s10 + $0x10] sm:$0xf] (%p79_p3) }
  0x19   : > { %v228_v2 = vld [vmem:[%s1294_s10 + $0x20] sm:$0xf]  ;;  %225 = vst [vmem:[%s1299_s11] sm:$0xf] %v224_v0  ;;  %227 = vst [vmem:[%s1299_s11 + $0x4] sm:$0xf] %v226_v1 }
  0x1a   : > { %229 = vst [vmem:[%s1299_s11 + $0x8] sm:$0xf] %v228_v2  ;;  %v230_v3 = vld [vmem:[%s1294_s10 + $0x30] sm:$0xf]  ;;  %v232_v4 = vld [vmem:[%s1294_s10 + $0x40] sm:$0xf] }
  0x1b   : > { %v234_v5 = vld [vmem:[%s1294_s10 + $0x50] sm:$0xf]  ;;  %231 = vst [vmem:[%s1299_s11 + $0xc] sm:$0xf] %v230_v3  ;;  %233 = vst [vmem:[%s1299_s11 + $0x10] sm:$0xf] %v232_v4 }
  0x1c   : > { %235 = vst [vmem:[%s1299_s11 + $0x14] sm:$0xf] %v234_v5  ;;  %v236_v6 = vld [vmem:[%s1294_s10 + $0x60] sm:$0xf]  ;;  %v238_v7 = vld [vmem:[%s1294_s10 + $0x70] sm:$0xf] }
  0x1d   : > { %v240_v8 = vld [vmem:[%s1294_s10 + $0x80] sm:$0xf]  ;;  %237 = vst [vmem:[%s1299_s11 + $0x18] sm:$0xf] %v236_v6  ;;  %239 = vst [vmem:[%s1299_s11 + $0x1c] sm:$0xf] %v238_v7 }
  0x1e   : > { %241 = vst [vmem:[%s1299_s11 + $0x20] sm:$0xf] %v240_v8  ;;  %v242_v9 = vld [vmem:[%s1294_s10 + $0x90] sm:$0xf]  ;;  %v244_v10 = vld [vmem:[%s1294_s10 + $0xa0] sm:$0xf] }
  0x1f   : > { %v246_v11 = vld [vmem:[%s1294_s10 + $0xb0] sm:$0xf]  ;;  %243 = vst [vmem:[%s1299_s11 + $0x24] sm:$0xf] %v242_v9  ;;  %245 = vst [vmem:[%s1299_s11 + $0x28] sm:$0xf] %v244_v10 }
  0x20   : > { %247 = vst [vmem:[%s1299_s11 + $0x2c] sm:$0xf] %v246_v11  ;;  %v248_v12 = vld [vmem:[%s1294_s10 + $0xc0] sm:$0xf]  ;;  %v250_v13 = vld [vmem:[%s1294_s10 + $0xd0] sm:$0xf] }
  0x21   : > { %v252_v14 = vld [vmem:[%s1294_s10 + $0xe0] sm:$0xf]  ;;  %249 = vst [vmem:[%s1299_s11 + $0x30] sm:$0xf] %v248_v12  ;;  %251 = vst [vmem:[%s1299_s11 + $0x34] sm:$0xf] %v250_v13 }
  0x22   : > { %253 = vst [vmem:[%s1299_s11 + $0x38] sm:$0xf] %v252_v14  ;;  %v254_v15 = vld [vmem:[%s1294_s10 + $0xf0] sm:$0xf]  ;;  %v256_v16 = vld [vmem:[%s1294_s10 + $0x100] sm:$0xf] }
  0x23   : > { %v258_v17 = vld [vmem:[%s1294_s10 + $0x110] sm:$0xf]  ;;  %255 = vst [vmem:[%s1299_s11 + $0x3c] sm:$0xf] %v254_v15  ;;  %257 = vst [vmem:[%s1299_s11 + $0x40] sm:$0xf] %v256_v16 }
  0x24   : > { %259 = vst [vmem:[%s1299_s11 + $0x44] sm:$0xf] %v258_v17  ;;  %v260_v18 = vld [vmem:[%s1294_s10 + $0x120] sm:$0xf]  ;;  %v262_v19 = vld [vmem:[%s1294_s10 + $0x130] sm:$0xf] }
  0x25   : > { %v264_v20 = vld [vmem:[%s1294_s10 + $0x140] sm:$0xf]  ;;  %261 = vst [vmem:[%s1299_s11 + $0x48] sm:$0xf] %v260_v18  ;;  %263 = vst [vmem:[%s1299_s11 + $0x4c] sm:$0xf] %v262_v19 }
  0x26   : > { %265 = vst [vmem:[%s1299_s11 + $0x50] sm:$0xf] %v264_v20  ;;  %v266_v21 = vld [vmem:[%s1294_s10 + $0x150] sm:$0xf]  ;;  %v268_v22 = vld [vmem:[%s1294_s10 + $0x160] sm:$0xf] }
  0x27   : > { %v270_v23 = vld [vmem:[%s1294_s10 + $0x170] sm:$0xf]  ;;  %267 = vst [vmem:[%s1299_s11 + $0x54] sm:$0xf] %v266_v21  ;;  %269 = vst [vmem:[%s1299_s11 + $0x58] sm:$0xf] %v268_v22 }
  0x28   : > { %271 = vst [vmem:[%s1299_s11 + $0x5c] sm:$0xf] %v270_v23  ;;  %v272_v24 = vld [vmem:[%s1294_s10 + $0x180] sm:$0xf]  ;;  %v274_v25 = vld [vmem:[%s1294_s10 + $0x190] sm:$0xf] }
  0x29   : > { %v276_v26 = vld [vmem:[%s1294_s10 + $0x1a0] sm:$0xf]  ;;  %273 = vst [vmem:[%s1299_s11 + $0x60] sm:$0xf] %v272_v24  ;;  %275 = vst [vmem:[%s1299_s11 + $0x64] sm:$0xf] %v274_v25 }
  0x2a   : > { %277 = vst [vmem:[%s1299_s11 + $0x68] sm:$0xf] %v276_v26  ;;  %v278_v27 = vld [vmem:[%s1294_s10 + $0x1b0] sm:$0xf]  ;;  %v280_v28 = vld [vmem:[%s1294_s10 + $0x1c0] sm:$0xf] }
  0x2b   : > { %v282_v29 = vld [vmem:[%s1294_s10 + $0x1d0] sm:$0xf]  ;;  %279 = vst [vmem:[%s1299_s11 + $0x6c] sm:$0xf] %v278_v27  ;;  %281 = vst [vmem:[%s1299_s11 + $0x70] sm:$0xf] %v280_v28 }
  0x2c   : > { %283 = vst [vmem:[%s1299_s11 + $0x74] sm:$0xf] %v282_v29  ;;  %v284_v30 = vld [vmem:[%s1294_s10 + $0x1e0] sm:$0xf]  ;;  %v286_v31 = vld [vmem:[%s1294_s10 + $0x1f0] sm:$0xf] }
  0x2d   : > { %v288_v32 = vld [vmem:[%s1294_s10 + $0x200] sm:$0xf]  ;;  %285 = vst [vmem:[%s1299_s11 + $0x78] sm:$0xf] %v284_v30  ;;  %287 = vst [vmem:[%s1299_s11 + $0x7c] sm:$0xf] %v286_v31 }
  0x2e   : > { %289 = vst [vmem:[%s1299_s11 + $0x80] sm:$0xf] %v288_v32  ;;  %v290_v33 = vld [vmem:[%s1294_s10 + $0x210] sm:$0xf]  ;;  %v292_v34 = vld [vmem:[%s1294_s10 + $0x220] sm:$0xf] }
  0x2f   : > { %v294_v35 = vld [vmem:[%s1294_s10 + $0x230] sm:$0xf]  ;;  %291 = vst [vmem:[%s1299_s11 + $0x84] sm:$0xf] %v290_v33  ;;  %293 = vst [vmem:[%s1299_s11 + $0x88] sm:$0xf] %v292_v34 }
  0x30   : > { %295 = vst [vmem:[%s1299_s11 + $0x8c] sm:$0xf] %v294_v35  ;;  %v296_v36 = vld [vmem:[%s1294_s10 + $0x240] sm:$0xf]  ;;  %v298_v37 = vld [vmem:[%s1294_s10 + $0x250] sm:$0xf] }
  0x31   : > { %v300_v38 = vld [vmem:[%s1294_s10 + $0x260] sm:$0xf]  ;;  %297 = vst [vmem:[%s1299_s11 + $0x90] sm:$0xf] %v296_v36  ;;  %299 = vst [vmem:[%s1299_s11 + $0x94] sm:$0xf] %v298_v37 }
  0x32   : > { %301 = vst [vmem:[%s1299_s11 + $0x98] sm:$0xf] %v300_v38  ;;  %v302_v39 = vld [vmem:[%s1294_s10 + $0x270] sm:$0xf]  ;;  %v304_v40 = vld [vmem:[%s1294_s10 + $0x280] sm:$0xf] }
  0x33   : > { %v306_v41 = vld [vmem:[%s1294_s10 + $0x290] sm:$0xf]  ;;  %303 = vst [vmem:[%s1299_s11 + $0x9c] sm:$0xf] %v302_v39  ;;  %305 = vst [vmem:[%s1299_s11 + $0xa0] sm:$0xf] %v304_v40 }
  0x34   : > { %307 = vst [vmem:[%s1299_s11 + $0xa4] sm:$0xf] %v306_v41  ;;  %v308_v42 = vld [vmem:[%s1294_s10 + $0x2a0] sm:$0xf]  ;;  %v310_v43 = vld [vmem:[%s1294_s10 + $0x2b0] sm:$0xf] }
  0x35   : > { %v312_v44 = vld [vmem:[%s1294_s10 + $0x2c0] sm:$0xf]  ;;  %309 = vst [vmem:[%s1299_s11 + $0xa8] sm:$0xf] %v308_v42  ;;  %311 = vst [vmem:[%s1299_s11 + $0xac] sm:$0xf] %v310_v43 }
  0x36   : > { %313 = vst [vmem:[%s1299_s11 + $0xb0] sm:$0xf] %v312_v44  ;;  %v314_v45 = vld [vmem:[%s1294_s10 + $0x2d0] sm:$0xf]  ;;  %v316_v46 = vld [vmem:[%s1294_s10 + $0x2e0] sm:$0xf] }
  0x37   : > { %v318_v47 = vld [vmem:[%s1294_s10 + $0x2f0] sm:$0xf]  ;;  %315 = vst [vmem:[%s1299_s11 + $0xb4] sm:$0xf] %v314_v45  ;;  %317 = vst [vmem:[%s1299_s11 + $0xb8] sm:$0xf] %v316_v46 }
  0x38   : > { %319 = vst [vmem:[%s1299_s11 + $0xbc] sm:$0xf] %v318_v47 }
  0x39 PF: > { %p974_p7 = scmp.ge.s32.totalorder %s1204_s21, 1  ;;  %p449_p8 = scmp.lt.s32.totalorder %s1204_s21, 25 }
  0x3b   : > { %p450_p9 = pnand %p974_p7, %p449_p8 }
  0x3c   : > { %s456_s12 = sand.u32 (!%p450_p9), 1, %s1180_s15   ;;  %s499_s13 = smul.u32 (!%p450_p9), 3, %s1188_s17 }
  0x3d   : > { %453 = sbr.rel (%p450_p9) target bundleno = 345 (0x159), region = 73  ;;  %p510_p10 = scmp.lt.s32.totalorder (!%p450_p9), %s1192_s18, 3 }
  0x3e   : > { %s1063_s14 = smul.u32 (!%p450_p9), 192, %s456_s12  ;;  %p502_p11 = scmp.lt.s32.totalorder (!%p450_p9), %s499_s13, 17 }
  0x3f   : > { %p977_p12 = scmp.ne.s32.totalorder (!%p450_p9), %s1188_s17, 0 }
  0x40   : > { %s1421_s12 = scalar_lea.vmem (!%p450_p9), [#allocation3], %s1063_s14 }
  0x44   : > { %s1501_s13 = smov (!%p502_p11, %s499_s13), 17  ;;  %s1503_s18 = smov (!%p510_p10, %s1192_s18), 3 }
  0x45   : > { %s975_s24 = sshll.u32 %s1501_s13, 2  ;;  %s512_s15 = scalar_lea.vmem %s1485_s2, %s1503_s18  ;;  %v1206_v48 = vmov (!%p977_p12), 0.0  }
  0x46   : > { %s1405_s27 = scalar_lea.vmem %s1483_s0, %s975_s24  ;;  %s515_s7 = scalar_lea.vmem %s1486_s3, %s1503_s18  ;;  %529 = vst [vmem:[#allocation2] sm:$0xff] (!%p977_p12), %v1206_v48 }
  0x47   : > { %s976_s8 = sshll.u32 %s1503_s18, 3  ;;  %528 = sbr.rel (%p977_p12) target bundleno = 78 (0x4e), region = 81 }
  0x48   : > { %s1419_s11 = scalar_lea.vmem %s1487_s4, %s976_s8 }
  0x4e PF: > { %v1123_v49 = vld [vmem:[%s1421_s12 + $0x40] sm:$0xff]   ;;  %v1207_v50 = vmov 0.0   ;;  %vm1208_vm0 = vmmov 0   ;;  %v1126_v53 = vld [vmem:[%s1421_s12 + $0x48] sm:$0xff]   ;;  %v1129_v56 = vld [vmem:[%s1421_s12 + $0x50] sm:$0xff]   ;;  %p1005_p13 = scmp.ne.s32.totalorder %s1188_s17, 5 }
  0x4f   : > { %1042 = vmatprep.subr.bf16.mxu1 %v1207_v50  ;;  %v1124_v51 = vld [vmem:[%s1421_s12] sm:$0xff]   ;;  %1011 = vmatprep.subr.bf16.mxu0 %v1123_v49  ;;  %v1127_v54 = vld [vmem:[%s1421_s12 + $0x8] sm:$0xff]   ;;  %v1130_v57 = vld [vmem:[%s1421_s12 + $0x10] sm:$0xff]  }
  0x50   : > { %v1125_v52 = vld [vmem:[%s1421_s12 + $0x80] sm:$0xff]   ;;  %1058 = vmatprep.mubr.msk.bf16.mxu1 %vm1208_vm0, %v1207_v50  ;;  %1012 = vmatpush3.bf16.msra.mxu0 %v1124_v51  ;;  %v1128_v55 = vld [vmem:[%s1421_s12 + $0x88] sm:$0xff]   ;;  %v1131_v58 = vld [vmem:[%s1421_s12 + $0x90] sm:$0xff]  }
  0x51   : > { %1043 = vmatpush3.bf16.msra.mxu1 %v1125_v52  ;;  %1013 = vmatprep.subr.bf16.mxu0 %v1126_v53  ;;  %v1132_v59 = vld [vmem:[%s1421_s12 + $0x58] sm:$0xff]   ;;  %v1135_v62 = vld [vmem:[%s1421_s12 + $0x60] sm:$0xff]   ;;  %v1138_v1 = vld [vmem:[%s1421_s12 + $0x68] sm:$0xff]  }
  0x52   : > { %1044 = vmatprep.subr.bf16.mxu1 %v1207_v50  ;;  %v1133_v60 = vld [vmem:[%s1421_s12 + $0x18] sm:$0xff]   ;;  %v1136_v63 = vld [vmem:[%s1421_s12 + $0x20] sm:$0xff]   ;;  %v1139_v2 = vld [vmem:[%s1421_s12 + $0x28] sm:$0xff]  }
  0x53   : > { %v1134_v61 = vld [vmem:[%s1421_s12 + $0x98] sm:$0xff]   ;;  %v1137_v0 = vld [vmem:[%s1421_s12 + $0xa0] sm:$0xff]   ;;  %v1140_v3 = vld [vmem:[%s1421_s12 + $0xa8] sm:$0xff]  }
  0x54   : > { %1014 = vmatpush3.bf16.msra.mxu0 %v1127_v54  ;;  %v1141_v4 = vld [vmem:[%s1421_s12 + $0x70] sm:$0xff]   ;;  %v1144_v7 = vld [vmem:[%s1421_s12 + $0x78] sm:$0xff]   ;;  %v1149_v13 = vld [vmem:[%s1405_s27 + $0x8] ss:$0 sps:$4 sm:$0xff]  }
  0x55   : > { %1045 = vmatpush3.bf16.msra.mxu1 %v1128_v55  ;;  %1015 = vmatprep.subr.bf16.mxu0 %v1129_v56  ;;  %v1142_v5 = vld [vmem:[%s1421_s12 + $0x30] sm:$0xff]   ;;  %v531_v8 = vld [vmem:[%s1405_s27] sm:$0xff] }
  0x56   : > { %1046 = vmatprep.subr.bf16.mxu1 %v1207_v50  ;;  %v1143_v6 = vld [vmem:[%s1421_s12 + $0xb0] sm:$0xff]   ;;  %v979_v9 = vcombine.high %v531_v8, %v531_v8  ;;  %v1145_v10 = vld [vmem:[%s1421_s12 + $0x38] sm:$0xff]   ;;  %v978_v12 = vcombine.low %v531_v8, %v531_v8 }
  0x57   : > { %v1146_v11 = vld [vmem:[%s1421_s12 + $0xb8] sm:$0xff]  }
  0x58   : > { %1016 = vmatpush3.bf16.msra.mxu0 %v1130_v57  ;;  %768 = vmatprep.mubr.bf16.mxu0 %v979_v9  ;;  %v530_v20 = vld [vmem:[#allocation2] sm:$0xff] }
  0x59   : > { %1047 = vmatpush3.bf16.msra.mxu1 %v1131_v58  ;;  %1017 = vmatprep.subr.bf16.mxu0 %v1132_v59  ;;  %v1006_v27 = vld [vmem:[%s512_s15] ss:$0 sm:$0xff] (!%p1005_p13) }
  0x5a   : > { %1048 = vmatprep.subr.bf16.mxu1 %v1207_v50  ;;  %v1007_v28 = vld [vmem:[%s515_s7] ss:$0 sm:$0xff] (!%p1005_p13) }
  0x5c   : > { %1018 = vmatpush3.bf16.msra.mxu0 %v1133_v60 }
  0x5d   : > { %1049 = vmatpush3.bf16.msra.mxu1 %v1134_v61  ;;  %1019 = vmatprep.subr.bf16.mxu0 %v1135_v62 }
  0x5e   : > { %1050 = vmatprep.subr.bf16.mxu1 %v1207_v50 }
  0x60   : > { %1020 = vmatpush3.bf16.msra.mxu0 %v1136_v63 }
  0x61   : > { %1051 = vmatpush3.bf16.msra.mxu1 %v1137_v0  ;;  %1021 = vmatprep.subr.bf16.mxu0 %v1138_v1 }
  0x62   : > { %1052 = vmatprep.subr.bf16.mxu1 %v1207_v50 }
  0x64   : > { %1022 = vmatpush3.bf16.msra.mxu0 %v1139_v2 }
  0x65   : > { %1053 = vmatpush3.bf16.msra.mxu1 %v1140_v3  ;;  %1023 = vmatprep.subr.bf16.mxu0 %v1141_v4 }
  0x66   : > { %1054 = vmatprep.subr.bf16.mxu1 %v1207_v50 }
  0x68   : > { %1024 = vmatpush3.bf16.msra.mxu0 %v1142_v5 }
  0x69   : > { %1055 = vmatpush3.bf16.msra.mxu1 %v1143_v6  ;;  %1025 = vmatprep.subr.bf16.mxu0 %v1144_v7 }
  0x6a   : > { %1056 = vmatprep.subr.bf16.mxu1 %v1207_v50 }
  0x6c   : > { %1026 = vmatpush3.bf16.msra.mxu0 %v1145_v10 }
  0x6d   : > { %1057 = vmatpush3.bf16.msra.mxu1 %v1146_v11 }
  0x6f   : > { %769 = vmatmul.mubr.bf16.vlgmr.msra.gmra.mrb[0].mxu0 %v978_v12 }
  0x70   : > { %1059 = vmatmul.mubr.bf16.vlgmr.msra.gmra.mrb[0].mxu1 %v1149_v13 }
 0x142   : > { %v1027_v14 = vpop.f32.mrb[0].mxu0 }
 0x143   : > { %v810_v15 = vpop.f32.mrb[0].mxu1  ;;  %v1028_v16 = vpop.f32.mrb[1].mxu0 }
 0x144   : > { %v1029_v17 = vadd.f32 %v1028_v16, %v1027_v14  ;;  %v1060_v18 = vpop.f32.mrb[1].mxu1  ;;  %v1030_v19 = vpop.f32.mrb[2].mxu0  ;;  %821 = sbr.rel (%p1005_p13) target bundleno = 345 (0x159), region = 85 }
 0x145   : > { %v813_v21 = vpop.f32.mrb[2].mxu1  ;;  %v1031_v22 = vpop.f32.mrb[3].mxu0 }
 0x146   : > { %v811_v23 = vadd.f32 %v1029_v17, %v810_v15  ;;  %v1061_v24 = vpop.f32.mrb[3].mxu1 }
 0x148   : > { %v816_v25 = vadd.f32 %v811_v23, %v530_v20 }
 0x14a   : > { %817 = vst [vmem:[#allocation2] sm:$0xff] %v816_v25 }
 0x151   : > { %v822_v26 = vld [vmem:[#allocation2] sm:$0xff] }
 0x152   : > { %v830_v29 = vmul.f32 %v1006_v27, %v822_v26 }
 0x154   : > { %v838_v30 = vadd.f32 %v1007_v28, %v830_v29 }
 0x156   : > { %v839_v31 = vmax.f32 %v838_v30, 0.0 }
 0x158   : > { %840 = vst [vmem:[%s1419_s11] sm:$0xff] %v839_v31 }
 0x159 PF: > { %s14_s21 = sadd.s32 1, %s1204_s21   ;;  %s1488_s15 = smov %s1184_s16 }
 0x15a   : > { %p11_p0 = scmp.ge.s32.totalorder %s14_s21, 26   ;;  %s1489_s16 = smov %s1285_s28 }
 0x15b   : > { %s1490_s17 = smov %s1196_s19  ;;  %s1491_s18 = smov %s1200_s20 }
 0x15c   : > { %s1492_s19 = smov %s1495_s22  ;;  %s1493_s20 = smov %s1499_s23 }
 0x15d   :  { %13 = sbr.rel (!%p11_p0) target bundleno = 4 (0x4), region = 129 }

// kernel: resnet18_forward.37
= control target key start
LH: loop header
LB: loop body
LE: loop exit
PB: predicated region body
PF: predicated region fallthrough
CT: control target
= control target key end

     0   :  { %s971_s15 = smov 0   ;;  %s973_s16 = smov 0   ;;  %s1132_s0 = inlined_call_operand.vmem [shape: bf16[8,256], index: 0, kind: input, shape index: {}]   ;;  %s1133_s1 = inlined_call_operand.vmem [shape: bf16[256,512], index: 1, kind: input, shape index: {}]   ;;  %s1134_s2 = inlined_call_operand.vmem [shape: f32[1,512], index: 2, kind: input, shape index: {}]   ;;  %s1135_s3 = inlined_call_operand.vmem [shape: f32[1,512], index: 3, kind: input, shape index: {}]   ;;  %s1136_s4 = inlined_call_operand.vmem [shape: f32[8,512], index: 4, kind: output, shape index: {}]  }
   0x1   :  { %s975_s17 = smov 0   ;;  %s977_s18 = smov 0  }
   0x2   :  { %s979_s19 = smov 0  }
   0x3 LB: > { %s29_s20 = sadd.s32 1, %s940_s18  ;;  %p77_p1 = scmp.ne.s32.totalorder %s932_s16, %s928_s15  ;;  %s944_s19 = sphi %s979_s19, %s14_s19   ;;  %s940_s18 = sphi %s977_s18, %s1140_s18   ;;  %s936_s17 = sphi %s975_s17, %s1139_s17   ;;  %s932_s16 = sphi %s973_s16, %s1138_s16   ;;  %s928_s15 = sphi %s971_s15, %s1137_s15  }
   0x4   : > { %p31_p0 = scmp.ge.s32.totalorder %s29_s20, 4  ;;  %p78_p2 = scmp.eq.s32.totalorder %s944_s19, 0 }
   0x5   : > { %s70_s22 = sadd.s32 1, %s932_s16  ;;  %p798_p5 = scmp.ge.s32.totalorder %s944_s19, 4 }
   0x6   : > { %s1142_s20 = smov (%p31_p0, %s29_s20), 0  ;;  %p79_p3 = por %p78_p2, %p77_p1 }
   0x7   : > { %s66_s21 = ssub.s32 %s940_s18, %s1142_s20  ;;  %196 = sbr.rel (%p798_p5) target bundleno = 39 (0x27), region = 20 }
   0x8   : > { %p68_p4 = scmp.eq.s32.totalorder %s66_s21, 0 }
   0xa   : > { %s1006_s23 = scalar_select %p68_p4, %s932_s16, %s70_s22  }
   0xe   : > { %199 = sbr.rel (!%p79_p3) target bundleno = 39 (0x27), region = 24  ;;  %s201_s24 = sand.u32 (%p79_p3), 1, %s932_s16  }
   0xf   : > { %s800_s25 = sshll.u32 (%p79_p3), %s940_s18, 2  ;;  %s799_s26 = sshll.u32 (%p79_p3), %s201_s24, 7 }
  0x10   : > { %s1014_s29 = scalar_lea.vmem (%p79_p3), %s1133_s1, %s800_s25  ;;  %s1018_s30 = scalar_lea.vmem (%p79_p3), [#allocation3], %s799_s26 }
  0x11   : > { %v224_v0 = vld [vmem:[%s1014_s29] sm:$0xf] (%p79_p3)  ;;  %v226_v1 = vld [vmem:[%s1014_s29 + $0x10] sm:$0xf] (%p79_p3) }
  0x12   : > { %225 = vst [vmem:[%s1018_s30] sm:$0xf] (%p79_p3), %v224_v0  ;;  %227 = vst [vmem:[%s1018_s30 + $0x4] sm:$0xf] (%p79_p3), %v226_v1  ;;  %v228_v2 = vld [vmem:[%s1014_s29 + $0x20] sm:$0xf] (%p79_p3) }
  0x13   : > { %v230_v3 = vld [vmem:[%s1014_s29 + $0x30] sm:$0xf] (%p79_p3)  ;;  %v232_v4 = vld [vmem:[%s1014_s29 + $0x40] sm:$0xf] (%p79_p3)  ;;  %229 = vst [vmem:[%s1018_s30 + $0x8] sm:$0xf] (%p79_p3), %v228_v2 }
  0x14   : > { %231 = vst [vmem:[%s1018_s30 + $0xc] sm:$0xf] (%p79_p3), %v230_v3  ;;  %233 = vst [vmem:[%s1018_s30 + $0x10] sm:$0xf] (%p79_p3), %v232_v4  ;;  %v234_v5 = vld [vmem:[%s1014_s29 + $0x50] sm:$0xf] (%p79_p3) }
  0x15   : > { %v236_v6 = vld [vmem:[%s1014_s29 + $0x60] sm:$0xf]  ;;  %v238_v7 = vld [vmem:[%s1014_s29 + $0x70] sm:$0xf]  ;;  %235 = vst [vmem:[%s1018_s30 + $0x14] sm:$0xf] %v234_v5 }
  0x16   : > { %237 = vst [vmem:[%s1018_s30 + $0x18] sm:$0xf] %v236_v6  ;;  %239 = vst [vmem:[%s1018_s30 + $0x1c] sm:$0xf] %v238_v7  ;;  %v240_v8 = vld [vmem:[%s1014_s29 + $0x80] sm:$0xf] }
  0x17   : > { %v242_v9 = vld [vmem:[%s1014_s29 + $0x90] sm:$0xf]  ;;  %v244_v10 = vld [vmem:[%s1014_s29 + $0xa0] sm:$0xf]  ;;  %241 = vst [vmem:[%s1018_s30 + $0x20] sm:$0xf] %v240_v8 }
  0x18   : > { %243 = vst [vmem:[%s1018_s30 + $0x24] sm:$0xf] %v242_v9  ;;  %245 = vst [vmem:[%s1018_s30 + $0x28] sm:$0xf] %v244_v10  ;;  %v246_v11 = vld [vmem:[%s1014_s29 + $0xb0] sm:$0xf] }
  0x19   : > { %v248_v12 = vld [vmem:[%s1014_s29 + $0xc0] sm:$0xf]  ;;  %v250_v13 = vld [vmem:[%s1014_s29 + $0xd0] sm:$0xf]  ;;  %247 = vst [vmem:[%s1018_s30 + $0x2c] sm:$0xf] %v246_v11 }
  0x1a   : > { %249 = vst [vmem:[%s1018_s30 + $0x30] sm:$0xf] %v248_v12  ;;  %251 = vst [vmem:[%s1018_s30 + $0x34] sm:$0xf] %v250_v13  ;;  %v252_v14 = vld [vmem:[%s1014_s29 + $0xe0] sm:$0xf] }
  0x1b   : > { %v254_v15 = vld [vmem:[%s1014_s29 + $0xf0] sm:$0xf]  ;;  %v256_v16 = vld [vmem:[%s1014_s29 + $0x100] sm:$0xf]  ;;  %253 = vst [vmem:[%s1018_s30 + $0x38] sm:$0xf] %v252_v14 }
  0x1c   : > { %255 = vst [vmem:[%s1018_s30 + $0x3c] sm:$0xf] %v254_v15  ;;  %257 = vst [vmem:[%s1018_s30 + $0x40] sm:$0xf] %v256_v16  ;;  %v258_v17 = vld [vmem:[%s1014_s29 + $0x110] sm:$0xf] }
  0x1d   : > { %v260_v18 = vld [vmem:[%s1014_s29 + $0x120] sm:$0xf]  ;;  %v262_v19 = vld [vmem:[%s1014_s29 + $0x130] sm:$0xf]  ;;  %259 = vst [vmem:[%s1018_s30 + $0x44] sm:$0xf] %v258_v17 }
  0x1e   : > { %261 = vst [vmem:[%s1018_s30 + $0x48] sm:$0xf] %v260_v18  ;;  %263 = vst [vmem:[%s1018_s30 + $0x4c] sm:$0xf] %v262_v19  ;;  %v264_v20 = vld [vmem:[%s1014_s29 + $0x140] sm:$0xf] }
  0x1f   : > { %v266_v21 = vld [vmem:[%s1014_s29 + $0x150] sm:$0xf]  ;;  %v268_v22 = vld [vmem:[%s1014_s29 + $0x160] sm:$0xf]  ;;  %265 = vst [vmem:[%s1018_s30 + $0x50] sm:$0xf] %v264_v20 }
  0x20   : > { %267 = vst [vmem:[%s1018_s30 + $0x54] sm:$0xf] %v266_v21  ;;  %269 = vst [vmem:[%s1018_s30 + $0x58] sm:$0xf] %v268_v22  ;;  %v270_v23 = vld [vmem:[%s1014_s29 + $0x170] sm:$0xf] }
  0x21   : > { %v272_v24 = vld [vmem:[%s1014_s29 + $0x180] sm:$0xf]  ;;  %v274_v25 = vld [vmem:[%s1014_s29 + $0x190] sm:$0xf]  ;;  %271 = vst [vmem:[%s1018_s30 + $0x5c] sm:$0xf] %v270_v23 }
  0x22   : > { %273 = vst [vmem:[%s1018_s30 + $0x60] sm:$0xf] %v272_v24  ;;  %275 = vst [vmem:[%s1018_s30 + $0x64] sm:$0xf] %v274_v25  ;;  %v276_v26 = vld [vmem:[%s1014_s29 + $0x1a0] sm:$0xf] }
  0x23   : > { %v278_v27 = vld [vmem:[%s1014_s29 + $0x1b0] sm:$0xf]  ;;  %v280_v28 = vld [vmem:[%s1014_s29 + $0x1c0] sm:$0xf]  ;;  %277 = vst [vmem:[%s1018_s30 + $0x68] sm:$0xf] %v276_v26 }
  0x24   : > { %279 = vst [vmem:[%s1018_s30 + $0x6c] sm:$0xf] %v278_v27  ;;  %281 = vst [vmem:[%s1018_s30 + $0x70] sm:$0xf] %v280_v28  ;;  %v282_v29 = vld [vmem:[%s1014_s29 + $0x1d0] sm:$0xf] }
  0x25   : > { %v284_v30 = vld [vmem:[%s1014_s29 + $0x1e0] sm:$0xf]  ;;  %v286_v31 = vld [vmem:[%s1014_s29 + $0x1f0] sm:$0xf]  ;;  %283 = vst [vmem:[%s1018_s30 + $0x74] sm:$0xf] %v282_v29 }
  0x26   : > { %285 = vst [vmem:[%s1018_s30 + $0x78] sm:$0xf] %v284_v30  ;;  %287 = vst [vmem:[%s1018_s30 + $0x7c] sm:$0xf] %v286_v31 }
  0x27 PF: > { %p801_p6 = scmp.ge.s32.totalorder %s944_s19, 1  ;;  %p385_p7 = scmp.lt.s32.totalorder %s944_s19, 5 }
  0x29   : > { %p386_p8 = pnand %p801_p6, %p385_p7 }
  0x2a   : > { %s392_s5 = sand.u32 (!%p386_p8), 1, %s928_s15   ;;  %v467_v32 = vld [vmem:[%s1132_s0] sm:$0xff] (!%p386_p8)  ;;  %p446_p9 = scmp.lt.s32.totalorder (!%p386_p8), %s936_s17, 3 }
  0x2b   : > { %389 = sbr.rel (%p386_p8) target bundleno = 298 (0x12a), region = 73  ;;  %s802_s8 = sshll.u32 (!%p386_p8), %s392_s5, 7  ;;  %v805_v33 = vcombine.high (!%p386_p8), %v467_v32, %v467_v32  ;;  %v804_v50 = vcombine.low (!%p386_p8), %v467_v32, %v467_v32 }
  0x2c   : > { %s1088_s9 = scalar_lea.vmem (!%p386_p8), [#allocation3], %s802_s8 }
  0x2d   : > { %v888_v34 = vld [vmem:[%s1088_s9 + $0x40] sm:$0xff] (!%p386_p8)   ;;  %635 = vmatprep.mubr.bf16.mxu0 (!%p386_p8), %v805_v33  ;;  %v890_v36 = vld [vmem:[%s1088_s9 + $0x48] sm:$0xff] (!%p386_p8)   ;;  %v892_v38 = vld [vmem:[%s1088_s9 + $0x50] sm:$0xff] (!%p386_p8)  }
  0x2e   : > { %v889_v35 = vld [vmem:[%s1088_s9] sm:$0xff] (!%p386_p8)   ;;  %826 = vmatprep.subr.bf16.mxu0 (!%p386_p8), %v888_v34  ;;  %v891_v37 = vld [vmem:[%s1088_s9 + $0x8] sm:$0xff] (!%p386_p8)   ;;  %v893_v39 = vld [vmem:[%s1088_s9 + $0x10] sm:$0xff] (!%p386_p8)  }
  0x2f   : > { %827 = vmatpush3.bf16.msra.mxu0 (!%p386_p8), %v889_v35  ;;  %v894_v40 = vld [vmem:[%s1088_s9 + $0x58] sm:$0xff] (!%p386_p8)   ;;  %v896_v42 = vld [vmem:[%s1088_s9 + $0x60] sm:$0xff] (!%p386_p8)   ;;  %v898_v44 = vld [vmem:[%s1088_s9 + $0x68] sm:$0xff] (!%p386_p8)  }
  0x30   : > { %828 = vmatprep.subr.bf16.mxu0 (!%p386_p8), %v890_v36  ;;  %v895_v41 = vld [vmem:[%s1088_s9 + $0x18] sm:$0xff] (!%p386_p8)   ;;  %v897_v43 = vld [vmem:[%s1088_s9 + $0x20] sm:$0xff] (!%p386_p8)   ;;  %v899_v45 = vld [vmem:[%s1088_s9 + $0x28] sm:$0xff] (!%p386_p8)  }
  0x31   : > { %v900_v46 = vld [vmem:[%s1088_s9 + $0x70] sm:$0xff] (!%p386_p8)   ;;  %v902_v48 = vld [vmem:[%s1088_s9 + $0x78] sm:$0xff] (!%p386_p8)  }
  0x32   : > { %v901_v47 = vld [vmem:[%s1088_s9 + $0x30] sm:$0xff]   ;;  %v903_v49 = vld [vmem:[%s1088_s9 + $0x38] sm:$0xff]   ;;  %s1144_s17 = smov (!%p446_p9, %s936_s17), 3 }
  0x33   : > { %829 = vmatpush3.bf16.msra.mxu0 %v891_v37  ;;  %s448_s12 = scalar_lea.vmem %s1134_s2, %s1144_s17  ;;  %s451_s15 = scalar_lea.vmem %s1135_s3, %s1144_s17 }
  0x34   : > { %830 = vmatprep.subr.bf16.mxu0 %v892_v38  ;;  %v822_v53 = vld [vmem:[%s448_s12] ss:$0 sm:$0xff]  ;;  %s803_s21 = sshll.u32 %s1144_s17, 3 }
  0x35   : > { %v823_v56 = vld [vmem:[%s451_s15] ss:$0 sm:$0xff]  ;;  %s459_s25 = scalar_lea.vmem %s1136_s4, %s803_s21 }
  0x37   : > { %831 = vmatpush3.bf16.msra.mxu0 %v893_v39 }
  0x38   : > { %832 = vmatprep.subr.bf16.mxu0 %v894_v40 }
  0x3b   : > { %833 = vmatpush3.bf16.msra.mxu0 %v895_v41 }
  0x3c   : > { %834 = vmatprep.subr.bf16.mxu0 %v896_v42 }
  0x3f   : > { %835 = vmatpush3.bf16.msra.mxu0 %v897_v43 }
  0x40   : > { %836 = vmatprep.subr.bf16.mxu0 %v898_v44 }
  0x43   : > { %837 = vmatpush3.bf16.msra.mxu0 %v899_v45 }
  0x44   : > { %838 = vmatprep.subr.bf16.mxu0 %v900_v46 }
  0x47   : > { %839 = vmatpush3.bf16.msra.mxu0 %v901_v47 }
  0x48   : > { %840 = vmatprep.subr.bf16.mxu0 %v902_v48 }
  0x4b   : > { %841 = vmatpush3.bf16.msra.mxu0 %v903_v49 }
  0x4e   : > { %636 = vmatmul.mubr.bf16.vlgmr.msra.gmra.mrb[0].mxu0 %v804_v50 }
 0x121   : > { %v842_v51 = vpop.f32.mrb[0].mxu0 }
 0x122   : > { %v843_v52 = vpop.f32.mrb[1].mxu0 }
 0x123   : > { %v844_v54 = vadd.f32 %v843_v52, %v842_v51  ;;  %v845_v55 = vpop.f32.mrb[2].mxu0 }
 0x124   : > { %v846_v57 = vpop.f32.mrb[3].mxu0 }
 0x125   : > { %v656_v58 = vmul.f32 %v844_v54, %v822_v53 }
 0x127   : > { %v664_v59 = vadd.f32 %v823_v56, %v656_v58 }
 0x129   : > { %665 = vst [vmem:[%s459_s25] sm:$0xff] %v664_v59 }
 0x12a PF: > { %s14_s19 = sadd.s32 1, %s944_s19   ;;  %s1137_s15 = smov %s932_s16 }
 0x12b   : > { %p11_p10 = scmp.ge.s32.totalorder %s14_s19, 6   ;;  %s1138_s16 = smov %s1006_s23 }
 0x12c   : > { %s1139_s17 = smov %s940_s18  ;;  %s1140_s18 = smov %s1142_s20 }
 0x12d   :  { %13 = sbr.rel (!%p11_p10) target bundleno = 3 (0x3), region = 129 }

// kernel: resnet18_forward.38
= control target key start
LH: loop header
LB: loop body
LE: loop exit
PB: predicated region body
PF: predicated region fallthrough
CT: control target
= control target key end

     0   :  { %s1753_s0 = inlined_call_operand.vmem [shape: bf16[8,4608], index: 0, kind: input, shape index: {}]   ;;  %s1754_s1 = inlined_call_operand.vmem [shape: bf16[4608,512], index: 1, kind: input, shape index: {}]   ;;  %s1755_s2 = inlined_call_operand.vmem [shape: f32[1,512], index: 2, kind: input, shape index: {}]   ;;  %s1756_s3 = inlined_call_operand.vmem [shape: f32[1,512], index: 3, kind: input, shape index: {}]   ;;  %s1757_s4 = inlined_call_operand.vmem [shape: f32[8,512], index: 4, kind: input, shape index: {}]   ;;  %s1758_s5 = inlined_call_operand.vmem [shape: f32[8,512], index: 5, kind: output, shape index: {}]  }
   0x1   :  { %1759 = sst [smem:[#allocation4_spill]] %s1754_s1 }
   0x2   :  { %s1458_s18 = smov 0   ;;  %s1460_s19 = smov 0  }
   0x3   :  { %s1462_s20 = smov 0   ;;  %s1464_s21 = smov 0  }
   0x4   :  { %s1466_s22 = smov 0   ;;  %s1468_s23 = smov 0  }
   0x5   :  { %s1470_s24 = smov 0  }
   0x6 LB: > { %s27_s25 = sadd.s32 1, %s1417_s22  ;;  %s30_s26 = sadd.s32 1, %s1421_s23  ;;  %s1425_s24 = sphi %s1470_s24, %s15_s24   ;;  %s1421_s23 = sphi %s1468_s23, %s1766_s23   ;;  %s1417_s22 = sphi %s1466_s22, %s1765_s22   ;;  %s1413_s21 = sphi %s1464_s21, %s1764_s21   ;;  %s1409_s20 = sphi %s1462_s20, %s1763_s20   ;;  %s1405_s19 = sphi %s1460_s19, %s1762_s19   ;;  %s1401_s18 = sphi %s1458_s18, %s1761_s18  }
   0x7   : > { %p28_p0 = scmp.ge.s32.totalorder %s27_s25, 9  ;;  %p78_p1 = scmp.ne.s32.totalorder %s1405_s19, %s1401_s18 }
   0x8   : > { %p79_p2 = scmp.eq.s32.totalorder %s1425_s24, 0  ;;  %s71_s30 = sadd.s32 1, %s1405_s19 }
   0x9   : > { %s1768_s25 = smov (%p28_p0, %s27_s25), 0  ;;  %s1770_s26 = smov (!%p28_p0, %s30_s26), %s1421_s23 }
   0xa   : > { %p80_p3 = por %p79_p2, %p78_p1  ;;  %p32_p4 = scmp.ge.s32.totalorder %s1770_s26, 4 }
   0xb   : > { %s66_s27 = ssub.s32 %s1417_s22, %s1768_s25  ;;  %p1180_p6 = scmp.ge.s32.totalorder %s1425_s24, 36 }
   0xc   : > { %s1772_s26 = smov (%p32_p4, %s1770_s26), 0 }
   0xd   : > { %s67_s28 = ssub.s32 %s1421_s23, %s1772_s26  ;;  %212 = sbr.rel (%p1180_p6) target bundleno = 73 (0x49), region = 16 }
   0xe   : > { %s68_s29 = sor.u32 %s67_s28, %s66_s27 }
   0xf   : > { %p69_p5 = scmp.eq.s32.totalorder %s68_s29, 0 }
  0x11   : > { %s1509_s6 = scalar_select %p69_p5, %s1405_s19, %s71_s30  }
  0x14   : > { %228 = sbr.rel (!%p80_p3) target bundleno = 73 (0x49), region = 24  ;;  %s230_s7 = sand.u32 (%p80_p3), 1, %s1405_s19  }
  0x15   : > { %s1233_s8 = sshll.u32 (%p80_p3), %s1417_s22, 8  ;;  %s1181_s9 = sshll.u32 (%p80_p3), %s230_s7, 8 }
  0x16   : > { %s235_s10 = sadd.s32 (%p80_p3), %s1421_s23, %s1233_s8  ;;  %s1760_s1 = sld [smem:[#allocation4_spill]] (%p80_p3) }
  0x17   : > { %s1184_s11 = sshll.u32 (%p80_p3), %s235_s10, 2  ;;  %s1523_s15 = scalar_lea.vmem (%p80_p3), [#allocation3], %s1181_s9 }
  0x1c   : > { %s1518_s14 = scalar_lea.vmem %s1760_s1, %s1184_s11 }
  0x1d   : > { %v253_v0 = vld [vmem:[%s1518_s14] sm:$0xf]  ;;  %v255_v1 = vld [vmem:[%s1518_s14 + $0x10] sm:$0xf] }
  0x1e   : > { %v257_v2 = vld [vmem:[%s1518_s14 + $0x20] sm:$0xf]  ;;  %254 = vst [vmem:[%s1523_s15] sm:$0xf] %v253_v0  ;;  %256 = vst [vmem:[%s1523_s15 + $0x4] sm:$0xf] %v255_v1 }
  0x1f   : > { %258 = vst [vmem:[%s1523_s15 + $0x8] sm:$0xf] %v257_v2  ;;  %v259_v3 = vld [vmem:[%s1518_s14 + $0x30] sm:$0xf]  ;;  %v261_v4 = vld [vmem:[%s1518_s14 + $0x40] sm:$0xf] }
  0x20   : > { %v263_v5 = vld [vmem:[%s1518_s14 + $0x50] sm:$0xf]  ;;  %260 = vst [vmem:[%s1523_s15 + $0xc] sm:$0xf] %v259_v3  ;;  %262 = vst [vmem:[%s1523_s15 + $0x10] sm:$0xf] %v261_v4 }
  0x21   : > { %264 = vst [vmem:[%s1523_s15 + $0x14] sm:$0xf] %v263_v5  ;;  %v265_v6 = vld [vmem:[%s1518_s14 + $0x60] sm:$0xf]  ;;  %v267_v7 = vld [vmem:[%s1518_s14 + $0x70] sm:$0xf] }
  0x22   : > { %v269_v8 = vld [vmem:[%s1518_s14 + $0x80] sm:$0xf]  ;;  %266 = vst [vmem:[%s1523_s15 + $0x18] sm:$0xf] %v265_v6  ;;  %268 = vst [vmem:[%s1523_s15 + $0x1c] sm:$0xf] %v267_v7 }
  0x23   : > { %270 = vst [vmem:[%s1523_s15 + $0x20] sm:$0xf] %v269_v8  ;;  %v271_v9 = vld [vmem:[%s1518_s14 + $0x90] sm:$0xf]  ;;  %v273_v10 = vld [vmem:[%s1518_s14 + $0xa0] sm:$0xf] }
  0x24   : > { %v275_v11 = vld [vmem:[%s1518_s14 + $0xb0] sm:$0xf]  ;;  %272 = vst [vmem:[%s1523_s15 + $0x24] sm:$0xf] %v271_v9  ;;  %274 = vst [vmem:[%s1523_s15 + $0x28] sm:$0xf] %v273_v10 }
  0x25   : > { %276 = vst [vmem:[%s1523_s15 + $0x2c] sm:$0xf] %v275_v11  ;;  %v277_v12 = vld [vmem:[%s1518_s14 + $0xc0] sm:$0xf]  ;;  %v279_v13 = vld [vmem:[%s1518_s14 + $0xd0] sm:$0xf] }
  0x26   : > { %v281_v14 = vld [vmem:[%s1518_s14 + $0xe0] sm:$0xf]  ;;  %278 = vst [vmem:[%s1523_s15 + $0x30] sm:$0xf] %v277_v12  ;;  %280 = vst [vmem:[%s1523_s15 + $0x34] sm:$0xf] %v279_v13 }
  0x27   : > { %282 = vst [vmem:[%s1523_s15 + $0x38] sm:$0xf] %v281_v14  ;;  %v283_v15 = vld [vmem:[%s1518_s14 + $0xf0] sm:$0xf]  ;;  %v285_v16 = vld [vmem:[%s1518_s14 + $0x100] sm:$0xf] }
  0x28   : > { %v287_v17 = vld [vmem:[%s1518_s14 + $0x110] sm:$0xf]  ;;  %284 = vst [vmem:[%s1523_s15 + $0x3c] sm:$0xf] %v283_v15  ;;  %286 = vst [vmem:[%s1523_s15 + $0x40] sm:$0xf] %v285_v16 }
  0x29   : > { %288 = vst [vmem:[%s1523_s15 + $0x44] sm:$0xf] %v287_v17  ;;  %v289_v18 = vld [vmem:[%s1518_s14 + $0x120] sm:$0xf]  ;;  %v291_v19 = vld [vmem:[%s1518_s14 + $0x130] sm:$0xf] }
  0x2a   : > { %v293_v20 = vld [vmem:[%s1518_s14 + $0x140] sm:$0xf]  ;;  %290 = vst [vmem:[%s1523_s15 + $0x48] sm:$0xf] %v289_v18  ;;  %292 = vst [vmem:[%s1523_s15 + $0x4c] sm:$0xf] %v291_v19 }
  0x2b   : > { %294 = vst [vmem:[%s1523_s15 + $0x50] sm:$0xf] %v293_v20  ;;  %v295_v21 = vld [vmem:[%s1518_s14 + $0x150] sm:$0xf]  ;;  %v297_v22 = vld [vmem:[%s1518_s14 + $0x160] sm:$0xf] }
  0x2c   : > { %v299_v23 = vld [vmem:[%s1518_s14 + $0x170] sm:$0xf]  ;;  %296 = vst [vmem:[%s1523_s15 + $0x54] sm:$0xf] %v295_v21  ;;  %298 = vst [vmem:[%s1523_s15 + $0x58] sm:$0xf] %v297_v22 }
  0x2d   : > { %300 = vst [vmem:[%s1523_s15 + $0x5c] sm:$0xf] %v299_v23  ;;  %v301_v24 = vld [vmem:[%s1518_s14 + $0x180] sm:$0xf]  ;;  %v303_v25 = vld [vmem:[%s1518_s14 + $0x190] sm:$0xf] }
  0x2e   : > { %v305_v26 = vld [vmem:[%s1518_s14 + $0x1a0] sm:$0xf]  ;;  %302 = vst [vmem:[%s1523_s15 + $0x60] sm:$0xf] %v301_v24  ;;  %304 = vst [vmem:[%s1523_s15 + $0x64] sm:$0xf] %v303_v25 }
  0x2f   : > { %306 = vst [vmem:[%s1523_s15 + $0x68] sm:$0xf] %v305_v26  ;;  %v307_v27 = vld [vmem:[%s1518_s14 + $0x1b0] sm:$0xf]  ;;  %v309_v28 = vld [vmem:[%s1518_s14 + $0x1c0] sm:$0xf] }
  0x30   : > { %v311_v29 = vld [vmem:[%s1518_s14 + $0x1d0] sm:$0xf]  ;;  %308 = vst [vmem:[%s1523_s15 + $0x6c] sm:$0xf] %v307_v27  ;;  %310 = vst [vmem:[%s1523_s15 + $0x70] sm:$0xf] %v309_v28 }
  0x31   : > { %312 = vst [vmem:[%s1523_s15 + $0x74] sm:$0xf] %v311_v29  ;;  %v313_v30 = vld [vmem:[%s1518_s14 + $0x1e0] sm:$0xf]  ;;  %v315_v31 = vld [vmem:[%s1518_s14 + $0x1f0] sm:$0xf] }
  0x32   : > { %v317_v32 = vld [vmem:[%s1518_s14 + $0x200] sm:$0xf]  ;;  %314 = vst [vmem:[%s1523_s15 + $0x78] sm:$0xf] %v313_v30  ;;  %316 = vst [vmem:[%s1523_s15 + $0x7c] sm:$0xf] %v315_v31 }
  0x33   : > { %318 = vst [vmem:[%s1523_s15 + $0x80] sm:$0xf] %v317_v32  ;;  %v319_v33 = vld [vmem:[%s1518_s14 + $0x210] sm:$0xf]  ;;  %v321_v34 = vld [vmem:[%s1518_s14 + $0x220] sm:$0xf] }
  0x34   : > { %v323_v35 = vld [vmem:[%s1518_s14 + $0x230] sm:$0xf]  ;;  %320 = vst [vmem:[%s1523_s15 + $0x84] sm:$0xf] %v319_v33  ;;  %322 = vst [vmem:[%s1523_s15 + $0x88] sm:$0xf] %v321_v34 }
  0x35   : > { %324 = vst [vmem:[%s1523_s15 + $0x8c] sm:$0xf] %v323_v35  ;;  %v325_v36 = vld [vmem:[%s1518_s14 + $0x240] sm:$0xf]  ;;  %v327_v37 = vld [vmem:[%s1518_s14 + $0x250] sm:$0xf] }
  0x36   : > { %v329_v38 = vld [vmem:[%s1518_s14 + $0x260] sm:$0xf]  ;;  %326 = vst [vmem:[%s1523_s15 + $0x90] sm:$0xf] %v325_v36  ;;  %328 = vst [vmem:[%s1523_s15 + $0x94] sm:$0xf] %v327_v37 }
  0x37   : > { %330 = vst [vmem:[%s1523_s15 + $0x98] sm:$0xf] %v329_v38  ;;  %v331_v39 = vld [vmem:[%s1518_s14 + $0x270] sm:$0xf]  ;;  %v333_v40 = vld [vmem:[%s1518_s14 + $0x280] sm:$0xf] }
  0x38   : > { %v335_v41 = vld [vmem:[%s1518_s14 + $0x290] sm:$0xf]  ;;  %332 = vst [vmem:[%s1523_s15 + $0x9c] sm:$0xf] %v331_v39  ;;  %334 = vst [vmem:[%s1523_s15 + $0xa0] sm:$0xf] %v333_v40 }
  0x39   : > { %336 = vst [vmem:[%s1523_s15 + $0xa4] sm:$0xf] %v335_v41  ;;  %v337_v42 = vld [vmem:[%s1518_s14 + $0x2a0] sm:$0xf]  ;;  %v339_v43 = vld [vmem:[%s1518_s14 + $0x2b0] sm:$0xf] }
  0x3a   : > { %v341_v44 = vld [vmem:[%s1518_s14 + $0x2c0] sm:$0xf]  ;;  %338 = vst [vmem:[%s1523_s15 + $0xa8] sm:$0xf] %v337_v42  ;;  %340 = vst [vmem:[%s1523_s15 + $0xac] sm:$0xf] %v339_v43 }
  0x3b   : > { %342 = vst [vmem:[%s1523_s15 + $0xb0] sm:$0xf] %v341_v44  ;;  %v343_v45 = vld [vmem:[%s1518_s14 + $0x2d0] sm:$0xf]  ;;  %v345_v46 = vld [vmem:[%s1518_s14 + $0x2e0] sm:$0xf] }
  0x3c   : > { %v347_v47 = vld [vmem:[%s1518_s14 + $0x2f0] sm:$0xf]  ;;  %344 = vst [vmem:[%s1523_s15 + $0xb4] sm:$0xf] %v343_v45  ;;  %346 = vst [vmem:[%s1523_s15 + $0xb8] sm:$0xf] %v345_v46 }
  0x3d   : > { %348 = vst [vmem:[%s1523_s15 + $0xbc] sm:$0xf] %v347_v47  ;;  %v349_v48 = vld [vmem:[%s1518_s14 + $0x300] sm:$0xf]  ;;  %v351_v49 = vld [vmem:[%s1518_s14 + $0x310] sm:$0xf] }
  0x3e   : > { %v353_v50 = vld [vmem:[%s1518_s14 + $0x320] sm:$0xf]  ;;  %350 = vst [vmem:[%s1523_s15 + $0xc0] sm:$0xf] %v349_v48  ;;  %352 = vst [vmem:[%s1523_s15 + $0xc4] sm:$0xf] %v351_v49 }
  0x3f   : > { %354 = vst [vmem:[%s1523_s15 + $0xc8] sm:$0xf] %v353_v50  ;;  %v355_v51 = vld [vmem:[%s1518_s14 + $0x330] sm:$0xf]  ;;  %v357_v52 = vld [vmem:[%s1518_s14 + $0x340] sm:$0xf] }
  0x40   : > { %v359_v53 = vld [vmem:[%s1518_s14 + $0x350] sm:$0xf]  ;;  %356 = vst [vmem:[%s1523_s15 + $0xcc] sm:$0xf] %v355_v51  ;;  %358 = vst [vmem:[%s1523_s15 + $0xd0] sm:$0xf] %v357_v52 }
  0x41   : > { %360 = vst [vmem:[%s1523_s15 + $0xd4] sm:$0xf] %v359_v53  ;;  %v361_v54 = vld [vmem:[%s1518_s14 + $0x360] sm:$0xf]  ;;  %v363_v55 = vld [vmem:[%s1518_s14 + $0x370] sm:$0xf] }
  0x42   : > { %v365_v56 = vld [vmem:[%s1518_s14 + $0x380] sm:$0xf]  ;;  %362 = vst [vmem:[%s1523_s15 + $0xd8] sm:$0xf] %v361_v54  ;;  %364 = vst [vmem:[%s1523_s15 + $0xdc] sm:$0xf] %v363_v55 }
  0x43   : > { %366 = vst [vmem:[%s1523_s15 + $0xe0] sm:$0xf] %v365_v56  ;;  %v367_v57 = vld [vmem:[%s1518_s14 + $0x390] sm:$0xf]  ;;  %v369_v58 = vld [vmem:[%s1518_s14 + $0x3a0] sm:$0xf] }
  0x44   : > { %v371_v59 = vld [vmem:[%s1518_s14 + $0x3b0] sm:$0xf]  ;;  %368 = vst [vmem:[%s1523_s15 + $0xe4] sm:$0xf] %v367_v57  ;;  %370 = vst [vmem:[%s1523_s15 + $0xe8] sm:$0xf] %v369_v58 }
  0x45   : > { %372 = vst [vmem:[%s1523_s15 + $0xec] sm:$0xf] %v371_v59  ;;  %v373_v60 = vld [vmem:[%s1518_s14 + $0x3c0] sm:$0xf]  ;;  %v375_v61 = vld [vmem:[%s1518_s14 + $0x3d0] sm:$0xf] }
  0x46   : > { %v377_v62 = vld [vmem:[%s1518_s14 + $0x3e0] sm:$0xf]  ;;  %374 = vst [vmem:[%s1523_s15 + $0xf0] sm:$0xf] %v373_v60  ;;  %376 = vst [vmem:[%s1523_s15 + $0xf4] sm:$0xf] %v375_v61 }
  0x47   : > { %378 = vst [vmem:[%s1523_s15 + $0xf8] sm:$0xf] %v377_v62  ;;  %v379_v63 = vld [vmem:[%s1518_s14 + $0x3f0] sm:$0xf] }
  0x48   : > { %380 = vst [vmem:[%s1523_s15 + $0xfc] sm:$0xf] %v379_v63 }
  0x49 PF: > { %p1185_p7 = scmp.ge.s32.totalorder %s1425_s24, 1  ;;  %p553_p8 = scmp.lt.s32.totalorder %s1425_s24, 37 }
  0x4b   : > { %p554_p9 = pnand %p1185_p7, %p553_p8 }
  0x4c   : > { %s560_s16 = sand.u32 (!%p554_p9), 1, %s1401_s18   ;;  %s1187_s17 = sshll.u32 (!%p554_p9), %s1409_s20, 2 }
  0x4d   : > { %557 = sbr.rel (%p554_p9) target bundleno = 367 (0x16f), region = 77  ;;  %s1186_s27 = sshll.u32 (!%p554_p9), %s560_s16, 8 }
  0x4e   : > { %p616_p10 = scmp.lt.s32.totalorder (!%p554_p9), %s1187_s17, 35  ;;  %p624_p11 = scmp.lt.s32.totalorder (!%p554_p9), %s1413_s21, 3 }
  0x4f   : > { %p1191_p12 = scmp.ne.s32.totalorder (!%p554_p9), %s1409_s20, 0 }
  0x54   : > { %s1774_s17 = smov (!%p616_p10, %s1187_s17), 35  ;;  %s1776_s21 = smov (!%p624_p11, %s1413_s21), 3 }
  0x55   : > { %s1188_s28 = sshll.u32 %s1774_s17, 2  ;;  %s626_s18 = scalar_lea.vmem %s1755_s2, %s1776_s21  ;;  %v1427_v0 = vmov (!%p1191_p12), 0.0  }
  0x56   : > { %s1661_s7 = scalar_lea.vmem %s1753_s0, %s1188_s28  ;;  %s629_s12 = scalar_lea.vmem %s1756_s3, %s1776_s21  ;;  %651 = vst [vmem:[#allocation2] sm:$0xff] (!%p1191_p12), %v1427_v0 }
  0x57   : > { %s1189_s13 = sshll.u32 %s1776_s21, 3  ;;  %s1682_s28 = scalar_lea.vmem [#allocation3], %s1186_s27 }
  0x58   : > { %s1675_s16 = scalar_lea.vmem %s1757_s4, %s1189_s13  ;;  %s1680_s29 = scalar_lea.vmem %s1758_s5, %s1189_s13 }
  0x59   : > { %650 = sbr.rel (%p1191_p12) target bundleno = 96 (0x60), region = 85 }
  0x60 PF: > { %v1335_v1 = vld [vmem:[%s1682_s28 + $0x40] sm:$0xff]   ;;  %v1339_v5 = vld [vmem:[%s1682_s28 + $0x48] sm:$0xff]   ;;  %v1343_v9 = vld [vmem:[%s1682_s28 + $0x50] sm:$0xff]   ;;  %p1228_p13 = scmp.ne.s32.totalorder %s1409_s20, 8 }
  0x61   : > { %v1336_v2 = vld [vmem:[%s1682_s28 + $0xc0] sm:$0xff]   ;;  %1234 = vmatprep.subr.bf16.mxu0 %v1335_v1  ;;  %v1340_v6 = vld [vmem:[%s1682_s28 + $0xc8] sm:$0xff]   ;;  %v1344_v10 = vld [vmem:[%s1682_s28 + $0xd0] sm:$0xff]  }
  0x62   : > { %v1337_v3 = vld [vmem:[%s1682_s28] sm:$0xff]   ;;  %1256 = vmatprep.subr.bf16.mxu1 %v1336_v2  ;;  %v1341_v7 = vld [vmem:[%s1682_s28 + $0x8] sm:$0xff]   ;;  %v1345_v11 = vld [vmem:[%s1682_s28 + $0x10] sm:$0xff]  }
  0x63   : > { %v1338_v4 = vld [vmem:[%s1682_s28 + $0x80] sm:$0xff]   ;;  %1235 = vmatpush3.bf16.msra.mxu0 %v1337_v3  ;;  %v1342_v8 = vld [vmem:[%s1682_s28 + $0x88] sm:$0xff]   ;;  %v1346_v12 = vld [vmem:[%s1682_s28 + $0x90] sm:$0xff]  }
  0x64   : > { %1257 = vmatpush3.bf16.msra.mxu1 %v1338_v4  ;;  %1236 = vmatprep.subr.bf16.mxu0 %v1339_v5  ;;  %v1347_v13 = vld [vmem:[%s1682_s28 + $0x58] sm:$0xff]   ;;  %v1351_v17 = vld [vmem:[%s1682_s28 + $0x60] sm:$0xff]   ;;  %v1355_v21 = vld [vmem:[%s1682_s28 + $0x68] sm:$0xff]  }
  0x65   : > { %1258 = vmatprep.subr.bf16.mxu1 %v1340_v6  ;;  %v1348_v14 = vld [vmem:[%s1682_s28 + $0xd8] sm:$0xff]   ;;  %v1352_v18 = vld [vmem:[%s1682_s28 + $0xe0] sm:$0xff]   ;;  %v1356_v22 = vld [vmem:[%s1682_s28 + $0xe8] sm:$0xff]  }
  0x66   : > { %v1349_v15 = vld [vmem:[%s1682_s28 + $0x18] sm:$0xff]   ;;  %v1353_v19 = vld [vmem:[%s1682_s28 + $0x20] sm:$0xff]   ;;  %v1357_v23 = vld [vmem:[%s1682_s28 + $0x28] sm:$0xff]  }
  0x67   : > { %1237 = vmatpush3.bf16.msra.mxu0 %v1341_v7  ;;  %v1350_v16 = vld [vmem:[%s1682_s28 + $0x98] sm:$0xff]   ;;  %v1354_v20 = vld [vmem:[%s1682_s28 + $0xa0] sm:$0xff]   ;;  %v1358_v24 = vld [vmem:[%s1682_s28 + $0xa8] sm:$0xff]  }
  0x68   : > { %1259 = vmatpush3.bf16.msra.mxu1 %v1342_v8  ;;  %1238 = vmatprep.subr.bf16.mxu0 %v1343_v9  ;;  %v1359_v25 = vld [vmem:[%s1682_s28 + $0x70] sm:$0xff]   ;;  %v1363_v29 = vld [vmem:[%s1682_s28 + $0x78] sm:$0xff]   ;;  %v654_v34 = vld [vmem:[%s1661_s7 + $0x8] sm:$0xff] }
  0x69   : > { %1260 = vmatprep.subr.bf16.mxu1 %v1344_v10  ;;  %v1360_v26 = vld [vmem:[%s1682_s28 + $0xf0] sm:$0xff]   ;;  %v1364_v30 = vld [vmem:[%s1682_s28 + $0xf8] sm:$0xff]   ;;  %v1194_v37 = vcombine.low %v654_v34, %v654_v34  ;;  %v1195_v38 = vcombine.high %v654_v34, %v654_v34 }
  0x6a   : > { %v1361_v27 = vld [vmem:[%s1682_s28 + $0x30] sm:$0xff]   ;;  %v1365_v31 = vld [vmem:[%s1682_s28 + $0x38] sm:$0xff]  }
  0x6b   : > { %1239 = vmatpush3.bf16.msra.mxu0 %v1345_v11  ;;  %v1362_v28 = vld [vmem:[%s1682_s28 + $0xb0] sm:$0xff]   ;;  %v1366_v32 = vld [vmem:[%s1682_s28 + $0xb8] sm:$0xff]   ;;  %997 = vmatprep.mubr.bf16.mxu1 %v1195_v38 }
  0x6c   : > { %1261 = vmatpush3.bf16.msra.mxu1 %v1346_v12  ;;  %1240 = vmatprep.subr.bf16.mxu0 %v1347_v13  ;;  %v653_v33 = vld [vmem:[%s1661_s7] sm:$0xff] }
  0x6d   : > { %1262 = vmatprep.subr.bf16.mxu1 %v1348_v14  ;;  %v1192_v35 = vcombine.low %v653_v33, %v653_v33  ;;  %v1193_v36 = vcombine.high %v653_v33, %v653_v33  ;;  %v652_v47 = vld [vmem:[#allocation2] sm:$0xff] }
  0x6e   : > { %v1229_v53 = vld [vmem:[%s626_s18] ss:$0 sm:$0xff] (!%p1228_p13) }
  0x6f   : > { %1241 = vmatpush3.bf16.msra.mxu0 %v1349_v15  ;;  %957 = vmatprep.mubr.bf16.mxu0 %v1193_v36  ;;  %v1230_v54 = vld [vmem:[%s629_s12] ss:$0 sm:$0xff] (!%p1228_p13) }
  0x70   : > { %1263 = vmatpush3.bf16.msra.mxu1 %v1350_v16  ;;  %1242 = vmatprep.subr.bf16.mxu0 %v1351_v17  ;;  %v1028_v56 = vld [vmem:[%s1675_s16] sm:$0xff] (!%p1228_p13) }
  0x71   : > { %1264 = vmatprep.subr.bf16.mxu1 %v1352_v18 }
  0x73   : > { %1243 = vmatpush3.bf16.msra.mxu0 %v1353_v19 }
  0x74   : > { %1265 = vmatpush3.bf16.msra.mxu1 %v1354_v20  ;;  %1244 = vmatprep.subr.bf16.mxu0 %v1355_v21 }
  0x75   : > { %1266 = vmatprep.subr.bf16.mxu1 %v1356_v22 }
  0x77   : > { %1245 = vmatpush3.bf16.msra.mxu0 %v1357_v23 }
  0x78   : > { %1267 = vmatpush3.bf16.msra.mxu1 %v1358_v24  ;;  %1246 = vmatprep.subr.bf16.mxu0 %v1359_v25 }
  0x79   : > { %1268 = vmatprep.subr.bf16.mxu1 %v1360_v26 }
  0x7b   : > { %1247 = vmatpush3.bf16.msra.mxu0 %v1361_v27 }
  0x7c   : > { %1269 = vmatpush3.bf16.msra.mxu1 %v1362_v28  ;;  %1248 = vmatprep.subr.bf16.mxu0 %v1363_v29 }
  0x7d   : > { %1270 = vmatprep.subr.bf16.mxu1 %v1364_v30 }
  0x7f   : > { %1249 = vmatpush3.bf16.msra.mxu0 %v1365_v31 }
  0x80   : > { %1271 = vmatpush3.bf16.msra.mxu1 %v1366_v32 }
  0x82   : > { %958 = vmatmul.mubr.bf16.vlgmr.msra.gmra.mrb[0].mxu0 %v1192_v35 }
  0x83   : > { %998 = vmatmul.mubr.bf16.vlgmr.msra.gmra.mrb[0].mxu1 %v1194_v37 }
 0x155   : > { %v1250_v39 = vpop.f32.mrb[0].mxu0 }
 0x156   : > { %v1272_v40 = vpop.f32.mrb[0].mxu1  ;;  %v1251_v41 = vpop.f32.mrb[1].mxu0 }
 0x157   : > { %v1273_v42 = vpop.f32.mrb[1].mxu1  ;;  %v1252_v43 = vadd.f32 %v1251_v41, %v1250_v39  ;;  %v1253_v45 = vpop.f32.mrb[2].mxu0 }
 0x158   : > { %v1274_v44 = vadd.f32 %v1273_v42, %v1272_v40  ;;  %v1275_v46 = vpop.f32.mrb[2].mxu1  ;;  %v1254_v48 = vpop.f32.mrb[3].mxu0  ;;  %1010 = sbr.rel (%p1228_p13) target bundleno = 367 (0x16f), region = 89 }
 0x159   : > { %v1276_v49 = vpop.f32.mrb[3].mxu1 }
 0x15a   : > { %v1000_v50 = vadd.f32 %v1274_v44, %v1252_v43 }
 0x15c   : > { %v1005_v51 = vadd.f32 %v1000_v50, %v652_v47 }
 0x15e   : > { %1006 = vst [vmem:[#allocation2] sm:$0xff] %v1005_v51 }
 0x165   : > { %v1011_v52 = vld [vmem:[#allocation2] sm:$0xff] }
 0x166   : > { %v1019_v55 = vmul.f32 %v1229_v53, %v1011_v52 }
 0x168   : > { %v1027_v57 = vadd.f32 %v1230_v54, %v1019_v55 }
 0x16a   : > { %v1029_v58 = vadd.f32 %v1028_v56, %v1027_v57 }
 0x16c   : > { %v1030_v59 = vmax.f32 %v1029_v58, 0.0 }
 0x16e   : > { %1031 = vst [vmem:[%s1680_s29] sm:$0xff] %v1030_v59 }
 0x16f PF: > { %s15_s24 = sadd.s32 1, %s1425_s24   ;;  %s1761_s18 = smov %s1405_s19 }
 0x170   : > { %p12_p0 = scmp.ge.s32.totalorder %s15_s24, 38   ;;  %s1762_s19 = smov %s1509_s6 }
 0x171   : > { %s1763_s20 = smov %s1417_s22  ;;  %s1764_s21 = smov %s1421_s23 }
 0x172   : > { %s1765_s22 = smov %s1768_s25  ;;  %s1766_s23 = smov %s1772_s26 }
 0x173   :  { %14 = sbr.rel (!%p12_p0) target bundleno = 6 (0x6), region = 136 }

// kernel: resnet18_forward.39
= control target key start
LH: loop header
LB: loop body
LE: loop exit
PB: predicated region body
PF: predicated region fallthrough
CT: control target
= control target key end

     0   :  { %s1374_s15 = smov 0   ;;  %s1376_s16 = smov 0   ;;  %s1663_s0 = inlined_call_operand.vmem [shape: bf16[8,4608], index: 0, kind: input, shape index: {}]   ;;  %s1664_s1 = inlined_call_operand.vmem [shape: bf16[4608,512], index: 1, kind: input, shape index: {}]   ;;  %s1665_s2 = inlined_call_operand.vmem [shape: f32[1,512], index: 2, kind: input, shape index: {}]   ;;  %s1666_s3 = inlined_call_operand.vmem [shape: f32[1,512], index: 3, kind: input, shape index: {}]   ;;  %s1667_s4 = inlined_call_operand.vmem [shape: f32[8,512], index: 4, kind: output, shape index: {}]  }
   0x1   :  { %s1378_s17 = smov 0   ;;  %s1380_s18 = smov 0  }
   0x2   :  { %s1382_s19 = smov 0   ;;  %s1384_s20 = smov 0  }
   0x3   :  { %s1386_s21 = smov 0  }
   0x4 LB: > { %s26_s22 = sadd.s32 1, %s1338_s19  ;;  %s29_s23 = sadd.s32 1, %s1342_s20  ;;  %s1346_s21 = sphi %s1386_s21, %s14_s21   ;;  %s1342_s20 = sphi %s1384_s20, %s1673_s20   ;;  %s1338_s19 = sphi %s1382_s19, %s1672_s19   ;;  %s1334_s18 = sphi %s1380_s18, %s1671_s18   ;;  %s1330_s17 = sphi %s1378_s17, %s1670_s17   ;;  %s1326_s16 = sphi %s1376_s16, %s1669_s16   ;;  %s1322_s15 = sphi %s1374_s15, %s1668_s15  }
   0x5   : > { %p27_p0 = scmp.ge.s32.totalorder %s26_s22, 9  ;;  %p77_p1 = scmp.ne.s32.totalorder %s1326_s16, %s1322_s15 }
   0x6   : > { %p78_p2 = scmp.eq.s32.totalorder %s1346_s21, 0  ;;  %s70_s27 = sadd.s32 1, %s1326_s16 }
   0x7   : > { %s1675_s22 = smov (%p27_p0, %s26_s22), 0  ;;  %s1677_s23 = smov (!%p27_p0, %s29_s23), %s1342_s20 }
   0x8   : > { %p79_p3 = por %p78_p2, %p77_p1  ;;  %p31_p4 = scmp.ge.s32.totalorder %s1677_s23, 4 }
   0x9   : > { %s65_s24 = ssub.s32 %s1338_s19, %s1675_s22  ;;  %p1102_p6 = scmp.ge.s32.totalorder %s1346_s21, 36 }
   0xa   : > { %s1679_s23 = smov (%p31_p4, %s1677_s23), 0 }
   0xb   : > { %s66_s25 = ssub.s32 %s1342_s20, %s1679_s23  ;;  %183 = sbr.rel (%p1102_p6) target bundleno = 67 (0x43), region = 16 }
   0xc   : > { %s67_s26 = sor.u32 %s66_s25, %s65_s24 }
   0xd   : > { %p68_p5 = scmp.eq.s32.totalorder %s67_s26, 0 }
   0xf   : > { %s1425_s28 = scalar_select %p68_p5, %s1326_s16, %s70_s27  }
  0x12   : > { %199 = sbr.rel (!%p79_p3) target bundleno = 67 (0x43), region = 24  ;;  %s201_s29 = sand.u32 (%p79_p3), 1, %s1326_s16  }
  0x13   : > { %s1154_s30 = sshll.u32 (%p79_p3), %s1338_s19, 8  ;;  %s1103_s5 = sshll.u32 (%p79_p3), %s201_s29, 8 }
  0x14   : > { %s206_s6 = sadd.s32 (%p79_p3), %s1342_s20, %s1154_s30  ;;  %s1439_s11 = scalar_lea.vmem (%p79_p3), [#allocation3], %s1103_s5 }
  0x15   : > { %s1106_s7 = sshll.u32 (%p79_p3), %s206_s6, 2 }
  0x16   : > { %s1434_s10 = scalar_lea.vmem (%p79_p3), %s1664_s1, %s1106_s7 }
  0x17   : > { %v224_v0 = vld [vmem:[%s1434_s10] sm:$0xf] (%p79_p3)  ;;  %v226_v1 = vld [vmem:[%s1434_s10 + $0x10] sm:$0xf] (%p79_p3) }
  0x18   : > { %v228_v2 = vld [vmem:[%s1434_s10 + $0x20] sm:$0xf] (%p79_p3)  ;;  %225 = vst [vmem:[%s1439_s11] sm:$0xf] (%p79_p3), %v224_v0  ;;  %227 = vst [vmem:[%s1439_s11 + $0x4] sm:$0xf] (%p79_p3), %v226_v1 }
  0x19   : > { %229 = vst [vmem:[%s1439_s11 + $0x8] sm:$0xf] %v228_v2  ;;  %v230_v3 = vld [vmem:[%s1434_s10 + $0x30] sm:$0xf]  ;;  %v232_v4 = vld [vmem:[%s1434_s10 + $0x40] sm:$0xf] }
  0x1a   : > { %v234_v5 = vld [vmem:[%s1434_s10 + $0x50] sm:$0xf]  ;;  %231 = vst [vmem:[%s1439_s11 + $0xc] sm:$0xf] %v230_v3  ;;  %233 = vst [vmem:[%s1439_s11 + $0x10] sm:$0xf] %v232_v4 }
  0x1b   : > { %235 = vst [vmem:[%s1439_s11 + $0x14] sm:$0xf] %v234_v5  ;;  %v236_v6 = vld [vmem:[%s1434_s10 + $0x60] sm:$0xf]  ;;  %v238_v7 = vld [vmem:[%s1434_s10 + $0x70] sm:$0xf] }
  0x1c   : > { %v240_v8 = vld [vmem:[%s1434_s10 + $0x80] sm:$0xf]  ;;  %237 = vst [vmem:[%s1439_s11 + $0x18] sm:$0xf] %v236_v6  ;;  %239 = vst [vmem:[%s1439_s11 + $0x1c] sm:$0xf] %v238_v7 }
  0x1d   : > { %241 = vst [vmem:[%s1439_s11 + $0x20] sm:$0xf] %v240_v8  ;;  %v242_v9 = vld [vmem:[%s1434_s10 + $0x90] sm:$0xf]  ;;  %v244_v10 = vld [vmem:[%s1434_s10 + $0xa0] sm:$0xf] }
  0x1e   : > { %v246_v11 = vld [vmem:[%s1434_s10 + $0xb0] sm:$0xf]  ;;  %243 = vst [vmem:[%s1439_s11 + $0x24] sm:$0xf] %v242_v9  ;;  %245 = vst [vmem:[%s1439_s11 + $0x28] sm:$0xf] %v244_v10 }
  0x1f   : > { %247 = vst [vmem:[%s1439_s11 + $0x2c] sm:$0xf] %v246_v11  ;;  %v248_v12 = vld [vmem:[%s1434_s10 + $0xc0] sm:$0xf]  ;;  %v250_v13 = vld [vmem:[%s1434_s10 + $0xd0] sm:$0xf] }
  0x20   : > { %v252_v14 = vld [vmem:[%s1434_s10 + $0xe0] sm:$0xf]  ;;  %249 = vst [vmem:[%s1439_s11 + $0x30] sm:$0xf] %v248_v12  ;;  %251 = vst [vmem:[%s1439_s11 + $0x34] sm:$0xf] %v250_v13 }
  0x21   : > { %253 = vst [vmem:[%s1439_s11 + $0x38] sm:$0xf] %v252_v14  ;;  %v254_v15 = vld [vmem:[%s1434_s10 + $0xf0] sm:$0xf]  ;;  %v256_v16 = vld [vmem:[%s1434_s10 + $0x100] sm:$0xf] }
  0x22   : > { %v258_v17 = vld [vmem:[%s1434_s10 + $0x110] sm:$0xf]  ;;  %255 = vst [vmem:[%s1439_s11 + $0x3c] sm:$0xf] %v254_v15  ;;  %257 = vst [vmem:[%s1439_s11 + $0x40] sm:$0xf] %v256_v16 }
  0x23   : > { %259 = vst [vmem:[%s1439_s11 + $0x44] sm:$0xf] %v258_v17  ;;  %v260_v18 = vld [vmem:[%s1434_s10 + $0x120] sm:$0xf]  ;;  %v262_v19 = vld [vmem:[%s1434_s10 + $0x130] sm:$0xf] }
  0x24   : > { %v264_v20 = vld [vmem:[%s1434_s10 + $0x140] sm:$0xf]  ;;  %261 = vst [vmem:[%s1439_s11 + $0x48] sm:$0xf] %v260_v18  ;;  %263 = vst [vmem:[%s1439_s11 + $0x4c] sm:$0xf] %v262_v19 }
  0x25   : > { %265 = vst [vmem:[%s1439_s11 + $0x50] sm:$0xf] %v264_v20  ;;  %v266_v21 = vld [vmem:[%s1434_s10 + $0x150] sm:$0xf]  ;;  %v268_v22 = vld [vmem:[%s1434_s10 + $0x160] sm:$0xf] }
  0x26   : > { %v270_v23 = vld [vmem:[%s1434_s10 + $0x170] sm:$0xf]  ;;  %267 = vst [vmem:[%s1439_s11 + $0x54] sm:$0xf] %v266_v21  ;;  %269 = vst [vmem:[%s1439_s11 + $0x58] sm:$0xf] %v268_v22 }
  0x27   : > { %271 = vst [vmem:[%s1439_s11 + $0x5c] sm:$0xf] %v270_v23  ;;  %v272_v24 = vld [vmem:[%s1434_s10 + $0x180] sm:$0xf]  ;;  %v274_v25 = vld [vmem:[%s1434_s10 + $0x190] sm:$0xf] }
  0x28   : > { %v276_v26 = vld [vmem:[%s1434_s10 + $0x1a0] sm:$0xf]  ;;  %273 = vst [vmem:[%s1439_s11 + $0x60] sm:$0xf] %v272_v24  ;;  %275 = vst [vmem:[%s1439_s11 + $0x64] sm:$0xf] %v274_v25 }
  0x29   : > { %277 = vst [vmem:[%s1439_s11 + $0x68] sm:$0xf] %v276_v26  ;;  %v278_v27 = vld [vmem:[%s1434_s10 + $0x1b0] sm:$0xf]  ;;  %v280_v28 = vld [vmem:[%s1434_s10 + $0x1c0] sm:$0xf] }
  0x2a   : > { %v282_v29 = vld [vmem:[%s1434_s10 + $0x1d0] sm:$0xf]  ;;  %279 = vst [vmem:[%s1439_s11 + $0x6c] sm:$0xf] %v278_v27  ;;  %281 = vst [vmem:[%s1439_s11 + $0x70] sm:$0xf] %v280_v28 }
  0x2b   : > { %283 = vst [vmem:[%s1439_s11 + $0x74] sm:$0xf] %v282_v29  ;;  %v284_v30 = vld [vmem:[%s1434_s10 + $0x1e0] sm:$0xf]  ;;  %v286_v31 = vld [vmem:[%s1434_s10 + $0x1f0] sm:$0xf] }
  0x2c   : > { %v288_v32 = vld [vmem:[%s1434_s10 + $0x200] sm:$0xf]  ;;  %285 = vst [vmem:[%s1439_s11 + $0x78] sm:$0xf] %v284_v30  ;;  %287 = vst [vmem:[%s1439_s11 + $0x7c] sm:$0xf] %v286_v31 }
  0x2d   : > { %289 = vst [vmem:[%s1439_s11 + $0x80] sm:$0xf] %v288_v32  ;;  %v290_v33 = vld [vmem:[%s1434_s10 + $0x210] sm:$0xf]  ;;  %v292_v34 = vld [vmem:[%s1434_s10 + $0x220] sm:$0xf] }
  0x2e   : > { %v294_v35 = vld [vmem:[%s1434_s10 + $0x230] sm:$0xf]  ;;  %291 = vst [vmem:[%s1439_s11 + $0x84] sm:$0xf] %v290_v33  ;;  %293 = vst [vmem:[%s1439_s11 + $0x88] sm:$0xf] %v292_v34 }
  0x2f   : > { %295 = vst [vmem:[%s1439_s11 + $0x8c] sm:$0xf] %v294_v35  ;;  %v296_v36 = vld [vmem:[%s1434_s10 + $0x240] sm:$0xf]  ;;  %v298_v37 = vld [vmem:[%s1434_s10 + $0x250] sm:$0xf] }
  0x30   : > { %v300_v38 = vld [vmem:[%s1434_s10 + $0x260] sm:$0xf]  ;;  %297 = vst [vmem:[%s1439_s11 + $0x90] sm:$0xf] %v296_v36  ;;  %299 = vst [vmem:[%s1439_s11 + $0x94] sm:$0xf] %v298_v37 }
  0x31   : > { %301 = vst [vmem:[%s1439_s11 + $0x98] sm:$0xf] %v300_v38  ;;  %v302_v39 = vld [vmem:[%s1434_s10 + $0x270] sm:$0xf]  ;;  %v304_v40 = vld [vmem:[%s1434_s10 + $0x280] sm:$0xf] }
  0x32   : > { %v306_v41 = vld [vmem:[%s1434_s10 + $0x290] sm:$0xf]  ;;  %303 = vst [vmem:[%s1439_s11 + $0x9c] sm:$0xf] %v302_v39  ;;  %305 = vst [vmem:[%s1439_s11 + $0xa0] sm:$0xf] %v304_v40 }
  0x33   : > { %307 = vst [vmem:[%s1439_s11 + $0xa4] sm:$0xf] %v306_v41  ;;  %v308_v42 = vld [vmem:[%s1434_s10 + $0x2a0] sm:$0xf]  ;;  %v310_v43 = vld [vmem:[%s1434_s10 + $0x2b0] sm:$0xf] }
  0x34   : > { %v312_v44 = vld [vmem:[%s1434_s10 + $0x2c0] sm:$0xf]  ;;  %309 = vst [vmem:[%s1439_s11 + $0xa8] sm:$0xf] %v308_v42  ;;  %311 = vst [vmem:[%s1439_s11 + $0xac] sm:$0xf] %v310_v43 }
  0x35   : > { %313 = vst [vmem:[%s1439_s11 + $0xb0] sm:$0xf] %v312_v44  ;;  %v314_v45 = vld [vmem:[%s1434_s10 + $0x2d0] sm:$0xf]  ;;  %v316_v46 = vld [vmem:[%s1434_s10 + $0x2e0] sm:$0xf] }
  0x36   : > { %v318_v47 = vld [vmem:[%s1434_s10 + $0x2f0] sm:$0xf]  ;;  %315 = vst [vmem:[%s1439_s11 + $0xb4] sm:$0xf] %v314_v45  ;;  %317 = vst [vmem:[%s1439_s11 + $0xb8] sm:$0xf] %v316_v46 }
  0x37   : > { %319 = vst [vmem:[%s1439_s11 + $0xbc] sm:$0xf] %v318_v47  ;;  %v320_v48 = vld [vmem:[%s1434_s10 + $0x300] sm:$0xf]  ;;  %v322_v49 = vld [vmem:[%s1434_s10 + $0x310] sm:$0xf] }
  0x38   : > { %v324_v50 = vld [vmem:[%s1434_s10 + $0x320] sm:$0xf]  ;;  %321 = vst [vmem:[%s1439_s11 + $0xc0] sm:$0xf] %v320_v48  ;;  %323 = vst [vmem:[%s1439_s11 + $0xc4] sm:$0xf] %v322_v49 }
  0x39   : > { %325 = vst [vmem:[%s1439_s11 + $0xc8] sm:$0xf] %v324_v50  ;;  %v326_v51 = vld [vmem:[%s1434_s10 + $0x330] sm:$0xf]  ;;  %v328_v52 = vld [vmem:[%s1434_s10 + $0x340] sm:$0xf] }
  0x3a   : > { %v330_v53 = vld [vmem:[%s1434_s10 + $0x350] sm:$0xf]  ;;  %327 = vst [vmem:[%s1439_s11 + $0xcc] sm:$0xf] %v326_v51  ;;  %329 = vst [vmem:[%s1439_s11 + $0xd0] sm:$0xf] %v328_v52 }
  0x3b   : > { %331 = vst [vmem:[%s1439_s11 + $0xd4] sm:$0xf] %v330_v53  ;;  %v332_v54 = vld [vmem:[%s1434_s10 + $0x360] sm:$0xf]  ;;  %v334_v55 = vld [vmem:[%s1434_s10 + $0x370] sm:$0xf] }
  0x3c   : > { %v336_v56 = vld [vmem:[%s1434_s10 + $0x380] sm:$0xf]  ;;  %333 = vst [vmem:[%s1439_s11 + $0xd8] sm:$0xf] %v332_v54  ;;  %335 = vst [vmem:[%s1439_s11 + $0xdc] sm:$0xf] %v334_v55 }
  0x3d   : > { %337 = vst [vmem:[%s1439_s11 + $0xe0] sm:$0xf] %v336_v56  ;;  %v338_v57 = vld [vmem:[%s1434_s10 + $0x390] sm:$0xf]  ;;  %v340_v58 = vld [vmem:[%s1434_s10 + $0x3a0] sm:$0xf] }
  0x3e   : > { %v342_v59 = vld [vmem:[%s1434_s10 + $0x3b0] sm:$0xf]  ;;  %339 = vst [vmem:[%s1439_s11 + $0xe4] sm:$0xf] %v338_v57  ;;  %341 = vst [vmem:[%s1439_s11 + $0xe8] sm:$0xf] %v340_v58 }
  0x3f   : > { %343 = vst [vmem:[%s1439_s11 + $0xec] sm:$0xf] %v342_v59  ;;  %v344_v60 = vld [vmem:[%s1434_s10 + $0x3c0] sm:$0xf]  ;;  %v346_v61 = vld [vmem:[%s1434_s10 + $0x3d0] sm:$0xf] }
  0x40   : > { %v348_v62 = vld [vmem:[%s1434_s10 + $0x3e0] sm:$0xf]  ;;  %345 = vst [vmem:[%s1439_s11 + $0xf0] sm:$0xf] %v344_v60  ;;  %347 = vst [vmem:[%s1439_s11 + $0xf4] sm:$0xf] %v346_v61 }
  0x41   : > { %349 = vst [vmem:[%s1439_s11 + $0xf8] sm:$0xf] %v348_v62  ;;  %v350_v63 = vld [vmem:[%s1434_s10 + $0x3f0] sm:$0xf] }
  0x42   : > { %351 = vst [vmem:[%s1439_s11 + $0xfc] sm:$0xf] %v350_v63 }
  0x43 PF: > { %p1107_p7 = scmp.ge.s32.totalorder %s1346_s21, 1  ;;  %p513_p8 = scmp.lt.s32.totalorder %s1346_s21, 37 }
  0x45   : > { %p514_p9 = pnand %p1107_p7, %p513_p8 }
  0x46   : > { %s520_s12 = sand.u32 (!%p514_p9), 1, %s1322_s15   ;;  %s1109_s13 = sshll.u32 (!%p514_p9), %s1330_s17, 2 }
  0x47   : > { %517 = sbr.rel (%p514_p9) target bundleno = 357 (0x165), region = 73  ;;  %s1108_s14 = sshll.u32 (!%p514_p9), %s520_s12, 8 }
  0x48   : > { %p566_p10 = scmp.lt.s32.totalorder (!%p514_p9), %s1109_s13, 35  ;;  %p574_p11 = scmp.lt.s32.totalorder (!%p514_p9), %s1334_s18, 3 }
  0x49   : > { %s1593_s12 = scalar_lea.vmem (!%p514_p9), [#allocation3], %s1108_s14  ;;  %p1112_p12 = scmp.ne.s32.totalorder (!%p514_p9), %s1330_s17, 0 }
  0x4e   : > { %s1681_s13 = smov (!%p566_p10, %s1109_s13), 35  ;;  %s1683_s18 = smov (!%p574_p11, %s1334_s18), 3 }
  0x4f   : > { %s1110_s24 = sshll.u32 %s1681_s13, 2  ;;  %s576_s15 = scalar_lea.vmem %s1665_s2, %s1683_s18  ;;  %v1348_v0 = vmov (!%p1112_p12), 0.0  }
  0x50   : > { %s1577_s27 = scalar_lea.vmem %s1663_s0, %s1110_s24  ;;  %s579_s7 = scalar_lea.vmem %s1666_s3, %s1683_s18  ;;  %593 = vst [vmem:[#allocation2] sm:$0xff] (!%p1112_p12), %v1348_v0 }
  0x51   : > { %s1111_s8 = sshll.u32 %s1683_s18, 3  ;;  %592 = sbr.rel (%p1112_p12) target bundleno = 88 (0x58), region = 81 }
  0x52   : > { %s1591_s11 = scalar_lea.vmem %s1667_s4, %s1111_s8 }
  0x58 PF: > { %v1256_v1 = vld [vmem:[%s1593_s12 + $0x40] sm:$0xff]   ;;  %v1260_v5 = vld [vmem:[%s1593_s12 + $0x48] sm:$0xff]   ;;  %v1264_v9 = vld [vmem:[%s1593_s12 + $0x50] sm:$0xff]   ;;  %p1149_p13 = scmp.ne.s32.totalorder %s1330_s17, 8 }
  0x59   : > { %v1257_v2 = vld [vmem:[%s1593_s12 + $0xc0] sm:$0xff]   ;;  %1155 = vmatprep.subr.bf16.mxu0 %v1256_v1  ;;  %v1261_v6 = vld [vmem:[%s1593_s12 + $0xc8] sm:$0xff]   ;;  %v1265_v10 = vld [vmem:[%s1593_s12 + $0xd0] sm:$0xff]  }
  0x5a   : > { %v1258_v3 = vld [vmem:[%s1593_s12] sm:$0xff]   ;;  %1177 = vmatprep.subr.bf16.mxu1 %v1257_v2  ;;  %v1262_v7 = vld [vmem:[%s1593_s12 + $0x8] sm:$0xff]   ;;  %v1266_v11 = vld [vmem:[%s1593_s12 + $0x10] sm:$0xff]  }
  0x5b   : > { %v1259_v4 = vld [vmem:[%s1593_s12 + $0x80] sm:$0xff]   ;;  %1156 = vmatpush3.bf16.msra.mxu0 %v1258_v3  ;;  %v1263_v8 = vld [vmem:[%s1593_s12 + $0x88] sm:$0xff]   ;;  %v1267_v12 = vld [vmem:[%s1593_s12 + $0x90] sm:$0xff]  }
  0x5c   : > { %1178 = vmatpush3.bf16.msra.mxu1 %v1259_v4  ;;  %1157 = vmatprep.subr.bf16.mxu0 %v1260_v5  ;;  %v1268_v13 = vld [vmem:[%s1593_s12 + $0x58] sm:$0xff]   ;;  %v1272_v17 = vld [vmem:[%s1593_s12 + $0x60] sm:$0xff]   ;;  %v1276_v21 = vld [vmem:[%s1593_s12 + $0x68] sm:$0xff]  }
  0x5d   : > { %1179 = vmatprep.subr.bf16.mxu1 %v1261_v6  ;;  %v1269_v14 = vld [vmem:[%s1593_s12 + $0xd8] sm:$0xff]   ;;  %v1273_v18 = vld [vmem:[%s1593_s12 + $0xe0] sm:$0xff]   ;;  %v1277_v22 = vld [vmem:[%s1593_s12 + $0xe8] sm:$0xff]  }
  0x5e   : > { %v1270_v15 = vld [vmem:[%s1593_s12 + $0x18] sm:$0xff]   ;;  %v1274_v19 = vld [vmem:[%s1593_s12 + $0x20] sm:$0xff]   ;;  %v1278_v23 = vld [vmem:[%s1593_s12 + $0x28] sm:$0xff]  }
  0x5f   : > { %1158 = vmatpush3.bf16.msra.mxu0 %v1262_v7  ;;  %v1271_v16 = vld [vmem:[%s1593_s12 + $0x98] sm:$0xff]   ;;  %v1275_v20 = vld [vmem:[%s1593_s12 + $0xa0] sm:$0xff]   ;;  %v1279_v24 = vld [vmem:[%s1593_s12 + $0xa8] sm:$0xff]  }
  0x60   : > { %1180 = vmatpush3.bf16.msra.mxu1 %v1263_v8  ;;  %1159 = vmatprep.subr.bf16.mxu0 %v1264_v9  ;;  %v1280_v25 = vld [vmem:[%s1593_s12 + $0x70] sm:$0xff]   ;;  %v1284_v29 = vld [vmem:[%s1593_s12 + $0x78] sm:$0xff]   ;;  %v596_v34 = vld [vmem:[%s1577_s27 + $0x8] sm:$0xff] }
  0x61   : > { %1181 = vmatprep.subr.bf16.mxu1 %v1265_v10  ;;  %v1281_v26 = vld [vmem:[%s1593_s12 + $0xf0] sm:$0xff]   ;;  %v1285_v30 = vld [vmem:[%s1593_s12 + $0xf8] sm:$0xff]   ;;  %v1115_v37 = vcombine.low %v596_v34, %v596_v34  ;;  %v1116_v38 = vcombine.high %v596_v34, %v596_v34 }
  0x62   : > { %v1282_v27 = vld [vmem:[%s1593_s12 + $0x30] sm:$0xff]   ;;  %v1286_v31 = vld [vmem:[%s1593_s12 + $0x38] sm:$0xff]  }
  0x63   : > { %1160 = vmatpush3.bf16.msra.mxu0 %v1266_v11  ;;  %v1283_v28 = vld [vmem:[%s1593_s12 + $0xb0] sm:$0xff]   ;;  %v1287_v32 = vld [vmem:[%s1593_s12 + $0xb8] sm:$0xff]   ;;  %939 = vmatprep.mubr.bf16.mxu1 %v1116_v38 }
  0x64   : > { %1182 = vmatpush3.bf16.msra.mxu1 %v1267_v12  ;;  %1161 = vmatprep.subr.bf16.mxu0 %v1268_v13  ;;  %v595_v33 = vld [vmem:[%s1577_s27] sm:$0xff] }
  0x65   : > { %1183 = vmatprep.subr.bf16.mxu1 %v1269_v14  ;;  %v1113_v35 = vcombine.low %v595_v33, %v595_v33  ;;  %v1114_v36 = vcombine.high %v595_v33, %v595_v33  ;;  %v594_v47 = vld [vmem:[#allocation2] sm:$0xff] }
  0x66   : > { %v1150_v53 = vld [vmem:[%s576_s15] ss:$0 sm:$0xff] (!%p1149_p13) }
  0x67   : > { %1162 = vmatpush3.bf16.msra.mxu0 %v1270_v15  ;;  %899 = vmatprep.mubr.bf16.mxu0 %v1114_v36  ;;  %v1151_v54 = vld [vmem:[%s579_s7] ss:$0 sm:$0xff] (!%p1149_p13) }
  0x68   : > { %1184 = vmatpush3.bf16.msra.mxu1 %v1271_v16  ;;  %1163 = vmatprep.subr.bf16.mxu0 %v1272_v17 }
  0x69   : > { %1185 = vmatprep.subr.bf16.mxu1 %v1273_v18 }
  0x6b   : > { %1164 = vmatpush3.bf16.msra.mxu0 %v1274_v19 }
  0x6c   : > { %1186 = vmatpush3.bf16.msra.mxu1 %v1275_v20  ;;  %1165 = vmatprep.subr.bf16.mxu0 %v1276_v21 }
  0x6d   : > { %1187 = vmatprep.subr.bf16.mxu1 %v1277_v22 }
  0x6f   : > { %1166 = vmatpush3.bf16.msra.mxu0 %v1278_v23 }
  0x70   : > { %1188 = vmatpush3.bf16.msra.mxu1 %v1279_v24  ;;  %1167 = vmatprep.subr.bf16.mxu0 %v1280_v25 }
  0x71   : > { %1189 = vmatprep.subr.bf16.mxu1 %v1281_v26 }
  0x73   : > { %1168 = vmatpush3.bf16.msra.mxu0 %v1282_v27 }
  0x74   : > { %1190 = vmatpush3.bf16.msra.mxu1 %v1283_v28  ;;  %1169 = vmatprep.subr.bf16.mxu0 %v1284_v29 }
  0x75   : > { %1191 = vmatprep.subr.bf16.mxu1 %v1285_v30 }
  0x77   : > { %1170 = vmatpush3.bf16.msra.mxu0 %v1286_v31 }
  0x78   : > { %1192 = vmatpush3.bf16.msra.mxu1 %v1287_v32 }
  0x7a   : > { %900 = vmatmul.mubr.bf16.vlgmr.msra.gmra.mrb[0].mxu0 %v1113_v35 }
  0x7b   : > { %940 = vmatmul.mubr.bf16.vlgmr.msra.gmra.mrb[0].mxu1 %v1115_v37 }
 0x14d   : > { %v1171_v39 = vpop.f32.mrb[0].mxu0 }
 0x14e   : > { %v1193_v40 = vpop.f32.mrb[0].mxu1  ;;  %v1172_v41 = vpop.f32.mrb[1].mxu0 }
 0x14f   : > { %v1194_v42 = vpop.f32.mrb[1].mxu1  ;;  %v1173_v43 = vadd.f32 %v1172_v41, %v1171_v39  ;;  %v1174_v45 = vpop.f32.mrb[2].mxu0 }
 0x150   : > { %v1195_v44 = vadd.f32 %v1194_v42, %v1193_v40  ;;  %v1196_v46 = vpop.f32.mrb[2].mxu1  ;;  %v1175_v48 = vpop.f32.mrb[3].mxu0  ;;  %952 = sbr.rel (%p1149_p13) target bundleno = 357 (0x165), region = 85 }
 0x151   : > { %v1197_v49 = vpop.f32.mrb[3].mxu1 }
 0x152   : > { %v942_v50 = vadd.f32 %v1195_v44, %v1173_v43 }
 0x154   : > { %v947_v51 = vadd.f32 %v942_v50, %v594_v47 }
 0x156   : > { %948 = vst [vmem:[#allocation2] sm:$0xff] %v947_v51 }
 0x15d   : > { %v953_v52 = vld [vmem:[#allocation2] sm:$0xff] }
 0x15e   : > { %v961_v55 = vmul.f32 %v1150_v53, %v953_v52 }
 0x160   : > { %v969_v56 = vadd.f32 %v1151_v54, %v961_v55 }
 0x162   : > { %v970_v57 = vmax.f32 %v969_v56, 0.0 }
 0x164   : > { %971 = vst [vmem:[%s1591_s11] sm:$0xff] %v970_v57 }
 0x165 PF: > { %s14_s21 = sadd.s32 1, %s1346_s21   ;;  %s1668_s15 = smov %s1326_s16 }
 0x166   : > { %p11_p0 = scmp.ge.s32.totalorder %s14_s21, 38   ;;  %s1669_s16 = smov %s1425_s28 }
 0x167   : > { %s1670_s17 = smov %s1338_s19  ;;  %s1671_s18 = smov %s1342_s20 }
 0x168   : > { %s1672_s19 = smov %s1675_s22  ;;  %s1673_s20 = smov %s1679_s23 }
 0x169   :  { %13 = sbr.rel (!%p11_p0) target bundleno = 4 (0x4), region = 129 }

// kernel: resnet18_forward.41
= control target key start
LH: loop header
LB: loop body
LE: loop exit
PB: predicated region body
PF: predicated region fallthrough
CT: control target
= control target key end

     0   :  { %v28_v30 = vlaneseq  ;;  %v542_v38 = vmov 1983009808   ;;  %s687_s0 = inlined_call_operand.vmem [shape: f32[4,2,512], index: 0, kind: input, shape index: {}]   ;;  %s688_s1 = inlined_call_operand.vmem [shape: bf16[512,128], index: 1, kind: input, shape index: {}]   ;;  %s689_s2 = inlined_call_operand.vmem [shape: f32[1,128], index: 2, kind: input, shape index: {}]   ;;  %s690_s3 = inlined_call_operand.hbm [shape: f32[2,128], index: 3, kind: output, shape index: {}]  }
   0x1   :  { %v486_v0 = vld [vmem:[%s688_s1 + $0x40] sm:$0xff]   ;;  %v490_v4 = vld [vmem:[%s688_s1 + $0x48] sm:$0xff]   ;;  %v494_v8 = vld [vmem:[%s688_s1 + $0x50] sm:$0xff]   ;;  %v26_v39 = vunpack.c.l.s4 %v542_v38 }
   0x2   :  { %v487_v1 = vld [vmem:[%s688_s1 + $0xc0] sm:$0xff]   ;;  %440 = vmatprep.subr.bf16.mxu0 %v486_v0  ;;  %v491_v5 = vld [vmem:[%s688_s1 + $0xc8] sm:$0xff]   ;;  %v495_v9 = vld [vmem:[%s688_s1 + $0xd0] sm:$0xff]   ;;  %v29_v40 = vshrl.u32 %v28_v30, 7 }
   0x3   :  { %v488_v2 = vld [vmem:[%s688_s1] sm:$0xff]   ;;  %462 = vmatprep.subr.bf16.mxu1 %v487_v1  ;;  %v492_v6 = vld [vmem:[%s688_s1 + $0x8] sm:$0xff]   ;;  %v496_v10 = vld [vmem:[%s688_s1 + $0x10] sm:$0xff]  }
   0x4   :  { %v489_v3 = vld [vmem:[%s688_s1 + $0x80] sm:$0xff]   ;;  %441 = vmatpush3.bf16.msra.mxu0 %v488_v2  ;;  %v493_v7 = vld [vmem:[%s688_s1 + $0x88] sm:$0xff]   ;;  %v497_v11 = vld [vmem:[%s688_s1 + $0x90] sm:$0xff]  }
   0x5   :  { %463 = vmatpush3.bf16.msra.mxu1 %v489_v3  ;;  %442 = vmatprep.subr.bf16.mxu0 %v490_v4  ;;  %v498_v12 = vld [vmem:[%s688_s1 + $0x58] sm:$0xff]   ;;  %v502_v16 = vld [vmem:[%s688_s1 + $0x60] sm:$0xff]   ;;  %v506_v20 = vld [vmem:[%s688_s1 + $0x68] sm:$0xff]  }
   0x6   :  { %464 = vmatprep.subr.bf16.mxu1 %v491_v5  ;;  %v499_v13 = vld [vmem:[%s688_s1 + $0xd8] sm:$0xff]   ;;  %v503_v17 = vld [vmem:[%s688_s1 + $0xe0] sm:$0xff]   ;;  %v507_v21 = vld [vmem:[%s688_s1 + $0xe8] sm:$0xff]  }
   0x7   :  { %v500_v14 = vld [vmem:[%s688_s1 + $0x18] sm:$0xff]   ;;  %v504_v18 = vld [vmem:[%s688_s1 + $0x20] sm:$0xff]   ;;  %v508_v22 = vld [vmem:[%s688_s1 + $0x28] sm:$0xff]  }
   0x8   :  { %443 = vmatpush3.bf16.msra.mxu0 %v492_v6  ;;  %v501_v15 = vld [vmem:[%s688_s1 + $0x98] sm:$0xff]   ;;  %v505_v19 = vld [vmem:[%s688_s1 + $0xa0] sm:$0xff]   ;;  %v509_v23 = vld [vmem:[%s688_s1 + $0xa8] sm:$0xff]  }
   0x9   :  { %465 = vmatpush3.bf16.msra.mxu1 %v493_v7  ;;  %444 = vmatprep.subr.bf16.mxu0 %v494_v8  ;;  %v510_v24 = vld [vmem:[%s688_s1 + $0x70] sm:$0xff]   ;;  %v514_v28 = vld [vmem:[%s688_s1 + $0x78] sm:$0xff]   ;;  %v16_v33 = vld [vmem:[%s687_s0] sm:$0xff] }
   0xa   :  { %466 = vmatprep.subr.bf16.mxu1 %v495_v9  ;;  %v511_v25 = vld [vmem:[%s688_s1 + $0xf0] sm:$0xff]   ;;  %v515_v29 = vld [vmem:[%s688_s1 + $0xf8] sm:$0xff]   ;;  %v17_v34 = vld [vmem:[%s687_s0 + $0x8] sm:$0xff] }
   0xb   :  { %v512_v26 = vld [vmem:[%s688_s1 + $0x30] sm:$0xff]   ;;  %v516_v31 = vld [vmem:[%s688_s1 + $0x38] sm:$0xff]   ;;  %v20_v37 = vmax.f32 %v16_v33, %v17_v34 }
   0xc   :  { %445 = vmatpush3.bf16.msra.mxu0 %v496_v10  ;;  %v513_v27 = vld [vmem:[%s688_s1 + $0xb0] sm:$0xff]   ;;  %v517_v32 = vld [vmem:[%s688_s1 + $0xb8] sm:$0xff]  }
   0xd   :  { %467 = vmatpush3.bf16.msra.mxu1 %v497_v11  ;;  %446 = vmatprep.subr.bf16.mxu0 %v498_v12  ;;  %v18_v35 = vld [vmem:[%s687_s0 + $0x10] sm:$0xff]  ;;  %v19_v36 = vld [vmem:[%s687_s0 + $0x18] sm:$0xff] }
   0xe   :  { %468 = vmatprep.subr.bf16.mxu1 %v499_v13 }
  0x10   :  { %447 = vmatpush3.bf16.msra.mxu0 %v500_v14 }
  0x11   :  { %469 = vmatpush3.bf16.msra.mxu1 %v501_v15  ;;  %448 = vmatprep.subr.bf16.mxu0 %v502_v16 }
  0x12   :  { %470 = vmatprep.subr.bf16.mxu1 %v503_v17 }
  0x14   :  { %449 = vmatpush3.bf16.msra.mxu0 %v504_v18 }
  0x15   :  { %471 = vmatpush3.bf16.msra.mxu1 %v505_v19  ;;  %450 = vmatprep.subr.bf16.mxu0 %v506_v20 }
  0x16   :  { %472 = vmatprep.subr.bf16.mxu1 %v507_v21 }
  0x18   :  { %451 = vmatpush3.bf16.msra.mxu0 %v508_v22 }
  0x19   :  { %473 = vmatpush3.bf16.msra.mxu1 %v509_v23  ;;  %452 = vmatprep.subr.bf16.mxu0 %v510_v24 }
  0x1a   :  { %474 = vmatprep.subr.bf16.mxu1 %v511_v25 }
  0x1c   :  { %453 = vmatpush3.bf16.msra.mxu0 %v512_v26 }
  0x1d   :  { %475 = vmatpush3.bf16.msra.mxu1 %v513_v27  ;;  %454 = vmatprep.subr.bf16.mxu0 %v514_v28 }
  0x1e   :  { %476 = vmatprep.subr.bf16.mxu1 %v515_v29 }
  0x20   :  { %455 = vmatpush3.bf16.msra.mxu0 %v516_v31 }
  0x21   :  { %477 = vmatpush3.bf16.msra.mxu1 %v517_v32 }
  0x22   :  { %8 = vsyncpa [#allocation3], 0  ;;  %v21_v41 = vmax.f32 %v18_v35, %v19_v36  ;;  %v27_v42 = vunpack.c.0.s8 %v26_v39  ;;  %v407_v56 = vld [vmem:[%s689_s2] ss:$0 sm:$0xff]  ;;  %s543_s30 = smov [#allocation2]  }
  0x23   :  { %s399_s4 = sshll.u32 %s543_s30, 4  ;;  %s400_s4 = int_to_ptr.vmem [resolvable:$true] %s399_s4 }
  0x24   :  { %v22_v43 = vmax.f32 %v20_v37, %v21_v41  ;;  %v30_v44 = vsub.s32 %v27_v42, %v29_v40  ;;  %s518_s5 = scalar_lea.vmem %s400_s4, 32  ;;  %p523_p1 = scmp.lt.s32.totalorder %s400_s4, %s400_s4 }
  0x25   :  { %p519_p0 = scmp.ne.s32.totalorder %s400_s4, %s518_s5  ;;  %p524_p2 = scmp.lt.s32.totalorder %s518_s5, %s518_s5 }
  0x26   :  { %v24_v45 = vcombine.high %v22_v43, %v22_v43  ;;  %v31_v46 = vrot.slane %v22_v43, %v30_v44 }
  0x27   :  { %p525_p3 = por %p524_p2, %p523_p1 }
  0x28   :  { %v38_v47 = vrot.slane %v24_v45, %v30_v44  ;;  %v39_v48 = vcombine.high %v31_v46, %v31_v46  ;;  %v45_v50 = vpack.c.bf16 %v31_v46, %v31_v46 }
  0x29   :  { %p526_p4 = pnand %p525_p3, %p519_p0 }
  0x2a   :  { %v40_v49 = vcombine.high %v38_v47, %v38_v47  ;;  %v46_v51 = vpack.c.bf16 %v39_v48, %v39_v48  ;;  %v47_v52 = vpack.c.bf16 %v38_v47, %v38_v47 }
  0x2c   :  { %v48_v53 = vpack.c.bf16 %v40_v49, %v40_v49  ;;  %344 = vmatprep.mubr.bf16.mxu0 %v46_v51 }
  0x2d   :  { %345 = vmatmul.mubr.bf16.vlgmr.msra.gmra.mrb[0].mxu0 %v45_v50 }
  0x2e   :  { %384 = vmatprep.mubr.bf16.mxu1 %v48_v53 }
  0x2f   :  { %385 = vmatmul.mubr.bf16.vlgmr.msra.gmra.mrb[0].mxu1 %v47_v52 }
 0x100   :  { %v456_v54 = vpop.f32.mrb[0].mxu0 }
 0x101   :  { %v457_v57 = vpop.f32.mrb[1].mxu0 }
 0x102   :  { %v478_v55 = vpop.f32.mrb[0].mxu1  ;;  %v458_v58 = vadd.f32 %v457_v57, %v456_v54  ;;  %v459_v60 = vpop.f32.mrb[2].mxu0 }
 0x103   :  { %v479_v59 = vpop.f32.mrb[1].mxu1  ;;  %v460_v63 = vpop.f32.mrb[3].mxu0 }
 0x104   :  { %v480_v61 = vadd.f32 %v479_v59, %v478_v55  ;;  %v481_v62 = vpop.f32.mrb[2].mxu1  ;;  %v347_v0 = vadd.f32 %v458_v58, %v407_v56 }
 0x105   :  { %v482_v1 = vpop.f32.mrb[3].mxu1 }
 0x106   :  { %v387_v2 = vadd.f32 %v480_v61, %v347_v0 }
 0x108   :  { %392 = vst [vmem:[#allocation2] sm:$0x3] %v387_v2 }
 0x109   :  { %529 = shalt.err (!%p526_p4)
}
 0x10a   :  { %s530_s7 = scalar_lea.hbm %s690_s3, 32 }
 0x10b   :  { %p531_p5 = scmp.ne.s32.totalorder %s690_s3, %s530_s7  ;;  %p534_p6 = scmp.lt.u32.totalorder %s530_s7, %s690_s3 }
 0x10d   :  { %p536_p7 = pnand %p534_p6, %p531_p5 }
 0x10f   :  { %539 = shalt.err (!%p536_p7)
}
 0x110   :  { %402 = dma.vmem_to_hbm [thread:$0]  %s400_s4, 32, %s690_s3, [#allocation3]  }
 0x111   :  { %540 = dma.done.wait [#allocation3], 32  }
 0x112   :  { %541 = vsyncadd [#allocation3], 4294967264 }
 0x113   :  { %406 = vsyncpa [#allocation3], 1 }

</bundles_post_ra>
